<compile_context>
chip_gen: v7x
topology: tpu7x:2x2x1
jax: 0.10.0
libtpu: 0.0.40
codegen_flags: <defaults>
</compile_context>

<pallas_src>
import jax
import jax.numpy as jnp
from jax import lax
from jax.experimental import pallas as pl
from jax.experimental.pallas import tpu as pltpu

# ----------------------------- synthetic model config ------------------------
B = 2
IN_DIM = 32                  # model_cfg.IN_DIM
NUM_BEV_FEATURES = 32        # model_cfg.NUM_BEV_FEATURES
NUM_KEYPOINTS = 128          # model_cfg.NUM_KEYPOINTS
SA_GROUPS = 4                # SA_block groups
NZ, NY, NX = 1, 16, 16       # encoded_spconv_tensor.spatial_shape
NV_PER_BATCH = 160           # voxels per batch element (>= NUM_KEYPOINTS)
NSAMPLE = 16                 # LOCAL_CONTEXT / DECODE nsample
POOL_RADIUS = 2.0
DEFORM_RADIUS = 4.0
DECODE_RADIUS = 2.0
VOXEL_SIZE = jnp.array([0.1, 0.1, 0.2], jnp.float32)
PC_RANGE = jnp.array([0.0, 0.0, -1.0, 12.8, 12.8, 0.6], jnp.float32)
DOWNSAMPLE = 8

CIN_ADAPT = NUM_BEV_FEATURES + 3     # 35 (use_xyz=True)
CIN_DECODE = IN_DIM + 3              # 35
CIN_PAD = 40                         # zero-padded contraction depth (8-aligned)


def _tensorcores_per_chip():
    """2 TensorCores per chip on v7x; 1 on v5e/v6e."""
    try:
        kind = jax.devices()[0].device_kind.lower()
    except Exception:
        return 1
    return 2 if any(tag in kind for tag in ("v7", "tpu7", "7x")) else 1


# ============================ Pallas kernels ==================================
def _adapt_sa3_kernel(xmlp_ref, wmlp_ref, wqkv_ref, wz_ref, gamma_ref, beta_ref,
                      o_ref):
    """Fused per-batch: adapt-context shared MLP + max-pool  ->  3 SA_blocks.

    xmlp_ref : (1, CIN_PAD, ns*nk)  grouped features, column index = s*nk + j
    wmlp_ref : (C, CIN_PAD)         shared MLP weight (BN==identity, no bias)
    wqkv_ref : (3, 3C, C)           fused t/p/g 1x1 conv weights per SA block
    wz_ref   : (3, G, cg, cg)       grouped 1x1 conv weights
    gamma/beta_ref : (3, G, cg, 1)  GroupNorm affine
    o_ref    : (1, C, nk)           context features of this batch element
    """
    C = o_ref.shape[1]
    nk = o_ref.shape[2]
    G = SA_GROUPS
    cg = C // G
    ns = NSAMPLE

    # ---- shared MLP: ONE lane-wide matmul, then max over nsample, then ReLU.
    y = jnp.dot(wmlp_ref[...], xmlp_ref[0],
                preferred_element_type=jnp.float32)          # (C, ns*nk)
    acc = y[:, 0:nk]
    for s in range(1, ns):                                   # lane-aligned slabs
        acc = jnp.maximum(acc, y[:, s * nk:(s + 1) * nk])
    x = jnp.maximum(acc, 0.0)                                # (C, nk)

    # ---- self_attn1 -> self_attn2 -> self_attn3, one attention group at a time
    # (live set stays ~(nk, nk); no (G, nk, nk) stacks, no 128x128 transposes).
    for blk in range(3):
        residual = x
        tpg = jnp.dot(wqkv_ref[blk], x,
                      preferred_element_type=jnp.float32)    # (3C, nk)
        group_out = []
        for gi in range(G):
            lo = gi * cg
            t_g = tpg[0 * C + lo:0 * C + lo + cg]            # value (cg, nk)
            p_g = tpg[1 * C + lo:1 * C + lo + cg]            # query (cg, nk)
            g_g = tpg[2 * C + lo:2 * C + lo + cg]            # key   (cg, nk)

            # KEY-major energy: eT[m, n] = sum_c g[c, m] p[c, n]  (== energy^T),
            # so softmax over keys is an axis-0 reduce and the second matmul is
            # canonical (no (nk, nk) transpose of the attention matrix).
            eT = lax.dot_general(g_g, p_g, (((0,), (0,)), ((), ())),
                                 preferred_element_type=jnp.float32)  # (nk, nk)
            eT = eT - jnp.max(eT, axis=0, keepdims=True)
            ex = jnp.exp(eT)   # f32 kept for parity; bf16 exp is a v6e/v7x-only tweak
            attn_t = ex * pl.reciprocal(jnp.sum(ex, axis=0, keepdims=True),
                                        approx=True)

            og = jnp.dot(t_g, attn_t,
                         preferred_element_type=jnp.float32)          # (cg, nk)
            zg = jnp.dot(wz_ref[blk, gi], og,
                         preferred_element_type=jnp.float32)          # (cg, nk)

            # GroupNorm (per attention group == per GN group), centered variance
            mu = jnp.mean(zg, axis=(0, 1), keepdims=True)
            var = jnp.mean((zg - mu) ** 2, axis=(0, 1), keepdims=True)
            zn = (zg - mu) * lax.rsqrt(var + 1e-5)
            group_out.append(zn * gamma_ref[blk, gi] + beta_ref[blk, gi]
                             + residual[lo:lo + cg])
        x = jnp.concatenate(group_out, axis=0)               # (C, nk)

    o_ref[0] = x


def _mlp_maxpool_kernel(x_ref, w_ref, o_ref):
    """Decode shared MLP + ReLU + max-pool over nsample (one matmul per tile).

    x_ref: (1, CIN_PAD, ns*tm)  column index = s*tm + j  (j local to this tile)
    w_ref: (Cout, CIN_PAD)
    o_ref: (1, Cout, tm)        lane-dense writeback (tm multiple of 128)."""
    tm = o_ref.shape[2]
    ns = NSAMPLE
    y = jnp.dot(w_ref[...], x_ref[0],
                preferred_element_type=jnp.float32)          # (Cout, ns*tm)
    acc = y[:, 0:tm]
    for s in range(1, ns):
        acc = jnp.maximum(acc, y[:, s * tm:(s + 1) * tm])
    o_ref[0] = jnp.maximum(acc, 0.0)


def _avgpool2x2_kernel(x_ref, o_ref):
    """F.interpolate(scale_factor=0.5, 'bilinear') == 2x2 average pool.
    x_ref: (1, 4, L) -- the four 2x2-window taps stacked on the sublane axis,
    o_ref: (1, 1, L) with L = C*Hh*Wh (lane-dense, no masked stores)."""
    o_ref[0] = 0.25 * jnp.sum(x_ref[0], axis=0, keepdims=True)


# ============================ Pallas wrappers =================================
def run_adapt_sa3(grouped, w_mlp, wqkv, wz4, gamma4, beta4):
    """grouped: (B*nk, ns, Cin_a). Returns context features (B, C, nk)."""
    C, nk, ns = IN_DIM, NUM_KEYPOINTS, NSAMPLE
    G, cg = SA_GROUPS, C // SA_GROUPS
    cin = grouped.shape[-1]
    # layout plumbing (plain JAX under jit): (B*nk, ns, Cin) -> (B, CIN_PAD, ns*nk)
    x = grouped.reshape(B, nk, ns, cin)
    x = jnp.pad(x, ((0, 0), (0, 0), (0, 0), (0, CIN_PAD - cin)))
    x = x.transpose(0, 3, 2, 1).reshape(B, CIN_PAD, ns * nk)
    return pl.pallas_call(
        _adapt_sa3_kernel,
        out_shape=jax.ShapeDtypeStruct((B, C, nk), jnp.float32),
        grid_spec=pltpu.PrefetchScalarGridSpec(
            num_scalar_prefetch=0,
            grid=(B,),
            in_specs=[
                pl.BlockSpec((1, CIN_PAD, ns * nk), lambda b: (b, 0, 0)),
                pl.BlockSpec((C, CIN_PAD), lambda b: (0, 0)),
                pl.BlockSpec((3, 3 * C, C), lambda b: (0, 0, 0)),
                pl.BlockSpec((3, G, cg, cg), lambda b: (0, 0, 0, 0)),
                pl.BlockSpec((3, G, cg, 1), lambda b: (0, 0, 0, 0)),
                pl.BlockSpec((3, G, cg, 1), lambda b: (0, 0, 0, 0)),
            ],
            out_specs=pl.BlockSpec((1, C, nk), lambda b: (b, 0, 0)),
        ),
        compiler_params=pltpu.CompilerParams(dimension_semantics=("parallel",)),
    )(x, w_mlp, wqkv, wz4, gamma4, beta4)


def run_decode_mlp(grouped, w_mlp, *, num_cores=1):
    """grouped: (M, ns, Cin_d); w_mlp: (Cout, CIN_PAD). Returns (Cout, M)."""
    M, ns, cin = grouped.shape
    cout = w_mlp.shape[0]
    ncores = max(num_cores, 1)
    lane = 128 * ncores
    m_pad = ((M + lane - 1) // lane) * lane          # 384 on 1 core, 512 on v7x
    tm = m_pad // ncores                             # multiple of 128
    ntiles = m_pad // tm
    x = jnp.pad(grouped, ((0, m_pad - M), (0, 0), (0, CIN_PAD - cin)))
    x = x.transpose(2, 1, 0)                                         # (Cin, ns, Mpad)
    x = (x.reshape(CIN_PAD, ns, ntiles, tm)
           .transpose(2, 0, 1, 3)
           .reshape(ntiles, CIN_PAD, ns * tm))                       # per-tile slab
    out = pl.pallas_call(
        _mlp_maxpool_kernel,
        out_shape=jax.ShapeDtypeStruct((ntiles, cout, tm), jnp.float32),
        grid_spec=pltpu.PrefetchScalarGridSpec(
            num_scalar_prefetch=0,
            grid=(ntiles,),
            in_specs=[
                pl.BlockSpec((1, CIN_PAD, ns * tm), lambda i: (i, 0, 0)),
                pl.BlockSpec((cout, CIN_PAD), lambda i: (0, 0)),
            ],
            out_specs=pl.BlockSpec((1, cout, tm), lambda i: (i, 0, 0)),
        ),
        compiler_params=pltpu.CompilerParams(dimension_semantics=("parallel",)),
    )(x, w_mlp)
    return out.transpose(1, 0, 2).reshape(cout, m_pad)[:, :M]


def run_avgpool2x2(x):
    """x: (B, C, H, W) -> (B, C, H/2, W/2) by 2x2 average pooling (VPU kernel)."""
    Bb, C, H, W = x.shape
    assert H % 2 == 0 and W % 2 == 0
    Hh, Wh = H // 2, W // 2
    L = C * Hh * Wh
    xr = (x.reshape(Bb, C, Hh, 2, Wh, 2)
            .transpose(0, 3, 5, 1, 2, 4)
            .reshape(Bb, 4, L))
    out = pl.pallas_call(
        _avgpool2x2_kernel,
        out_shape=jax.ShapeDtypeStruct((Bb, 1, L), jnp.float32),
        grid_spec=pltpu.PrefetchScalarGridSpec(
            num_scalar_prefetch=0,
            grid=(Bb,),
            in_specs=[pl.BlockSpec((1, 4, L), lambda b: (b, 0, 0))],
            out_specs=pl.BlockSpec((1, 1, L), lambda b: (b, 0, 0)),
        ),
        compiler_params=pltpu.CompilerParams(dimension_semantics=("parallel",)),
    )(xr)
    return out.reshape(Bb, C, Hh, Wh)


# ============================ plain-JAX glue ==================================
def get_voxel_centers(coords_zyx, downsample_times, voxel_size, pc_range):
    xyz_idx = coords_zyx[:, ::-1].astype(jnp.float32)          # [z,y,x] -> [x,y,z]
    vs = voxel_size * downsample_times
    return (xyz_idx + 0.5) * vs + pc_range[:3]


def farthest_point_sample(points, n_samples):
    N = points.shape[0]

    def body(i, state):
        idxs, dists, last = state
        lastp = points[last]
        d = jnp.sum((points - lastp[None, :]) ** 2, axis=-1)
        dists = jnp.minimum(dists, d)
        nxt = jnp.argmax(dists).astype(jnp.int32)
        idxs = idxs.at[i].set(nxt)
        return idxs, dists, nxt

    idxs0 = jnp.zeros((n_samples,), jnp.int32)
    dists0 = jnp.full((N,), 1e10, jnp.float32)
    idxs, _, _ = lax.fori_loop(1, n_samples, body, (idxs0, dists0, jnp.int32(0)))
    return idxs


def ball_query_group(q_xyz, q_batch, s_xyz, s_batch, s_feats, radius, nsample):
    """pcdet-style ball query + grouping (use_xyz=True, empty balls zeroed)."""
    Ms = s_xyz.shape[0]
    d2 = jnp.sum((q_xyz[:, None, :] - s_xyz[None, :, :]) ** 2, axis=-1)
    valid = (d2 < radius ** 2) & (q_batch[:, None] == s_batch[None, :])
    order = jnp.where(valid, jnp.arange(Ms)[None, :], Ms + jnp.arange(Ms)[None, :])
    idx_sorted = jnp.argsort(order, axis=1)[:, :nsample]
    picked_valid = jnp.take_along_axis(valid, idx_sorted, axis=1)
    first_idx = idx_sorted[:, :1]
    idx = jnp.where(picked_valid, idx_sorted, first_idx)
    empty = ~picked_valid[:, 0]
    grouped_xyz = s_xyz[idx] - q_xyz[:, None, :]
    grouped = jnp.concatenate([grouped_xyz, s_feats[idx]], axis=-1)
    grouped = jnp.where(empty[:, None, None], 0.0, grouped)
    return grouped, empty


def deform_keypoints(q_xyz, q_batch, s_xyz, s_batch, radius):
    # TODO(synk): StackSAModuleMSGAdapt predicts offsets with a learned network;
    # approximated here by the mean of in-radius neighbour positions.
    d2 = jnp.sum((q_xyz[:, None, :] - s_xyz[None, :, :]) ** 2, axis=-1)
    valid = (d2 < radius ** 2) & (q_batch[:, None] == s_batch[None, :])
    w = valid.astype(jnp.float32)
    cnt = jnp.sum(w, axis=1, keepdims=True)
    mean_xyz = (w @ s_xyz) / jnp.maximum(cnt, 1.0)
    return jnp.where(cnt > 0.0, mean_xyz, q_xyz)


def _prepare_weights(params):
    """Fuse / pad / reshape module weights for the kernels (trace-time cheap)."""
    cg = IN_DIM // SA_GROUPS
    wqkv = jnp.concatenate([params["wt"], params["wp"], params["wg"]], axis=1)
    wz4 = params["wz"].reshape(3, SA_GROUPS, cg, cg)
    gamma4 = params["gn_gamma"].reshape(3, SA_GROUPS, cg, 1)
    beta4 = params["gn_beta"].reshape(3, SA_GROUPS, cg, 1)
    w_adapt = jnp.pad(params["w_adapt"], ((0, CIN_PAD - CIN_ADAPT), (0, 0))).T
    w_decode = jnp.pad(params["w_decode"], ((0, CIN_PAD - CIN_DECODE), (0, 0))).T
    return wqkv, wz4, gamma4, beta4, w_adapt, w_decode


# ============================ end-to-end forward ==============================
def voxel_context_3d_dsa_forward(coords, voxel_feats, params):
    """coords: (B*Nv, 4) int32 [bs, z, y, x]; voxel_feats: (B*Nv, NUM_BEV_FEATURES)."""
    ncores = _tensorcores_per_chip()
    wqkv, wz4, gamma4, beta4, w_adapt, w_decode = _prepare_weights(params)

    # voxel centers
    xyz = get_voxel_centers(coords[:, 1:4], DOWNSAMPLE, VOXEL_SIZE, PC_RANGE)
    vox_batch = coords[:, 0]

    # keypoints via FPS (Nv >= NUM_KEYPOINTS so the padding branch never triggers)
    xyz_b = xyz.reshape(B, NV_PER_BATCH, 3)
    kp_idx = jax.vmap(lambda p: farthest_point_sample(p, NUM_KEYPOINTS))(xyz_b)
    keypoints = jnp.take_along_axis(xyz_b, kp_idx[..., None], axis=1)
    kp_flat = keypoints.reshape(-1, 3)
    kp_batch = jnp.repeat(jnp.arange(B, dtype=jnp.int32), NUM_KEYPOINTS)

    # adapt_context grouping (glue) + fused [MLP+max-pool -> 3x SA_block] kernel
    def_xyz_flat = deform_keypoints(kp_flat, kp_batch, xyz, vox_batch, DEFORM_RADIUS)
    grouped_a, _ = ball_query_group(def_xyz_flat, kp_batch, xyz, vox_batch,
                                    voxel_feats, POOL_RADIUS, NSAMPLE)
    ctx = run_adapt_sa3(grouped_a, w_adapt, wqkv, wz4, gamma4, beta4)   # (B, C, nk)
    context_features = ctx.transpose(0, 2, 1).reshape(B * NUM_KEYPOINTS, IN_DIM)

    # decode: group keypoints around every voxel center + MLP + max-pool (Pallas)
    grouped_d, _ = ball_query_group(xyz, vox_batch, def_xyz_flat, kp_batch,
                                    context_features, DECODE_RADIUS, NSAMPLE)
    voxel_ctx_t = run_decode_mlp(grouped_d, w_decode, num_cores=ncores)  # (C, B*Nv)

    # scatter to dense BEV image (data-dependent indexing: glue, under jit).
    # NOTE: index formula matches the PyTorch module verbatim (z + y*nx + x);
    # it is only general for nz == 1 / unique coords per batch.
    bev_list = []
    for b in range(B):
        fb_t = voxel_ctx_t[:, b * NV_PER_BATCH:(b + 1) * NV_PER_BATCH]
        cb = coords[b * NV_PER_BATCH:(b + 1) * NV_PER_BATCH]
        indices = cb[:, 1] + cb[:, 2] * NX + cb[:, 3]
        spatial = jnp.zeros((NUM_BEV_FEATURES, NZ * NX * NY), jnp.float32)
        spatial = spatial.at[:, indices].set(fb_t)
        bev_list.append(spatial)
    bev = jnp.stack(bev_list, 0).reshape(B, NUM_BEV_FEATURES * NZ, NY, NX)

    # bilinear 0.5x downsample (== 2x2 avg pool)                     (Pallas)
    bev_half = run_avgpool2x2(bev)
    return [bev, bev_half]


voxel_context_3d_dsa_forward_jit = jax.jit(voxel_context_3d_dsa_forward)


# ============================ pure-JAX references (sanity) ====================
def _adapt_sa3_ref(grouped, w_mlp, wqkv, wz4, gamma4, beta4):
    nk, ns, C, G = NUM_KEYPOINTS, NSAMPLE, IN_DIM, SA_GROUPS
    cg = C // G
    cin = grouped.shape[-1]
    feats = grouped.reshape(B, nk, ns, cin)
    y = jnp.einsum("of,bjsf->bojs", w_mlp[:, :cin], feats)       # (B, C, nk, ns)
    x_all = jnp.maximum(jnp.max(y, axis=-1), 0.0)                # (B, C, nk)
    outs = []
    for b in range(B):
        xb = x_all[b]
        for blk in range(3):
            residual = xb
            tpg = wqkv[blk] @ xb
            tt, pp, gg = tpg[:C], tpg[C:2 * C], tpg[2 * C:3 * C]
            gouts = []
            for gi in range(G):
                lo = gi * cg
                t_g, p_g, g_g = tt[lo:lo + cg], pp[lo:lo + cg], gg[lo:lo + cg]
                energy = p_g.T @ g_g                              # (nk, nk)
                attn = jax.nn.softmax(energy, axis=-1)
                og = t_g @ attn.T
                zg = wz4[blk, gi] @ og
                mu = zg.mean()
                var = ((zg - mu) ** 2).mean()
                zn = (zg - mu) / jnp.sqrt(var + 1e-5)
                gouts.append(zn * gamma4[blk, gi] + beta4[blk, gi]
                             + residual[lo:lo + cg])
            xb = jnp.concatenate(gouts, axis=0)
        outs.append(xb)
    return jnp.stack(outs, 0)


def _mlp_maxpool_ref(grouped, w_mlp):
    cin = grouped.shape[-1]
    y = jnp.einsum("of,msf->oms", w_mlp[:, :cin], grouped)
    return jnp.maximum(jnp.max(y, axis=-1), 0.0)


# ============================ main ============================================
if __name__ == "__main__":
    key = jax.random.PRNGKey(0)
    keys = jax.random.split(key, 10)

    # synthetic sparse voxel tensor: unique (z=0, y, x) coords per batch element
    coords_list = []
    for b in range(B):
        perm = jax.random.permutation(jax.random.fold_in(keys[0], b),
                                      NY * NX)[:NV_PER_BATCH]
        ys = (perm // NX).astype(jnp.int32)
        xs = (perm % NX).astype(jnp.int32)
        zs = jnp.zeros_like(ys)
        bs = jnp.full_like(ys, b)
        coords_list.append(jnp.stack([bs, zs, ys, xs], axis=1))
    coords = jnp.concatenate(coords_list, axis=0).astype(jnp.int32)        # (B*Nv, 4)
    voxel_feats = jax.random.normal(keys[1], (B * NV_PER_BATCH, NUM_BEV_FEATURES),
                                    jnp.float32)

    # deterministic parameter init (shapes from the module's __init__)
    pk = jax.random.split(keys[2], 6)
    params = {
        # SA_block 1..3 : t / p / g 1x1 convs, grouped z conv, GroupNorm affine
        "wt": 0.1 * jax.random.normal(pk[0], (3, IN_DIM, IN_DIM), jnp.float32),
        "wp": 0.1 * jax.random.normal(pk[1], (3, IN_DIM, IN_DIM), jnp.float32),
        "wg": 0.1 * jax.random.normal(pk[2], (3, IN_DIM, IN_DIM), jnp.float32),
        "wz": 0.1 * jax.random.normal(pk[3], (3, IN_DIM, IN_DIM // SA_GROUPS),
                                      jnp.float32),
        "gn_gamma": jnp.ones((3, IN_DIM, 1), jnp.float32),
        "gn_beta": jnp.zeros((3, IN_DIM, 1), jnp.float32),
        # adapt_context MLP: [NUM_BEV_FEATURES + 3 xyz] -> IN_DIM (BN == identity)
        # TODO(synk): MLP BatchNorm/bias treated as identity (inference-style fold).
        "w_adapt": 0.2 * jax.random.normal(pk[4], (NUM_BEV_FEATURES + 3, IN_DIM),
                                           jnp.float32),
        # decode MLP: [IN_DIM + 3 xyz] -> NUM_BEV_FEATURES (BN == identity)
        "w_decode": 0.2 * jax.random.normal(pk[5], (IN_DIM + 3, NUM_BEV_FEATURES),
                                            jnp.float32),
    }

    # -------- full jitted forward --------
    voxel_context = voxel_context_3d_dsa_forward_jit(coords, voxel_feats, params)
    voxel_context = jax.block_until_ready(voxel_context)
    full, half = voxel_context
    assert full.shape == (B, NUM_BEV_FEATURES * NZ, NY, NX)
    assert half.shape == (B, NUM_BEV_FEATURES * NZ, NY // 2, NX // 2)
    assert bool(jnp.all(jnp.isfinite(full))) and bool(jnp.all(jnp.isfinite(half)))

    # -------- kernel sanity checks vs pure-JAX references --------
    wqkv, wz4, gamma4, beta4, w_adapt, w_decode = _prepare_weights(params)
    grouped_chk_a = 0.5 * jax.random.normal(
        keys[3], (B * NUM_KEYPOINTS, NSAMPLE, CIN_ADAPT), jnp.float32)
    ctx_k = run_adapt_sa3(grouped_chk_a, w_adapt, wqkv, wz4, gamma4, beta4)
    ctx_r = _adapt_sa3_ref(grouped_chk_a, w_adapt, wqkv, wz4, gamma4, beta4)
    assert float(jnp.max(jnp.abs(ctx_k - ctx_r))) < 0.1

    grouped_chk_d = 0.5 * jax.random.normal(
        keys[4], (B * NV_PER_BATCH, NSAMPLE, CIN_DECODE), jnp.float32)
    dec_k = run_decode_mlp(grouped_chk_d, w_decode,
                           num_cores=_tensorcores_per_chip())
    dec_r = _mlp_maxpool_ref(grouped_chk_d, w_decode)
    assert float(jnp.max(jnp.abs(dec_k - dec_r))) < 0.05

    pool_ref = full.reshape(B, NUM_BEV_FEATURES * NZ, NY // 2, 2,
                            NX // 2, 2).mean(axis=(3, 5))
    assert float(jnp.max(jnp.abs(half - pool_ref))) < 1e-4

    print("KERNEL_OK")
</pallas_src>

<mosaic_0001>
module attributes {stable_mosaic.version = 11 : i64} {
  func.func private @main(%arg0: i32) attributes {dimension_semantics = [#tpu.dimension_semantics<core_parallel>], iteration_bounds = array<i64: 2>, tpu.core_type = #tpu.core_type<sc_scalar_subcore>, window_params = []} {
    return
  }
}

module attributes {stable_mosaic.version = 11 : i64} {
  func.func private @main(%arg0: i32) attributes {dimension_semantics = [#tpu.dimension_semantics<core_parallel>], iteration_bounds = array<i64: 2>, tpu.core_type = #tpu.core_type<sc_scalar_subcore>, window_params = []} {
    return
  }
}

module attributes {stable_mosaic.version = 11 : i64} {
  func.func @_adapt_sa3_kernel(%arg0: i32, %arg1: memref<1x40x2048xf32, #tpu.memory_space<vmem>>, %arg2: memref<32x40xf32, #tpu.memory_space<vmem>>, %arg3: memref<3x96x32xf32, #tpu.memory_space<vmem>>, %arg4: memref<3x4x8x8xf32, #tpu.memory_space<vmem>>, %arg5: memref<3x4x8x1xf32, #tpu.memory_space<vmem>>, %arg6: memref<3x4x8x1xf32, #tpu.memory_space<vmem>>, %arg7: memref<1x32x128xf32, #tpu.memory_space<vmem>>) attributes {dimension_semantics = [#tpu.dimension_semantics<parallel>], iteration_bounds = array<i64: 2>, scalar_prefetch = 0 : i64, scratch_operands = 0 : i64, tpu.core_type = #tpu.core_type<tc>, window_params = [{transform_indices = @transform_0, window_bounds = array<i64: 1, 40, 2048>}, {pipeline_mode = #tpu.pipeline_mode<synchronous>, transform_indices = @transform_1, window_bounds = array<i64: 32, 40>}, {pipeline_mode = #tpu.pipeline_mode<synchronous>, transform_indices = @transform_2, window_bounds = array<i64: 3, 96, 32>}, {pipeline_mode = #tpu.pipeline_mode<synchronous>, transform_indices = @transform_3, window_bounds = array<i64: 3, 4, 8, 8>}, {pipeline_mode = #tpu.pipeline_mode<synchronous>, transform_indices = @transform_4, window_bounds = array<i64: 3, 4, 8, 1>}, {pipeline_mode = #tpu.pipeline_mode<synchronous>, transform_indices = @transform_5, window_bounds = array<i64: 3, 4, 8, 1>}, {transform_indices = @transform_6, window_bounds = array<i64: 1, 32, 128>}]} {
    %c0 = arith.constant 0 : index
    %c0_0 = arith.constant 0 : index
    %0 = vector.load %arg2[%c0, %c0_0] : memref<32x40xf32, #tpu.memory_space<vmem>>, vector<32x40xf32>
    %c0_1 = arith.constant 0 : index
    %c0_2 = arith.constant 0 : index
    %c0_3 = arith.constant 0 : index
    %1 = vector.load %arg1[%c0_1, %c0_2, %c0_3] : memref<1x40x2048xf32, #tpu.memory_space<vmem>>, vector<1x40x2048xf32>
    %2 = vector.shape_cast %1 : vector<1x40x2048xf32> to vector<40x2048xf32>
    %cst = arith.constant dense<0.000000e+00> : vector<32x2048xf32>
    %3 = tpu.matmul %0, %2, %cst {dimension_numbers = #tpu.dot_dimension_numbers<[1], [0], [0], [1], [0, 0, 1, 1], [], []>} : vector<32x40xf32>, vector<40x2048xf32>, vector<32x2048xf32> -> vector<32x2048xf32>
    %4 = vector.extract_strided_slice %3 {offsets = [0, 0], sizes = [32, 128], strides = [1, 1]} : vector<32x2048xf32> to vector<32x128xf32>
    %5 = vector.extract_strided_slice %3 {offsets = [0, 128], sizes = [32, 128], strides = [1, 1]} : vector<32x2048xf32> to vector<32x128xf32>
    %6 = arith.maximumf %4, %5 : vector<32x128xf32>
    %7 = vector.extract_strided_slice %3 {offsets = [0, 256], sizes = [32, 128], strides = [1, 1]} : vector<32x2048xf32> to vector<32x128xf32>
    %8 = arith.maximumf %6, %7 : vector<32x128xf32>
    %9 = vector.extract_strided_slice %3 {offsets = [0, 384], sizes = [32, 128], strides = [1, 1]} : vector<32x2048xf32> to vector<32x128xf32>
    %10 = arith.maximumf %8, %9 : vector<32x128xf32>
    %11 = vector.extract_strided_slice %3 {offsets = [0, 512], sizes = [32, 128], strides = [1, 1]} : vector<32x2048xf32> to vector<32x128xf32>
    %12 = arith.maximumf %10, %11 : vector<32x128xf32>
    %13 = vector.extract_strided_slice %3 {offsets = [0, 640], sizes = [32, 128], strides = [1, 1]} : vector<32x2048xf32> to vector<32x128xf32>
    %14 = arith.maximumf %12, %13 : vector<32x128xf32>
    %15 = vector.extract_strided_slice %3 {offsets = [0, 768], sizes = [32, 128], strides = [1, 1]} : vector<32x2048xf32> to vector<32x128xf32>
    %16 = arith.maximumf %14, %15 : vector<32x128xf32>
    %17 = vector.extract_strided_slice %3 {offsets = [0, 896], sizes = [32, 128], strides = [1, 1]} : vector<32x2048xf32> to vector<32x128xf32>
    %18 = arith.maximumf %16, %17 : vector<32x128xf32>
    %19 = vector.extract_strided_slice %3 {offsets = [0, 1024], sizes = [32, 128], strides = [1, 1]} : vector<32x2048xf32> to vector<32x128xf32>
    %20 = arith.maximumf %18, %19 : vector<32x128xf32>
    %21 = vector.extract_strided_slice %3 {offsets = [0, 1152], sizes = [32, 128], strides = [1, 1]} : vector<32x2048xf32> to vector<32x128xf32>
    %22 = arith.maximumf %20, %21 : vector<32x128xf32>
    %23 = vector.extract_strided_slice %3 {offsets = [0, 1280], sizes = [32, 128], strides = [1, 1]} : vector<32x2048xf32> to vector<32x128xf32>
    %24 = arith.maximumf %22, %23 : vector<32x128xf32>
    %25 = vector.extract_strided_slice %3 {offsets = [0, 1408], sizes = [32, 128], strides = [1, 1]} : vector<32x2048xf32> to vector<32x128xf32>
    %26 = arith.maximumf %24, %25 : vector<32x128xf32>
    %27 = vector.extract_strided_slice %3 {offsets = [0, 1536], sizes = [32, 128], strides = [1, 1]} : vector<32x2048xf32> to vector<32x128xf32>
    %28 = arith.maximumf %26, %27 : vector<32x128xf32>
    %29 = vector.extract_strided_slice %3 {offsets = [0, 1664], sizes = [32, 128], strides = [1, 1]} : vector<32x2048xf32> to vector<32x128xf32>
    %30 = arith.maximumf %28, %29 : vector<32x128xf32>
    %31 = vector.extract_strided_slice %3 {offsets = [0, 1792], sizes = [32, 128], strides = [1, 1]} : vector<32x2048xf32> to vector<32x128xf32>
    %32 = arith.maximumf %30, %31 : vector<32x128xf32>
    %33 = vector.extract_strided_slice %3 {offsets = [0, 1920], sizes = [32, 128], strides = [1, 1]} : vector<32x2048xf32> to vector<32x128xf32>
    %34 = arith.maximumf %32, %33 : vector<32x128xf32>
    %cst_4 = arith.constant 0.000000e+00 : f32
    %35 = vector.broadcast %cst_4 : f32 to vector<32x128xf32>
    %36 = arith.maximumf %34, %35 : vector<32x128xf32>
    %c0_5 = arith.constant 0 : index
    %c0_6 = arith.constant 0 : index
    %c0_7 = arith.constant 0 : index
    %37 = vector.load %arg3[%c0_5, %c0_6, %c0_7] : memref<3x96x32xf32, #tpu.memory_space<vmem>>, vector<1x96x32xf32>
    %38 = vector.shape_cast %37 : vector<1x96x32xf32> to vector<96x32xf32>
    %cst_8 = arith.constant dense<0.000000e+00> : vector<96x128xf32>
    %39 = tpu.matmul %38, %36, %cst_8 {dimension_numbers = #tpu.dot_dimension_numbers<[1], [0], [0], [1], [0, 0, 1, 1], [], []>} : vector<96x32xf32>, vector<32x128xf32>, vector<96x128xf32> -> vector<96x128xf32>
    %40 = vector.extract_strided_slice %39 {offsets = [0, 0], sizes = [8, 128], strides = [1, 1]} : vector<96x128xf32> to vector<8x128xf32>
    %41 = vector.extract_strided_slice %39 {offsets = [32, 0], sizes = [8, 128], strides = [1, 1]} : vector<96x128xf32> to vector<8x128xf32>
    %42 = vector.extract_strided_slice %39 {offsets = [64, 0], sizes = [8, 128], strides = [1, 1]} : vector<96x128xf32> to vector<8x128xf32>
    %cst_9 = arith.constant dense<0.000000e+00> : vector<128x128xf32>
    %43 = tpu.matmul %42, %41, %cst_9 {dimension_numbers = #tpu.dot_dimension_numbers<[0], [0], [1], [1], [0, 1, 1, 1], [], []>} : vector<8x128xf32>, vector<8x128xf32>, vector<128x128xf32> -> vector<128x128xf32>
    %cst_10 = arith.constant dense<0xFF800000> : vector<128xf32>
    %44 = vector.multi_reduction <maximumf>, %43, %cst_10 [0] : vector<128x128xf32> to vector<128xf32>
    %45 = vector.shape_cast %44 : vector<128xf32> to vector<1x128xf32>
    %46 = vector.broadcast %45 : vector<1x128xf32> to vector<128x128xf32>
    %47 = arith.subf %43, %46 : vector<128x128xf32>
    %48 = math.exp %47 : vector<128x128xf32>
    %cst_11 = arith.constant dense<0.000000e+00> : vector<128xf32>
    %49 = vector.multi_reduction <add>, %48, %cst_11 [0] : vector<128x128xf32> to vector<128xf32>
    %50 = vector.shape_cast %49 : vector<128xf32> to vector<1x128xf32>
    %51 = tpu.reciprocal %50 {approx = true} : vector<1x128xf32> -> vector<1x128xf32>
    %52 = vector.broadcast %51 : vector<1x128xf32> to vector<128x128xf32>
    %53 = arith.mulf %48, %52 : vector<128x128xf32>
    %cst_12 = arith.constant dense<0.000000e+00> : vector<8x128xf32>
    %54 = tpu.matmul %40, %53, %cst_12 {dimension_numbers = #tpu.dot_dimension_numbers<[1], [0], [0], [1], [0, 0, 1, 1], [], []>} : vector<8x128xf32>, vector<128x128xf32>, vector<8x128xf32> -> vector<8x128xf32>
    %c0_13 = arith.constant 0 : index
    %c0_14 = arith.constant 0 : index
    %c0_15 = arith.constant 0 : index
    %c0_16 = arith.constant 0 : index
    %55 = vector.load %arg4[%c0_13, %c0_14, %c0_15, %c0_16] : memref<3x4x8x8xf32, #tpu.memory_space<vmem>>, vector<1x1x8x8xf32>
    %56 = vector.shape_cast %55 : vector<1x1x8x8xf32> to vector<8x8xf32>
    %cst_17 = arith.constant dense<0.000000e+00> : vector<8x128xf32>
    %57 = tpu.matmul %56, %54, %cst_17 {dimension_numbers = #tpu.dot_dimension_numbers<[1], [0], [0], [1], [0, 0, 1, 1], [], []>} : vector<8x8xf32>, vector<8x128xf32>, vector<8x128xf32> -> vector<8x128xf32>
    %58 = vector.shape_cast %57 : vector<8x128xf32> to vector<1x8x128xf32>
    %cst_18 = arith.constant dense<0.000000e+00> : vector<1xf32>
    %59 = vector.multi_reduction <add>, %58, %cst_18 [1, 2] : vector<1x8x128xf32> to vector<1xf32>
    %60 = vector.shape_cast %59 : vector<1xf32> to vector<1x1x1xf32>
    %61 = vector.extract %60[0, 0, 0] : f32 from vector<1x1x1xf32>
    %62 = vector.broadcast %61 : f32 to vector<1x1xf32>
    %cst_19 = arith.constant 1.024000e+03 : f32
    %63 = vector.broadcast %cst_19 : f32 to vector<1x1xf32>
    %64 = arith.divf %62, %63 : vector<1x1xf32>
    %65 = vector.broadcast %64 : vector<1x1xf32> to vector<8x128xf32>
    %66 = arith.subf %57, %65 : vector<8x128xf32>
    %67 = arith.mulf %66, %66 : vector<8x128xf32>
    %68 = vector.shape_cast %67 : vector<8x128xf32> to vector<1x8x128xf32>
    %cst_20 = arith.constant dense<0.000000e+00> : vector<1xf32>
    %69 = vector.multi_reduction <add>, %68, %cst_20 [1, 2] : vector<1x8x128xf32> to vector<1xf32>
    %70 = vector.shape_cast %69 : vector<1xf32> to vector<1x1x1xf32>
    %71 = vector.extract %70[0, 0, 0] : f32 from vector<1x1x1xf32>
    %72 = vector.broadcast %71 : f32 to vector<1x1xf32>
    %cst_21 = arith.constant 1.024000e+03 : f32
    %73 = vector.broadcast %cst_21 : f32 to vector<1x1xf32>
    %74 = arith.divf %72, %73 : vector<1x1xf32>
    %75 = vector.broadcast %64 : vector<1x1xf32> to vector<8x128xf32>
    %76 = arith.subf %57, %75 : vector<8x128xf32>
    %cst_22 = arith.constant 9.99999974E-6 : f32
    %77 = vector.broadcast %cst_22 : f32 to vector<1x1xf32>
    %78 = arith.addf %74, %77 : vector<1x1xf32>
    %79 = math.rsqrt %78 : vector<1x1xf32>
    %80 = vector.broadcast %79 : vector<1x1xf32> to vector<8x128xf32>
    %81 = arith.mulf %76, %80 : vector<8x128xf32>
    %c0_23 = arith.constant 0 : index
    %c0_24 = arith.constant 0 : index
    %c0_25 = arith.constant 0 : index
    %c0_26 = arith.constant 0 : index
    %82 = vector.load %arg5[%c0_23, %c0_24, %c0_25, %c0_26] : memref<3x4x8x1xf32, #tpu.memory_space<vmem>>, vector<1x1x8x1xf32>
    %83 = vector.shape_cast %82 : vector<1x1x8x1xf32> to vector<8x1xf32>
    %84 = vector.broadcast %83 : vector<8x1xf32> to vector<8x128xf32>
    %85 = arith.mulf %81, %84 : vector<8x128xf32>
    %c0_27 = arith.constant 0 : index
    %c0_28 = arith.constant 0 : index
    %c0_29 = arith.constant 0 : index
    %c0_30 = arith.constant 0 : index
    %86 = vector.load %arg6[%c0_27, %c0_28, %c0_29, %c0_30] : memref<3x4x8x1xf32, #tpu.memory_space<vmem>>, vector<1x1x8x1xf32>
    %87 = vector.shape_cast %86 : vector<1x1x8x1xf32> to vector<8x1xf32>
    %88 = vector.broadcast %87 : vector<8x1xf32> to vector<8x128xf32>
    %89 = arith.addf %85, %88 : vector<8x128xf32>
    %90 = vector.extract_strided_slice %36 {offsets = [0, 0], sizes = [8, 128], strides = [1, 1]} : vector<32x128xf32> to vector<8x128xf32>
    %91 = arith.addf %89, %90 : vector<8x128xf32>
    %92 = vector.extract_strided_slice %39 {offsets = [8, 0], sizes = [8, 128], strides = [1, 1]} : vector<96x128xf32> to vector<8x128xf32>
    %93 = vector.extract_strided_slice %39 {offsets = [40, 0], sizes = [8, 128], strides = [1, 1]} : vector<96x128xf32> to vector<8x128xf32>
    %94 = vector.extract_strided_slice %39 {offsets = [72, 0], sizes = [8, 128], strides = [1, 1]} : vector<96x128xf32> to vector<8x128xf32>
    %cst_31 = arith.constant dense<0.000000e+00> : vector<128x128xf32>
    %95 = tpu.matmul %94, %93, %cst_31 {dimension_numbers = #tpu.dot_dimension_numbers<[0], [0], [1], [1], [0, 1, 1, 1], [], []>} : vector<8x128xf32>, vector<8x128xf32>, vector<128x128xf32> -> vector<128x128xf32>
    %cst_32 = arith.constant dense<0xFF800000> : vector<128xf32>
    %96 = vector.multi_reduction <maximumf>, %95, %cst_32 [0] : vector<128x128xf32> to vector<128xf32>
    %97 = vector.shape_cast %96 : vector<128xf32> to vector<1x128xf32>
    %98 = vector.broadcast %97 : vector<1x128xf32> to vector<128x128xf32>
    %99 = arith.subf %95, %98 : vector<128x128xf32>
    %100 = math.exp %99 : vector<128x128xf32>
    %cst_33 = arith.constant dense<0.000000e+00> : vector<128xf32>
    %101 = vector.multi_reduction <add>, %100, %cst_33 [0] : vector<128x128xf32> to vector<128xf32>
    %102 = vector.shape_cast %101 : vector<128xf32> to vector<1x128xf32>
    %103 = tpu.reciprocal %102 {approx = true} : vector<1x128xf32> -> vector<1x128xf32>
    %104 = vector.broadcast %103 : vector<1x128xf32> to vector<128x128xf32>
    %105 = arith.mulf %100, %104 : vector<128x128xf32>
    %cst_34 = arith.constant dense<0.000000e+00> : vector<8x128xf32>
    %106 = tpu.matmul %92, %105, %cst_34 {dimension_numbers = #tpu.dot_dimension_numbers<[1], [0], [0], [1], [0, 0, 1, 1], [], []>} : vector<8x128xf32>, vector<128x128xf32>, vector<8x128xf32> -> vector<8x128xf32>
    %c0_35 = arith.constant 0 : index
    %c1 = arith.constant 1 : index
    %c0_36 = arith.constant 0 : index
    %c0_37 = arith.constant 0 : index
    %107 = vector.load %arg4[%c0_35, %c1, %c0_36, %c0_37] : memref<3x4x8x8xf32, #tpu.memory_space<vmem>>, vector<1x1x8x8xf32>
    %108 = vector.shape_cast %107 : vector<1x1x8x8xf32> to vector<8x8xf32>
    %cst_38 = arith.constant dense<0.000000e+00> : vector<8x128xf32>
    %109 = tpu.matmul %108, %106, %cst_38 {dimension_numbers = #tpu.dot_dimension_numbers<[1], [0], [0], [1], [0, 0, 1, 1], [], []>} : vector<8x8xf32>, vector<8x128xf32>, vector<8x128xf32> -> vector<8x128xf32>
    %110 = vector.shape_cast %109 : vector<8x128xf32> to vector<1x8x128xf32>
    %cst_39 = arith.constant dense<0.000000e+00> : vector<1xf32>
    %111 = vector.multi_reduction <add>, %110, %cst_39 [1, 2] : vector<1x8x128xf32> to vector<1xf32>
    %112 = vector.shape_cast %111 : vector<1xf32> to vector<1x1x1xf32>
    %113 = vector.extract %112[0, 0, 0] : f32 from vector<1x1x1xf32>
    %114 = vector.broadcast %113 : f32 to vector<1x1xf32>
    %cst_40 = arith.constant 1.024000e+03 : f32
    %115 = vector.broadcast %cst_40 : f32 to vector<1x1xf32>
    %116 = arith.divf %114, %115 : vector<1x1xf32>
    %117 = vector.broadcast %116 : vector<1x1xf32> to vector<8x128xf32>
    %118 = arith.subf %109, %117 : vector<8x128xf32>
    %119 = arith.mulf %118, %118 : vector<8x128xf32>
    %120 = vector.shape_cast %119 : vector<8x128xf32> to vector<1x8x128xf32>
    %cst_41 = arith.constant dense<0.000000e+00> : vector<1xf32>
    %121 = vector.multi_reduction <add>, %120, %cst_41 [1, 2] : vector<1x8x128xf32> to vector<1xf32>
    %122 = vector.shape_cast %121 : vector<1xf32> to vector<1x1x1xf32>
    %123 = vector.extract %122[0, 0, 0] : f32 from vector<1x1x1xf32>
    %124 = vector.broadcast %123 : f32 to vector<1x1xf32>
    %cst_42 = arith.constant 1.024000e+03 : f32
    %125 = vector.broadcast %cst_42 : f32 to vector<1x1xf32>
    %126 = arith.divf %124, %125 : vector<1x1xf32>
    %127 = vector.broadcast %116 : vector<1x1xf32> to vector<8x128xf32>
    %128 = arith.subf %109, %127 : vector<8x128xf32>
    %cst_43 = arith.constant 9.99999974E-6 : f32
    %129 = vector.broadcast %cst_43 : f32 to vector<1x1xf32>
    %130 = arith.addf %126, %129 : vector<1x1xf32>
    %131 = math.rsqrt %130 : vector<1x1xf32>
    %132 = vector.broadcast %131 : vector<1x1xf32> to vector<8x128xf32>
    %133 = arith.mulf %128, %132 : vector<8x128xf32>
    %c0_44 = arith.constant 0 : index
    %c1_45 = arith.constant 1 : index
    %c0_46 = arith.constant 0 : index
    %c0_47 = arith.constant 0 : index
    %134 = vector.load %arg5[%c0_44, %c1_45, %c0_46, %c0_47] : memref<3x4x8x1xf32, #tpu.memory_space<vmem>>, vector<1x1x8x1xf32>
    %135 = vector.shape_cast %134 : vector<1x1x8x1xf32> to vector<8x1xf32>
    %136 = vector.broadcast %135 : vector<8x1xf32> to vector<8x128xf32>
    %137 = arith.mulf %133, %136 : vector<8x128xf32>
    %c0_48 = arith.constant 0 : index
    %c1_49 = arith.constant 1 : index
    %c0_50 = arith.constant 0 : index
    %c0_51 = arith.constant 0 : index
    %138 = vector.load %arg6[%c0_48, %c1_49, %c0_50, %c0_51] : memref<3x4x8x1xf32, #tpu.memory_space<vmem>>, vector<1x1x8x1xf32>
    %139 = vector.shape_cast %138 : vector<1x1x8x1xf32> to vector<8x1xf32>
    %140 = vector.broadcast %139 : vector<8x1xf32> to vector<8x128xf32>
    %141 = arith.addf %137, %140 : vector<8x128xf32>
    %142 = vector.extract_strided_slice %36 {offsets = [8, 0], sizes = [8, 128], strides = [1, 1]} : vector<32x128xf32> to vector<8x128xf32>
    %143 = arith.addf %141, %142 : vector<8x128xf32>
    %144 = vector.extract_strided_slice %39 {offsets = [16, 0], sizes = [8, 128], strides = [1, 1]} : vector<96x128xf32> to vector<8x128xf32>
    %145 = vector.extract_strided_slice %39 {offsets = [48, 0], sizes = [8, 128], strides = [1, 1]} : vector<96x128xf32> to vector<8x128xf32>
    %146 = vector.extract_strided_slice %39 {offsets = [80, 0], sizes = [8, 128], strides = [1, 1]} : vector<96x128xf32> to vector<8x128xf32>
    %cst_52 = arith.constant dense<0.000000e+00> : vector<128x128xf32>
    %147 = tpu.matmul %146, %145, %cst_52 {dimension_numbers = #tpu.dot_dimension_numbers<[0], [0], [1], [1], [0, 1, 1, 1], [], []>} : vector<8x128xf32>, vector<8x128xf32>, vector<128x128xf32> -> vector<128x128xf32>
    %cst_53 = arith.constant dense<0xFF800000> : vector<128xf32>
    %148 = vector.multi_reduction <maximumf>, %147, %cst_53 [0] : vector<128x128xf32> to vector<128xf32>
    %149 = vector.shape_cast %148 : vector<128xf32> to vector<1x128xf32>
    %150 = vector.broadcast %149 : vector<1x128xf32> to vector<128x128xf32>
    %151 = arith.subf %147, %150 : vector<128x128xf32>
    %152 = math.exp %151 : vector<128x128xf32>
    %cst_54 = arith.constant dense<0.000000e+00> : vector<128xf32>
    %153 = vector.multi_reduction <add>, %152, %cst_54 [0] : vector<128x128xf32> to vector<128xf32>
    %154 = vector.shape_cast %153 : vector<128xf32> to vector<1x128xf32>
    %155 = tpu.reciprocal %154 {approx = true} : vector<1x128xf32> -> vector<1x128xf32>
    %156 = vector.broadcast %155 : vector<1x128xf32> to vector<128x128xf32>
    %157 = arith.mulf %152, %156 : vector<128x128xf32>
    %cst_55 = arith.constant dense<0.000000e+00> : vector<8x128xf32>
    %158 = tpu.matmul %144, %157, %cst_55 {dimension_numbers = #tpu.dot_dimension_numbers<[1], [0], [0], [1], [0, 0, 1, 1], [], []>} : vector<8x128xf32>, vector<128x128xf32>, vector<8x128xf32> -> vector<8x128xf32>
    %c0_56 = arith.constant 0 : index
    %c2 = arith.constant 2 : index
    %c0_57 = arith.constant 0 : index
    %c0_58 = arith.constant 0 : index
    %159 = vector.load %arg4[%c0_56, %c2, %c0_57, %c0_58] : memref<3x4x8x8xf32, #tpu.memory_space<vmem>>, vector<1x1x8x8xf32>
    %160 = vector.shape_cast %159 : vector<1x1x8x8xf32> to vector<8x8xf32>
    %cst_59 = arith.constant dense<0.000000e+00> : vector<8x128xf32>
    %161 = tpu.matmul %160, %158, %cst_59 {dimension_numbers = #tpu.dot_dimension_numbers<[1], [0], [0], [1], [0, 0, 1, 1], [], []>} : vector<8x8xf32>, vector<8x128xf32>, vector<8x128xf32> -> vector<8x128xf32>
    %162 = vector.shape_cast %161 : vector<8x128xf32> to vector<1x8x128xf32>
    %cst_60 = arith.constant dense<0.000000e+00> : vector<1xf32>
    %163 = vector.multi_reduction <add>, %162, %cst_60 [1, 2] : vector<1x8x128xf32> to vector<1xf32>
    %164 = vector.shape_cast %163 : vector<1xf32> to vector<1x1x1xf32>
    %165 = vector.extract %164[0, 0, 0] : f32 from vector<1x1x1xf32>
    %166 = vector.broadcast %165 : f32 to vector<1x1xf32>
    %cst_61 = arith.constant 1.024000e+03 : f32
    %167 = vector.broadcast %cst_61 : f32 to vector<1x1xf32>
    %168 = arith.divf %166, %167 : vector<1x1xf32>
    %169 = vector.broadcast %168 : vector<1x1xf32> to vector<8x128xf32>
    %170 = arith.subf %161, %169 : vector<8x128xf32>
    %171 = arith.mulf %170, %170 : vector<8x128xf32>
    %172 = vector.shape_cast %171 : vector<8x128xf32> to vector<1x8x128xf32>
    %cst_62 = arith.constant dense<0.000000e+00> : vector<1xf32>
    %173 = vector.multi_reduction <add>, %172, %cst_62 [1, 2] : vector<1x8x128xf32> to vector<1xf32>
    %174 = vector.shape_cast %173 : vector<1xf32> to vector<1x1x1xf32>
    %175 = vector.extract %174[0, 0, 0] : f32 from vector<1x1x1xf32>
    %176 = vector.broadcast %175 : f32 to vector<1x1xf32>
    %cst_63 = arith.constant 1.024000e+03 : f32
    %177 = vector.broadcast %cst_63 : f32 to vector<1x1xf32>
    %178 = arith.divf %176, %177 : vector<1x1xf32>
    %179 = vector.broadcast %168 : vector<1x1xf32> to vector<8x128xf32>
    %180 = arith.subf %161, %179 : vector<8x128xf32>
    %cst_64 = arith.constant 9.99999974E-6 : f32
    %181 = vector.broadcast %cst_64 : f32 to vector<1x1xf32>
    %182 = arith.addf %178, %181 : vector<1x1xf32>
    %183 = math.rsqrt %182 : vector<1x1xf32>
    %184 = vector.broadcast %183 : vector<1x1xf32> to vector<8x128xf32>
    %185 = arith.mulf %180, %184 : vector<8x128xf32>
    %c0_65 = arith.constant 0 : index
    %c2_66 = arith.constant 2 : index
    %c0_67 = arith.constant 0 : index
    %c0_68 = arith.constant 0 : index
    %186 = vector.load %arg5[%c0_65, %c2_66, %c0_67, %c0_68] : memref<3x4x8x1xf32, #tpu.memory_space<vmem>>, vector<1x1x8x1xf32>
    %187 = vector.shape_cast %186 : vector<1x1x8x1xf32> to vector<8x1xf32>
    %188 = vector.broadcast %187 : vector<8x1xf32> to vector<8x128xf32>
    %189 = arith.mulf %185, %188 : vector<8x128xf32>
    %c0_69 = arith.constant 0 : index
    %c2_70 = arith.constant 2 : index
    %c0_71 = arith.constant 0 : index
    %c0_72 = arith.constant 0 : index
    %190 = vector.load %arg6[%c0_69, %c2_70, %c0_71, %c0_72] : memref<3x4x8x1xf32, #tpu.memory_space<vmem>>, vector<1x1x8x1xf32>
    %191 = vector.shape_cast %190 : vector<1x1x8x1xf32> to vector<8x1xf32>
    %192 = vector.broadcast %191 : vector<8x1xf32> to vector<8x128xf32>
    %193 = arith.addf %189, %192 : vector<8x128xf32>
    %194 = vector.extract_strided_slice %36 {offsets = [16, 0], sizes = [8, 128], strides = [1, 1]} : vector<32x128xf32> to vector<8x128xf32>
    %195 = arith.addf %193, %194 : vector<8x128xf32>
    %196 = vector.extract_strided_slice %39 {offsets = [24, 0], sizes = [8, 128], strides = [1, 1]} : vector<96x128xf32> to vector<8x128xf32>
    %197 = vector.extract_strided_slice %39 {offsets = [56, 0], sizes = [8, 128], strides = [1, 1]} : vector<96x128xf32> to vector<8x128xf32>
    %198 = vector.extract_strided_slice %39 {offsets = [88, 0], sizes = [8, 128], strides = [1, 1]} : vector<96x128xf32> to vector<8x128xf32>
    %cst_73 = arith.constant dense<0.000000e+00> : vector<128x128xf32>
    %199 = tpu.matmul %198, %197, %cst_73 {dimension_numbers = #tpu.dot_dimension_numbers<[0], [0], [1], [1], [0, 1, 1, 1], [], []>} : vector<8x128xf32>, vector<8x128xf32>, vector<128x128xf32> -> vector<128x128xf32>
    %cst_74 = arith.constant dense<0xFF800000> : vector<128xf32>
    %200 = vector.multi_reduction <maximumf>, %199, %cst_74 [0] : vector<128x128xf32> to vector<128xf32>
    %201 = vector.shape_cast %200 : vector<128xf32> to vector<1x128xf32>
    %202 = vector.broadcast %201 : vector<1x128xf32> to vector<128x128xf32>
    %203 = arith.subf %199, %202 : vector<128x128xf32>
    %204 = math.exp %203 : vector<128x128xf32>
    %cst_75 = arith.constant dense<0.000000e+00> : vector<128xf32>
    %205 = vector.multi_reduction <add>, %204, %cst_75 [0] : vector<128x128xf32> to vector<128xf32>
    %206 = vector.shape_cast %205 : vector<128xf32> to vector<1x128xf32>
    %207 = tpu.reciprocal %206 {approx = true} : vector<1x128xf32> -> vector<1x128xf32>
    %208 = vector.broadcast %207 : vector<1x128xf32> to vector<128x128xf32>
    %209 = arith.mulf %204, %208 : vector<128x128xf32>
    %cst_76 = arith.constant dense<0.000000e+00> : vector<8x128xf32>
    %210 = tpu.matmul %196, %209, %cst_76 {dimension_numbers = #tpu.dot_dimension_numbers<[1], [0], [0], [1], [0, 0, 1, 1], [], []>} : vector<8x128xf32>, vector<128x128xf32>, vector<8x128xf32> -> vector<8x128xf32>
    %c0_77 = arith.constant 0 : index
    %c3 = arith.constant 3 : index
    %c0_78 = arith.constant 0 : index
    %c0_79 = arith.constant 0 : index
    %211 = vector.load %arg4[%c0_77, %c3, %c0_78, %c0_79] : memref<3x4x8x8xf32, #tpu.memory_space<vmem>>, vector<1x1x8x8xf32>
    %212 = vector.shape_cast %211 : vector<1x1x8x8xf32> to vector<8x8xf32>
    %cst_80 = arith.constant dense<0.000000e+00> : vector<8x128xf32>
    %213 = tpu.matmul %212, %210, %cst_80 {dimension_numbers = #tpu.dot_dimension_numbers<[1], [0], [0], [1], [0, 0, 1, 1], [], []>} : vector<8x8xf32>, vector<8x128xf32>, vector<8x128xf32> -> vector<8x128xf32>
    %214 = vector.shape_cast %213 : vector<8x128xf32> to vector<1x8x128xf32>
    %cst_81 = arith.constant dense<0.000000e+00> : vector<1xf32>
    %215 = vector.multi_reduction <add>, %214, %cst_81 [1, 2] : vector<1x8x128xf32> to vector<1xf32>
    %216 = vector.shape_cast %215 : vector<1xf32> to vector<1x1x1xf32>
    %217 = vector.extract %216[0, 0, 0] : f32 from vector<1x1x1xf32>
    %218 = vector.broadcast %217 : f32 to vector<1x1xf32>
    %cst_82 = arith.constant 1.024000e+03 : f32
    %219 = vector.broadcast %cst_82 : f32 to vector<1x1xf32>
    %220 = arith.divf %218, %219 : vector<1x1xf32>
    %221 = vector.broadcast %220 : vector<1x1xf32> to vector<8x128xf32>
    %222 = arith.subf %213, %221 : vector<8x128xf32>
    %223 = arith.mulf %222, %222 : vector<8x128xf32>
    %224 = vector.shape_cast %223 : vector<8x128xf32> to vector<1x8x128xf32>
    %cst_83 = arith.constant dense<0.000000e+00> : vector<1xf32>
    %225 = vector.multi_reduction <add>, %224, %cst_83 [1, 2] : vector<1x8x128xf32> to vector<1xf32>
    %226 = vector.shape_cast %225 : vector<1xf32> to vector<1x1x1xf32>
    %227 = vector.extract %226[0, 0, 0] : f32 from vector<1x1x1xf32>
    %228 = vector.broadcast %227 : f32 to vector<1x1xf32>
    %cst_84 = arith.constant 1.024000e+03 : f32
    %229 = vector.broadcast %cst_84 : f32 to vector<1x1xf32>
    %230 = arith.divf %228, %229 : vector<1x1xf32>
    %231 = vector.broadcast %220 : vector<1x1xf32> to vector<8x128xf32>
    %232 = arith.subf %213, %231 : vector<8x128xf32>
    %cst_85 = arith.constant 9.99999974E-6 : f32
    %233 = vector.broadcast %cst_85 : f32 to vector<1x1xf32>
    %234 = arith.addf %230, %233 : vector<1x1xf32>
    %235 = math.rsqrt %234 : vector<1x1xf32>
    %236 = vector.broadcast %235 : vector<1x1xf32> to vector<8x128xf32>
    %237 = arith.mulf %232, %236 : vector<8x128xf32>
    %c0_86 = arith.constant 0 : index
    %c3_87 = arith.constant 3 : index
    %c0_88 = arith.constant 0 : index
    %c0_89 = arith.constant 0 : index
    %238 = vector.load %arg5[%c0_86, %c3_87, %c0_88, %c0_89] : memref<3x4x8x1xf32, #tpu.memory_space<vmem>>, vector<1x1x8x1xf32>
    %239 = vector.shape_cast %238 : vector<1x1x8x1xf32> to vector<8x1xf32>
    %240 = vector.broadcast %239 : vector<8x1xf32> to vector<8x128xf32>
    %241 = arith.mulf %237, %240 : vector<8x128xf32>
    %c0_90 = arith.constant 0 : index
    %c3_91 = arith.constant 3 : index
    %c0_92 = arith.constant 0 : index
    %c0_93 = arith.constant 0 : index
    %242 = vector.load %arg6[%c0_90, %c3_91, %c0_92, %c0_93] : memref<3x4x8x1xf32, #tpu.memory_space<vmem>>, vector<1x1x8x1xf32>
    %243 = vector.shape_cast %242 : vector<1x1x8x1xf32> to vector<8x1xf32>
    %244 = vector.broadcast %243 : vector<8x1xf32> to vector<8x128xf32>
    %245 = arith.addf %241, %244 : vector<8x128xf32>
    %246 = vector.extract_strided_slice %36 {offsets = [24, 0], sizes = [8, 128], strides = [1, 1]} : vector<32x128xf32> to vector<8x128xf32>
    %247 = arith.addf %245, %246 : vector<8x128xf32>
    %248 = tpu.concatenate %91, %143, %195, %247 in 0 : vector<8x128xf32>, vector<8x128xf32>, vector<8x128xf32>, vector<8x128xf32> -> vector<32x128xf32>
    %c1_94 = arith.constant 1 : index
    %c0_95 = arith.constant 0 : index
    %c0_96 = arith.constant 0 : index
    %249 = vector.load %arg3[%c1_94, %c0_95, %c0_96] : memref<3x96x32xf32, #tpu.memory_space<vmem>>, vector<1x96x32xf32>
    %250 = vector.shape_cast %249 : vector<1x96x32xf32> to vector<96x32xf32>
    %cst_97 = arith.constant dense<0.000000e+00> : vector<96x128xf32>
    %251 = tpu.matmul %250, %248, %cst_97 {dimension_numbers = #tpu.dot_dimension_numbers<[1], [0], [0], [1], [0, 0, 1, 1], [], []>} : vector<96x32xf32>, vector<32x128xf32>, vector<96x128xf32> -> vector<96x128xf32>
    %252 = vector.extract_strided_slice %251 {offsets = [0, 0], sizes = [8, 128], strides = [1, 1]} : vector<96x128xf32> to vector<8x128xf32>
    %253 = vector.extract_strided_slice %251 {offsets = [32, 0], sizes = [8, 128], strides = [1, 1]} : vector<96x128xf32> to vector<8x128xf32>
    %254 = vector.extract_strided_slice %251 {offsets = [64, 0], sizes = [8, 128], strides = [1, 1]} : vector<96x128xf32> to vector<8x128xf32>
    %cst_98 = arith.constant dense<0.000000e+00> : vector<128x128xf32>
    %255 = tpu.matmul %254, %253, %cst_98 {dimension_numbers = #tpu.dot_dimension_numbers<[0], [0], [1], [1], [0, 1, 1, 1], [], []>} : vector<8x128xf32>, vector<8x128xf32>, vector<128x128xf32> -> vector<128x128xf32>
    %cst_99 = arith.constant dense<0xFF800000> : vector<128xf32>
    %256 = vector.multi_reduction <maximumf>, %255, %cst_99 [0] : vector<128x128xf32> to vector<128xf32>
    %257 = vector.shape_cast %256 : vector<128xf32> to vector<1x128xf32>
    %258 = vector.broadcast %257 : vector<1x128xf32> to vector<128x128xf32>
    %259 = arith.subf %255, %258 : vector<128x128xf32>
    %260 = math.exp %259 : vector<128x128xf32>
    %cst_100 = arith.constant dense<0.000000e+00> : vector<128xf32>
    %261 = vector.multi_reduction <add>, %260, %cst_100 [0] : vector<128x128xf32> to vector<128xf32>
    %262 = vector.shape_cast %261 : vector<128xf32> to vector<1x128xf32>
    %263 = tpu.reciprocal %262 {approx = true} : vector<1x128xf32> -> vector<1x128xf32>
    %264 = vector.broadcast %263 : vector<1x128xf32> to vector<128x128xf32>
    %265 = arith.mulf %260, %264 : vector<128x128xf32>
    %cst_101 = arith.constant dense<0.000000e+00> : vector<8x128xf32>
    %266 = tpu.matmul %252, %265, %cst_101 {dimension_numbers = #tpu.dot_dimension_numbers<[1], [0], [0], [1], [0, 0, 1, 1], [], []>} : vector<8x128xf32>, vector<128x128xf32>, vector<8x128xf32> -> vector<8x128xf32>
    %c1_102 = arith.constant 1 : index
    %c0_103 = arith.constant 0 : index
    %c0_104 = arith.constant 0 : index
    %c0_105 = arith.constant 0 : index
    %267 = vector.load %arg4[%c1_102, %c0_103, %c0_104, %c0_105] : memref<3x4x8x8xf32, #tpu.memory_space<vmem>>, vector<1x1x8x8xf32>
    %268 = vector.shape_cast %267 : vector<1x1x8x8xf32> to vector<8x8xf32>
    %cst_106 = arith.constant dense<0.000000e+00> : vector<8x128xf32>
    %269 = tpu.matmul %268, %266, %cst_106 {dimension_numbers = #tpu.dot_dimension_numbers<[1], [0], [0], [1], [0, 0, 1, 1], [], []>} : vector<8x8xf32>, vector<8x128xf32>, vector<8x128xf32> -> vector<8x128xf32>
    %270 = vector.shape_cast %269 : vector<8x128xf32> to vector<1x8x128xf32>
    %cst_107 = arith.constant dense<0.000000e+00> : vector<1xf32>
    %271 = vector.multi_reduction <add>, %270, %cst_107 [1, 2] : vector<1x8x128xf32> to vector<1xf32>
    %272 = vector.shape_cast %271 : vector<1xf32> to vector<1x1x1xf32>
    %273 = vector.extract %272[0, 0, 0] : f32 from vector<1x1x1xf32>
    %274 = vector.broadcast %273 : f32 to vector<1x1xf32>
    %cst_108 = arith.constant 1.024000e+03 : f32
    %275 = vector.broadcast %cst_108 : f32 to vector<1x1xf32>
    %276 = arith.divf %274, %275 : vector<1x1xf32>
    %277 = vector.broadcast %276 : vector<1x1xf32> to vector<8x128xf32>
    %278 = arith.subf %269, %277 : vector<8x128xf32>
    %279 = arith.mulf %278, %278 : vector<8x128xf32>
    %280 = vector.shape_cast %279 : vector<8x128xf32> to vector<1x8x128xf32>
    %cst_109 = arith.constant dense<0.000000e+00> : vector<1xf32>
    %281 = vector.multi_reduction <add>, %280, %cst_109 [1, 2] : vector<1x8x128xf32> to vector<1xf32>
    %282 = vector.shape_cast %281 : vector<1xf32> to vector<1x1x1xf32>
    %283 = vector.extract %282[0, 0, 0] : f32 from vector<1x1x1xf32>
    %284 = vector.broadcast %283 : f32 to vector<1x1xf32>
    %cst_110 = arith.constant 1.024000e+03 : f32
    %285 = vector.broadcast %cst_110 : f32 to vector<1x1xf32>
    %286 = arith.divf %284, %285 : vector<1x1xf32>
    %287 = vector.broadcast %276 : vector<1x1xf32> to vector<8x128xf32>
    %288 = arith.subf %269, %287 : vector<8x128xf32>
    %cst_111 = arith.constant 9.99999974E-6 : f32
    %289 = vector.broadcast %cst_111 : f32 to vector<1x1xf32>
    %290 = arith.addf %286, %289 : vector<1x1xf32>
    %291 = math.rsqrt %290 : vector<1x1xf32>
    %292 = vector.broadcast %291 : vector<1x1xf32> to vector<8x128xf32>
    %293 = arith.mulf %288, %292 : vector<8x128xf32>
    %c1_112 = arith.constant 1 : index
    %c0_113 = arith.constant 0 : index
    %c0_114 = arith.constant 0 : index
    %c0_115 = arith.constant 0 : index
    %294 = vector.load %arg5[%c1_112, %c0_113, %c0_114, %c0_115] : memref<3x4x8x1xf32, #tpu.memory_space<vmem>>, vector<1x1x8x1xf32>
    %295 = vector.shape_cast %294 : vector<1x1x8x1xf32> to vector<8x1xf32>
    %296 = vector.broadcast %295 : vector<8x1xf32> to vector<8x128xf32>
    %297 = arith.mulf %293, %296 : vector<8x128xf32>
    %c1_116 = arith.constant 1 : index
    %c0_117 = arith.constant 0 : index
    %c0_118 = arith.constant 0 : index
    %c0_119 = arith.constant 0 : index
    %298 = vector.load %arg6[%c1_116, %c0_117, %c0_118, %c0_119] : memref<3x4x8x1xf32, #tpu.memory_space<vmem>>, vector<1x1x8x1xf32>
    %299 = vector.shape_cast %298 : vector<1x1x8x1xf32> to vector<8x1xf32>
    %300 = vector.broadcast %299 : vector<8x1xf32> to vector<8x128xf32>
    %301 = arith.addf %297, %300 : vector<8x128xf32>
    %302 = vector.extract_strided_slice %248 {offsets = [0, 0], sizes = [8, 128], strides = [1, 1]} : vector<32x128xf32> to vector<8x128xf32>
    %303 = arith.addf %301, %302 : vector<8x128xf32>
    %304 = vector.extract_strided_slice %251 {offsets = [8, 0], sizes = [8, 128], strides = [1, 1]} : vector<96x128xf32> to vector<8x128xf32>
    %305 = vector.extract_strided_slice %251 {offsets = [40, 0], sizes = [8, 128], strides = [1, 1]} : vector<96x128xf32> to vector<8x128xf32>
    %306 = vector.extract_strided_slice %251 {offsets = [72, 0], sizes = [8, 128], strides = [1, 1]} : vector<96x128xf32> to vector<8x128xf32>
    %cst_120 = arith.constant dense<0.000000e+00> : vector<128x128xf32>
    %307 = tpu.matmul %306, %305, %cst_120 {dimension_numbers = #tpu.dot_dimension_numbers<[0], [0], [1], [1], [0, 1, 1, 1], [], []>} : vector<8x128xf32>, vector<8x128xf32>, vector<128x128xf32> -> vector<128x128xf32>
    %cst_121 = arith.constant dense<0xFF800000> : vector<128xf32>
    %308 = vector.multi_reduction <maximumf>, %307, %cst_121 [0] : vector<128x128xf32> to vector<128xf32>
    %309 = vector.shape_cast %308 : vector<128xf32> to vector<1x128xf32>
    %310 = vector.broadcast %309 : vector<1x128xf32> to vector<128x128xf32>
    %311 = arith.subf %307, %310 : vector<128x128xf32>
    %312 = math.exp %311 : vector<128x128xf32>
    %cst_122 = arith.constant dense<0.000000e+00> : vector<128xf32>
    %313 = vector.multi_reduction <add>, %312, %cst_122 [0] : vector<128x128xf32> to vector<128xf32>
    %314 = vector.shape_cast %313 : vector<128xf32> to vector<1x128xf32>
    %315 = tpu.reciprocal %314 {approx = true} : vector<1x128xf32> -> vector<1x128xf32>
    %316 = vector.broadcast %315 : vector<1x128xf32> to vector<128x128xf32>
    %317 = arith.mulf %312, %316 : vector<128x128xf32>
    %cst_123 = arith.constant dense<0.000000e+00> : vector<8x128xf32>
    %318 = tpu.matmul %304, %317, %cst_123 {dimension_numbers = #tpu.dot_dimension_numbers<[1], [0], [0], [1], [0, 0, 1, 1], [], []>} : vector<8x128xf32>, vector<128x128xf32>, vector<8x128xf32> -> vector<8x128xf32>
    %c1_124 = arith.constant 1 : index
    %c1_125 = arith.constant 1 : index
    %c0_126 = arith.constant 0 : index
    %c0_127 = arith.constant 0 : index
    %319 = vector.load %arg4[%c1_124, %c1_125, %c0_126, %c0_127] : memref<3x4x8x8xf32, #tpu.memory_space<vmem>>, vector<1x1x8x8xf32>
    %320 = vector.shape_cast %319 : vector<1x1x8x8xf32> to vector<8x8xf32>
    %cst_128 = arith.constant dense<0.000000e+00> : vector<8x128xf32>
    %321 = tpu.matmul %320, %318, %cst_128 {dimension_numbers = #tpu.dot_dimension_numbers<[1], [0], [0], [1], [0, 0, 1, 1], [], []>} : vector<8x8xf32>, vector<8x128xf32>, vector<8x128xf32> -> vector<8x128xf32>
    %322 = vector.shape_cast %321 : vector<8x128xf32> to vector<1x8x128xf32>
    %cst_129 = arith.constant dense<0.000000e+00> : vector<1xf32>
    %323 = vector.multi_reduction <add>, %322, %cst_129 [1, 2] : vector<1x8x128xf32> to vector<1xf32>
    %324 = vector.shape_cast %323 : vector<1xf32> to vector<1x1x1xf32>
    %325 = vector.extract %324[0, 0, 0] : f32 from vector<1x1x1xf32>
    %326 = vector.broadcast %325 : f32 to vector<1x1xf32>
    %cst_130 = arith.constant 1.024000e+03 : f32
    %327 = vector.broadcast %cst_130 : f32 to vector<1x1xf32>
    %328 = arith.divf %326, %327 : vector<1x1xf32>
    %329 = vector.broadcast %328 : vector<1x1xf32> to vector<8x128xf32>
    %330 = arith.subf %321, %329 : vector<8x128xf32>
    %331 = arith.mulf %330, %330 : vector<8x128xf32>
    %332 = vector.shape_cast %331 : vector<8x128xf32> to vector<1x8x128xf32>
    %cst_131 = arith.constant dense<0.000000e+00> : vector<1xf32>
    %333 = vector.multi_reduction <add>, %332, %cst_131 [1, 2] : vector<1x8x128xf32> to vector<1xf32>
    %334 = vector.shape_cast %333 : vector<1xf32> to vector<1x1x1xf32>
    %335 = vector.extract %334[0, 0, 0] : f32 from vector<1x1x1xf32>
    %336 = vector.broadcast %335 : f32 to vector<1x1xf32>
    %cst_132 = arith.constant 1.024000e+03 : f32
    %337 = vector.broadcast %cst_132 : f32 to vector<1x1xf32>
    %338 = arith.divf %336, %337 : vector<1x1xf32>
    %339 = vector.broadcast %328 : vector<1x1xf32> to vector<8x128xf32>
    %340 = arith.subf %321, %339 : vector<8x128xf32>
    %cst_133 = arith.constant 9.99999974E-6 : f32
    %341 = vector.broadcast %cst_133 : f32 to vector<1x1xf32>
    %342 = arith.addf %338, %341 : vector<1x1xf32>
    %343 = math.rsqrt %342 : vector<1x1xf32>
    %344 = vector.broadcast %343 : vector<1x1xf32> to vector<8x128xf32>
    %345 = arith.mulf %340, %344 : vector<8x128xf32>
    %c1_134 = arith.constant 1 : index
    %c1_135 = arith.constant 1 : index
    %c0_136 = arith.constant 0 : index
    %c0_137 = arith.constant 0 : index
    %346 = vector.load %arg5[%c1_134, %c1_135, %c0_136, %c0_137] : memref<3x4x8x1xf32, #tpu.memory_space<vmem>>, vector<1x1x8x1xf32>
    %347 = vector.shape_cast %346 : vector<1x1x8x1xf32> to vector<8x1xf32>
    %348 = vector.broadcast %347 : vector<8x1xf32> to vector<8x128xf32>
    %349 = arith.mulf %345, %348 : vector<8x128xf32>
    %c1_138 = arith.constant 1 : index
    %c1_139 = arith.constant 1 : index
    %c0_140 = arith.constant 0 : index
    %c0_141 = arith.constant 0 : index
    %350 = vector.load %arg6[%c1_138, %c1_139, %c0_140, %c0_141] : memref<3x4x8x1xf32, #tpu.memory_space<vmem>>, vector<1x1x8x1xf32>
    %351 = vector.shape_cast %350 : vector<1x1x8x1xf32> to vector<8x1xf32>
    %352 = vector.broadcast %351 : vector<8x1xf32> to vector<8x128xf32>
    %353 = arith.addf %349, %352 : vector<8x128xf32>
    %354 = vector.extract_strided_slice %248 {offsets = [8, 0], sizes = [8, 128], strides = [1, 1]} : vector<32x128xf32> to vector<8x128xf32>
    %355 = arith.addf %353, %354 : vector<8x128xf32>
    %356 = vector.extract_strided_slice %251 {offsets = [16, 0], sizes = [8, 128], strides = [1, 1]} : vector<96x128xf32> to vector<8x128xf32>
    %357 = vector.extract_strided_slice %251 {offsets = [48, 0], sizes = [8, 128], strides = [1, 1]} : vector<96x128xf32> to vector<8x128xf32>
    %358 = vector.extract_strided_slice %251 {offsets = [80, 0], sizes = [8, 128], strides = [1, 1]} : vector<96x128xf32> to vector<8x128xf32>
    %cst_142 = arith.constant dense<0.000000e+00> : vector<128x128xf32>
    %359 = tpu.matmul %358, %357, %cst_142 {dimension_numbers = #tpu.dot_dimension_numbers<[0], [0], [1], [1], [0, 1, 1, 1], [], []>} : vector<8x128xf32>, vector<8x128xf32>, vector<128x128xf32> -> vector<128x128xf32>
    %cst_143 = arith.constant dense<0xFF800000> : vector<128xf32>
    %360 = vector.multi_reduction <maximumf>, %359, %cst_143 [0] : vector<128x128xf32> to vector<128xf32>
    %361 = vector.shape_cast %360 : vector<128xf32> to vector<1x128xf32>
    %362 = vector.broadcast %361 : vector<1x128xf32> to vector<128x128xf32>
    %363 = arith.subf %359, %362 : vector<128x128xf32>
    %364 = math.exp %363 : vector<128x128xf32>
    %cst_144 = arith.constant dense<0.000000e+00> : vector<128xf32>
    %365 = vector.multi_reduction <add>, %364, %cst_144 [0] : vector<128x128xf32> to vector<128xf32>
    %366 = vector.shape_cast %365 : vector<128xf32> to vector<1x128xf32>
    %367 = tpu.reciprocal %366 {approx = true} : vector<1x128xf32> -> vector<1x128xf32>
    %368 = vector.broadcast %367 : vector<1x128xf32> to vector<128x128xf32>
    %369 = arith.mulf %364, %368 : vector<128x128xf32>
    %cst_145 = arith.constant dense<0.000000e+00> : vector<8x128xf32>
    %370 = tpu.matmul %356, %369, %cst_145 {dimension_numbers = #tpu.dot_dimension_numbers<[1], [0], [0], [1], [0, 0, 1, 1], [], []>} : vector<8x128xf32>, vector<128x128xf32>, vector<8x128xf32> -> vector<8x128xf32>
    %c1_146 = arith.constant 1 : index
    %c2_147 = arith.constant 2 : index
    %c0_148 = arith.constant 0 : index
    %c0_149 = arith.constant 0 : index
    %371 = vector.load %arg4[%c1_146, %c2_147, %c0_148, %c0_149] : memref<3x4x8x8xf32, #tpu.memory_space<vmem>>, vector<1x1x8x8xf32>
    %372 = vector.shape_cast %371 : vector<1x1x8x8xf32> to vector<8x8xf32>
    %cst_150 = arith.constant dense<0.000000e+00> : vector<8x128xf32>
    %373 = tpu.matmul %372, %370, %cst_150 {dimension_numbers = #tpu.dot_dimension_numbers<[1], [0], [0], [1], [0, 0, 1, 1], [], []>} : vector<8x8xf32>, vector<8x128xf32>, vector<8x128xf32> -> vector<8x128xf32>
    %374 = vector.shape_cast %373 : vector<8x128xf32> to vector<1x8x128xf32>
    %cst_151 = arith.constant dense<0.000000e+00> : vector<1xf32>
    %375 = vector.multi_reduction <add>, %374, %cst_151 [1, 2] : vector<1x8x128xf32> to vector<1xf32>
    %376 = vector.shape_cast %375 : vector<1xf32> to vector<1x1x1xf32>
    %377 = vector.extract %376[0, 0, 0] : f32 from vector<1x1x1xf32>
    %378 = vector.broadcast %377 : f32 to vector<1x1xf32>
    %cst_152 = arith.constant 1.024000e+03 : f32
    %379 = vector.broadcast %cst_152 : f32 to vector<1x1xf32>
    %380 = arith.divf %378, %379 : vector<1x1xf32>
    %381 = vector.broadcast %380 : vector<1x1xf32> to vector<8x128xf32>
    %382 = arith.subf %373, %381 : vector<8x128xf32>
    %383 = arith.mulf %382, %382 : vector<8x128xf32>
    %384 = vector.shape_cast %383 : vector<8x128xf32> to vector<1x8x128xf32>
    %cst_153 = arith.constant dense<0.000000e+00> : vector<1xf32>
    %385 = vector.multi_reduction <add>, %384, %cst_153 [1, 2] : vector<1x8x128xf32> to vector<1xf32>
    %386 = vector.shape_cast %385 : vector<1xf32> to vector<1x1x1xf32>
    %387 = vector.extract %386[0, 0, 0] : f32 from vector<1x1x1xf32>
    %388 = vector.broadcast %387 : f32 to vector<1x1xf32>
    %cst_154 = arith.constant 1.024000e+03 : f32
    %389 = vector.broadcast %cst_154 : f32 to vector<1x1xf32>
    %390 = arith.divf %388, %389 : vector<1x1xf32>
    %391 = vector.broadcast %380 : vector<1x1xf32> to vector<8x128xf32>
    %392 = arith.subf %373, %391 : vector<8x128xf32>
    %cst_155 = arith.constant 9.99999974E-6 : f32
    %393 = vector.broadcast %cst_155 : f32 to vector<1x1xf32>
    %394 = arith.addf %390, %393 : vector<1x1xf32>
    %395 = math.rsqrt %394 : vector<1x1xf32>
    %396 = vector.broadcast %395 : vector<1x1xf32> to vector<8x128xf32>
    %397 = arith.mulf %392, %396 : vector<8x128xf32>
    %c1_156 = arith.constant 1 : index
    %c2_157 = arith.constant 2 : index
    %c0_158 = arith.constant 0 : index
    %c0_159 = arith.constant 0 : index
    %398 = vector.load %arg5[%c1_156, %c2_157, %c0_158, %c0_159] : memref<3x4x8x1xf32, #tpu.memory_space<vmem>>, vector<1x1x8x1xf32>
    %399 = vector.shape_cast %398 : vector<1x1x8x1xf32> to vector<8x1xf32>
    %400 = vector.broadcast %399 : vector<8x1xf32> to vector<8x128xf32>
    %401 = arith.mulf %397, %400 : vector<8x128xf32>
    %c1_160 = arith.constant 1 : index
    %c2_161 = arith.constant 2 : index
    %c0_162 = arith.constant 0 : index
    %c0_163 = arith.constant 0 : index
    %402 = vector.load %arg6[%c1_160, %c2_161, %c0_162, %c0_163] : memref<3x4x8x1xf32, #tpu.memory_space<vmem>>, vector<1x1x8x1xf32>
    %403 = vector.shape_cast %402 : vector<1x1x8x1xf32> to vector<8x1xf32>
    %404 = vector.broadcast %403 : vector<8x1xf32> to vector<8x128xf32>
    %405 = arith.addf %401, %404 : vector<8x128xf32>
    %406 = vector.extract_strided_slice %248 {offsets = [16, 0], sizes = [8, 128], strides = [1, 1]} : vector<32x128xf32> to vector<8x128xf32>
    %407 = arith.addf %405, %406 : vector<8x128xf32>
    %408 = vector.extract_strided_slice %251 {offsets = [24, 0], sizes = [8, 128], strides = [1, 1]} : vector<96x128xf32> to vector<8x128xf32>
    %409 = vector.extract_strided_slice %251 {offsets = [56, 0], sizes = [8, 128], strides = [1, 1]} : vector<96x128xf32> to vector<8x128xf32>
    %410 = vector.extract_strided_slice %251 {offsets = [88, 0], sizes = [8, 128], strides = [1, 1]} : vector<96x128xf32> to vector<8x128xf32>
    %cst_164 = arith.constant dense<0.000000e+00> : vector<128x128xf32>
    %411 = tpu.matmul %410, %409, %cst_164 {dimension_numbers = #tpu.dot_dimension_numbers<[0], [0], [1], [1], [0, 1, 1, 1], [], []>} : vector<8x128xf32>, vector<8x128xf32>, vector<128x128xf32> -> vector<128x128xf32>
    %cst_165 = arith.constant dense<0xFF800000> : vector<128xf32>
    %412 = vector.multi_reduction <maximumf>, %411, %cst_165 [0] : vector<128x128xf32> to vector<128xf32>
    %413 = vector.shape_cast %412 : vector<128xf32> to vector<1x128xf32>
    %414 = vector.broadcast %413 : vector<1x128xf32> to vector<128x128xf32>
    %415 = arith.subf %411, %414 : vector<128x128xf32>
    %416 = math.exp %415 : vector<128x128xf32>
    %cst_166 = arith.constant dense<0.000000e+00> : vector<128xf32>
    %417 = vector.multi_reduction <add>, %416, %cst_166 [0] : vector<128x128xf32> to vector<128xf32>
    %418 = vector.shape_cast %417 : vector<128xf32> to vector<1x128xf32>
    %419 = tpu.reciprocal %418 {approx = true} : vector<1x128xf32> -> vector<1x128xf32>
    %420 = vector.broadcast %419 : vector<1x128xf32> to vector<128x128xf32>
    %421 = arith.mulf %416, %420 : vector<128x128xf32>
    %cst_167 = arith.constant dense<0.000000e+00> : vector<8x128xf32>
    %422 = tpu.matmul %408, %421, %cst_167 {dimension_numbers = #tpu.dot_dimension_numbers<[1], [0], [0], [1], [0, 0, 1, 1], [], []>} : vector<8x128xf32>, vector<128x128xf32>, vector<8x128xf32> -> vector<8x128xf32>
    %c1_168 = arith.constant 1 : index
    %c3_169 = arith.constant 3 : index
    %c0_170 = arith.constant 0 : index
    %c0_171 = arith.constant 0 : index
    %423 = vector.load %arg4[%c1_168, %c3_169, %c0_170, %c0_171] : memref<3x4x8x8xf32, #tpu.memory_space<vmem>>, vector<1x1x8x8xf32>
    %424 = vector.shape_cast %423 : vector<1x1x8x8xf32> to vector<8x8xf32>
    %cst_172 = arith.constant dense<0.000000e+00> : vector<8x128xf32>
    %425 = tpu.matmul %424, %422, %cst_172 {dimension_numbers = #tpu.dot_dimension_numbers<[1], [0], [0], [1], [0, 0, 1, 1], [], []>} : vector<8x8xf32>, vector<8x128xf32>, vector<8x128xf32> -> vector<8x128xf32>
    %426 = vector.shape_cast %425 : vector<8x128xf32> to vector<1x8x128xf32>
    %cst_173 = arith.constant dense<0.000000e+00> : vector<1xf32>
    %427 = vector.multi_reduction <add>, %426, %cst_173 [1, 2] : vector<1x8x128xf32> to vector<1xf32>
    %428 = vector.shape_cast %427 : vector<1xf32> to vector<1x1x1xf32>
    %429 = vector.extract %428[0, 0, 0] : f32 from vector<1x1x1xf32>
    %430 = vector.broadcast %429 : f32 to vector<1x1xf32>
    %cst_174 = arith.constant 1.024000e+03 : f32
    %431 = vector.broadcast %cst_174 : f32 to vector<1x1xf32>
    %432 = arith.divf %430, %431 : vector<1x1xf32>
    %433 = vector.broadcast %432 : vector<1x1xf32> to vector<8x128xf32>
    %434 = arith.subf %425, %433 : vector<8x128xf32>
    %435 = arith.mulf %434, %434 : vector<8x128xf32>
    %436 = vector.shape_cast %435 : vector<8x128xf32> to vector<1x8x128xf32>
    %cst_175 = arith.constant dense<0.000000e+00> : vector<1xf32>
    %437 = vector.multi_reduction <add>, %436, %cst_175 [1, 2] : vector<1x8x128xf32> to vector<1xf32>
    %438 = vector.shape_cast %437 : vector<1xf32> to vector<1x1x1xf32>
    %439 = vector.extract %438[0, 0, 0] : f32 from vector<1x1x1xf32>
    %440 = vector.broadcast %439 : f32 to vector<1x1xf32>
    %cst_176 = arith.constant 1.024000e+03 : f32
    %441 = vector.broadcast %cst_176 : f32 to vector<1x1xf32>
    %442 = arith.divf %440, %441 : vector<1x1xf32>
    %443 = vector.broadcast %432 : vector<1x1xf32> to vector<8x128xf32>
    %444 = arith.subf %425, %443 : vector<8x128xf32>
    %cst_177 = arith.constant 9.99999974E-6 : f32
    %445 = vector.broadcast %cst_177 : f32 to vector<1x1xf32>
    %446 = arith.addf %442, %445 : vector<1x1xf32>
    %447 = math.rsqrt %446 : vector<1x1xf32>
    %448 = vector.broadcast %447 : vector<1x1xf32> to vector<8x128xf32>
    %449 = arith.mulf %444, %448 : vector<8x128xf32>
    %c1_178 = arith.constant 1 : index
    %c3_179 = arith.constant 3 : index
    %c0_180 = arith.constant 0 : index
    %c0_181 = arith.constant 0 : index
    %450 = vector.load %arg5[%c1_178, %c3_179, %c0_180, %c0_181] : memref<3x4x8x1xf32, #tpu.memory_space<vmem>>, vector<1x1x8x1xf32>
    %451 = vector.shape_cast %450 : vector<1x1x8x1xf32> to vector<8x1xf32>
    %452 = vector.broadcast %451 : vector<8x1xf32> to vector<8x128xf32>
    %453 = arith.mulf %449, %452 : vector<8x128xf32>
    %c1_182 = arith.constant 1 : index
    %c3_183 = arith.constant 3 : index
    %c0_184 = arith.constant 0 : index
    %c0_185 = arith.constant 0 : index
    %454 = vector.load %arg6[%c1_182, %c3_183, %c0_184, %c0_185] : memref<3x4x8x1xf32, #tpu.memory_space<vmem>>, vector<1x1x8x1xf32>
    %455 = vector.shape_cast %454 : vector<1x1x8x1xf32> to vector<8x1xf32>
    %456 = vector.broadcast %455 : vector<8x1xf32> to vector<8x128xf32>
    %457 = arith.addf %453, %456 : vector<8x128xf32>
    %458 = vector.extract_strided_slice %248 {offsets = [24, 0], sizes = [8, 128], strides = [1, 1]} : vector<32x128xf32> to vector<8x128xf32>
    %459 = arith.addf %457, %458 : vector<8x128xf32>
    %460 = tpu.concatenate %303, %355, %407, %459 in 0 : vector<8x128xf32>, vector<8x128xf32>, vector<8x128xf32>, vector<8x128xf32> -> vector<32x128xf32>
    %c2_186 = arith.constant 2 : index
    %c0_187 = arith.constant 0 : index
    %c0_188 = arith.constant 0 : index
    %461 = vector.load %arg3[%c2_186, %c0_187, %c0_188] : memref<3x96x32xf32, #tpu.memory_space<vmem>>, vector<1x96x32xf32>
    %462 = vector.shape_cast %461 : vector<1x96x32xf32> to vector<96x32xf32>
    %cst_189 = arith.constant dense<0.000000e+00> : vector<96x128xf32>
    %463 = tpu.matmul %462, %460, %cst_189 {dimension_numbers = #tpu.dot_dimension_numbers<[1], [0], [0], [1], [0, 0, 1, 1], [], []>} : vector<96x32xf32>, vector<32x128xf32>, vector<96x128xf32> -> vector<96x128xf32>
    %464 = vector.extract_strided_slice %463 {offsets = [0, 0], sizes = [8, 128], strides = [1, 1]} : vector<96x128xf32> to vector<8x128xf32>
    %465 = vector.extract_strided_slice %463 {offsets = [32, 0], sizes = [8, 128], strides = [1, 1]} : vector<96x128xf32> to vector<8x128xf32>
    %466 = vector.extract_strided_slice %463 {offsets = [64, 0], sizes = [8, 128], strides = [1, 1]} : vector<96x128xf32> to vector<8x128xf32>
    %cst_190 = arith.constant dense<0.000000e+00> : vector<128x128xf32>
    %467 = tpu.matmul %466, %465, %cst_190 {dimension_numbers = #tpu.dot_dimension_numbers<[0], [0], [1], [1], [0, 1, 1, 1], [], []>} : vector<8x128xf32>, vector<8x128xf32>, vector<128x128xf32> -> vector<128x128xf32>
    %cst_191 = arith.constant dense<0xFF800000> : vector<128xf32>
    %468 = vector.multi_reduction <maximumf>, %467, %cst_191 [0] : vector<128x128xf32> to vector<128xf32>
    %469 = vector.shape_cast %468 : vector<128xf32> to vector<1x128xf32>
    %470 = vector.broadcast %469 : vector<1x128xf32> to vector<128x128xf32>
    %471 = arith.subf %467, %470 : vector<128x128xf32>
    %472 = math.exp %471 : vector<128x128xf32>
    %cst_192 = arith.constant dense<0.000000e+00> : vector<128xf32>
    %473 = vector.multi_reduction <add>, %472, %cst_192 [0] : vector<128x128xf32> to vector<128xf32>
    %474 = vector.shape_cast %473 : vector<128xf32> to vector<1x128xf32>
    %475 = tpu.reciprocal %474 {approx = true} : vector<1x128xf32> -> vector<1x128xf32>
    %476 = vector.broadcast %475 : vector<1x128xf32> to vector<128x128xf32>
    %477 = arith.mulf %472, %476 : vector<128x128xf32>
    %cst_193 = arith.constant dense<0.000000e+00> : vector<8x128xf32>
    %478 = tpu.matmul %464, %477, %cst_193 {dimension_numbers = #tpu.dot_dimension_numbers<[1], [0], [0], [1], [0, 0, 1, 1], [], []>} : vector<8x128xf32>, vector<128x128xf32>, vector<8x128xf32> -> vector<8x128xf32>
    %c2_194 = arith.constant 2 : index
    %c0_195 = arith.constant 0 : index
    %c0_196 = arith.constant 0 : index
    %c0_197 = arith.constant 0 : index
    %479 = vector.load %arg4[%c2_194, %c0_195, %c0_196, %c0_197] : memref<3x4x8x8xf32, #tpu.memory_space<vmem>>, vector<1x1x8x8xf32>
    %480 = vector.shape_cast %479 : vector<1x1x8x8xf32> to vector<8x8xf32>
    %cst_198 = arith.constant dense<0.000000e+00> : vector<8x128xf32>
    %481 = tpu.matmul %480, %478, %cst_198 {dimension_numbers = #tpu.dot_dimension_numbers<[1], [0], [0], [1], [0, 0, 1, 1], [], []>} : vector<8x8xf32>, vector<8x128xf32>, vector<8x128xf32> -> vector<8x128xf32>
    %482 = vector.shape_cast %481 : vector<8x128xf32> to vector<1x8x128xf32>
    %cst_199 = arith.constant dense<0.000000e+00> : vector<1xf32>
    %483 = vector.multi_reduction <add>, %482, %cst_199 [1, 2] : vector<1x8x128xf32> to vector<1xf32>
    %484 = vector.shape_cast %483 : vector<1xf32> to vector<1x1x1xf32>
    %485 = vector.extract %484[0, 0, 0] : f32 from vector<1x1x1xf32>
    %486 = vector.broadcast %485 : f32 to vector<1x1xf32>
    %cst_200 = arith.constant 1.024000e+03 : f32
    %487 = vector.broadcast %cst_200 : f32 to vector<1x1xf32>
    %488 = arith.divf %486, %487 : vector<1x1xf32>
    %489 = vector.broadcast %488 : vector<1x1xf32> to vector<8x128xf32>
    %490 = arith.subf %481, %489 : vector<8x128xf32>
    %491 = arith.mulf %490, %490 : vector<8x128xf32>
    %492 = vector.shape_cast %491 : vector<8x128xf32> to vector<1x8x128xf32>
    %cst_201 = arith.constant dense<0.000000e+00> : vector<1xf32>
    %493 = vector.multi_reduction <add>, %492, %cst_201 [1, 2] : vector<1x8x128xf32> to vector<1xf32>
    %494 = vector.shape_cast %493 : vector<1xf32> to vector<1x1x1xf32>
    %495 = vector.extract %494[0, 0, 0] : f32 from vector<1x1x1xf32>
    %496 = vector.broadcast %495 : f32 to vector<1x1xf32>
    %cst_202 = arith.constant 1.024000e+03 : f32
    %497 = vector.broadcast %cst_202 : f32 to vector<1x1xf32>
    %498 = arith.divf %496, %497 : vector<1x1xf32>
    %499 = vector.broadcast %488 : vector<1x1xf32> to vector<8x128xf32>
    %500 = arith.subf %481, %499 : vector<8x128xf32>
    %cst_203 = arith.constant 9.99999974E-6 : f32
    %501 = vector.broadcast %cst_203 : f32 to vector<1x1xf32>
    %502 = arith.addf %498, %501 : vector<1x1xf32>
    %503 = math.rsqrt %502 : vector<1x1xf32>
    %504 = vector.broadcast %503 : vector<1x1xf32> to vector<8x128xf32>
    %505 = arith.mulf %500, %504 : vector<8x128xf32>
    %c2_204 = arith.constant 2 : index
    %c0_205 = arith.constant 0 : index
    %c0_206 = arith.constant 0 : index
    %c0_207 = arith.constant 0 : index
    %506 = vector.load %arg5[%c2_204, %c0_205, %c0_206, %c0_207] : memref<3x4x8x1xf32, #tpu.memory_space<vmem>>, vector<1x1x8x1xf32>
    %507 = vector.shape_cast %506 : vector<1x1x8x1xf32> to vector<8x1xf32>
    %508 = vector.broadcast %507 : vector<8x1xf32> to vector<8x128xf32>
    %509 = arith.mulf %505, %508 : vector<8x128xf32>
    %c2_208 = arith.constant 2 : index
    %c0_209 = arith.constant 0 : index
    %c0_210 = arith.constant 0 : index
    %c0_211 = arith.constant 0 : index
    %510 = vector.load %arg6[%c2_208, %c0_209, %c0_210, %c0_211] : memref<3x4x8x1xf32, #tpu.memory_space<vmem>>, vector<1x1x8x1xf32>
    %511 = vector.shape_cast %510 : vector<1x1x8x1xf32> to vector<8x1xf32>
    %512 = vector.broadcast %511 : vector<8x1xf32> to vector<8x128xf32>
    %513 = arith.addf %509, %512 : vector<8x128xf32>
    %514 = vector.extract_strided_slice %460 {offsets = [0, 0], sizes = [8, 128], strides = [1, 1]} : vector<32x128xf32> to vector<8x128xf32>
    %515 = arith.addf %513, %514 : vector<8x128xf32>
    %516 = vector.extract_strided_slice %463 {offsets = [8, 0], sizes = [8, 128], strides = [1, 1]} : vector<96x128xf32> to vector<8x128xf32>
    %517 = vector.extract_strided_slice %463 {offsets = [40, 0], sizes = [8, 128], strides = [1, 1]} : vector<96x128xf32> to vector<8x128xf32>
    %518 = vector.extract_strided_slice %463 {offsets = [72, 0], sizes = [8, 128], strides = [1, 1]} : vector<96x128xf32> to vector<8x128xf32>
    %cst_212 = arith.constant dense<0.000000e+00> : vector<128x128xf32>
    %519 = tpu.matmul %518, %517, %cst_212 {dimension_numbers = #tpu.dot_dimension_numbers<[0], [0], [1], [1], [0, 1, 1, 1], [], []>} : vector<8x128xf32>, vector<8x128xf32>, vector<128x128xf32> -> vector<128x128xf32>
    %cst_213 = arith.constant dense<0xFF800000> : vector<128xf32>
    %520 = vector.multi_reduction <maximumf>, %519, %cst_213 [0] : vector<128x128xf32> to vector<128xf32>
    %521 = vector.shape_cast %520 : vector<128xf32> to vector<1x128xf32>
    %522 = vector.broadcast %521 : vector<1x128xf32> to vector<128x128xf32>
    %523 = arith.subf %519, %522 : vector<128x128xf32>
    %524 = math.exp %523 : vector<128x128xf32>
    %cst_214 = arith.constant dense<0.000000e+00> : vector<128xf32>
    %525 = vector.multi_reduction <add>, %524, %cst_214 [0] : vector<128x128xf32> to vector<128xf32>
    %526 = vector.shape_cast %525 : vector<128xf32> to vector<1x128xf32>
    %527 = tpu.reciprocal %526 {approx = true} : vector<1x128xf32> -> vector<1x128xf32>
    %528 = vector.broadcast %527 : vector<1x128xf32> to vector<128x128xf32>
    %529 = arith.mulf %524, %528 : vector<128x128xf32>
    %cst_215 = arith.constant dense<0.000000e+00> : vector<8x128xf32>
    %530 = tpu.matmul %516, %529, %cst_215 {dimension_numbers = #tpu.dot_dimension_numbers<[1], [0], [0], [1], [0, 0, 1, 1], [], []>} : vector<8x128xf32>, vector<128x128xf32>, vector<8x128xf32> -> vector<8x128xf32>
    %c2_216 = arith.constant 2 : index
    %c1_217 = arith.constant 1 : index
    %c0_218 = arith.constant 0 : index
    %c0_219 = arith.constant 0 : index
    %531 = vector.load %arg4[%c2_216, %c1_217, %c0_218, %c0_219] : memref<3x4x8x8xf32, #tpu.memory_space<vmem>>, vector<1x1x8x8xf32>
    %532 = vector.shape_cast %531 : vector<1x1x8x8xf32> to vector<8x8xf32>
    %cst_220 = arith.constant dense<0.000000e+00> : vector<8x128xf32>
    %533 = tpu.matmul %532, %530, %cst_220 {dimension_numbers = #tpu.dot_dimension_numbers<[1], [0], [0], [1], [0, 0, 1, 1], [], []>} : vector<8x8xf32>, vector<8x128xf32>, vector<8x128xf32> -> vector<8x128xf32>
    %534 = vector.shape_cast %533 : vector<8x128xf32> to vector<1x8x128xf32>
    %cst_221 = arith.constant dense<0.000000e+00> : vector<1xf32>
    %535 = vector.multi_reduction <add>, %534, %cst_221 [1, 2] : vector<1x8x128xf32> to vector<1xf32>
    %536 = vector.shape_cast %535 : vector<1xf32> to vector<1x1x1xf32>
    %537 = vector.extract %536[0, 0, 0] : f32 from vector<1x1x1xf32>
    %538 = vector.broadcast %537 : f32 to vector<1x1xf32>
    %cst_222 = arith.constant 1.024000e+03 : f32
    %539 = vector.broadcast %cst_222 : f32 to vector<1x1xf32>
    %540 = arith.divf %538, %539 : vector<1x1xf32>
    %541 = vector.broadcast %540 : vector<1x1xf32> to vector<8x128xf32>
    %542 = arith.subf %533, %541 : vector<8x128xf32>
    %543 = arith.mulf %542, %542 : vector<8x128xf32>
    %544 = vector.shape_cast %543 : vector<8x128xf32> to vector<1x8x128xf32>
    %cst_223 = arith.constant dense<0.000000e+00> : vector<1xf32>
    %545 = vector.multi_reduction <add>, %544, %cst_223 [1, 2] : vector<1x8x128xf32> to vector<1xf32>
    %546 = vector.shape_cast %545 : vector<1xf32> to vector<1x1x1xf32>
    %547 = vector.extract %546[0, 0, 0] : f32 from vector<1x1x1xf32>
    %548 = vector.broadcast %547 : f32 to vector<1x1xf32>
    %cst_224 = arith.constant 1.024000e+03 : f32
    %549 = vector.broadcast %cst_224 : f32 to vector<1x1xf32>
    %550 = arith.divf %548, %549 : vector<1x1xf32>
    %551 = vector.broadcast %540 : vector<1x1xf32> to vector<8x128xf32>
    %552 = arith.subf %533, %551 : vector<8x128xf32>
    %cst_225 = arith.constant 9.99999974E-6 : f32
    %553 = vector.broadcast %cst_225 : f32 to vector<1x1xf32>
    %554 = arith.addf %550, %553 : vector<1x1xf32>
    %555 = math.rsqrt %554 : vector<1x1xf32>
    %556 = vector.broadcast %555 : vector<1x1xf32> to vector<8x128xf32>
    %557 = arith.mulf %552, %556 : vector<8x128xf32>
    %c2_226 = arith.constant 2 : index
    %c1_227 = arith.constant 1 : index
    %c0_228 = arith.constant 0 : index
    %c0_229 = arith.constant 0 : index
    %558 = vector.load %arg5[%c2_226, %c1_227, %c0_228, %c0_229] : memref<3x4x8x1xf32, #tpu.memory_space<vmem>>, vector<1x1x8x1xf32>
    %559 = vector.shape_cast %558 : vector<1x1x8x1xf32> to vector<8x1xf32>
    %560 = vector.broadcast %559 : vector<8x1xf32> to vector<8x128xf32>
    %561 = arith.mulf %557, %560 : vector<8x128xf32>
    %c2_230 = arith.constant 2 : index
    %c1_231 = arith.constant 1 : index
    %c0_232 = arith.constant 0 : index
    %c0_233 = arith.constant 0 : index
    %562 = vector.load %arg6[%c2_230, %c1_231, %c0_232, %c0_233] : memref<3x4x8x1xf32, #tpu.memory_space<vmem>>, vector<1x1x8x1xf32>
    %563 = vector.shape_cast %562 : vector<1x1x8x1xf32> to vector<8x1xf32>
    %564 = vector.broadcast %563 : vector<8x1xf32> to vector<8x128xf32>
    %565 = arith.addf %561, %564 : vector<8x128xf32>
    %566 = vector.extract_strided_slice %460 {offsets = [8, 0], sizes = [8, 128], strides = [1, 1]} : vector<32x128xf32> to vector<8x128xf32>
    %567 = arith.addf %565, %566 : vector<8x128xf32>
    %568 = vector.extract_strided_slice %463 {offsets = [16, 0], sizes = [8, 128], strides = [1, 1]} : vector<96x128xf32> to vector<8x128xf32>
    %569 = vector.extract_strided_slice %463 {offsets = [48, 0], sizes = [8, 128], strides = [1, 1]} : vector<96x128xf32> to vector<8x128xf32>
    %570 = vector.extract_strided_slice %463 {offsets = [80, 0], sizes = [8, 128], strides = [1, 1]} : vector<96x128xf32> to vector<8x128xf32>
    %cst_234 = arith.constant dense<0.000000e+00> : vector<128x128xf32>
    %571 = tpu.matmul %570, %569, %cst_234 {dimension_numbers = #tpu.dot_dimension_numbers<[0], [0], [1], [1], [0, 1, 1, 1], [], []>} : vector<8x128xf32>, vector<8x128xf32>, vector<128x128xf32> -> vector<128x128xf32>
    %cst_235 = arith.constant dense<0xFF800000> : vector<128xf32>
    %572 = vector.multi_reduction <maximumf>, %571, %cst_235 [0] : vector<128x128xf32> to vector<128xf32>
    %573 = vector.shape_cast %572 : vector<128xf32> to vector<1x128xf32>
    %574 = vector.broadcast %573 : vector<1x128xf32> to vector<128x128xf32>
    %575 = arith.subf %571, %574 : vector<128x128xf32>
    %576 = math.exp %575 : vector<128x128xf32>
    %cst_236 = arith.constant dense<0.000000e+00> : vector<128xf32>
    %577 = vector.multi_reduction <add>, %576, %cst_236 [0] : vector<128x128xf32> to vector<128xf32>
    %578 = vector.shape_cast %577 : vector<128xf32> to vector<1x128xf32>
    %579 = tpu.reciprocal %578 {approx = true} : vector<1x128xf32> -> vector<1x128xf32>
    %580 = vector.broadcast %579 : vector<1x128xf32> to vector<128x128xf32>
    %581 = arith.mulf %576, %580 : vector<128x128xf32>
    %cst_237 = arith.constant dense<0.000000e+00> : vector<8x128xf32>
    %582 = tpu.matmul %568, %581, %cst_237 {dimension_numbers = #tpu.dot_dimension_numbers<[1], [0], [0], [1], [0, 0, 1, 1], [], []>} : vector<8x128xf32>, vector<128x128xf32>, vector<8x128xf32> -> vector<8x128xf32>
    %c2_238 = arith.constant 2 : index
    %c2_239 = arith.constant 2 : index
    %c0_240 = arith.constant 0 : index
    %c0_241 = arith.constant 0 : index
    %583 = vector.load %arg4[%c2_238, %c2_239, %c0_240, %c0_241] : memref<3x4x8x8xf32, #tpu.memory_space<vmem>>, vector<1x1x8x8xf32>
    %584 = vector.shape_cast %583 : vector<1x1x8x8xf32> to vector<8x8xf32>
    %cst_242 = arith.constant dense<0.000000e+00> : vector<8x128xf32>
    %585 = tpu.matmul %584, %582, %cst_242 {dimension_numbers = #tpu.dot_dimension_numbers<[1], [0], [0], [1], [0, 0, 1, 1], [], []>} : vector<8x8xf32>, vector<8x128xf32>, vector<8x128xf32> -> vector<8x128xf32>
    %586 = vector.shape_cast %585 : vector<8x128xf32> to vector<1x8x128xf32>
    %cst_243 = arith.constant dense<0.000000e+00> : vector<1xf32>
    %587 = vector.multi_reduction <add>, %586, %cst_243 [1, 2] : vector<1x8x128xf32> to vector<1xf32>
    %588 = vector.shape_cast %587 : vector<1xf32> to vector<1x1x1xf32>
    %589 = vector.extract %588[0, 0, 0] : f32 from vector<1x1x1xf32>
    %590 = vector.broadcast %589 : f32 to vector<1x1xf32>
    %cst_244 = arith.constant 1.024000e+03 : f32
    %591 = vector.broadcast %cst_244 : f32 to vector<1x1xf32>
    %592 = arith.divf %590, %591 : vector<1x1xf32>
    %593 = vector.broadcast %592 : vector<1x1xf32> to vector<8x128xf32>
    %594 = arith.subf %585, %593 : vector<8x128xf32>
    %595 = arith.mulf %594, %594 : vector<8x128xf32>
    %596 = vector.shape_cast %595 : vector<8x128xf32> to vector<1x8x128xf32>
    %cst_245 = arith.constant dense<0.000000e+00> : vector<1xf32>
    %597 = vector.multi_reduction <add>, %596, %cst_245 [1, 2] : vector<1x8x128xf32> to vector<1xf32>
    %598 = vector.shape_cast %597 : vector<1xf32> to vector<1x1x1xf32>
    %599 = vector.extract %598[0, 0, 0] : f32 from vector<1x1x1xf32>
    %600 = vector.broadcast %599 : f32 to vector<1x1xf32>
    %cst_246 = arith.constant 1.024000e+03 : f32
    %601 = vector.broadcast %cst_246 : f32 to vector<1x1xf32>
    %602 = arith.divf %600, %601 : vector<1x1xf32>
    %603 = vector.broadcast %592 : vector<1x1xf32> to vector<8x128xf32>
    %604 = arith.subf %585, %603 : vector<8x128xf32>
    %cst_247 = arith.constant 9.99999974E-6 : f32
    %605 = vector.broadcast %cst_247 : f32 to vector<1x1xf32>
    %606 = arith.addf %602, %605 : vector<1x1xf32>
    %607 = math.rsqrt %606 : vector<1x1xf32>
    %608 = vector.broadcast %607 : vector<1x1xf32> to vector<8x128xf32>
    %609 = arith.mulf %604, %608 : vector<8x128xf32>
    %c2_248 = arith.constant 2 : index
    %c2_249 = arith.constant 2 : index
    %c0_250 = arith.constant 0 : index
    %c0_251 = arith.constant 0 : index
    %610 = vector.load %arg5[%c2_248, %c2_249, %c0_250, %c0_251] : memref<3x4x8x1xf32, #tpu.memory_space<vmem>>, vector<1x1x8x1xf32>
    %611 = vector.shape_cast %610 : vector<1x1x8x1xf32> to vector<8x1xf32>
    %612 = vector.broadcast %611 : vector<8x1xf32> to vector<8x128xf32>
    %613 = arith.mulf %609, %612 : vector<8x128xf32>
    %c2_252 = arith.constant 2 : index
    %c2_253 = arith.constant 2 : index
    %c0_254 = arith.constant 0 : index
    %c0_255 = arith.constant 0 : index
    %614 = vector.load %arg6[%c2_252, %c2_253, %c0_254, %c0_255] : memref<3x4x8x1xf32, #tpu.memory_space<vmem>>, vector<1x1x8x1xf32>
    %615 = vector.shape_cast %614 : vector<1x1x8x1xf32> to vector<8x1xf32>
    %616 = vector.broadcast %615 : vector<8x1xf32> to vector<8x128xf32>
    %617 = arith.addf %613, %616 : vector<8x128xf32>
    %618 = vector.extract_strided_slice %460 {offsets = [16, 0], sizes = [8, 128], strides = [1, 1]} : vector<32x128xf32> to vector<8x128xf32>
    %619 = arith.addf %617, %618 : vector<8x128xf32>
    %620 = vector.extract_strided_slice %463 {offsets = [24, 0], sizes = [8, 128], strides = [1, 1]} : vector<96x128xf32> to vector<8x128xf32>
    %621 = vector.extract_strided_slice %463 {offsets = [56, 0], sizes = [8, 128], strides = [1, 1]} : vector<96x128xf32> to vector<8x128xf32>
    %622 = vector.extract_strided_slice %463 {offsets = [88, 0], sizes = [8, 128], strides = [1, 1]} : vector<96x128xf32> to vector<8x128xf32>
    %cst_256 = arith.constant dense<0.000000e+00> : vector<128x128xf32>
    %623 = tpu.matmul %622, %621, %cst_256 {dimension_numbers = #tpu.dot_dimension_numbers<[0], [0], [1], [1], [0, 1, 1, 1], [], []>} : vector<8x128xf32>, vector<8x128xf32>, vector<128x128xf32> -> vector<128x128xf32>
    %cst_257 = arith.constant dense<0xFF800000> : vector<128xf32>
    %624 = vector.multi_reduction <maximumf>, %623, %cst_257 [0] : vector<128x128xf32> to vector<128xf32>
    %625 = vector.shape_cast %624 : vector<128xf32> to vector<1x128xf32>
    %626 = vector.broadcast %625 : vector<1x128xf32> to vector<128x128xf32>
    %627 = arith.subf %623, %626 : vector<128x128xf32>
    %628 = math.exp %627 : vector<128x128xf32>
    %cst_258 = arith.constant dense<0.000000e+00> : vector<128xf32>
    %629 = vector.multi_reduction <add>, %628, %cst_258 [0] : vector<128x128xf32> to vector<128xf32>
    %630 = vector.shape_cast %629 : vector<128xf32> to vector<1x128xf32>
    %631 = tpu.reciprocal %630 {approx = true} : vector<1x128xf32> -> vector<1x128xf32>
    %632 = vector.broadcast %631 : vector<1x128xf32> to vector<128x128xf32>
    %633 = arith.mulf %628, %632 : vector<128x128xf32>
    %cst_259 = arith.constant dense<0.000000e+00> : vector<8x128xf32>
    %634 = tpu.matmul %620, %633, %cst_259 {dimension_numbers = #tpu.dot_dimension_numbers<[1], [0], [0], [1], [0, 0, 1, 1], [], []>} : vector<8x128xf32>, vector<128x128xf32>, vector<8x128xf32> -> vector<8x128xf32>
    %c2_260 = arith.constant 2 : index
    %c3_261 = arith.constant 3 : index
    %c0_262 = arith.constant 0 : index
    %c0_263 = arith.constant 0 : index
    %635 = vector.load %arg4[%c2_260, %c3_261, %c0_262, %c0_263] : memref<3x4x8x8xf32, #tpu.memory_space<vmem>>, vector<1x1x8x8xf32>
    %636 = vector.shape_cast %635 : vector<1x1x8x8xf32> to vector<8x8xf32>
    %cst_264 = arith.constant dense<0.000000e+00> : vector<8x128xf32>
    %637 = tpu.matmul %636, %634, %cst_264 {dimension_numbers = #tpu.dot_dimension_numbers<[1], [0], [0], [1], [0, 0, 1, 1], [], []>} : vector<8x8xf32>, vector<8x128xf32>, vector<8x128xf32> -> vector<8x128xf32>
    %638 = vector.shape_cast %637 : vector<8x128xf32> to vector<1x8x128xf32>
    %cst_265 = arith.constant dense<0.000000e+00> : vector<1xf32>
    %639 = vector.multi_reduction <add>, %638, %cst_265 [1, 2] : vector<1x8x128xf32> to vector<1xf32>
    %640 = vector.shape_cast %639 : vector<1xf32> to vector<1x1x1xf32>
    %641 = vector.extract %640[0, 0, 0] : f32 from vector<1x1x1xf32>
    %642 = vector.broadcast %641 : f32 to vector<1x1xf32>
    %cst_266 = arith.constant 1.024000e+03 : f32
    %643 = vector.broadcast %cst_266 : f32 to vector<1x1xf32>
    %644 = arith.divf %642, %643 : vector<1x1xf32>
    %645 = vector.broadcast %644 : vector<1x1xf32> to vector<8x128xf32>
    %646 = arith.subf %637, %645 : vector<8x128xf32>
    %647 = arith.mulf %646, %646 : vector<8x128xf32>
    %648 = vector.shape_cast %647 : vector<8x128xf32> to vector<1x8x128xf32>
    %cst_267 = arith.constant dense<0.000000e+00> : vector<1xf32>
    %649 = vector.multi_reduction <add>, %648, %cst_267 [1, 2] : vector<1x8x128xf32> to vector<1xf32>
    %650 = vector.shape_cast %649 : vector<1xf32> to vector<1x1x1xf32>
    %651 = vector.extract %650[0, 0, 0] : f32 from vector<1x1x1xf32>
    %652 = vector.broadcast %651 : f32 to vector<1x1xf32>
    %cst_268 = arith.constant 1.024000e+03 : f32
    %653 = vector.broadcast %cst_268 : f32 to vector<1x1xf32>
    %654 = arith.divf %652, %653 : vector<1x1xf32>
    %655 = vector.broadcast %644 : vector<1x1xf32> to vector<8x128xf32>
    %656 = arith.subf %637, %655 : vector<8x128xf32>
    %cst_269 = arith.constant 9.99999974E-6 : f32
    %657 = vector.broadcast %cst_269 : f32 to vector<1x1xf32>
    %658 = arith.addf %654, %657 : vector<1x1xf32>
    %659 = math.rsqrt %658 : vector<1x1xf32>
    %660 = vector.broadcast %659 : vector<1x1xf32> to vector<8x128xf32>
    %661 = arith.mulf %656, %660 : vector<8x128xf32>
    %c2_270 = arith.constant 2 : index
    %c3_271 = arith.constant 3 : index
    %c0_272 = arith.constant 0 : index
    %c0_273 = arith.constant 0 : index
    %662 = vector.load %arg5[%c2_270, %c3_271, %c0_272, %c0_273] : memref<3x4x8x1xf32, #tpu.memory_space<vmem>>, vector<1x1x8x1xf32>
    %663 = vector.shape_cast %662 : vector<1x1x8x1xf32> to vector<8x1xf32>
    %664 = vector.broadcast %663 : vector<8x1xf32> to vector<8x128xf32>
    %665 = arith.mulf %661, %664 : vector<8x128xf32>
    %c2_274 = arith.constant 2 : index
    %c3_275 = arith.constant 3 : index
    %c0_276 = arith.constant 0 : index
    %c0_277 = arith.constant 0 : index
    %666 = vector.load %arg6[%c2_274, %c3_275, %c0_276, %c0_277] : memref<3x4x8x1xf32, #tpu.memory_space<vmem>>, vector<1x1x8x1xf32>
    %667 = vector.shape_cast %666 : vector<1x1x8x1xf32> to vector<8x1xf32>
    %668 = vector.broadcast %667 : vector<8x1xf32> to vector<8x128xf32>
    %669 = arith.addf %665, %668 : vector<8x128xf32>
    %670 = vector.extract_strided_slice %460 {offsets = [24, 0], sizes = [8, 128], strides = [1, 1]} : vector<32x128xf32> to vector<8x128xf32>
    %671 = arith.addf %669, %670 : vector<8x128xf32>
    %672 = tpu.concatenate %515, %567, %619, %671 in 0 : vector<8x128xf32>, vector<8x128xf32>, vector<8x128xf32>, vector<8x128xf32> -> vector<32x128xf32>
    %c0_278 = arith.constant 0 : index
    %c0_279 = arith.constant 0 : index
    %c0_280 = arith.constant 0 : index
    %673 = vector.load %arg7[%c0_278, %c0_279, %c0_280] : memref<1x32x128xf32, #tpu.memory_space<vmem>>, vector<1x32x128xf32>
    %674 = vector.shape_cast %673 : vector<1x32x128xf32> to vector<32x128xf32>
    %675 = vector.shape_cast %672 : vector<32x128xf32> to vector<1x32x128xf32>
    tpu.vector_store %arg7[%c0_278, %c0_279, %c0_280], %675 {strides = array<i32>} : memref<1x32x128xf32, #tpu.memory_space<vmem>>, vector<1x32x128xf32>,
    return
  }
  func.func @transform_0(%arg0: i32) -> (i32, i32, i32) {
    %c0_i32 = arith.constant 0 : i32
    %c0_i32_0 = arith.constant 0 : i32
    %c0_i32_1 = arith.constant 0 : i32
    return %arg0, %c0_i32, %c0_i32_0 : i32, i32, i32
  }
  func.func @transform_1(%arg0: i32) -> (i32, i32) {
    %c0_i32 = arith.constant 0 : i32
    %c0_i32_0 = arith.constant 0 : i32
    %c0_i32_1 = arith.constant 0 : i32
    return %c0_i32, %c0_i32_0 : i32, i32
  }
  func.func @transform_2(%arg0: i32) -> (i32, i32, i32) {
    %c0_i32 = arith.constant 0 : i32
    %c0_i32_0 = arith.constant 0 : i32
    %c0_i32_1 = arith.constant 0 : i32
    %c0_i32_2 = arith.constant 0 : i32
    return %c0_i32, %c0_i32_0, %c0_i32_1 : i32, i32, i32
  }
  func.func @transform_3(%arg0: i32) -> (i32, i32, i32, i32) {
    %c0_i32 = arith.constant 0 : i32
    %c0_i32_0 = arith.constant 0 : i32
    %c0_i32_1 = arith.constant 0 : i32
    %c0_i32_2 = arith.constant 0 : i32
    %c0_i32_3 = arith.constant 0 : i32
    return %c0_i32, %c0_i32_0, %c0_i32_1, %c0_i32_2 : i32, i32, i32, i32
  }
  func.func @transform_4(%arg0: i32) -> (i32, i32, i32, i32) {
    %c0_i32 = arith.constant 0 : i32
    %c0_i32_0 = arith.constant 0 : i32
    %c0_i32_1 = arith.constant 0 : i32
    %c0_i32_2 = arith.constant 0 : i32
    %c0_i32_3 = arith.constant 0 : i32
    return %c0_i32, %c0_i32_0, %c0_i32_1, %c0_i32_2 : i32, i32, i32, i32
  }
  func.func @transform_5(%arg0: i32) -> (i32, i32, i32, i32) {
    %c0_i32 = arith.constant 0 : i32
    %c0_i32_0 = arith.constant 0 : i32
    %c0_i32_1 = arith.constant 0 : i32
    %c0_i32_2 = arith.constant 0 : i32
    %c0_i32_3 = arith.constant 0 : i32
    return %c0_i32, %c0_i32_0, %c0_i32_1, %c0_i32_2 : i32, i32, i32, i32
  }
  func.func @transform_6(%arg0: i32) -> (i32, i32, i32) {
    %c0_i32 = arith.constant 0 : i32
    %c0_i32_0 = arith.constant 0 : i32
    %c0_i32_1 = arith.constant 0 : i32
    return %arg0, %c0_i32, %c0_i32_0 : i32, i32, i32
  }
}

module attributes {stable_mosaic.version = 11 : i64} {
  func.func @_mlp_maxpool_kernel(%arg0: i32, %arg1: memref<1x40x6144xf32, #tpu.memory_space<vmem>>, %arg2: memref<32x40xf32, #tpu.memory_space<vmem>>, %arg3: memref<1x32x384xf32, #tpu.memory_space<vmem>>) attributes {dimension_semantics = [#tpu.dimension_semantics<parallel>], iteration_bounds = array<i64: 1>, scalar_prefetch = 0 : i64, scratch_operands = 0 : i64, tpu.core_type = #tpu.core_type<tc>, window_params = [{transform_indices = @transform_0, window_bounds = array<i64: 1, 40, 6144>}, {pipeline_mode = #tpu.pipeline_mode<synchronous>, transform_indices = @transform_1, window_bounds = array<i64: 32, 40>}, {transform_indices = @transform_2, window_bounds = array<i64: 1, 32, 384>}]} {
    %c0 = arith.constant 0 : index
    %c0_0 = arith.constant 0 : index
    %0 = vector.load %arg2[%c0, %c0_0] : memref<32x40xf32, #tpu.memory_space<vmem>>, vector<32x40xf32>
    %c0_1 = arith.constant 0 : index
    %c0_2 = arith.constant 0 : index
    %c0_3 = arith.constant 0 : index
    %1 = vector.load %arg1[%c0_1, %c0_2, %c0_3] : memref<1x40x6144xf32, #tpu.memory_space<vmem>>, vector<1x40x6144xf32>
    %2 = vector.shape_cast %1 : vector<1x40x6144xf32> to vector<40x6144xf32>
    %cst = arith.constant dense<0.000000e+00> : vector<32x6144xf32>
    %3 = tpu.matmul %0, %2, %cst {dimension_numbers = #tpu.dot_dimension_numbers<[1], [0], [0], [1], [0, 0, 1, 1], [], []>} : vector<32x40xf32>, vector<40x6144xf32>, vector<32x6144xf32> -> vector<32x6144xf32>
    %4 = vector.extract_strided_slice %3 {offsets = [0, 0], sizes = [32, 384], strides = [1, 1]} : vector<32x6144xf32> to vector<32x384xf32>
    %5 = vector.extract_strided_slice %3 {offsets = [0, 384], sizes = [32, 384], strides = [1, 1]} : vector<32x6144xf32> to vector<32x384xf32>
    %6 = arith.maximumf %4, %5 : vector<32x384xf32>
    %7 = vector.extract_strided_slice %3 {offsets = [0, 768], sizes = [32, 384], strides = [1, 1]} : vector<32x6144xf32> to vector<32x384xf32>
    %8 = arith.maximumf %6, %7 : vector<32x384xf32>
    %9 = vector.extract_strided_slice %3 {offsets = [0, 1152], sizes = [32, 384], strides = [1, 1]} : vector<32x6144xf32> to vector<32x384xf32>
    %10 = arith.maximumf %8, %9 : vector<32x384xf32>
    %11 = vector.extract_strided_slice %3 {offsets = [0, 1536], sizes = [32, 384], strides = [1, 1]} : vector<32x6144xf32> to vector<32x384xf32>
    %12 = arith.maximumf %10, %11 : vector<32x384xf32>
    %13 = vector.extract_strided_slice %3 {offsets = [0, 1920], sizes = [32, 384], strides = [1, 1]} : vector<32x6144xf32> to vector<32x384xf32>
    %14 = arith.maximumf %12, %13 : vector<32x384xf32>
    %15 = vector.extract_strided_slice %3 {offsets = [0, 2304], sizes = [32, 384], strides = [1, 1]} : vector<32x6144xf32> to vector<32x384xf32>
    %16 = arith.maximumf %14, %15 : vector<32x384xf32>
    %17 = vector.extract_strided_slice %3 {offsets = [0, 2688], sizes = [32, 384], strides = [1, 1]} : vector<32x6144xf32> to vector<32x384xf32>
    %18 = arith.maximumf %16, %17 : vector<32x384xf32>
    %19 = vector.extract_strided_slice %3 {offsets = [0, 3072], sizes = [32, 384], strides = [1, 1]} : vector<32x6144xf32> to vector<32x384xf32>
    %20 = arith.maximumf %18, %19 : vector<32x384xf32>
    %21 = vector.extract_strided_slice %3 {offsets = [0, 3456], sizes = [32, 384], strides = [1, 1]} : vector<32x6144xf32> to vector<32x384xf32>
    %22 = arith.maximumf %20, %21 : vector<32x384xf32>
    %23 = vector.extract_strided_slice %3 {offsets = [0, 3840], sizes = [32, 384], strides = [1, 1]} : vector<32x6144xf32> to vector<32x384xf32>
    %24 = arith.maximumf %22, %23 : vector<32x384xf32>
    %25 = vector.extract_strided_slice %3 {offsets = [0, 4224], sizes = [32, 384], strides = [1, 1]} : vector<32x6144xf32> to vector<32x384xf32>
    %26 = arith.maximumf %24, %25 : vector<32x384xf32>
    %27 = vector.extract_strided_slice %3 {offsets = [0, 4608], sizes = [32, 384], strides = [1, 1]} : vector<32x6144xf32> to vector<32x384xf32>
    %28 = arith.maximumf %26, %27 : vector<32x384xf32>
    %29 = vector.extract_strided_slice %3 {offsets = [0, 4992], sizes = [32, 384], strides = [1, 1]} : vector<32x6144xf32> to vector<32x384xf32>
    %30 = arith.maximumf %28, %29 : vector<32x384xf32>
    %31 = vector.extract_strided_slice %3 {offsets = [0, 5376], sizes = [32, 384], strides = [1, 1]} : vector<32x6144xf32> to vector<32x384xf32>
    %32 = arith.maximumf %30, %31 : vector<32x384xf32>
    %33 = vector.extract_strided_slice %3 {offsets = [0, 5760], sizes = [32, 384], strides = [1, 1]} : vector<32x6144xf32> to vector<32x384xf32>
    %34 = arith.maximumf %32, %33 : vector<32x384xf32>
    %cst_4 = arith.constant 0.000000e+00 : f32
    %35 = vector.broadcast %cst_4 : f32 to vector<32x384xf32>
    %36 = arith.maximumf %34, %35 : vector<32x384xf32>
    %c0_5 = arith.constant 0 : index
    %c0_6 = arith.constant 0 : index
    %c0_7 = arith.constant 0 : index
    %37 = vector.load %arg3[%c0_5, %c0_6, %c0_7] : memref<1x32x384xf32, #tpu.memory_space<vmem>>, vector<1x32x384xf32>
    %38 = vector.shape_cast %37 : vector<1x32x384xf32> to vector<32x384xf32>
    %39 = vector.shape_cast %36 : vector<32x384xf32> to vector<1x32x384xf32>
    tpu.vector_store %arg3[%c0_5, %c0_6, %c0_7], %39 {strides = array<i32>} : memref<1x32x384xf32, #tpu.memory_space<vmem>>, vector<1x32x384xf32>,
    return
  }
  func.func @transform_0(%arg0: i32) -> (i32, i32, i32) {
    %c0_i32 = arith.constant 0 : i32
    %c0_i32_0 = arith.constant 0 : i32
    %c0_i32_1 = arith.constant 0 : i32
    return %arg0, %c0_i32, %c0_i32_0 : i32, i32, i32
  }
  func.func @transform_1(%arg0: i32) -> (i32, i32) {
    %c0_i32 = arith.constant 0 : i32
    %c0_i32_0 = arith.constant 0 : i32
    %c0_i32_1 = arith.constant 0 : i32
    return %c0_i32, %c0_i32_0 : i32, i32
  }
  func.func @transform_2(%arg0: i32) -> (i32, i32, i32) {
    %c0_i32 = arith.constant 0 : i32
    %c0_i32_0 = arith.constant 0 : i32
    %c0_i32_1 = arith.constant 0 : i32
    return %arg0, %c0_i32, %c0_i32_0 : i32, i32, i32
  }
}

module attributes {stable_mosaic.version = 11 : i64} {
  func.func @_avgpool2x2_kernel(%arg0: i32, %arg1: memref<1x4x2048xf32, #tpu.memory_space<vmem>>, %arg2: memref<1x1x2048xf32, #tpu.memory_space<vmem>>) attributes {dimension_semantics = [#tpu.dimension_semantics<parallel>], iteration_bounds = array<i64: 2>, scalar_prefetch = 0 : i64, scratch_operands = 0 : i64, tpu.core_type = #tpu.core_type<tc>, window_params = [{transform_indices = @transform_0, window_bounds = array<i64: 1, 4, 2048>}, {transform_indices = @transform_1, window_bounds = array<i64: 1, 1, 2048>}]} {
    %c0 = arith.constant 0 : index
    %c0_0 = arith.constant 0 : index
    %c0_1 = arith.constant 0 : index
    %0 = vector.load %arg1[%c0, %c0_0, %c0_1] : memref<1x4x2048xf32, #tpu.memory_space<vmem>>, vector<1x4x2048xf32>
    %1 = vector.shape_cast %0 : vector<1x4x2048xf32> to vector<4x2048xf32>
    %cst = arith.constant dense<0.000000e+00> : vector<2048xf32>
    %2 = vector.multi_reduction <add>, %1, %cst [0] : vector<4x2048xf32> to vector<2048xf32>
    %3 = vector.shape_cast %2 : vector<2048xf32> to vector<1x2048xf32>
    %cst_2 = arith.constant 2.500000e-01 : f32
    %4 = vector.broadcast %cst_2 : f32 to vector<1x2048xf32>
    %5 = arith.mulf %4, %3 : vector<1x2048xf32>
    %c0_3 = arith.constant 0 : index
    %c0_4 = arith.constant 0 : index
    %c0_5 = arith.constant 0 : index
    %6 = vector.load %arg2[%c0_3, %c0_4, %c0_5] : memref<1x1x2048xf32, #tpu.memory_space<vmem>>, vector<1x1x2048xf32>
    %7 = vector.shape_cast %6 : vector<1x1x2048xf32> to vector<1x2048xf32>
    %8 = vector.shape_cast %5 : vector<1x2048xf32> to vector<1x1x2048xf32>
    tpu.vector_store %arg2[%c0_3, %c0_4, %c0_5], %8 {strides = array<i32>} : memref<1x1x2048xf32, #tpu.memory_space<vmem>>, vector<1x1x2048xf32>,
    return
  }
  func.func @transform_0(%arg0: i32) -> (i32, i32, i32) {
    %c0_i32 = arith.constant 0 : i32
    %c0_i32_0 = arith.constant 0 : i32
    %c0_i32_1 = arith.constant 0 : i32
    return %arg0, %c0_i32, %c0_i32_0 : i32, i32, i32
  }
  func.func @transform_1(%arg0: i32) -> (i32, i32, i32) {
    %c0_i32 = arith.constant 0 : i32
    %c0_i32_0 = arith.constant 0 : i32
    %c0_i32_1 = arith.constant 0 : i32
    return %arg0, %c0_i32, %c0_i32_0 : i32, i32, i32
  }
}

</mosaic_0001>

<bundles_post_ra>
// kernel: custom-call.8
= control target key start
LH: loop header
LB: loop body
LE: loop exit
PB: predicated region body
PF: predicated region fallthrough
CT: control target
= control target key end

     0   :  { %s6_s0 = inlined_call_operand.vmem [shape: f32[2,160], index: 0, kind: output, shape index: {}]  }

// kernel: voxel_context_3d_dsa_forward.3
= control target key start
LH: loop header
LB: loop body
LE: loop exit
PB: predicated region body
PF: predicated region fallthrough
CT: control target
= control target key end

     0   :  { %s10565_s21 = smov 0   ;;  %s12446_s0 = inlined_call_operand.vmem [shape: f32[2,40,2048], index: 0, kind: input, shape index: {}]   ;;  %s12447_s1 = inlined_call_operand.vmem [shape: f32[32,40], index: 1, kind: input, shape index: {}]   ;;  %s12448_s2 = inlined_call_operand.vmem [shape: f32[3,96,32], index: 2, kind: input, shape index: {}]   ;;  %s12449_s3 = inlined_call_operand.vmem [shape: f32[3,4,8,8], index: 3, kind: input, shape index: {}]   ;;  %s12450_s4 = inlined_call_operand.vmem [shape: f32[3,4,8,1], index: 4, kind: input, shape index: {}]   ;;  %s12451_s5 = inlined_call_operand.vmem [shape: f32[3,4,8,1], index: 5, kind: input, shape index: {}]   ;;  %s12452_s6 = inlined_call_operand.vmem [shape: f32[2,32,128], index: 6, kind: output, shape index: {}]  }
   0x1 LB: > { %s7957_s22 = sadd.s32 4294967295, %s10524_s21   ;;  %p7961_p0 = scmp.ge.s32.totalorder %s10524_s21, 1  ;;  %s10524_s21 = sphi %s10565_s21, %s16_s21  }
   0x2   : > { %p212_p1 = scmp.lt.s32.totalorder %s10524_s21, 3 }
   0x4   : > { %p213_p2 = pnand %p7961_p0, %p212_p1 }
   0x6   : > { %216 = sbr.rel (%p213_p2) target bundleno = 9666 (0x25c2), region = 44 }
   0xd   : > { %p242_p3 = scmp.lt.s32.totalorder %s7957_s22, 1  ;;  %v12453_v0 = vmov 0.0   ;;  %v10611_v35 = vld [vmem:[%s12447_s1] sm:$0xff]  ;;  %vm336_vm0 = vcmask 326656   ;;  %v10628_v48 = vld [vmem:[%s12447_s1 + $0x8] sm:$0xff]  ;;  %v10640_v54 = vld [vmem:[%s12447_s1 + $0x10] sm:$0xff] }
   0xe   : > { %413 = vmatprep.mubr.f32.mxu0 %v12453_v0  ;;  %502 = vmatprep.mubr.f32.mxu1 %v12453_v0  ;;  %vm1137_vm1 = vcmask 261120   ;;  %vm1331_vm2 = vcmask 64512   ;;  %vm10528_vm3 = vmmov 0  }
   0xf   : > { %s12466_s22 = smov (!%p242_p3, %s7957_s22), 1 }
  0x10   : > { %s10023_s23 = smul.u32 640, %s12466_s22 }
  0x12   : > { %s10581_s26 = scalar_lea.vmem %s12446_s0, %s10023_s23 }
  0x13   : > { %v257_v1 = vld [vmem:[%s10581_s26 + $0x8] sm:$0xff]  ;;  %v256_v3 = vld [vmem:[%s10581_s26] sm:$0xff]  ;;  %v259_v6 = vld [vmem:[%s10581_s26 + $0x18] sm:$0xff] }
  0x14   : > { %v273_v2 = vld [vmem:[%s10581_s26 + $0x88] sm:$0xff]  ;;  %v272_v5 = vld [vmem:[%s10581_s26 + $0x80] sm:$0xff]  ;;  %v275_v7 = vld [vmem:[%s10581_s26 + $0x98] sm:$0xff] }
  0x15   : > { %v9647_v4 = vpack.c.bf16 %v273_v2, %v257_v1  ;;  %v9649_v8 = vpack.c.bf16 %v272_v5, %v256_v3  ;;  %v9655_v9 = vpack.c.bf16 %v275_v7, %v259_v6  ;;  %v289_v10 = vld [vmem:[%s10581_s26 + $0x108] sm:$0xff]  ;;  %v258_v12 = vld [vmem:[%s10581_s26 + $0x10] sm:$0xff]  ;;  %v288_v15 = vld [vmem:[%s10581_s26 + $0x100] sm:$0xff] }
  0x16   : > { %v305_v11 = vld [vmem:[%s10581_s26 + $0x188] sm:$0xff]  ;;  %v274_v14 = vld [vmem:[%s10581_s26 + $0x90] sm:$0xff]  ;;  %v304_v16 = vld [vmem:[%s10581_s26 + $0x180] sm:$0xff] }
  0x17   : > { %9648 = vmatprep.subr.bf16.mxu0 %v9647_v4  ;;  %v9651_v13 = vpack.c.bf16 %v305_v11, %v289_v10  ;;  %9656 = vmatprep.subr.bf16.mxu1 %v9655_v9  ;;  %v9657_v17 = vpack.c.bf16 %v274_v14, %v258_v12  ;;  %v9653_v18 = vpack.c.bf16 %v304_v16, %v288_v15  ;;  %v291_v19 = vld [vmem:[%s10581_s26 + $0x118] sm:$0xff]  ;;  %v290_v22 = vld [vmem:[%s10581_s26 + $0x110] sm:$0xff]  ;;  %v321_v24 = vld [vmem:[%s10581_s26 + $0x208] sm:$0xff] }
  0x18   : > { %9650 = vmatpush1.bf16.msra.mxu0 %v9649_v8  ;;  %v307_v20 = vld [vmem:[%s10581_s26 + $0x198] sm:$0xff]  ;;  %v306_v23 = vld [vmem:[%s10581_s26 + $0x190] sm:$0xff]  ;;  %v261_v26 = vld [vmem:[%s10581_s26 + $0x28] sm:$0xff] }
  0x19   : > { %9652 = vmatprep.subr.bf16.mxu0 %v9651_v13  ;;  %v9659_v21 = vpack.c.bf16 %v307_v20, %v291_v19  ;;  %9658 = vmatpush1.bf16.msra.mxu1 %v9657_v17  ;;  %v9661_v25 = vpack.c.bf16 %v306_v23, %v290_v22  ;;  %v277_v27 = vld [vmem:[%s10581_s26 + $0xa8] sm:$0xff]  ;;  %v323_v28 = vld [vmem:[%s10581_s26 + $0x218] sm:$0xff]  ;;  %v260_v29 = vld [vmem:[%s10581_s26 + $0x20] sm:$0xff] }
  0x1a   : > { %v276_v30 = vld [vmem:[%s10581_s26 + $0xa0] sm:$0xff]  ;;  %v9663_v32 = vpack.c.bf16 %v277_v27, %v261_v26  ;;  %v263_v33 = vld [vmem:[%s10581_s26 + $0x38] sm:$0xff]  ;;  %v293_v36 = vld [vmem:[%s10581_s26 + $0x128] sm:$0xff] }
  0x1b   : > { %9660 = vmatprep.subr.bf16.mxu1 %v9659_v21  ;;  %v320_v31 = vld [vmem:[%s10581_s26 + $0x200] sm:$0xff]  ;;  %v279_v34 = vld [vmem:[%s10581_s26 + $0xb8] sm:$0xff]  ;;  %v309_v37 = vld [vmem:[%s10581_s26 + $0x1a8] sm:$0xff]  ;;  %v9665_v39 = vpack.c.bf16 %v276_v30, %v260_v29 }
  0x1c   : > { %9654 = vmatpush1.bf16.msra.mxu0 %v9653_v18  ;;  %v322_v38 = vld [vmem:[%s10581_s26 + $0x210] sm:$0xff]  ;;  %v9671_v42 = vpack.c.bf16 %v279_v34, %v263_v33  ;;  %v292_v43 = vld [vmem:[%s10581_s26 + $0x120] sm:$0xff]  ;;  %v9667_v45 = vpack.c.bf16 %v309_v37, %v293_v36  ;;  %v295_v46 = vld [vmem:[%s10581_s26 + $0x138] sm:$0xff] }
  0x1d   : > { %357 = vmatprep.subr.mxu0 %v321_v24  ;;  %9662 = vmatpush1.bf16.msra.mxu1 %v9661_v25  ;;  %v262_v40 = vld [vmem:[%s10581_s26 + $0x30] sm:$0xff]  ;;  %v308_v44 = vld [vmem:[%s10581_s26 + $0x1a0] sm:$0xff]  ;;  %v311_v47 = vld [vmem:[%s10581_s26 + $0x1b8] sm:$0xff] }
  0x1e   : > { %446 = vmatprep.subr.mxu1 %v323_v28  ;;  %v278_v41 = vld [vmem:[%s10581_s26 + $0xb0] sm:$0xff]  ;;  %v9669_v50 = vpack.c.bf16 %v308_v44, %v292_v43  ;;  %v9675_v53 = vpack.c.bf16 %v311_v47, %v295_v46  ;;  %v325_v55 = vld [vmem:[%s10581_s26 + $0x228] sm:$0xff]  ;;  %v324_v59 = vld [vmem:[%s10581_s26 + $0x220] sm:$0xff] }
  0x1f   : > { %v9673_v49 = vpack.c.bf16 %v278_v41, %v262_v40  ;;  %v294_v51 = vld [vmem:[%s10581_s26 + $0x130] sm:$0xff]  ;;  %v265_v57 = vld [vmem:[%s10581_s26 + $0x48] sm:$0xff]  ;;  %v267_v60 = vld [vmem:[%s10581_s26 + $0x58] sm:$0xff] }
  0x20   : > { %358 = vmatpush1.msra.mxu0 %v320_v31  ;;  %v310_v52 = vld [vmem:[%s10581_s26 + $0x1b0] sm:$0xff]  ;;  %v281_v58 = vld [vmem:[%s10581_s26 + $0xc8] sm:$0xff]  ;;  %v283_v61 = vld [vmem:[%s10581_s26 + $0xd8] sm:$0xff] }
  0x21   : > { %7965 = vmatmul.mubr.msk.f32.vlgmr.msra.gmra.mrb[0].mxu0 %vm336_vm0, %v10611_v35  ;;  %9664 = vmatprep.subr.bf16.mxu0 %v9663_v32  ;;  %v9677_v56 = vpack.c.bf16 %v310_v52, %v294_v51  ;;  %v327_v62 = vld [vmem:[%s10581_s26 + $0x238] sm:$0xff]  ;;  %v9679_v63 = vpack.c.bf16 %v281_v58, %v265_v57  ;;  %v326_v2 = vld [vmem:[%s10581_s26 + $0x230] sm:$0xff]  ;;  %v264_v3 = vld [vmem:[%s10581_s26 + $0x40] sm:$0xff]  ;;  %v9687_v5 = vpack.c.bf16 %v283_v61, %v267_v60 }
  0x22   : > { %447 = vmatpush1.msra.mxu1 %v322_v38  ;;  %419 = vmatprep.mubr.f32.mxu0 %v12453_v0  ;;  %v10659_v1 = vld [vmem:[%s12447_s1 + $0x18] sm:$0xff]  ;;  %v280_v4 = vld [vmem:[%s10581_s26 + $0xc0] sm:$0xff]  ;;  %v297_v6 = vld [vmem:[%s10581_s26 + $0x148] sm:$0xff] }
  0x23   : > { %7969 = vmatmul.mubr.msk.f32.vlgmr.msra.gmra.mrb[0].mxu1 %vm336_vm0, %v10611_v35  ;;  %9666 = vmatpush1.bf16.msra.mxu0 %v9665_v39  ;;  %v313_v7 = vld [vmem:[%s10581_s26 + $0x1c8] sm:$0xff]  ;;  %v266_v8 = vld [vmem:[%s10581_s26 + $0x50] sm:$0xff]  ;;  %v9681_v10 = vpack.c.bf16 %v280_v4, %v264_v3  ;;  %v299_v11 = vld [vmem:[%s10581_s26 + $0x158] sm:$0xff] }
  0x24   : > { %508 = vmatprep.mubr.f32.mxu1 %v12453_v0  ;;  %9672 = vmatprep.subr.bf16.mxu1 %v9671_v42  ;;  %v282_v9 = vld [vmem:[%s10581_s26 + $0xd0] sm:$0xff]  ;;  %v315_v12 = vld [vmem:[%s10581_s26 + $0x1d8] sm:$0xff]  ;;  %v9683_v13 = vpack.c.bf16 %v313_v7, %v297_v6  ;;  %v296_v14 = vld [vmem:[%s10581_s26 + $0x140] sm:$0xff] }
  0x25   : > { %7966 = vmatmul.mubr.msk.f32.gmra.mrb[2].mxu0 %vm336_vm0, %v10628_v48  ;;  %9668 = vmatprep.subr.bf16.mxu0 %v9667_v45  ;;  %v312_v15 = vld [vmem:[%s10581_s26 + $0x1c0] sm:$0xff]  ;;  %v9689_v16 = vpack.c.bf16 %v282_v9, %v266_v8  ;;  %v9691_v17 = vpack.c.bf16 %v315_v12, %v299_v11  ;;  %v298_v18 = vld [vmem:[%s10581_s26 + $0x150] sm:$0xff]  ;;  %v329_v21 = vld [vmem:[%s10581_s26 + $0x248] sm:$0xff] }
  0x26   : > { %425 = vmatprep.mubr.f32.mxu0 %v12453_v0  ;;  %9674 = vmatpush1.bf16.msra.mxu1 %v9673_v49  ;;  %v314_v19 = vld [vmem:[%s10581_s26 + $0x1d0] sm:$0xff]  ;;  %v9685_v20 = vpack.c.bf16 %v312_v15, %v296_v14  ;;  %v269_v23 = vld [vmem:[%s10581_s26 + $0x68] sm:$0xff]  ;;  %v331_v25 = vld [vmem:[%s10581_s26 + $0x258] sm:$0xff] }
  0x27   : > { %7970 = vmatmul.mubr.msk.f32.gmra.mrb[2].mxu1 %vm336_vm0, %v10628_v48  ;;  %9670 = vmatpush1.bf16.msra.mxu0 %v9669_v50  ;;  %v9693_v22 = vpack.c.bf16 %v314_v19, %v298_v18  ;;  %v285_v24 = vld [vmem:[%s10581_s26 + $0xe8] sm:$0xff]  ;;  %v271_v26 = vld [vmem:[%s10581_s26 + $0x78] sm:$0xff]  ;;  %v328_v28 = vld [vmem:[%s10581_s26 + $0x240] sm:$0xff] }
  0x28   : > { %514 = vmatprep.mubr.f32.mxu1 %v12453_v0  ;;  %9676 = vmatprep.subr.bf16.mxu1 %v9675_v53  ;;  %v287_v27 = vld [vmem:[%s10581_s26 + $0xf8] sm:$0xff]  ;;  %v9695_v29 = vpack.c.bf16 %v285_v24, %v269_v23  ;;  %v330_v30 = vld [vmem:[%s10581_s26 + $0x250] sm:$0xff]  ;;  %v268_v32 = vld [vmem:[%s10581_s26 + $0x60] sm:$0xff] }
  0x29   : > { %7967 = vmatmul.mubr.msk.f32.gmra.mrb[4].mxu0 %vm336_vm0, %v10640_v54  ;;  %535 = vmatprep.subr.mxu0 %v325_v55  ;;  %v9703_v31 = vpack.c.bf16 %v287_v27, %v271_v26  ;;  %v284_v33 = vld [vmem:[%s10581_s26 + $0xe0] sm:$0xff]  ;;  %v301_v34 = vld [vmem:[%s10581_s26 + $0x168] sm:$0xff]  ;;  %v270_v37 = vld [vmem:[%s10581_s26 + $0x70] sm:$0xff] }
  0x2a   : > { %431 = vmatprep.mubr.f32.mxu0 %v12453_v0  ;;  %9678 = vmatpush1.bf16.msra.mxu1 %v9677_v56  ;;  %v317_v36 = vld [vmem:[%s10581_s26 + $0x1e8] sm:$0xff]  ;;  %v286_v38 = vld [vmem:[%s10581_s26 + $0xf0] sm:$0xff]  ;;  %v9697_v39 = vpack.c.bf16 %v284_v33, %v268_v32  ;;  %v303_v40 = vld [vmem:[%s10581_s26 + $0x178] sm:$0xff] }
  0x2b   : > { %7971 = vmatmul.mubr.msk.f32.gmra.mrb[4].mxu1 %vm336_vm0, %v10640_v54  ;;  %536 = vmatpush1.msra.mxu0 %v324_v59  ;;  %v319_v41 = vld [vmem:[%s10581_s26 + $0x1f8] sm:$0xff]  ;;  %v9699_v42 = vpack.c.bf16 %v317_v36, %v301_v34  ;;  %v300_v43 = vld [vmem:[%s10581_s26 + $0x160] sm:$0xff]  ;;  %v9705_v45 = vpack.c.bf16 %v286_v38, %v270_v37  ;;  %v302_v47 = vld [vmem:[%s10581_s26 + $0x170] sm:$0xff] }
  0x2c   : > { %520 = vmatprep.mubr.f32.mxu1 %v12453_v0  ;;  %624 = vmatprep.subr.mxu1 %v327_v62  ;;  %v316_v44 = vld [vmem:[%s10581_s26 + $0x1e0] sm:$0xff]  ;;  %v9707_v46 = vpack.c.bf16 %v319_v41, %v303_v40  ;;  %v318_v49 = vld [vmem:[%s10581_s26 + $0x1f0] sm:$0xff]  ;;  %v333_v51 = vld [vmem:[%s10581_s26 + $0x268] sm:$0xff] }
  0x2d   : > { %7968 = vmatmul.mubr.msk.f32.gmra.mrb[6].mxu0 %vm336_vm0, %v10659_v1  ;;  %9680 = vmatprep.subr.bf16.mxu0 %v9679_v63  ;;  %v9701_v50 = vpack.c.bf16 %v316_v44, %v300_v43  ;;  %v9709_v52 = vpack.c.bf16 %v318_v49, %v302_v47  ;;  %v335_v53 = vld [vmem:[%s10581_s26 + $0x278] sm:$0xff]  ;;  %v332_v55 = vld [vmem:[%s10581_s26 + $0x260] sm:$0xff]  ;;  %v334_v56 = vld [vmem:[%s10581_s26 + $0x270] sm:$0xff] }
  0x2e   : > { %591 = vmatprep.mubr.f32.mxu0 %v12453_v0  ;;  %625 = vmatpush1.msra.mxu1 %v326_v2 }
  0x2f   : > { %7972 = vmatmul.mubr.msk.f32.gmra.mrb[6].mxu1 %vm336_vm0, %v10659_v1  ;;  %9688 = vmatprep.subr.bf16.mxu1 %v9687_v5 }
  0x30   : > { %680 = vmatprep.mubr.f32.mxu1 %v12453_v0 }
  0x31   : > { %7973 = vmatmul.mubr.msk.f32.vlgmr.msra.gmra.mrb[8].mxu0 %vm336_vm0, %v10611_v35 }
  0x32   : > { %597 = vmatprep.mubr.f32.mxu0 %v12453_v0  ;;  %9682 = vmatpush1.bf16.msra.mxu0 %v9681_v10 }
  0x33   : > { %7977 = vmatmul.mubr.msk.f32.vlgmr.msra.gmra.mrb[8].mxu1 %vm336_vm0, %v10611_v35  ;;  %9684 = vmatprep.subr.bf16.mxu0 %v9683_v13 }
  0x34   : > { %686 = vmatprep.mubr.f32.mxu1 %v12453_v0  ;;  %9690 = vmatpush1.bf16.msra.mxu1 %v9689_v16 }
  0x35   : > { %7974 = vmatmul.mubr.msk.f32.gmra.mrb[10].mxu0 %vm336_vm0, %v10628_v48  ;;  %9692 = vmatprep.subr.bf16.mxu1 %v9691_v17 }
  0x36   : > { %603 = vmatprep.mubr.f32.mxu0 %v12453_v0  ;;  %9686 = vmatpush1.bf16.msra.mxu0 %v9685_v20 }
  0x37   : > { %7978 = vmatmul.mubr.msk.f32.gmra.mrb[10].mxu1 %vm336_vm0, %v10628_v48  ;;  %713 = vmatprep.subr.mxu0 %v329_v21 }
  0x38   : > { %692 = vmatprep.mubr.f32.mxu1 %v12453_v0  ;;  %9694 = vmatpush1.bf16.msra.mxu1 %v9693_v22 }
  0x39   : > { %7975 = vmatmul.mubr.msk.f32.gmra.mrb[12].mxu0 %vm336_vm0, %v10640_v54  ;;  %802 = vmatprep.subr.mxu1 %v331_v25 }
  0x3a   : > { %609 = vmatprep.mubr.f32.mxu0 %v12453_v0  ;;  %714 = vmatpush1.msra.mxu0 %v328_v28 }
  0x3b   : > { %7979 = vmatmul.mubr.msk.f32.gmra.mrb[12].mxu1 %vm336_vm0, %v10640_v54  ;;  %9696 = vmatprep.subr.bf16.mxu0 %v9695_v29 }
  0x3c   : > { %698 = vmatprep.mubr.f32.mxu1 %v12453_v0  ;;  %803 = vmatpush1.msra.mxu1 %v330_v30 }
  0x3d   : > { %7976 = vmatmul.mubr.msk.f32.gmra.mrb[14].mxu0 %vm336_vm0, %v10659_v1  ;;  %9704 = vmatprep.subr.bf16.mxu1 %v9703_v31 }
  0x3e   : > { %769 = vmatprep.mubr.f32.mxu0 %v12453_v0 }
  0x3f   : > { %7980 = vmatmul.mubr.msk.f32.gmra.mrb[14].mxu1 %vm336_vm0, %v10659_v1 }
  0x40   : > { %858 = vmatprep.mubr.f32.mxu1 %v12453_v0 }
  0x41   : > { %7981 = vmatmul.mubr.msk.f32.vlgmr.msra.gmra.mrb[16].mxu0 %vm336_vm0, %v10611_v35 }
  0x42   : > { %775 = vmatprep.mubr.f32.mxu0 %v12453_v0  ;;  %9698 = vmatpush1.bf16.msra.mxu0 %v9697_v39 }
  0x43   : > { %7985 = vmatmul.mubr.msk.f32.vlgmr.msra.gmra.mrb[16].mxu1 %vm336_vm0, %v10611_v35  ;;  %9700 = vmatprep.subr.bf16.mxu0 %v9699_v42 }
  0x44   : > { %864 = vmatprep.mubr.f32.mxu1 %v12453_v0  ;;  %9706 = vmatpush1.bf16.msra.mxu1 %v9705_v45 }
  0x45   : > { %7982 = vmatmul.mubr.msk.f32.gmra.mrb[18].mxu0 %vm336_vm0, %v10628_v48  ;;  %9708 = vmatprep.subr.bf16.mxu1 %v9707_v46 }
  0x46   : > { %781 = vmatprep.mubr.f32.mxu0 %v12453_v0  ;;  %9702 = vmatpush1.bf16.msra.mxu0 %v9701_v50 }
  0x47   : > { %7986 = vmatmul.mubr.msk.f32.gmra.mrb[18].mxu1 %vm336_vm0, %v10628_v48  ;;  %891 = vmatprep.subr.mxu0 %v333_v51 }
  0x48   : > { %870 = vmatprep.mubr.f32.mxu1 %v12453_v0  ;;  %9710 = vmatpush1.bf16.msra.mxu1 %v9709_v52 }
  0x49   : > { %7983 = vmatmul.mubr.msk.f32.gmra.mrb[20].mxu0 %vm336_vm0, %v10640_v54  ;;  %980 = vmatprep.subr.mxu1 %v335_v53 }
  0x4a   : > { %787 = vmatprep.mubr.f32.mxu0 %v12453_v0  ;;  %892 = vmatpush1.msra.mxu0 %v332_v55 }
  0x4b   : > { %7987 = vmatmul.mubr.msk.f32.gmra.mrb[20].mxu1 %vm336_vm0, %v10640_v54 }
  0x4c   : > { %876 = vmatprep.mubr.f32.mxu1 %v12453_v0  ;;  %981 = vmatpush1.msra.mxu1 %v334_v56 }
  0x4d   : > { %7984 = vmatmul.mubr.msk.f32.gmra.mrb[22].mxu0 %vm336_vm0, %v10659_v1 }
  0x4e   : > { %947 = vmatprep.mubr.f32.mxu0 %v12453_v0 }
  0x4f   : > { %7988 = vmatmul.mubr.msk.f32.gmra.mrb[22].mxu1 %vm336_vm0, %v10659_v1 }
  0x50   : > { %1036 = vmatprep.mubr.f32.mxu1 %v12453_v0 }
  0x51   : > { %7989 = vmatmul.mubr.msk.f32.vlgmr.msra.gmra.mrb[24].mxu0 %vm336_vm0, %v10611_v35 }
  0x52   : > { %953 = vmatprep.mubr.f32.mxu0 %v12453_v0 }
  0x53   : > { %7993 = vmatmul.mubr.msk.f32.vlgmr.msra.gmra.mrb[24].mxu1 %vm336_vm0, %v10611_v35  ;;  %v1125_v35 = vld [vmem:[%s12448_s2] sm:$0xff] }
  0x54   : > { %1042 = vmatprep.mubr.f32.mxu1 %v12453_v0 }
  0x55   : > { %7990 = vmatmul.mubr.msk.f32.gmra.mrb[26].mxu0 %vm336_vm0, %v10628_v48 }
  0x56   : > { %959 = vmatprep.mubr.f32.mxu0 %v12453_v0 }
  0x57   : > { %7994 = vmatmul.mubr.msk.f32.gmra.mrb[26].mxu1 %vm336_vm0, %v10628_v48 }
  0x58   : > { %1048 = vmatprep.mubr.f32.mxu1 %v12453_v0 }
  0x59   : > { %7991 = vmatmul.mubr.msk.f32.gmra.mrb[28].mxu0 %vm336_vm0, %v10640_v54 }
  0x5a   : > { %965 = vmatprep.mubr.f32.mxu0 %v12453_v0 }
  0x5b   : > { %7995 = vmatmul.mubr.msk.f32.gmra.mrb[28].mxu1 %vm336_vm0, %v10640_v54 }
  0x5c   : > { %1054 = vmatprep.mubr.f32.mxu1 %v12453_v0 }
  0x5d   : > { %7992 = vmatmul.mubr.msk.f32.gmra.mrb[30].mxu0 %vm336_vm0, %v10659_v1 }
  0x5e   : > { %8785 = vmatprep.mubr.msk.f32.mxu0 %vm1137_vm1, %v1125_v35 }
  0x5f   : > { %7996 = vmatmul.mubr.msk.f32.gmra.mrb[30].mxu1 %vm336_vm0, %v10659_v1 }
  0xf4   : > { %v415_v48 = vpop.f32.mrb[0].mxu0 }
  0xf5   : > { %v417_v57 = vpop.f32.mrb[1].mxu0 }
  0xf6   : > { %v1061_v58 = vmax.f32 %v415_v48, %v417_v57  ;;  %v504_v59 = vpop.f32.mrb[0].mxu1 }
  0xf7   : > { %v506_v54 = vpop.f32.mrb[1].mxu1 }
  0xf8   : > { %v1065_v60 = vmax.f32 %v1061_v58, %v504_v59  ;;  %v421_v61 = vpop.f32.mrb[2].mxu0 }
  0xf9   : > { %v423_v62 = vpop.f32.mrb[3].mxu0 }
  0xfa   : > { %v1069_v63 = vmax.f32 %v1065_v60, %v506_v54  ;;  %v1062_v2 = vmax.f32 %v421_v61, %v423_v62  ;;  %v510_v3 = vpop.f32.mrb[2].mxu1 }
  0xfb   : > { %v512_v4 = vpop.f32.mrb[3].mxu1 }
  0xfc   : > { %v1066_v1 = vmax.f32 %v1062_v2, %v510_v3  ;;  %v427_v5 = vpop.f32.mrb[4].mxu0 }
  0xfd   : > { %v429_v6 = vpop.f32.mrb[5].mxu0 }
  0xfe   : > { %v1070_v7 = vmax.f32 %v1066_v1, %v512_v4  ;;  %v1063_v8 = vmax.f32 %v427_v5, %v429_v6  ;;  %v516_v9 = vpop.f32.mrb[4].mxu1 }
  0xff   : > { %v518_v10 = vpop.f32.mrb[5].mxu1 }
 0x100   : > { %v1067_v11 = vmax.f32 %v1063_v8, %v516_v9  ;;  %v433_v12 = vpop.f32.mrb[6].mxu0 }
 0x101   : > { %v435_v13 = vpop.f32.mrb[7].mxu0 }
 0x102   : > { %v1071_v14 = vmax.f32 %v1067_v11, %v518_v10  ;;  %v1064_v15 = vmax.f32 %v433_v12, %v435_v13  ;;  %v522_v16 = vpop.f32.mrb[6].mxu1 }
 0x103   : > { %v524_v17 = vpop.f32.mrb[7].mxu1 }
 0x104   : > { %v1068_v18 = vmax.f32 %v1064_v15, %v522_v16  ;;  %v593_v19 = vpop.f32.mrb[8].mxu0 }
 0x105   : > { %v1073_v20 = vmax.f32 %v1069_v63, %v593_v19  ;;  %v595_v21 = vpop.f32.mrb[9].mxu0 }
 0x106   : > { %v1072_v22 = vmax.f32 %v1068_v18, %v524_v17  ;;  %v682_v23 = vpop.f32.mrb[8].mxu1 }
 0x107   : > { %v1077_v24 = vmax.f32 %v1073_v20, %v595_v21  ;;  %v684_v25 = vpop.f32.mrb[9].mxu1 }
 0x108   : > { %v599_v26 = vpop.f32.mrb[10].mxu0 }
 0x109   : > { %v1081_v27 = vmax.f32 %v1077_v24, %v682_v23  ;;  %v1074_v28 = vmax.f32 %v1070_v7, %v599_v26  ;;  %v601_v29 = vpop.f32.mrb[11].mxu0 }
 0x10a   : > { %v688_v30 = vpop.f32.mrb[10].mxu1 }
 0x10b   : > { %v1085_v31 = vmax.f32 %v1081_v27, %v684_v25  ;;  %v1078_v32 = vmax.f32 %v1074_v28, %v601_v29  ;;  %v690_v33 = vpop.f32.mrb[11].mxu1 }
 0x10c   : > { %v605_v34 = vpop.f32.mrb[12].mxu0 }
 0x10d   : > { %v1082_v36 = vmax.f32 %v1078_v32, %v688_v30  ;;  %v1075_v37 = vmax.f32 %v1071_v14, %v605_v34  ;;  %v607_v38 = vpop.f32.mrb[13].mxu0 }
 0x10e   : > { %v694_v39 = vpop.f32.mrb[12].mxu1 }
 0x10f   : > { %v1086_v40 = vmax.f32 %v1082_v36, %v690_v33  ;;  %v1079_v41 = vmax.f32 %v1075_v37, %v607_v38  ;;  %v696_v42 = vpop.f32.mrb[13].mxu1 }
 0x110   : > { %v611_v43 = vpop.f32.mrb[14].mxu0 }
 0x111   : > { %v1083_v44 = vmax.f32 %v1079_v41, %v694_v39  ;;  %v1076_v45 = vmax.f32 %v1072_v22, %v611_v43  ;;  %v613_v46 = vpop.f32.mrb[15].mxu0 }
 0x112   : > { %v700_v47 = vpop.f32.mrb[14].mxu1 }
 0x113   : > { %v1087_v49 = vmax.f32 %v1083_v44, %v696_v42  ;;  %v1080_v50 = vmax.f32 %v1076_v45, %v613_v46  ;;  %v702_v51 = vpop.f32.mrb[15].mxu1 }
 0x114   : > { %v771_v52 = vpop.f32.mrb[16].mxu0 }
 0x115   : > { %v1084_v53 = vmax.f32 %v1080_v50, %v700_v47  ;;  %v1089_v55 = vmax.f32 %v1085_v31, %v771_v52  ;;  %v773_v56 = vpop.f32.mrb[17].mxu0 }
 0x116   : > { %v860_v35 = vpop.f32.mrb[16].mxu1 }
 0x117   : > { %v1088_v48 = vmax.f32 %v1084_v53, %v702_v51  ;;  %v1093_v57 = vmax.f32 %v1089_v55, %v773_v56  ;;  %v862_v58 = vpop.f32.mrb[17].mxu1 }
 0x118   : > { %v777_v59 = vpop.f32.mrb[18].mxu0 }
 0x119   : > { %v1097_v54 = vmax.f32 %v1093_v57, %v860_v35  ;;  %v1090_v60 = vmax.f32 %v1086_v40, %v777_v59  ;;  %v779_v61 = vpop.f32.mrb[19].mxu0 }
 0x11a   : > { %v866_v62 = vpop.f32.mrb[18].mxu1 }
 0x11b   : > { %v1101_v63 = vmax.f32 %v1097_v54, %v862_v58  ;;  %v1094_v2 = vmax.f32 %v1090_v60, %v779_v61  ;;  %v868_v3 = vpop.f32.mrb[19].mxu1  ;;  %v1126_v54 = vld [vmem:[%s12448_s2 + $0x8] sm:$0xff]  ;;  %v1127_v60 = vld [vmem:[%s12448_s2 + $0x10] sm:$0xff]  ;;  %v1128_v61 = vld [vmem:[%s12448_s2 + $0x18] sm:$0xff] }
 0x11c   : > { %v783_v4 = vpop.f32.mrb[20].mxu0 }
 0x11d   : > { %v1098_v1 = vmax.f32 %v1094_v2, %v866_v62  ;;  %v1091_v5 = vmax.f32 %v1087_v49, %v783_v4  ;;  %v785_v6 = vpop.f32.mrb[21].mxu0  ;;  %v1129_v62 = vld [vmem:[%s12448_s2 + $0x20] sm:$0xff]  ;;  %v1131_v2 = vld [vmem:[%s12448_s2 + $0x30] sm:$0xff] }
 0x11e   : > { %v872_v7 = vpop.f32.mrb[20].mxu1  ;;  %v1133_v4 = vld [vmem:[%s12448_s2 + $0x40] sm:$0xff] }
 0x11f   : > { %v1102_v8 = vmax.f32 %v1098_v1, %v868_v3  ;;  %v1095_v9 = vmax.f32 %v1091_v5, %v785_v6  ;;  %v874_v10 = vpop.f32.mrb[21].mxu1  ;;  %v1132_v3 = vld [vmem:[%s12448_s2 + $0x38] sm:$0xff]  ;;  %v1134_v1 = vld [vmem:[%s12448_s2 + $0x48] sm:$0xff] }
 0x120   : > { %v789_v11 = vpop.f32.mrb[22].mxu0 }
 0x121   : > { %v1099_v12 = vmax.f32 %v1095_v9, %v872_v7  ;;  %v1092_v13 = vmax.f32 %v1088_v48, %v789_v11  ;;  %v791_v14 = vpop.f32.mrb[23].mxu0 }
 0x122   : > { %v878_v15 = vpop.f32.mrb[22].mxu1 }
 0x123   : > { %v1103_v16 = vmax.f32 %v1099_v12, %v874_v10  ;;  %v1096_v17 = vmax.f32 %v1092_v13, %v791_v14  ;;  %v880_v18 = vpop.f32.mrb[23].mxu1 }
 0x124   : > { %v949_v19 = vpop.f32.mrb[24].mxu0 }
 0x125   : > { %v1100_v20 = vmax.f32 %v1096_v17, %v878_v15  ;;  %v1105_v21 = vmax.f32 %v1101_v63, %v949_v19  ;;  %v951_v22 = vpop.f32.mrb[25].mxu0  ;;  %v1130_v63 = vld [vmem:[%s12448_s2 + $0x28] sm:$0xff]  ;;  %v1135_v15 = vld [vmem:[%s12448_s2 + $0x50] sm:$0xff] }
 0x126   : > { %v1038_v23 = vpop.f32.mrb[24].mxu1 }
 0x127   : > { %v1104_v24 = vmax.f32 %v1100_v20, %v880_v18  ;;  %v1109_v25 = vmax.f32 %v1105_v21, %v951_v22  ;;  %v1040_v26 = vpop.f32.mrb[25].mxu1 }
 0x128   : > { %v955_v27 = vpop.f32.mrb[26].mxu0 }
 0x129   : > { %v1113_v28 = vmax.f32 %v1109_v25, %v1038_v23  ;;  %v1106_v29 = vmax.f32 %v1102_v8, %v955_v27  ;;  %v957_v30 = vpop.f32.mrb[27].mxu0 }
 0x12a   : > { %v1044_v31 = vpop.f32.mrb[26].mxu1 }
 0x12b   : > { %v1117_v32 = vmax.f32 %v1113_v28, %v1040_v26  ;;  %v1110_v33 = vmax.f32 %v1106_v29, %v957_v30  ;;  %v1046_v34 = vpop.f32.mrb[27].mxu1 }
 0x12c   : > { %v961_v36 = vpop.f32.mrb[28].mxu0 }
 0x12d   : > { %v1114_v37 = vmax.f32 %v1110_v33, %v1044_v31  ;;  %v1107_v38 = vmax.f32 %v1103_v16, %v961_v36  ;;  %v963_v39 = vpop.f32.mrb[29].mxu0  ;;  %v10781_v45 = vmax.f32 %v1117_v32, 0.0  ;;  %v1136_v16 = vld [vmem:[%s12448_s2 + $0x58] sm:$0xff] }
 0x12e   : > { %v1050_v40 = vpop.f32.mrb[28].mxu1 }
 0x12f   : > { %v1118_v41 = vmax.f32 %v1114_v37, %v1046_v34  ;;  %v1111_v42 = vmax.f32 %v1107_v38, %v963_v39  ;;  %v1052_v43 = vpop.f32.mrb[29].mxu1 }
 0x130   : > { %v967_v44 = vpop.f32.mrb[30].mxu0 }
 0x131   : > { %v10783_v46 = vmax.f32 %v1118_v41, 0.0  ;;  %v1115_v47 = vmax.f32 %v1111_v42, %v1050_v40  ;;  %v1108_v49 = vmax.f32 %v1104_v24, %v967_v44  ;;  %v969_v50 = vpop.f32.mrb[31].mxu0 }
 0x132   : > { %v1056_v51 = vpop.f32.mrb[30].mxu1 }
 0x133   : > { %v9711_v52 = vpack.c.bf16 %v10783_v46, %v10781_v45  ;;  %v1119_v53 = vmax.f32 %v1115_v47, %v1052_v43  ;;  %v1112_v55 = vmax.f32 %v1108_v49, %v969_v50  ;;  %v1058_v56 = vpop.f32.mrb[31].mxu1 }
 0x135   : > { %v1116_v35 = vmax.f32 %v1112_v55, %v1056_v51  ;;  %9712 = vmatprep.subr.bf16.mxu0 %v9711_v52  ;;  %v10787_v57 = vmax.f32 %v1119_v53, 0.0 }
 0x136   : > { %9714 = vmatpush3.bf16.msra.mxu0 %v9711_v52 }
 0x137   : > { %v1120_v48 = vmax.f32 %v1116_v35, %v1058_v56 }
 0x139   : > { %v10789_v58 = vmax.f32 %v1120_v48, 0.0  ;;  %v12455_v48 = vmov 0.0|0.0  }
 0x13b   : > { %v9715_v59 = vpack.c.bf16 %v10789_v58, %v10787_v57 }
 0x13d   : > { %9716 = vmatprep.subr.bf16.mxu0 %v9715_v59 }
 0x13e   : > { %9718 = vmatpush3.bf16.msra.mxu0 %v9715_v59 }
 0x141   : > { %8786 = vmatmul.mubr.msk.f32.vlgmr.msra.gmra.mrb[32].mxu0 %vm1137_vm1, %v1126_v54 }
 0x142   : > { %8788 = vmatprep.mubr.msk.f32.mxu0 %vm1137_vm1, %v1127_v60 }
 0x145   : > { %8789 = vmatmul.mubr.msk.f32.gmra.mrb[34].mxu0 %vm1137_vm1, %v1128_v61 }
 0x146   : > { %8791 = vmatprep.mubr.msk.f32.mxu0 %vm1137_vm1, %v1129_v62 }
 0x149   : > { %8792 = vmatmul.mubr.msk.f32.gmra.mrb[36].mxu0 %vm1137_vm1, %v1130_v63 }
 0x14a   : > { %8794 = vmatprep.mubr.msk.f32.mxu0 %vm1137_vm1, %v1131_v2 }
 0x14d   : > { %8795 = vmatmul.mubr.msk.f32.gmra.mrb[38].mxu0 %vm1137_vm1, %v1132_v3 }
 0x14e   : > { %8797 = vmatprep.mubr.msk.f32.mxu0 %vm1137_vm1, %v1133_v4 }
 0x151   : > { %8798 = vmatmul.mubr.msk.f32.gmra.mrb[40].mxu0 %vm1137_vm1, %v1134_v1 }
 0x152   : > { %8800 = vmatprep.mubr.msk.f32.mxu0 %vm1137_vm1, %v1135_v15 }
 0x155   : > { %8801 = vmatmul.mubr.msk.f32.gmra.mrb[42].mxu0 %vm1137_vm1, %v1136_v16 }
 0x214   : > { %v10829_v5 = vpop.f32.mrb[32].mxu0 }
 0x215   : > { %v10831_v6 = vpop.f32.mrb[33].mxu0 }
 0x218   : > { %v10833_v7 = vpop.f32.mrb[34].mxu0 }
 0x219   : > { %v10835_v8 = vpop.f32.mrb[35].mxu0 }
 0x21c   : > { %v8793_v9 = vpop.f32.mrb[36].mxu0 }
 0x21d   : > { %v1260_v10 = vpop.f32.mrb[37].mxu0  ;;  %8869 = vmatprep.subr.mxu0 %v8793_v9 }
 0x21e   : > { %8803 = vmatprep.subr.mxu1 %v1260_v10  ;;  %8870 = vmatpush3.msra.mxu0 %v8793_v9 }
 0x21f   : > { %8804 = vmatpush3.msra.mxu1 %v1260_v10  ;;  %8930 = vmatprep.subr.mxu0 %v12453_v0 }
 0x220   : > { %v10838_v11 = vpop.f32.mrb[38].mxu0  ;;  %9719 = vmatprep.subr.bf16.mxu1 %v12455_v48 }
 0x221   : > { %v10840_v12 = vpop.f32.mrb[39].mxu0 }
 0x224   : > { %v8799_v13 = vpop.f32.mrb[40].mxu0 }
 0x225   : > { %v1280_v14 = vpop.f32.mrb[41].mxu0 }
 0x226   : > { %1299 = vxpose.xlu0.b32.start.end [1/1] (short) %v1280_v14, 128 }
 0x228   : > { %v10907_v4 = vpop.f32.mrb[42].mxu0 }
 0x229   : > { %v1290_v9 = vpop.f32.mrb[43].mxu0 }
 0x22a   : > { %2340 = vxpose.xlu1.b32.start.end [1/1] (short) %v1290_v9, 128 }
 0x263   : > { %1819 = vxpose.xlu0.b32.start.end [1/1] (short) %v8799_v13, 128 }
 0x267   : > { %2861 = vxpose.xlu1.b32.start.end [1/1] (short) %v10907_v4, 128 }
 0x2a6   : > { %v1315_v17 = vpop.trf.xlu0 }
 0x2a7   : > { %8805 = vmatprep.mubr.msk.f32.mxu1 %vm1331_vm2, %v1315_v17 }
 0x2aa   : > { %v1316_v18 = vpop.trf.xlu0 }
 0x2ab   : > { %8806 = vmatmul.mubr.msk.f32.vlgmr.msra.gmra.mrb[32].mxu1 %vm1331_vm2, %v1316_v18 }
 0x2ae   : > { %v1317_v19 = vpop.trf.xlu0 }
 0x2af   : > { %8808 = vmatprep.mubr.msk.f32.mxu1 %vm1331_vm2, %v1317_v19 }
 0x2b2   : > { %v1318_v20 = vpop.trf.xlu0 }
 0x2b3   : > { %8809 = vmatmul.mubr.msk.f32.gmra.mrb[34].mxu1 %vm1331_vm2, %v1318_v20 }
 0x2b6   : > { %v1319_v21 = vpop.trf.xlu0 }
 0x2b7   : > { %8811 = vmatprep.mubr.msk.f32.mxu1 %vm1331_vm2, %v1319_v21 }
 0x2ba   : > { %v1320_v22 = vpop.trf.xlu0 }
 0x2bb   : > { %8812 = vmatmul.mubr.msk.f32.gmra.mrb[36].mxu1 %vm1331_vm2, %v1320_v22 }
 0x2be   : > { %v1321_v23 = vpop.trf.xlu0 }
 0x2bf   : > { %8814 = vmatprep.mubr.msk.f32.mxu1 %vm1331_vm2, %v1321_v23 }
 0x2c2   : > { %v1322_v24 = vpop.trf.xlu0 }
 0x2c3   : > { %8815 = vmatmul.mubr.msk.f32.gmra.mrb[38].mxu1 %vm1331_vm2, %v1322_v24 }
 0x2c6   : > { %v1323_v25 = vpop.trf.xlu0 }
 0x2c7   : > { %8817 = vmatprep.mubr.msk.f32.mxu1 %vm1331_vm2, %v1323_v25 }
 0x2ca   : > { %v1324_v26 = vpop.trf.xlu0 }
 0x2cb   : > { %8818 = vmatmul.mubr.msk.f32.gmra.mrb[40].mxu1 %vm1331_vm2, %v1324_v26 }
 0x2ce   : > { %v1325_v27 = vpop.trf.xlu0 }
 0x2cf   : > { %8820 = vmatprep.mubr.msk.f32.mxu1 %vm1331_vm2, %v1325_v27 }
 0x2d2   : > { %v1326_v28 = vpop.trf.xlu0 }
 0x2d3   : > { %8821 = vmatmul.mubr.msk.f32.gmra.mrb[42].mxu1 %vm1331_vm2, %v1326_v28 }
 0x2d6   : > { %v1327_v29 = vpop.trf.xlu0 }
 0x2d7   : > { %8823 = vmatprep.mubr.msk.f32.mxu1 %vm1331_vm2, %v1327_v29 }
 0x2da   : > { %v1328_v30 = vpop.trf.xlu0 }
 0x2db   : > { %8824 = vmatmul.mubr.msk.f32.gmra.mrb[44].mxu1 %vm1331_vm2, %v1328_v30 }
 0x2de   : > { %v1329_v31 = vpop.trf.xlu0 }
 0x2df   : > { %8826 = vmatprep.mubr.msk.f32.mxu1 %vm1331_vm2, %v1329_v31 }
 0x2e2   : > { %v1330_v32 = vpop.trf.xlu0 }
 0x2e3   : > { %8827 = vmatmul.mubr.msk.f32.gmra.mrb[46].mxu1 %vm1331_vm2, %v1330_v32 }
 0x2e4   : > { %8861 = vmatprep.mubr.msk.f32.mxu1 %vm10528_vm3, %v12453_v0 }
 0x2e6   : > { %v1835_v33 = vpop.trf.xlu0 }
 0x2e7   : > { %8871 = vmatprep.mubr.msk.f32.mxu0 %vm1331_vm2, %v1835_v33 }
 0x2ea   : > { %v1836_v34 = vpop.trf.xlu0 }
 0x2eb   : > { %8872 = vmatmul.mubr.msk.f32.vlgmr.msra.gmra.mrb[44].mxu0 %vm1331_vm2, %v1836_v34 }
 0x2ee   : > { %v1837_v36 = vpop.trf.xlu0 }
 0x2ef   : > { %8874 = vmatprep.mubr.msk.f32.mxu0 %vm1331_vm2, %v1837_v36 }
 0x2f2   : > { %v1838_v37 = vpop.trf.xlu0 }
 0x2f3   : > { %8875 = vmatmul.mubr.msk.f32.gmra.mrb[46].mxu0 %vm1331_vm2, %v1838_v37 }
 0x2f6   : > { %v1839_v38 = vpop.trf.xlu0 }
 0x2f7   : > { %8877 = vmatprep.mubr.msk.f32.mxu0 %vm1331_vm2, %v1839_v38 }
 0x2fa   : > { %v1840_v39 = vpop.trf.xlu0 }
 0x2fb   : > { %8878 = vmatmul.mubr.msk.f32.gmra.mrb[48].mxu0 %vm1331_vm2, %v1840_v39 }
 0x2fe   : > { %v1841_v40 = vpop.trf.xlu0 }
 0x2ff   : > { %8880 = vmatprep.mubr.msk.f32.mxu0 %vm1331_vm2, %v1841_v40 }
 0x302   : > { %v1842_v41 = vpop.trf.xlu0 }
 0x303   : > { %8881 = vmatmul.mubr.msk.f32.gmra.mrb[50].mxu0 %vm1331_vm2, %v1842_v41 }
 0x306   : > { %v1843_v42 = vpop.trf.xlu0 }
 0x307   : > { %8883 = vmatprep.mubr.msk.f32.mxu0 %vm1331_vm2, %v1843_v42 }
 0x30a   : > { %v1844_v43 = vpop.trf.xlu0 }
 0x30b   : > { %8884 = vmatmul.mubr.msk.f32.gmra.mrb[52].mxu0 %vm1331_vm2, %v1844_v43 }
 0x30e   : > { %v1845_v44 = vpop.trf.xlu0 }
 0x30f   : > { %8886 = vmatprep.mubr.msk.f32.mxu0 %vm1331_vm2, %v1845_v44 }
 0x312   : > { %v1846_v47 = vpop.trf.xlu0 }
 0x313   : > { %8887 = vmatmul.mubr.msk.f32.gmra.mrb[54].mxu0 %vm1331_vm2, %v1846_v47 }
 0x316   : > { %v1847_v49 = vpop.trf.xlu0 }
 0x317   : > { %8889 = vmatprep.mubr.msk.f32.mxu0 %vm1331_vm2, %v1847_v49 }
 0x31a   : > { %v1848_v50 = vpop.trf.xlu0 }
 0x31b   : > { %8890 = vmatmul.mubr.msk.f32.gmra.mrb[56].mxu0 %vm1331_vm2, %v1848_v50 }
 0x31e   : > { %v1849_v51 = vpop.trf.xlu0 }
 0x31f   : > { %8892 = vmatprep.mubr.msk.f32.mxu0 %vm1331_vm2, %v1849_v51 }
 0x322   : > { %v1850_v52 = vpop.trf.xlu0 }
 0x323   : > { %8893 = vmatmul.mubr.msk.f32.gmra.mrb[58].mxu0 %vm1331_vm2, %v1850_v52 }
 0x324   : > { %8932 = vmatprep.mubr.msk.f32.mxu0 %vm10528_vm3, %v12453_v0 }
 0x37e   : > { %v10882_v53 = vpop.f32.mrb[32].mxu1 }
 0x37f   : > { %v10884_v55 = vpop.f32.mrb[33].mxu1 }
 0x386   : > { %v10886_v56 = vpop.f32.mrb[34].mxu1 }
 0x387   : > { %v10888_v35 = vpop.f32.mrb[35].mxu1 }
 0x38e   : > { %v10891_v59 = vpop.f32.mrb[36].mxu1 }
 0x38f   : > { %v1526_v54 = vmax.f32 %v10882_v53, %v10891_v59  ;;  %v10895_v60 = vpop.f32.mrb[37].mxu1 }
 0x390   : > { %v1525_v61 = vmax.f32 %v10884_v55, %v10895_v60 }
 0x396   : > { %v10899_v62 = vpop.f32.mrb[38].mxu1 }
 0x397   : > { %v1528_v63 = vmax.f32 %v10886_v56, %v10899_v62  ;;  %v10903_v2 = vpop.f32.mrb[39].mxu1 }
 0x398   : > { %v1527_v3 = vmax.f32 %v10888_v35, %v10903_v2 }
 0x39e   : > { %v10909_v1 = vpop.f32.mrb[40].mxu1 }
 0x39f   : > { %v1530_v10 = vmax.f32 %v1526_v54, %v10909_v1  ;;  %v10912_v13 = vpop.f32.mrb[41].mxu1 }
 0x3a0   : > { %v1529_v14 = vmax.f32 %v1525_v61, %v10912_v13 }
 0x3a6   : > { %v10915_v15 = vpop.f32.mrb[42].mxu1 }
 0x3a7   : > { %v1532_v16 = vmax.f32 %v1528_v63, %v10915_v15  ;;  %v10918_v17 = vpop.f32.mrb[43].mxu1 }
 0x3a8   : > { %v1531_v18 = vmax.f32 %v1527_v3, %v10918_v17 }
 0x3ae   : > { %v10921_v19 = vpop.f32.mrb[44].mxu1 }
 0x3af   : > { %v1534_v20 = vmax.f32 %v1530_v10, %v10921_v19  ;;  %v10924_v21 = vpop.f32.mrb[45].mxu1 }
 0x3b0   : > { %v1533_v22 = vmax.f32 %v1529_v14, %v10924_v21 }
 0x3b2   : > { %v1537_v23 = vmax.f32 %v1533_v22, %v1534_v20 }
 0x3b6   : > { %v10927_v24 = vpop.f32.mrb[46].mxu1 }
 0x3b7   : > { %v1536_v25 = vmax.f32 %v1532_v16, %v10927_v24  ;;  %v10930_v26 = vpop.f32.mrb[47].mxu1 }
 0x3b8   : > { %v1535_v27 = vmax.f32 %v1531_v18, %v10930_v26 }
 0x3ba   : > { %v1538_v28 = vmax.f32 %v1535_v27, %v1536_v25 }
 0x3bc   : > { %v1539_v29 = vmax.f32 %v1537_v23, %v1538_v28 }
 0x3be   : > { %v1540_v30 = vrot.slane %v1539_v29, 4  ;;  %v10933_v31 = vpop.f32.mrb[44].mxu0 }
 0x3bf   : > { %v10935_v32 = vpop.f32.mrb[45].mxu0 }
 0x3c0   : > { %v1541_v33 = vmax.f32 %v1539_v29, %v1540_v30 }
 0x3c2   : > { %v1542_v34 = vrot.slane %v1541_v33, 2 }
 0x3c4   : > { %v1543_v36 = vmax.f32 %v1541_v33, %v1542_v34 }
 0x3c6   : > { %v1544_v37 = vrot.slane %v1543_v36, 1  ;;  %v10941_v38 = vpop.f32.mrb[46].mxu0 }
 0x3c7   : > { %v10943_v39 = vpop.f32.mrb[47].mxu0 }
 0x3c8   : > { %v10945_v40 = vmax.f32 %v1543_v36, %v1544_v37 }
 0x3ca   : > { %v1546_v41 = vsub.f32 %v10884_v55, %v10945_v40  ;;  %v1547_v42 = vsub.f32 %v10882_v53, %v10945_v40  ;;  %v1548_v43 = vsub.f32 %v10888_v35, %v10945_v40  ;;  %v1549_v44 = vsub.f32 %v10886_v56, %v10945_v40 }
 0x3cb   : > { %v1550_v47 = vsub.f32 %v10895_v60, %v10945_v40  ;;  %v1551_v49 = vsub.f32 %v10891_v59, %v10945_v40  ;;  %v1552_v50 = vsub.f32 %v10903_v2, %v10945_v40  ;;  %v1553_v51 = vsub.f32 %v10899_v62, %v10945_v40 }
 0x3cc   : > { %v1554_v52 = vsub.f32 %v10912_v13, %v10945_v40  ;;  %v1555_v53 = vsub.f32 %v10909_v1, %v10945_v40  ;;  %v1556_v55 = vsub.f32 %v10918_v17, %v10945_v40  ;;  %v1557_v56 = vsub.f32 %v10915_v15, %v10945_v40 }
 0x3cd   : > { %v1558_v35 = vsub.f32 %v10924_v21, %v10945_v40  ;;  %v1559_v59 = vsub.f32 %v10921_v19, %v10945_v40  ;;  %v1560_v54 = vsub.f32 %v10930_v26, %v10945_v40  ;;  %v1561_v60 = vsub.f32 %v10927_v24, %v10945_v40 }
 0x3ce   : > { %v1562_v61 = vmul.f32 1.442695, %v1546_v41  ;;  %v1564_v62 = vmul.f32 1.442695, %v1547_v42  ;;  %v1566_v63 = vmul.f32 1.442695, %v1548_v43 }
 0x3cf   : > { %v1568_v2 = vmul.f32 1.442695, %v1549_v44  ;;  %v1570_v3 = vmul.f32 1.442695, %v1550_v47  ;;  %v10979_v1 = vpop.f32.mrb[48].mxu0 }
 0x3d0   : > { %10086 = vpow2.f32 %v1562_v61  ;;  %v2045_v9 = vmax.f32 %v10933_v31, %v10979_v1  ;;  %v10983_v10 = vpop.f32.mrb[49].mxu0  ;;  %v1572_v13 = vmul.f32 1.442695, %v1551_v49  ;;  %v1574_v16 = vmul.f32 1.442695, %v1552_v50 }
 0x3d1   : > { %10088 = vpow2.f32 %v1564_v62  ;;  %v2044_v14 = vmax.f32 %v10935_v32, %v10983_v10  ;;  %v1576_v20 = vmul.f32 1.442695, %v1553_v51  ;;  %v1578_v23 = vmul.f32 1.442695, %v1554_v52 }
 0x3d2   : > { %10090 = vpow2.f32 %v1566_v63  ;;  %v1580_v26 = vmul.f32 1.442695, %v1555_v53  ;;  %v1582_v30 = vmul.f32 1.442695, %v1556_v55  ;;  %v1584_v40 = vmul.f32 1.442695, %v1557_v56 }
 0x3d3   : > { %10092 = vpow2.f32 %v1568_v2  ;;  %v1586_v43 = vmul.f32 1.442695, %v1558_v35  ;;  %v1588_v49 = vmul.f32 1.442695, %v1559_v59  ;;  %v1590_v53 = vmul.f32 1.442695, %v1560_v54 }
 0x3d4   : > { %10094 = vpow2.f32 %v1570_v3  ;;  %v1592_v59 = vmul.f32 1.442695, %v1561_v60 }
 0x3d5   : > { %10096 = vpow2.f32 %v1572_v13 }
 0x3d6   : > { %v10987_v15 = vpop.f32.mrb[50].mxu0  ;;  %10098 = vpow2.f32 %v1574_v16 }
 0x3d7   : > { %v2047_v17 = vmax.f32 %v10941_v38, %v10987_v15  ;;  %v10991_v18 = vpop.f32.mrb[51].mxu0  ;;  %10100 = vpow2.f32 %v1576_v20 }
 0x3d8   : > { %v2046_v19 = vmax.f32 %v10943_v39, %v10991_v18  ;;  %10102 = vpow2.f32 %v1578_v23 }
 0x3d9   : > { %10104 = vpow2.f32 %v1580_v26 }
 0x3da   : > { %v10995_v21 = vpop.eup %10086  ;;  %10106 = vpow2.f32 %v1582_v30 }
 0x3db   : > { %v10997_v22 = vpop.eup %10088  ;;  %10108 = vpow2.f32 %v1584_v40 }
 0x3dc   : > { %v1594_v24 = vadd.f32 %v10997_v22, %v10995_v21  ;;  %v11002_v25 = vpop.eup %10090  ;;  %10110 = vpow2.f32 %v1586_v43 }
 0x3dd   : > { %v11007_v29 = vpop.eup %10092  ;;  %10112 = vpow2.f32 %v1588_v49 }
 0x3de   : > { %v1595_v27 = vadd.f32 %v11002_v25, %v1594_v24  ;;  %v11005_v28 = vpop.f32.mrb[52].mxu0  ;;  %v11014_v37 = vpop.eup %10094  ;;  %10114 = vpow2.f32 %v1590_v53 }
 0x3df   : > { %v2049_v33 = vmax.f32 %v2045_v9, %v11005_v28  ;;  %v11010_v34 = vpop.f32.mrb[53].mxu0  ;;  %v11017_v42 = vpop.eup %10096  ;;  %10116 = vpow2.f32 %v1592_v59 }
 0x3e0   : > { %v1596_v36 = vadd.f32 %v11007_v29, %v1595_v27  ;;  %v2048_v4 = vmax.f32 %v2044_v14, %v11010_v34  ;;  %v11020_v47 = vpop.eup %10098 }
 0x3e1   : > { %v11025_v52 = vpop.eup %10100 }
 0x3e2   : > { %v1597_v41 = vadd.f32 %v11014_v37, %v1596_v36  ;;  %v11032_v62 = vpop.eup %10102 }
 0x3e3   : > { %v11035_v2 = vpop.eup %10104 }
 0x3e4   : > { %v1598_v44 = vadd.f32 %v11017_v42, %v1597_v41  ;;  %v11038_v54 = vpop.eup %10106 }
 0x3e5   : > { %v11043_v14 = vpop.eup %10108 }
 0x3e6   : > { %v1599_v50 = vadd.f32 %v11020_v47, %v1598_v44  ;;  %v11023_v51 = vpop.f32.mrb[54].mxu0  ;;  %v11050_v20 = vpop.eup %10110 }
 0x3e7   : > { %v2051_v55 = vmax.f32 %v2047_v17, %v11023_v51  ;;  %v11028_v56 = vpop.f32.mrb[55].mxu0  ;;  %v11053_v26 = vpop.eup %10112 }
 0x3e8   : > { %v1600_v35 = vadd.f32 %v11025_v52, %v1599_v50  ;;  %v2050_v61 = vmax.f32 %v2046_v19, %v11028_v56  ;;  %v11056_v30 = vpop.eup %10114 }
 0x3e9   : > { %v11061_v40 = vpop.eup %10116 }
 0x3ea   : > { %v1601_v63 = vadd.f32 %v11032_v62, %v1600_v35 }
 0x3ec   : > { %v1602_v3 = vadd.f32 %v11035_v2, %v1601_v63 }
 0x3ee   : > { %v1603_v9 = vadd.f32 %v11038_v54, %v1602_v3  ;;  %v11041_v13 = vpop.f32.mrb[56].mxu0 }
 0x3ef   : > { %v2053_v16 = vmax.f32 %v2049_v33, %v11041_v13  ;;  %v11046_v17 = vpop.f32.mrb[57].mxu0 }
 0x3f0   : > { %v1604_v60 = vadd.f32 %v11043_v14, %v1603_v9  ;;  %v2052_v19 = vmax.f32 %v2048_v4, %v11046_v17 }
 0x3f2   : > { %v1605_v23 = vadd.f32 %v11050_v20, %v1604_v60  ;;  %v2056_v24 = vmax.f32 %v2052_v19, %v2053_v16 }
 0x3f4   : > { %v1606_v27 = vadd.f32 %v11053_v26, %v1605_v23 }
 0x3f6   : > { %v1607_v36 = vadd.f32 %v11056_v30, %v1606_v27  ;;  %v11059_v33 = vpop.f32.mrb[58].mxu0 }
 0x3f7   : > { %v2055_v41 = vmax.f32 %v2051_v55, %v11059_v33  ;;  %v11064_v4 = vpop.f32.mrb[59].mxu0 }
 0x3f8   : > { %v1608_v43 = vadd.f32 %v11061_v40, %v1607_v36  ;;  %v2054_v44 = vmax.f32 %v2050_v61, %v11064_v4 }
 0x3fa   : > { %v1609_v49 = vrot.slane %v1608_v43, 4  ;;  %v2057_v50 = vmax.f32 %v2054_v44, %v2055_v41 }
 0x3fc   : > { %v1610_v53 = vadd.f32 %v1609_v49, %v1608_v43  ;;  %v2058_v35 = vmax.f32 %v2056_v24, %v2057_v50 }
 0x3fe   : > { %v1611_v59 = vrot.slane %v1610_v53, 2  ;;  %v2059_v63 = vrot.slane %v2058_v35, 4 }
 0x400   : > { %v1612_v3 = vadd.f32 %v1611_v59, %v1610_v53  ;;  %v2060_v9 = vmax.f32 %v2058_v35, %v2059_v63 }
 0x402   : > { %v1613_v16 = vrot.slane %v1612_v3, 1  ;;  %v2061_v60 = vrot.slane %v2060_v9, 2 }
 0x404   : > { %v1614_v19 = vadd.f32 %v1613_v16, %v1612_v3  ;;  %v2062_v23 = vmax.f32 %v2060_v9, %v2061_v60 }
 0x406   : > { %10118 = vrcp.f32 %v1614_v19  ;;  %v2063_v55 = vrot.slane %v2062_v23, 1 }
 0x408   : > { %v11068_v27 = vmax.f32 %v2062_v23, %v2063_v55 }
 0x40a   : > { %v2065_v36 = vsub.f32 %v10935_v32, %v11068_v27  ;;  %v2066_v61 = vsub.f32 %v10933_v31, %v11068_v27  ;;  %v2067_v24 = vsub.f32 %v10943_v39, %v11068_v27  ;;  %v2068_v41 = vsub.f32 %v10941_v38, %v11068_v27 }
 0x40b   : > { %v2069_v43 = vsub.f32 %v10983_v10, %v11068_v27  ;;  %v2070_v44 = vsub.f32 %v10979_v1, %v11068_v27  ;;  %v2071_v49 = vsub.f32 %v10991_v18, %v11068_v27  ;;  %v2072_v32 = vsub.f32 %v10987_v15, %v11068_v27 }
 0x40c   : > { %v2073_v31 = vsub.f32 %v11010_v34, %v11068_v27  ;;  %v2074_v39 = vsub.f32 %v11005_v28, %v11068_v27  ;;  %v2075_v38 = vsub.f32 %v11028_v56, %v11068_v27  ;;  %v2076_v10 = vsub.f32 %v11023_v51, %v11068_v27 }
 0x40d   : > { %v2077_v1 = vsub.f32 %v11046_v17, %v11068_v27  ;;  %v2078_v18 = vsub.f32 %v11041_v13, %v11068_v27  ;;  %v2079_v15 = vsub.f32 %v11064_v4, %v11068_v27  ;;  %v2080_v34 = vsub.f32 %v11059_v33, %v11068_v27 }
 0x40e   : > { %v2081_v50 = vmul.f32 1.442695, %v2065_v36  ;;  %v2083_v28 = vmul.f32 1.442695, %v2066_v61  ;;  %v2085_v56 = vmul.f32 1.442695, %v2067_v24 }
 0x40f   : > { %v2087_v35 = vmul.f32 1.442695, %v2068_v41  ;;  %v2089_v59 = vmul.f32 1.442695, %v2069_v43  ;;  %v2093_v43 = vmul.f32 1.442695, %v2071_v49 }
 0x410   : > { %v10119_v53 = vpop.eup %10118  ;;  %10120 = vpow2.f32 %v2081_v50  ;;  %v2099_v49 = vmul.f32 1.442695, %v2074_v39  ;;  %v2103_v39 = vmul.f32 1.442695, %v2076_v10 }
 0x411   : > { %v1616_v63 = vmul.f32 %v10119_v53, %v10995_v21  ;;  %v1617_v3 = vmul.f32 %v10119_v53, %v10997_v22  ;;  %v1618_v9 = vmul.f32 %v10119_v53, %v11002_v25  ;;  %v1619_v16 = vmul.f32 %v10119_v53, %v11007_v29 }
 0x412   : > { %v1620_v60 = vmul.f32 %v10119_v53, %v11014_v37  ;;  %v1621_v19 = vmul.f32 %v10119_v53, %v11017_v42  ;;  %v1622_v23 = vmul.f32 %v10119_v53, %v11020_v47  ;;  %v1623_v55 = vmul.f32 %v10119_v53, %v11025_v52 }
 0x413   : > { %v9720_v36 = vpack.c.bf16 %v1617_v3, %v1616_v63  ;;  %v9723_v61 = vpack.c.bf16 %v1619_v16, %v1618_v9  ;;  %v1624_v24 = vmul.f32 %v10119_v53, %v11032_v62  ;;  %v1625_v21 = vmul.f32 %v10119_v53, %v11035_v2 }
 0x414   : > { %v9726_v41 = vpack.c.bf16 %v1621_v19, %v1620_v60  ;;  %v9729_v22 = vpack.c.bf16 %v1623_v55, %v1622_v23  ;;  %v1626_v25 = vmul.f32 %v10119_v53, %v11038_v54  ;;  %v1627_v29 = vmul.f32 %v10119_v53, %v11043_v14 }
 0x415   : > { %9721 = vmatpush3.bf16.msra.mxu1 %v9720_v36  ;;  %v9732_v37 = vpack.c.bf16 %v1625_v21, %v1624_v24  ;;  %v1628_v42 = vmul.f32 %v10119_v53, %v11050_v20  ;;  %v1629_v47 = vmul.f32 %v10119_v53, %v11053_v26  ;;  %10122 = vpow2.f32 %v2083_v28 }
 0x416   : > { %9722 = vmatprep.subr.bf16.mxu1 %v12455_v48  ;;  %v9735_v52 = vpack.c.bf16 %v1627_v29, %v1626_v25  ;;  %10124 = vpow2.f32 %v2085_v56  ;;  %v2091_v2 = vmul.f32 1.442695, %v2070_v44  ;;  %v1630_v54 = vmul.f32 %v10119_v53, %v11056_v30 }
 0x417   : > { %v9738_v62 = vpack.c.bf16 %v1629_v47, %v1628_v42  ;;  %10126 = vpow2.f32 %v2087_v35  ;;  %v1631_v14 = vmul.f32 %v10119_v53, %v11061_v40  ;;  %v2095_v20 = vmul.f32 1.442695, %v2072_v32 }
 0x418   : > { %10128 = vpow2.f32 %v2089_v59  ;;  %v2097_v28 = vmul.f32 1.442695, %v2073_v31  ;;  %v2101_v32 = vmul.f32 1.442695, %v2075_v38  ;;  %v2105_v63 = vmul.f32 1.442695, %v2077_v1 }
 0x419   : > { %9724 = vmatpush3.bf16.msra.mxu1 %v9723_v61  ;;  %10130 = vpow2.f32 %v2091_v2  ;;  %v9741_v26 = vpack.c.bf16 %v1631_v14, %v1630_v54  ;;  %v2107_v9 = vmul.f32 1.442695, %v2078_v18  ;;  %v2109_v16 = vmul.f32 1.442695, %v2079_v15 }
 0x41a   : > { %v11119_v50 = vpop.eup %10120  ;;  %9725 = vmatprep.subr.bf16.mxu1 %v12455_v48  ;;  %10132 = vpow2.f32 %v2093_v43  ;;  %v2111_v60 = vmul.f32 1.442695, %v2080_v34 }
 0x41b   : > { %10134 = vpow2.f32 %v2095_v20 }
 0x41c   : > { %10136 = vpow2.f32 %v2097_v28 }
 0x41d   : > { %9727 = vmatpush3.bf16.msra.mxu1 %v9726_v41  ;;  %10138 = vpow2.f32 %v2099_v49 }
 0x41e   : > { %9728 = vmatprep.subr.bf16.mxu1 %v12455_v48  ;;  %10140 = vpow2.f32 %v2101_v32 }
 0x41f   : > { %v11123_v44 = vpop.eup %10122  ;;  %10142 = vpow2.f32 %v2103_v39 }
 0x420   : > { %v11125_v56 = vpop.eup %10124  ;;  %v2113_v30 = vadd.f32 %v11123_v44, %v11119_v50  ;;  %10144 = vpow2.f32 %v2105_v63 }
 0x421   : > { %v11129_v40 = vpop.eup %10126  ;;  %9730 = vmatpush3.bf16.msra.mxu1 %v9729_v22  ;;  %10146 = vpow2.f32 %v2107_v9 }
 0x422   : > { %9731 = vmatprep.subr.bf16.mxu1 %v12455_v48  ;;  %v2114_v31 = vadd.f32 %v11125_v56, %v2113_v30  ;;  %v10129_v53 = vpop.eup %10128  ;;  %10148 = vpow2.f32 %v2109_v16 }
 0x423   : > { %v10131_v59 = vpop.eup %10130  ;;  %10150 = vpow2.f32 %v2111_v60 }
 0x424   : > { %v2115_v35 = vadd.f32 %v11129_v40, %v2114_v31  ;;  %v10133_v3 = vpop.eup %10132 }
 0x425   : > { %9733 = vmatpush3.bf16.msra.mxu1 %v9732_v37  ;;  %v10135_v10 = vpop.eup %10134 }
 0x426   : > { %9734 = vmatprep.subr.bf16.mxu1 %v12455_v48  ;;  %v2116_v38 = vadd.f32 %v10129_v53, %v2115_v35  ;;  %v10137_v1 = vpop.eup %10136 }
 0x427   : > { %v10139_v13 = vpop.eup %10138 }
 0x428   : > { %v2117_v51 = vadd.f32 %v10131_v59, %v2116_v38  ;;  %v10141_v23 = vpop.eup %10140 }
 0x429   : > { %9736 = vmatpush3.bf16.msra.mxu1 %v9735_v52  ;;  %v10143_v15 = vpop.eup %10142 }
 0x42a   : > { %9737 = vmatprep.subr.bf16.mxu1 %v12455_v48  ;;  %v2118_v17 = vadd.f32 %v10133_v3, %v2117_v51  ;;  %v10145_v36 = vpop.eup %10144 }
 0x42b   : > { %v10147_v33 = vpop.eup %10146 }
 0x42c   : > { %v2119_v19 = vadd.f32 %v10135_v10, %v2118_v17  ;;  %v10149_v34 = vpop.eup %10148 }
 0x42d   : > { %9739 = vmatpush3.bf16.msra.mxu1 %v9738_v62  ;;  %v10151_v21 = vpop.eup %10150 }
 0x42e   : > { %v2120_v18 = vadd.f32 %v10137_v1, %v2119_v19  ;;  %9740 = vmatprep.subr.bf16.mxu1 %v12455_v48 }
 0x430   : > { %v2121_v4 = vadd.f32 %v10139_v13, %v2120_v18 }
 0x431   : > { %9742 = vmatpush3.bf16.msra.mxu1 %v9741_v26 }
 0x432   : > { %v2122_v55 = vadd.f32 %v10141_v23, %v2121_v4  ;;  %8864 = vmatprep.subr.mxu1 %v12453_v0 }
 0x434   : > { %v2123_v61 = vadd.f32 %v10143_v15, %v2122_v55  ;;  %8862 = vmatmul.mubr.f32.vlgmr.msra.gmra.mrb[48].mxu1 %v10831_v6 }
 0x435   : > { %8866 = vmatprep.mubr.msk.f32.mxu1 %vm10528_vm3, %v12453_v0 }
 0x436   : > { %v2124_v27 = vadd.f32 %v10145_v36, %v2123_v61 }
 0x438   : > { %v2125_v24 = vadd.f32 %v10147_v33, %v2124_v27 }
 0x43a   : > { %v2126_v41 = vadd.f32 %v10149_v34, %v2125_v24 }
 0x43c   : > { %v2127_v22 = vadd.f32 %v10151_v21, %v2126_v41 }
 0x43e   : > { %v2128_v25 = vrot.slane %v2127_v22, 4 }
 0x440   : > { %v2129_v29 = vadd.f32 %v2128_v25, %v2127_v22 }
 0x442   : > { %v2130_v37 = vrot.slane %v2129_v29, 2 }
 0x444   : > { %v2131_v42 = vadd.f32 %v2130_v37, %v2129_v29 }
 0x446   : > { %v2132_v47 = vrot.slane %v2131_v42, 1 }
 0x448   : > { %v2133_v52 = vadd.f32 %v2132_v47, %v2131_v42 }
 0x44a   : > { %10152 = vrcp.f32 %v2133_v52 }
 0x454   : > { %v10153_v62 = vpop.eup %10152 }
 0x455   : > { %v2135_v6 = vmul.f32 %v10153_v62, %v11119_v50  ;;  %v2136_v2 = vmul.f32 %v10153_v62, %v11123_v44  ;;  %v2137_v43 = vmul.f32 %v10153_v62, %v11125_v56  ;;  %v2138_v54 = vmul.f32 %v10153_v62, %v11129_v40 }
 0x456   : > { %v2139_v14 = vmul.f32 %v10153_v62, %v10129_v53  ;;  %v2140_v20 = vmul.f32 %v10153_v62, %v10131_v59  ;;  %v2141_v26 = vmul.f32 %v10153_v62, %v10133_v3  ;;  %v2142_v28 = vmul.f32 %v10153_v62, %v10135_v10  ;;  %v2356_v53 = vpop.trf.xlu1 }
 0x457   : > { %v9744_v49 = vpack.c.bf16 %v2136_v2, %v2135_v6  ;;  %v9747_v30 = vpack.c.bf16 %v2138_v54, %v2137_v43  ;;  %v2143_v32 = vmul.f32 %v10153_v62, %v10137_v1  ;;  %v2144_v31 = vmul.f32 %v10153_v62, %v10139_v13  ;;  %v1702_v1 = vld [vmem:[%s12449_s3] sm:$0xff] }
 0x458   : > { %v9750_v39 = vpack.c.bf16 %v2140_v20, %v2139_v14  ;;  %v9753_v35 = vpack.c.bf16 %v2142_v28, %v2141_v26  ;;  %v2145_v63 = vmul.f32 %v10153_v62, %v10141_v23  ;;  %v2146_v38 = vmul.f32 %v10153_v62, %v10143_v15 }
 0x459   : > { %v9756_v9 = vpack.c.bf16 %v2144_v31, %v2143_v32  ;;  %v2147_v50 = vmul.f32 %v10153_v62, %v10145_v36  ;;  %v2148_v51 = vmul.f32 %v10153_v62, %v10147_v33  ;;  %v2149_v44 = vmul.f32 %v10153_v62, %v10149_v34 }
 0x45a   : > { %v9759_v16 = vpack.c.bf16 %v2146_v38, %v2145_v63  ;;  %v2150_v56 = vmul.f32 %v10153_v62, %v10151_v21  ;;  %v2357_v59 = vpop.trf.xlu1  ;;  %v8042_v21 = vld [vmem:[%s12449_s3 + $0x8] sm:$0xff] }
 0x45b   : > { %v9762_v17 = vpack.c.bf16 %v2148_v51, %v2147_v50 }
 0x45c   : > { %v9765_v40 = vpack.c.bf16 %v2150_v56, %v2149_v44 }
 0x45e   : > { %v2358_v3 = vpop.trf.xlu1 }
 0x462   : > { %v2359_v10 = vpop.trf.xlu1 }
 0x466   : > { %v2360_v60 = vpop.trf.xlu1 }
 0x46a   : > { %v2361_v18 = vpop.trf.xlu1 }
 0x46e   : > { %v2362_v23 = vpop.trf.xlu1 }
 0x472   : > { %v2363_v4 = vpop.trf.xlu1 }
 0x476   : > { %v2364_v15 = vpop.trf.xlu1 }
 0x47a   : > { %v2365_v55 = vpop.trf.xlu1 }
 0x47e   : > { %v2366_v36 = vpop.trf.xlu1 }
 0x482   : > { %v2367_v61 = vpop.trf.xlu1 }
 0x486   : > { %v2368_v33 = vpop.trf.xlu1 }
 0x507   : > { %v1698_v19 = vpop.f32.mrb[48].mxu1 }
 0x508   : > { %v8863_v13 = vpop.f32.mrb[49].mxu1  ;;  %8865 = vmatpush3.msra.mxu1 %v1698_v19 }
 0x509   : > { %8867 = vmatmul.mubr.msk.f32.vlgmr.msra.gmra.mrb[50].mxu1 %vm1331_vm2, %v1702_v1  ;;  %9743 = vmatprep.subr.bf16.mxu1 %v12455_v48 }
 0x50a   : > { %9745 = vmatpush3.bf16.msra.mxu1 %v9744_v49  ;;  %8927 = vmatprep.mubr.msk.f32.mxu1 %vm10528_vm3, %v12453_v0 }
 0x50b   : > { %9746 = vmatprep.subr.bf16.mxu1 %v12455_v48 }
 0x50e   : > { %9748 = vmatpush3.bf16.msra.mxu1 %v9747_v30 }
 0x50f   : > { %9749 = vmatprep.subr.bf16.mxu1 %v12455_v48 }
 0x512   : > { %9751 = vmatpush3.bf16.msra.mxu1 %v9750_v39 }
 0x513   : > { %9752 = vmatprep.subr.bf16.mxu1 %v12455_v48 }
 0x516   : > { %9754 = vmatpush3.bf16.msra.mxu1 %v9753_v35 }
 0x517   : > { %9755 = vmatprep.subr.bf16.mxu1 %v12455_v48 }
 0x51a   : > { %9757 = vmatpush3.bf16.msra.mxu1 %v9756_v9 }
 0x51b   : > { %9758 = vmatprep.subr.bf16.mxu1 %v12455_v48 }
 0x51e   : > { %9760 = vmatpush3.bf16.msra.mxu1 %v9759_v16 }
 0x51f   : > { %9761 = vmatprep.subr.bf16.mxu1 %v12455_v48 }
 0x522   : > { %9763 = vmatpush3.bf16.msra.mxu1 %v9762_v17 }
 0x523   : > { %9764 = vmatprep.subr.bf16.mxu1 %v12455_v48 }
 0x526   : > { %9766 = vmatpush3.bf16.msra.mxu1 %v9765_v40 }
 0x527   : > { %8935 = vmatprep.subr.mxu1 %v10840_v12 }
 0x529   : > { %8928 = vmatmul.mubr.f32.vlgmr.msra.gmra.mrb[52].mxu1 %v10829_v5  ;;  %v2369_v5 = vpop.trf.xlu1 }
 0x52a   : > { %8936 = vmatpush3.msra.mxu1 %v10840_v12  ;;  %8937 = vmatprep.mubr.msk.f32.mxu1 %vm1331_vm2, %v2356_v53 }
 0x52b   : > { %8996 = vmatprep.subr.mxu1 %v12453_v0 }
 0x52d   : > { %8938 = vmatmul.mubr.msk.f32.vlgmr.msra.gmra.mrb[54].mxu1 %vm1331_vm2, %v2357_v59  ;;  %v2370_v12 = vpop.trf.xlu1 }
 0x52e   : > { %8940 = vmatprep.mubr.msk.f32.mxu1 %vm1331_vm2, %v2358_v3 }
 0x531   : > { %8941 = vmatmul.mubr.msk.f32.gmra.mrb[56].mxu1 %vm1331_vm2, %v2359_v10  ;;  %v2371_v27 = vpop.trf.xlu1 }
 0x532   : > { %8943 = vmatprep.mubr.msk.f32.mxu1 %vm1331_vm2, %v2360_v60 }
 0x535   : > { %8944 = vmatmul.mubr.msk.f32.gmra.mrb[58].mxu1 %vm1331_vm2, %v2361_v18 }
 0x536   : > { %8946 = vmatprep.mubr.msk.f32.mxu1 %vm1331_vm2, %v2362_v23 }
 0x539   : > { %8947 = vmatmul.mubr.msk.f32.gmra.mrb[60].mxu1 %vm1331_vm2, %v2363_v4 }
 0x53a   : > { %8949 = vmatprep.mubr.msk.f32.mxu1 %vm1331_vm2, %v2364_v15 }
 0x53d   : > { %8950 = vmatmul.mubr.msk.f32.gmra.mrb[62].mxu1 %vm1331_vm2, %v2365_v55 }
 0x53e   : > { %8952 = vmatprep.mubr.msk.f32.mxu1 %vm1331_vm2, %v2366_v36 }
 0x541   : > { %8953 = vmatmul.mubr.msk.f32.gmra.mrb[64].mxu1 %vm1331_vm2, %v2367_v61 }
 0x542   : > { %8955 = vmatprep.mubr.msk.f32.mxu1 %vm1331_vm2, %v2368_v33 }
 0x545   : > { %8956 = vmatmul.mubr.msk.f32.gmra.mrb[66].mxu1 %vm1331_vm2, %v2369_v5 }
 0x546   : > { %8958 = vmatprep.mubr.msk.f32.mxu1 %vm1331_vm2, %v2370_v12 }
 0x549   : > { %8959 = vmatmul.mubr.msk.f32.gmra.mrb[68].mxu1 %vm1331_vm2, %v2371_v27 }
 0x54a   : > { %8998 = vmatprep.mubr.msk.f32.mxu1 %vm10528_vm3, %v12453_v0 }
 0x5dc   : > { %v11196_v34 = vpop.f32.mrb[50].mxu1 }
 0x5dd   : > { %1776 = vadd.xlane.f32.xlu0 %v11196_v34  ;;  %v8868_v24 = vpop.f32.mrb[51].mxu1 }
 0x5fc   : > { %v2217_v41 = vpop.f32.mrb[52].mxu1 }
 0x5fd   : > { %v8929_v22 = vpop.f32.mrb[53].mxu1  ;;  %8931 = vmatpush3.msra.mxu0 %v2217_v41 }
 0x5fe   : > { %8933 = vmatmul.mubr.msk.f32.vlgmr.msra.gmra.mrb[60].mxu0 %vm1331_vm2, %v8042_v21  ;;  %9767 = vmatprep.subr.bf16.mxu0 %v12455_v48 }
 0x5ff   : > { %8993 = vmatprep.mubr.msk.f32.mxu0 %vm10528_vm3, %v12453_v0 }
 0x600   : > { %v8939_v25 = vpop.f32.mrb[54].mxu1 }
 0x601   : > { %v2486_v29 = vpop.f32.mrb[55].mxu1 }
 0x604   : > { %v8942_v37 = vpop.f32.mrb[56].mxu1 }
 0x605   : > { %v2496_v42 = vpop.f32.mrb[57].mxu1 }
 0x608   : > { %v8945_v47 = vpop.f32.mrb[58].mxu1 }
 0x609   : > { %v2566_v52 = vmax.f32 %v8939_v25, %v8945_v47  ;;  %v2506_v62 = vpop.f32.mrb[59].mxu1 }
 0x60a   : > { %v2565_v6 = vmax.f32 %v2486_v29, %v2506_v62 }
 0x60c   : > { %v8948_v2 = vpop.f32.mrb[60].mxu1 }
 0x60d   : > { %v2568_v43 = vmax.f32 %v8942_v37, %v8948_v2  ;;  %v2516_v54 = vpop.f32.mrb[61].mxu1 }
 0x60e   : > { %v2567_v14 = vmax.f32 %v2496_v42, %v2516_v54 }
 0x610   : > { %v8951_v20 = vpop.f32.mrb[62].mxu1 }
 0x611   : > { %v2570_v26 = vmax.f32 %v2566_v52, %v8951_v20  ;;  %v2526_v28 = vpop.f32.mrb[63].mxu1 }
 0x612   : > { %v2569_v49 = vmax.f32 %v2565_v6, %v2526_v28 }
 0x614   : > { %v11206_v30 = vpop.f32.mrb[64].mxu1 }
 0x615   : > { %v2572_v32 = vmax.f32 %v2568_v43, %v11206_v30  ;;  %v2536_v31 = vpop.f32.mrb[65].mxu1 }
 0x616   : > { %v2571_v39 = vmax.f32 %v2567_v14, %v2536_v31 }
 0x618   : > { %v11209_v35 = vpop.f32.mrb[66].mxu1 }
 0x619   : > { %v2574_v63 = vmax.f32 %v2570_v26, %v11209_v35  ;;  %v11212_v38 = vpop.f32.mrb[67].mxu1 }
 0x61a   : > { %v2573_v9 = vmax.f32 %v2569_v49, %v11212_v38 }
 0x61c   : > { %v2577_v50 = vmax.f32 %v2573_v9, %v2574_v63  ;;  %v11215_v51 = vpop.f32.mrb[68].mxu1 }
 0x61d   : > { %v2576_v44 = vmax.f32 %v2572_v32, %v11215_v51  ;;  %v11218_v16 = vpop.f32.mrb[69].mxu1 }
 0x61e   : > { %v2575_v56 = vmax.f32 %v2571_v39, %v11218_v16 }
 0x620   : > { %v2578_v17 = vmax.f32 %v2575_v56, %v2576_v44 }
 0x622   : > { %v2579_v40 = vmax.f32 %v2577_v50, %v2578_v17 }
 0x624   : > { %v2580_v53 = vrot.slane %v2579_v40, 4 }
 0x626   : > { %v2581_v59 = vmax.f32 %v2579_v40, %v2580_v53 }
 0x628   : > { %v2582_v3 = vrot.slane %v2581_v59, 2 }
 0x62a   : > { %v2583_v10 = vmax.f32 %v2581_v59, %v2582_v3 }
 0x62c   : > { %v2584_v60 = vrot.slane %v2583_v10, 1 }
 0x62e   : > { %v2585_v1 = vmax.f32 %v2583_v10, %v2584_v60 }
 0x630   : > { %v2586_v19 = vsub.f32 %v2486_v29, %v2585_v1  ;;  %v2587_v13 = vsub.f32 %v8939_v25, %v2585_v1  ;;  %v2588_v18 = vsub.f32 %v2496_v42, %v2585_v1  ;;  %v2589_v23 = vsub.f32 %v8942_v37, %v2585_v1 }
 0x631   : > { %v2590_v4 = vsub.f32 %v2506_v62, %v2585_v1  ;;  %v2591_v15 = vsub.f32 %v8945_v47, %v2585_v1  ;;  %v2592_v55 = vsub.f32 %v2516_v54, %v2585_v1  ;;  %v2593_v36 = vsub.f32 %v8948_v2, %v2585_v1 }
 0x632   : > { %v2594_v61 = vsub.f32 %v2526_v28, %v2585_v1  ;;  %v2595_v33 = vsub.f32 %v8951_v20, %v2585_v1  ;;  %v2596_v5 = vsub.f32 %v2536_v31, %v2585_v1  ;;  %v2597_v12 = vsub.f32 %v11206_v30, %v2585_v1 }
 0x633   : > { %v2598_v27 = vsub.f32 %v11212_v38, %v2585_v1  ;;  %v2599_v24 = vsub.f32 %v11209_v35, %v2585_v1  ;;  %v2600_v21 = vsub.f32 %v11218_v16, %v2585_v1  ;;  %v2601_v41 = vsub.f32 %v11215_v51, %v2585_v1 }
 0x634   : > { %v2602_v22 = vmul.f32 1.442695, %v2586_v19  ;;  %v2604_v25 = vmul.f32 1.442695, %v2587_v13  ;;  %v2606_v29 = vmul.f32 1.442695, %v2588_v18 }
 0x635   : > { %v2608_v37 = vmul.f32 1.442695, %v2589_v23  ;;  %v2610_v42 = vmul.f32 1.442695, %v2590_v4  ;;  %v2612_v47 = vmul.f32 1.442695, %v2591_v15 }
 0x636   : > { %10154 = vpow2.f32 %v2602_v22  ;;  %v2614_v52 = vmul.f32 1.442695, %v2592_v55  ;;  %v2616_v62 = vmul.f32 1.442695, %v2593_v36  ;;  %v2618_v43 = vmul.f32 1.442695, %v2594_v61  ;;  %v11238_v61 = vpop.trf.xlu1 }
 0x637   : > { %10156 = vpow2.f32 %v2604_v25  ;;  %v2620_v20 = vmul.f32 1.442695, %v2595_v33  ;;  %v2622_v49 = vmul.f32 1.442695, %v2596_v5  ;;  %v2624_v31 = vmul.f32 1.442695, %v2597_v12 }
 0x638   : > { %10158 = vpow2.f32 %v2606_v29  ;;  %v2626_v63 = vmul.f32 1.442695, %v2598_v27  ;;  %v2628_v50 = vmul.f32 1.442695, %v2599_v24  ;;  %v2630_v16 = vmul.f32 1.442695, %v2600_v21 }
 0x639   : > { %10160 = vpow2.f32 %v2608_v37  ;;  %v2632_v40 = vmul.f32 1.442695, %v2601_v41 }
 0x63a   : > { %10162 = vpow2.f32 %v2610_v42  ;;  %v11240_v27 = vpop.trf.xlu1 }
 0x63b   : > { %10164 = vpow2.f32 %v2612_v47 }
 0x63c   : > { %10166 = vpow2.f32 %v2614_v52 }
 0x63d   : > { %10168 = vpow2.f32 %v2616_v62 }
 0x63e   : > { %10170 = vpow2.f32 %v2618_v43  ;;  %v11242_v22 = vpop.trf.xlu1 }
 0x63f   : > { %10172 = vpow2.f32 %v2620_v20 }
 0x640   : > { %v11226_v6 = vpop.eup %10154  ;;  %10174 = vpow2.f32 %v2622_v49 }
 0x641   : > { %v11228_v2 = vpop.eup %10156  ;;  %10176 = vpow2.f32 %v2624_v31 }
 0x642   : > { %v2634_v54 = vadd.f32 %v11228_v2, %v11226_v6  ;;  %v11232_v14 = vpop.eup %10158  ;;  %10178 = vpow2.f32 %v2626_v63  ;;  %v2880_v52 = vpop.trf.xlu1 }
 0x643   : > { %v11235_v28 = vpop.eup %10160  ;;  %10180 = vpow2.f32 %v2628_v50 }
 0x644   : > { %v2635_v26 = vadd.f32 %v11232_v14, %v2634_v54  ;;  %v10163_v32 = vpop.eup %10162  ;;  %10182 = vpow2.f32 %v2630_v16 }
 0x645   : > { %v10165_v35 = vpop.eup %10164  ;;  %10184 = vpow2.f32 %v2632_v40 }
 0x646   : > { %v2636_v30 = vadd.f32 %v11235_v28, %v2635_v26  ;;  %v10167_v9 = vpop.eup %10166  ;;  %v2881_v20 = vpop.trf.xlu1 }
 0x647   : > { %v10169_v44 = vpop.eup %10168 }
 0x648   : > { %v2637_v39 = vadd.f32 %v10163_v32, %v2636_v30  ;;  %v10171_v17 = vpop.eup %10170 }
 0x649   : > { %v10173_v59 = vpop.eup %10172 }
 0x64a   : > { %v2638_v38 = vadd.f32 %v10165_v35, %v2637_v39  ;;  %v10175_v10 = vpop.eup %10174 }
 0x64b   : > { %v10177_v1 = vpop.eup %10176 }
 0x64c   : > { %v2639_v51 = vadd.f32 %v10167_v9, %v2638_v38  ;;  %v10179_v13 = vpop.eup %10178 }
 0x64d   : > { %v10181_v23 = vpop.eup %10180 }
 0x64e   : > { %v2640_v56 = vadd.f32 %v10169_v44, %v2639_v51  ;;  %v10183_v15 = vpop.eup %10182 }
 0x64f   : > { %v10185_v36 = vpop.eup %10184 }
 0x650   : > { %v2641_v53 = vadd.f32 %v10171_v17, %v2640_v56 }
 0x652   : > { %v2642_v3 = vadd.f32 %v10173_v59, %v2641_v53 }
 0x654   : > { %v2643_v60 = vadd.f32 %v10175_v10, %v2642_v3 }
 0x656   : > { %v2644_v19 = vadd.f32 %v10177_v1, %v2643_v60 }
 0x658   : > { %v2645_v18 = vadd.f32 %v10179_v13, %v2644_v19 }
 0x65a   : > { %v2646_v4 = vadd.f32 %v10181_v23, %v2645_v18 }
 0x65c   : > { %v2647_v55 = vadd.f32 %v10183_v15, %v2646_v4  ;;  %v2882_v4 = vpop.trf.xlu1 }
 0x65e   : > { %v2648_v33 = vadd.f32 %v10185_v36, %v2647_v55 }
 0x660   : > { %v2649_v5 = vrot.slane %v2648_v33, 4 }
 0x662   : > { %v2650_v12 = vadd.f32 %v2649_v5, %v2648_v33 }
 0x664   : > { %v2651_v24 = vrot.slane %v2650_v12, 2 }
 0x666   : > { %v2652_v21 = vadd.f32 %v2651_v24, %v2650_v12 }
 0x668   : > { %v2653_v41 = vrot.slane %v2652_v21, 1 }
 0x66a   : > { %v2654_v25 = vadd.f32 %v2653_v41, %v2652_v21  ;;  %v1777_v29 = vpop.xlane.xlu0 %1776 }
 0x66b   : > { %v1778_v37 = vrot.slane %v1777_v29, 4 }
 0x66c   : > { %10186 = vrcp.f32 %v2654_v25 }
 0x66d   : > { %v1779_v42 = vadd.f32 %v1778_v37, %v1777_v29 }
 0x66f   : > { %v1780_v47 = vrot.slane %v1779_v42, 2 }
 0x671   : > { %v1781_v62 = vadd.f32 %v1780_v47, %v1779_v42 }
 0x673   : > { %v1782_v43 = vrot.slane %v1781_v62, 1 }
 0x675   : > { %v1783_v54 = vadd.f32 %v1782_v43, %v1781_v62 }
 0x676   : > { %v10187_v26 = vpop.eup %10186 }
 0x677   : > { %10024 = vpush %v1783_v54  ;;  %v2656_v49 = vmul.f32 %v10187_v26, %v11226_v6  ;;  %v2657_v30 = vmul.f32 %v10187_v26, %v11228_v2  ;;  %v2658_v31 = vmul.f32 %v10187_v26, %v11232_v14  ;;  %v2659_v39 = vmul.f32 %v10187_v26, %v11235_v28 }
 0x678   : > { %v2660_v63 = vmul.f32 %v10187_v26, %v10163_v32  ;;  %v2661_v38 = vmul.f32 %v10187_v26, %v10165_v35  ;;  %v2662_v50 = vmul.f32 %v10187_v26, %v10167_v9  ;;  %v2663_v51 = vmul.f32 %v10187_v26, %v10169_v44  ;;  %v2883_v44 = vpop.trf.xlu1 }
 0x679   : > { %v9768_v16 = vpack.c.bf16 %v2657_v30, %v2656_v49  ;;  %v9771_v56 = vpack.c.bf16 %v2659_v39, %v2658_v31  ;;  %v2664_v40 = vmul.f32 %v10187_v26, %v10171_v17  ;;  %v2665_v53 = vmul.f32 %v10187_v26, %v10173_v59 }
 0x67a   : > { %v9774_v3 = vpack.c.bf16 %v2661_v38, %v2660_v63  ;;  %v9777_v60 = vpack.c.bf16 %v2663_v51, %v2662_v50  ;;  %v2666_v19 = vmul.f32 %v10187_v26, %v10175_v10  ;;  %v2667_v18 = vmul.f32 %v10187_v26, %v10177_v1 }
 0x67b   : > { %9769 = vmatpush3.bf16.msra.mxu0 %v9768_v16  ;;  %v9780_v6 = vpack.c.bf16 %v2665_v53, %v2664_v40  ;;  %v2668_v2 = vmul.f32 %v10187_v26, %v10179_v13  ;;  %v2669_v55 = vmul.f32 %v10187_v26, %v10181_v23  ;;  %v2670_v14 = vmul.f32 %v10187_v26, %v10183_v15 }
 0x67c   : > { %9770 = vmatprep.subr.bf16.mxu0 %v12455_v48  ;;  %v9783_v28 = vpack.c.bf16 %v2667_v18, %v2666_v19  ;;  %v2671_v32 = vmul.f32 %v10187_v26, %v10185_v36  ;;  %v2884_v17 = vpop.trf.xlu1 }
 0x67d   : > { %v9786_v35 = vpack.c.bf16 %v2669_v55, %v2668_v2 }
 0x67e   : > { %v9789_v9 = vpack.c.bf16 %v2671_v32, %v2670_v14 }
 0x67f   : > { %9772 = vmatpush3.bf16.msra.mxu0 %v9771_v56 }
 0x680   : > { %9773 = vmatprep.subr.bf16.mxu0 %v12455_v48  ;;  %v2885_v59 = vpop.trf.xlu1 }
 0x683   : > { %9775 = vmatpush3.bf16.msra.mxu0 %v9774_v3 }
 0x684   : > { %9776 = vmatprep.subr.bf16.mxu0 %v12455_v48  ;;  %v2886_v10 = vpop.trf.xlu1 }
 0x687   : > { %9778 = vmatpush3.bf16.msra.mxu0 %v9777_v60 }
 0x688   : > { %9779 = vmatprep.subr.bf16.mxu0 %v12455_v48  ;;  %v2887_v1 = vpop.trf.xlu1 }
 0x68b   : > { %9781 = vmatpush3.bf16.msra.mxu0 %v9780_v6 }
 0x68c   : > { %9782 = vmatprep.subr.bf16.mxu0 %v12455_v48  ;;  %v2888_v13 = vpop.trf.xlu1 }
 0x68f   : > { %9784 = vmatpush3.bf16.msra.mxu0 %v9783_v28 }
 0x690   : > { %9785 = vmatprep.subr.bf16.mxu0 %v12455_v48  ;;  %v2889_v23 = vpop.trf.xlu1 }
 0x693   : > { %9787 = vmatpush3.bf16.msra.mxu0 %v9786_v35 }
 0x694   : > { %9788 = vmatprep.subr.bf16.mxu0 %v12455_v48  ;;  %v2890_v15 = vpop.trf.xlu1 }
 0x697   : > { %9790 = vmatpush3.bf16.msra.mxu0 %v9789_v9 }
 0x698   : > { %9001 = vmatprep.subr.mxu0 %v10838_v11  ;;  %v2891_v33 = vpop.trf.xlu1 }
 0x69a   : > { %8994 = vmatmul.mubr.f32.vlgmr.msra.gmra.mrb[62].mxu0 %v10835_v8 }
 0x69b   : > { %9002 = vmatpush3.msra.mxu0 %v10838_v11  ;;  %9003 = vmatprep.mubr.msk.f32.mxu0 %vm1331_vm2, %v11238_v61 }
 0x69c   : > { %9062 = vmatprep.subr.mxu0 %v12453_v0  ;;  %v2892_v5 = vpop.trf.xlu1 }
 0x69e   : > { %9004 = vmatmul.mubr.msk.f32.vlgmr.msra.gmra.mrb[64].mxu0 %vm1331_vm2, %v11240_v27 }
 0x69f   : > { %9006 = vmatprep.mubr.msk.f32.mxu0 %vm1331_vm2, %v11242_v22 }
 0x6a2   : > { %9007 = vmatmul.mubr.msk.f32.gmra.mrb[66].mxu0 %vm1331_vm2, %v2880_v52 }
 0x6a3   : > { %9009 = vmatprep.mubr.msk.f32.mxu0 %vm1331_vm2, %v2881_v20  ;;  %v8062_v20 = vld [vmem:[%s12449_s3 + $0x10] sm:$0xff] }
 0x6a6   : > { %9010 = vmatmul.mubr.msk.f32.gmra.mrb[68].mxu0 %vm1331_vm2, %v2882_v4 }
 0x6a7   : > { %9012 = vmatprep.mubr.msk.f32.mxu0 %vm1331_vm2, %v2883_v44 }
 0x6a8   : > { %s10025_s17 = spop %10024 }
 0x6a9   : > { %v1785_v8 = vstv %s10025_s17 }
 0x6aa   : > { %9013 = vmatmul.mubr.msk.f32.gmra.mrb[70].mxu0 %vm1331_vm2, %v2884_v17  ;;  %v1787_v11 = vmul.f32 0.0009765625, %v1785_v8 }
 0x6ab   : > { %9015 = vmatprep.mubr.msk.f32.mxu0 %vm1331_vm2, %v2885_v59 }
 0x6ac   : > { %v11272_v36 = vsub.f32 %v11196_v34, %v1787_v11 }
 0x6ae   : > { %9016 = vmatmul.mubr.msk.f32.gmra.mrb[72].mxu0 %vm1331_vm2, %v2886_v10  ;;  %v1789_v61 = vmul.f32 %v11272_v36, %v11272_v36 }
 0x6af   : > { %9018 = vmatprep.mubr.msk.f32.mxu0 %vm1331_vm2, %v2887_v1 }
 0x6b0   : > { %1790 = vadd.xlane.f32.xlu1 %v1789_v61 }
 0x6b2   : > { %9019 = vmatmul.mubr.msk.f32.gmra.mrb[74].mxu0 %vm1331_vm2, %v2888_v13 }
 0x6b3   : > { %9021 = vmatprep.mubr.msk.f32.mxu0 %vm1331_vm2, %v2889_v23 }
 0x6b6   : > { %9022 = vmatmul.mubr.msk.f32.gmra.mrb[76].mxu0 %vm1331_vm2, %v2890_v15 }
 0x6b7   : > { %9024 = vmatprep.mubr.msk.f32.mxu0 %vm1331_vm2, %v2891_v33 }
 0x6ba   : > { %9025 = vmatmul.mubr.msk.f32.gmra.mrb[78].mxu0 %vm1331_vm2, %v2892_v5 }
 0x6bb   : > { %9064 = vmatprep.mubr.msk.f32.mxu0 %vm10528_vm3, %v12453_v0 }
 0x6d1   : > { %v11285_v34 = vpop.f32.mrb[60].mxu0 }
 0x6d2   : > { %2296 = vadd.xlane.f32.xlu1 %v11285_v34  ;;  %v8934_v12 = vpop.f32.mrb[61].mxu0 }
 0x73d   : > { %v1791_v27 = vpop.xlane.xlu1 %1790 }
 0x73e   : > { %v1792_v24 = vrot.slane %v1791_v27, 4 }
 0x740   : > { %v1793_v21 = vadd.f32 %v1792_v24, %v1791_v27 }
 0x742   : > { %v1794_v41 = vrot.slane %v1793_v21, 2 }
 0x744   : > { %v1795_v22 = vadd.f32 %v1794_v41, %v1793_v21 }
 0x746   : > { %v1796_v25 = vrot.slane %v1795_v22, 1 }
 0x748   : > { %v1797_v29 = vadd.f32 %v1796_v25, %v1795_v22 }
 0x74a   : > { %10026 = vpush %v1797_v29 }
 0x75f   : > { %v2297_v37 = vpop.xlane.xlu1 %2296 }
 0x760   : > { %v2298_v42 = vrot.slane %v2297_v37, 4 }
 0x762   : > { %v2299_v47 = vadd.f32 %v2298_v42, %v2297_v37 }
 0x764   : > { %v2300_v52 = vrot.slane %v2299_v47, 2 }
 0x766   : > { %v2301_v62 = vadd.f32 %v2300_v52, %v2299_v47 }
 0x768   : > { %v2302_v43 = vrot.slane %v2301_v62, 1 }
 0x76a   : > { %v2303_v54 = vadd.f32 %v2302_v43, %v2301_v62 }
 0x76c   : > { %10028 = vpush %v2303_v54 }
 0x76d   : > { %v2738_v26 = vpop.f32.mrb[62].mxu0 }
 0x76e   : > { %v8995_v49 = vpop.f32.mrb[63].mxu0  ;;  %8997 = vmatpush3.msra.mxu1 %v2738_v26 }
 0x76f   : > { %8999 = vmatmul.mubr.msk.f32.vlgmr.msra.gmra.mrb[70].mxu1 %vm1331_vm2, %v8062_v20  ;;  %9791 = vmatprep.subr.bf16.mxu1 %v12455_v48 }
 0x770   : > { %9059 = vmatprep.mubr.msk.f32.mxu1 %vm10528_vm3, %v12453_v0 }
 0x771   : > { %v9005_v30 = vpop.f32.mrb[64].mxu0 }
 0x772   : > { %v3007_v31 = vpop.f32.mrb[65].mxu0 }
 0x775   : > { %v9008_v39 = vpop.f32.mrb[66].mxu0 }
 0x776   : > { %v3017_v63 = vpop.f32.mrb[67].mxu0 }
 0x779   : > { %v11295_v38 = vpop.f32.mrb[68].mxu0 }
 0x77a   : > { %v3087_v50 = vmax.f32 %v9005_v30, %v11295_v38  ;;  %v3027_v51 = vpop.f32.mrb[69].mxu0 }
 0x77b   : > { %v3086_v16 = vmax.f32 %v3007_v31, %v3027_v51  ;;  %s11325_s20 = spop %10026 }
 0x77d   : > { %v11298_v56 = vpop.f32.mrb[70].mxu0 }
 0x77e   : > { %v3089_v40 = vmax.f32 %v9008_v39, %v11298_v56  ;;  %v3037_v53 = vpop.f32.mrb[71].mxu0 }
 0x77f   : > { %v3088_v3 = vmax.f32 %v3017_v63, %v3037_v53 }
 0x781   : > { %v11301_v60 = vpop.f32.mrb[72].mxu0 }
 0x782   : > { %v3091_v19 = vmax.f32 %v3087_v50, %v11301_v60  ;;  %v11304_v18 = vpop.f32.mrb[73].mxu0 }
 0x783   : > { %v3090_v6 = vmax.f32 %v3086_v16, %v11304_v18 }
 0x785   : > { %v11307_v4 = vpop.f32.mrb[74].mxu0 }
 0x786   : > { %v3093_v2 = vmax.f32 %v3089_v40, %v11307_v4  ;;  %v11310_v55 = vpop.f32.mrb[75].mxu0 }
 0x787   : > { %v3092_v14 = vmax.f32 %v3088_v3, %v11310_v55 }
 0x789   : > { %v11313_v28 = vpop.f32.mrb[76].mxu0 }
 0x78a   : > { %v3095_v32 = vmax.f32 %v3091_v19, %v11313_v28  ;;  %v11316_v35 = vpop.f32.mrb[77].mxu0 }
 0x78b   : > { %v3094_v9 = vmax.f32 %v3090_v6, %v11316_v35 }
 0x78d   : > { %v3098_v44 = vmax.f32 %v3094_v9, %v3095_v32  ;;  %v11319_v17 = vpop.f32.mrb[78].mxu0 }
 0x78e   : > { %v3097_v59 = vmax.f32 %v3093_v2, %v11319_v17  ;;  %v11322_v10 = vpop.f32.mrb[79].mxu0 }
 0x78f   : > { %v3096_v1 = vmax.f32 %v3092_v14, %v11322_v10 }
 0x791   : > { %v3099_v13 = vmax.f32 %v3096_v1, %v3097_v59 }
 0x793   : > { %v3100_v23 = vmax.f32 %v3098_v44, %v3099_v13 }
 0x795   : > { %v3101_v8 = vrot.slane %v3100_v23, 4 }
 0x797   : > { %v3102_v11 = vmax.f32 %v3100_v23, %v3101_v8 }
 0x799   : > { %v3103_v15 = vrot.slane %v3102_v11, 2 }
 0x79b   : > { %v3104_v61 = vmax.f32 %v3102_v11, %v3103_v15 }
 0x79d   : > { %v3105_v33 = vrot.slane %v3104_v61, 1  ;;  %s10029_s23 = spop %10028 }
 0x79e   : > { %v2305_v5 = vstv %s10029_s23 }
 0x79f   : > { %v11327_v12 = vmax.f32 %v3104_v61, %v3105_v33  ;;  %v2306_v27 = vmul.f32 0.0009765625, %v2305_v5 }
 0x7a1   : > { %v3107_v24 = vsub.f32 %v3007_v31, %v11327_v12  ;;  %v3108_v21 = vsub.f32 %v9005_v30, %v11327_v12  ;;  %v3109_v41 = vsub.f32 %v3017_v63, %v11327_v12  ;;  %v3110_v22 = vsub.f32 %v9008_v39, %v11327_v12 }
 0x7a2   : > { %v3111_v25 = vsub.f32 %v3027_v51, %v11327_v12  ;;  %v3112_v29 = vsub.f32 %v11295_v38, %v11327_v12  ;;  %v3113_v37 = vsub.f32 %v3037_v53, %v11327_v12  ;;  %v3114_v42 = vsub.f32 %v11298_v56, %v11327_v12 }
 0x7a3   : > { %v3115_v47 = vsub.f32 %v11304_v18, %v11327_v12  ;;  %v3116_v52 = vsub.f32 %v11301_v60, %v11327_v12  ;;  %v3117_v62 = vsub.f32 %v11310_v55, %v11327_v12  ;;  %v3118_v43 = vsub.f32 %v11307_v4, %v11327_v12 }
 0x7a4   : > { %v3119_v54 = vsub.f32 %v11316_v35, %v11327_v12  ;;  %v3120_v20 = vsub.f32 %v11313_v28, %v11327_v12  ;;  %v3121_v26 = vsub.f32 %v11322_v10, %v11327_v12  ;;  %v3122_v49 = vsub.f32 %v11319_v17, %v11327_v12 }
 0x7a5   : > { %v3123_v30 = vmul.f32 1.442695, %v3107_v24  ;;  %v3125_v31 = vmul.f32 1.442695, %v3108_v21  ;;  %v3127_v39 = vmul.f32 1.442695, %v3109_v41  ;;  %v11356_v63 = vsub.f32 %v11285_v34, %v2306_v27 }
 0x7a6   : > { %v3129_v38 = vmul.f32 1.442695, %v3110_v22  ;;  %v3131_v50 = vmul.f32 1.442695, %v3111_v25  ;;  %v3133_v16 = vmul.f32 1.442695, %v3112_v29 }
 0x7a7   : > { %10188 = vpow2.f32 %v3123_v30  ;;  %v2308_v51 = vmul.f32 %v11356_v63, %v11356_v63  ;;  %v3135_v56 = vmul.f32 1.442695, %v3113_v37  ;;  %v3137_v40 = vmul.f32 1.442695, %v3114_v42 }
 0x7a8   : > { %10190 = vpow2.f32 %v3125_v31  ;;  %v3139_v34 = vmul.f32 1.442695, %v3115_v47  ;;  %v3141_v18 = vmul.f32 1.442695, %v3116_v52  ;;  %v3143_v2 = vmul.f32 1.442695, %v3117_v62 }
 0x7a9   : > { %10192 = vpow2.f32 %v3127_v39  ;;  %2309 = vadd.xlane.f32.xlu1 %v2308_v51  ;;  %v3145_v28 = vmul.f32 1.442695, %v3118_v43  ;;  %v3147_v9 = vmul.f32 1.442695, %v3119_v54  ;;  %v3149_v59 = vmul.f32 1.442695, %v3120_v20 }
 0x7aa   : > { %10194 = vpow2.f32 %v3129_v38  ;;  %v3151_v13 = vmul.f32 1.442695, %v3121_v26  ;;  %v3153_v11 = vmul.f32 1.442695, %v3122_v49 }
 0x7ab   : > { %10196 = vpow2.f32 %v3131_v50 }
 0x7ac   : > { %10198 = vpow2.f32 %v3133_v16 }
 0x7ad   : > { %10200 = vpow2.f32 %v3135_v56 }
 0x7ae   : > { %10202 = vpow2.f32 %v3137_v40 }
 0x7af   : > { %10204 = vpow2.f32 %v3139_v34 }
 0x7b0   : > { %10206 = vpow2.f32 %v3141_v18 }
 0x7b1   : > { %v10189_v53 = vpop.eup %10188  ;;  %10208 = vpow2.f32 %v3143_v2 }
 0x7b2   : > { %v10191_v3 = vpop.eup %10190  ;;  %10210 = vpow2.f32 %v3145_v28 }
 0x7b3   : > { %v3155_v60 = vadd.f32 %v10191_v3, %v10189_v53  ;;  %v10193_v19 = vpop.eup %10192  ;;  %10212 = vpow2.f32 %v3147_v9 }
 0x7b4   : > { %v10195_v4 = vpop.eup %10194  ;;  %10214 = vpow2.f32 %v3149_v59 }
 0x7b5   : > { %v3156_v6 = vadd.f32 %v10193_v19, %v3155_v60  ;;  %v10197_v14 = vpop.eup %10196  ;;  %10216 = vpow2.f32 %v3151_v13 }
 0x7b6   : > { %v10199_v35 = vpop.eup %10198  ;;  %10218 = vpow2.f32 %v3153_v11 }
 0x7b7   : > { %v3157_v55 = vadd.f32 %v10195_v4, %v3156_v6  ;;  %v10201_v17 = vpop.eup %10200 }
 0x7b8   : > { %v10203_v1 = vpop.eup %10202 }
 0x7b9   : > { %v3158_v32 = vadd.f32 %v10197_v14, %v3157_v55  ;;  %v10205_v8 = vpop.eup %10204 }
 0x7ba   : > { %v10207_v61 = vpop.eup %10206 }
 0x7bb   : > { %v3159_v44 = vadd.f32 %v10199_v35, %v3158_v32  ;;  %v10209_v5 = vpop.eup %10208 }
 0x7bc   : > { %v10211_v27 = vpop.eup %10210 }
 0x7bd   : > { %v3160_v10 = vadd.f32 %v10201_v17, %v3159_v44  ;;  %v10213_v21 = vpop.eup %10212 }
 0x7be   : > { %v10215_v22 = vpop.eup %10214 }
 0x7bf   : > { %v3161_v23 = vadd.f32 %v10203_v1, %v3160_v10  ;;  %v10217_v29 = vpop.eup %10216 }
 0x7c0   : > { %v10219_v42 = vpop.eup %10218 }
 0x7c1   : > { %v3162_v15 = vadd.f32 %v10205_v8, %v3161_v23 }
 0x7c3   : > { %v3163_v33 = vadd.f32 %v10207_v61, %v3162_v15 }
 0x7c5   : > { %v3164_v12 = vadd.f32 %v10209_v5, %v3163_v33 }
 0x7c7   : > { %v3165_v24 = vadd.f32 %v10211_v27, %v3164_v12 }
 0x7c9   : > { %v3166_v41 = vadd.f32 %v10213_v21, %v3165_v24 }
 0x7cb   : > { %v3167_v25 = vadd.f32 %v10215_v22, %v3166_v41 }
 0x7cd   : > { %v3168_v37 = vadd.f32 %v10217_v29, %v3167_v25 }
 0x7cf   : > { %v3169_v47 = vadd.f32 %v10219_v42, %v3168_v37 }
 0x7d1   : > { %v3170_v52 = vrot.slane %v3169_v47, 4 }
 0x7d3   : > { %v3171_v62 = vadd.f32 %v3170_v52, %v3169_v47 }
 0x7d5   : > { %v3172_v43 = vrot.slane %v3171_v62, 2 }
 0x7d7   : > { %v3173_v54 = vadd.f32 %v3172_v43, %v3171_v62 }
 0x7d9   : > { %v3174_v20 = vrot.slane %v3173_v54, 1 }
 0x7db   : > { %v3175_v26 = vadd.f32 %v3174_v20, %v3173_v54 }
 0x7dd   : > { %10220 = vrcp.f32 %v3175_v26 }
 0x7e7   : > { %v10221_v49 = vpop.eup %10220 }
 0x7e8   : > { %v3177_v30 = vmul.f32 %v10221_v49, %v10189_v53  ;;  %v3178_v31 = vmul.f32 %v10221_v49, %v10191_v3  ;;  %v3179_v39 = vmul.f32 %v10221_v49, %v10193_v19  ;;  %v3180_v38 = vmul.f32 %v10221_v49, %v10195_v4 }
 0x7e9   : > { %v3181_v50 = vmul.f32 %v10221_v49, %v10197_v14  ;;  %v3182_v51 = vmul.f32 %v10221_v49, %v10199_v35  ;;  %v3183_v16 = vmul.f32 %v10221_v49, %v10201_v17  ;;  %v3184_v56 = vmul.f32 %v10221_v49, %v10203_v1 }
 0x7ea   : > { %v9792_v40 = vpack.c.bf16 %v3178_v31, %v3177_v30  ;;  %v9795_v34 = vpack.c.bf16 %v3180_v38, %v3179_v39  ;;  %v3185_v60 = vmul.f32 %v10221_v49, %v10205_v8  ;;  %v3186_v18 = vmul.f32 %v10221_v49, %v10207_v61  ;;  %v1804_v31 = vld [vmem:[%s12450_s4] sm:$0xff] }
 0x7eb   : > { %v9798_v6 = vpack.c.bf16 %v3182_v51, %v3181_v50  ;;  %v9801_v2 = vpack.c.bf16 %v3184_v56, %v3183_v16  ;;  %v3187_v55 = vmul.f32 %v10221_v49, %v10209_v5  ;;  %v3188_v28 = vmul.f32 %v10221_v49, %v10211_v27 }
 0x7ec   : > { %9793 = vmatpush3.bf16.msra.mxu1 %v9792_v40  ;;  %v9804_v32 = vpack.c.bf16 %v3186_v18, %v3185_v60  ;;  %v3189_v9 = vmul.f32 %v10221_v49, %v10213_v21  ;;  %v3190_v44 = vmul.f32 %v10221_v49, %v10215_v22  ;;  %v3191_v53 = vmul.f32 %v10221_v49, %v10217_v29 }
 0x7ed   : > { %9794 = vmatprep.subr.bf16.mxu1 %v12455_v48  ;;  %v9807_v3 = vpack.c.bf16 %v3188_v28, %v3187_v55  ;;  %v3192_v19 = vmul.f32 %v10221_v49, %v10219_v42  ;;  %v10529_v42 = vmov 0   ;;  %v1811_v55 = vld [vmem:[%s12451_s5] sm:$0xff]  ;;  %v8045_v28 = vld [vmem:[%s12451_s5 + $0x8] sm:$0xff] }
 0x7ee   : > { %v9810_v4 = vpack.c.bf16 %v3190_v44, %v3189_v9  ;;  %10084 = vset.pattern.permute.xlu0 %v10529_v42  ;;  %10085 = vset.pattern.permute.xlu1 %v10529_v42  ;;  %v8084_v9 = vld [vmem:[%s12450_s4 + $0x18] sm:$0xff]  ;;  %v8065_v44 = vld [vmem:[%s12451_s5 + $0x10] sm:$0xff] }
 0x7ef   : > { %v9813_v14 = vpack.c.bf16 %v3192_v19, %v3191_v53  ;;  %v8085_v53 = vld [vmem:[%s12451_s5 + $0x18] sm:$0xff]  ;;  %v1799_v19 = vstv %s11325_s20 }
 0x7f0   : > { %9796 = vmatpush3.bf16.msra.mxu1 %v9795_v34 }
 0x7f1   : > { %9797 = vmatprep.subr.bf16.mxu1 %v12455_v48 }
 0x7f4   : > { %9799 = vmatpush3.bf16.msra.mxu1 %v9798_v6 }
 0x7f5   : > { %9800 = vmatprep.subr.bf16.mxu1 %v12455_v48 }
 0x7f8   : > { %9802 = vmatpush3.bf16.msra.mxu1 %v9801_v2  ;;  %v8044_v2 = vld [vmem:[%s12450_s4 + $0x8] sm:$0xff] }
 0x7f9   : > { %9803 = vmatprep.subr.bf16.mxu1 %v12455_v48 }
 0x7fc   : > { %9805 = vmatpush3.bf16.msra.mxu1 %v9804_v32  ;;  %v8064_v32 = vld [vmem:[%s12450_s4 + $0x10] sm:$0xff] }
 0x7fd   : > { %9806 = vmatprep.subr.bf16.mxu1 %v12455_v48 }
 0x800   : > { %9808 = vmatpush3.bf16.msra.mxu1 %v9807_v3  ;;  %v8086_v3 = vld [vmem:[%s12448_s2 + $0x60] sm:$0xff] }
 0x801   : > { %9809 = vmatprep.subr.bf16.mxu1 %v12455_v48 }
 0x804   : > { %9811 = vmatpush3.bf16.msra.mxu1 %v9810_v4 }
 0x805   : > { %9812 = vmatprep.subr.bf16.mxu1 %v12455_v48 }
 0x808   : > { %9814 = vmatpush3.bf16.msra.mxu1 %v9813_v14  ;;  %v1800_v14 = vmul.f32 0.0009765625, %v1799_v19 }
 0x80b   : > { %9060 = vmatmul.mubr.f32.vlgmr.msra.gmra.mrb[72].mxu1 %v10833_v7  ;;  %v8082_v7 = vld [vmem:[%s12449_s3 + $0x18] sm:$0xff] }
 0x80c   : > { %9075 = vmatprep.mubr.msk.f32.mxu1 %vm1137_vm1, %v8086_v3 }
 0x836   : > { %v2310_v35 = vpop.xlane.xlu1 %2309 }
 0x837   : > { %v2311_v17 = vrot.slane %v2310_v35, 4 }
 0x839   : > { %v2312_v59 = vadd.f32 %v2311_v17, %v2310_v35  ;;  %v1801_v17 = vadd.f32 1e-05, %v1800_v14 }
 0x83b   : > { %v2313_v10 = vrot.slane %v2312_v59, 2  ;;  %10222 = vrsqrt.f32 %v1801_v17 }
 0x83d   : > { %v2314_v1 = vadd.f32 %v2313_v10, %v2312_v59 }
 0x83f   : > { %v2315_v13 = vrot.slane %v2314_v1, 1 }
 0x841   : > { %v2316_v11 = vadd.f32 %v2315_v13, %v2314_v1 }
 0x842   : > { %v2813_v23 = vpop.f32.mrb[70].mxu1 }
 0x843   : > { %2817 = vadd.xlane.f32.xlu0 %v2813_v23  ;;  %v9000_v8 = vpop.f32.mrb[71].mxu1  ;;  %10030 = vpush %v2316_v11 }
 0x874   : > { %s11372_s26 = spop %10030 }
 0x875   : > { %v2318_v4 = vstv %s11372_s26 }
 0x876   : > { %v2319_v35 = vmul.f32 0.0009765625, %v2318_v4 }
 0x878   : > { %v2320_v59 = vadd.f32 1e-05, %v2319_v35 }
 0x87a   : > { %10224 = vrsqrt.f32 %v2320_v59 }
 0x8d0   : > { %v2818_v15 = vpop.xlane.xlu0 %2817 }
 0x8d1   : > { %v2819_v61 = vrot.slane %v2818_v15, 4 }
 0x8d3   : > { %v2820_v33 = vadd.f32 %v2819_v61, %v2818_v15 }
 0x8d5   : > { %v2821_v5 = vrot.slane %v2820_v33, 2 }
 0x8d7   : > { %v2822_v12 = vadd.f32 %v2821_v5, %v2820_v33 }
 0x8d9   : > { %v2823_v27 = vrot.slane %v2822_v12, 1 }
 0x8db   : > { %v2824_v24 = vadd.f32 %v2823_v27, %v2822_v12 }
 0x8dd   : > { %10032 = vpush %v2824_v24 }
 0x8de   : > { %v3259_v21 = vpop.f32.mrb[72].mxu1 }
 0x8df   : > { %v9061_v41 = vpop.f32.mrb[73].mxu1  ;;  %9063 = vmatpush3.msra.mxu0 %v3259_v21 }
 0x8e0   : > { %9065 = vmatmul.mubr.msk.f32.vlgmr.msra.gmra.mrb[80].mxu0 %vm1331_vm2, %v8082_v7 }
 0x90e   : > { %s10033_s27 = spop %10032 }
 0x90f   : > { %v2826_v22 = vstv %s10033_s27 }
 0x910   : > { %v2827_v25 = vmul.f32 0.0009765625, %v2826_v22 }
 0x912   : > { %v11374_v29 = vsub.f32 %v2813_v23, %v2827_v25  ;;  %v10223_v23 = vpop.eup %10222 }
 0x913   : > { %v10225_v15 = vpop.eup %10224  ;;  %v1803_v33 = vmul.f32 %v10223_v23, %v11272_v36 }
 0x914   : > { %v2829_v37 = vmul.f32 %v11374_v29, %v11374_v29  ;;  %v2322_v24 = vmul.f32 %v10225_v15, %v11356_v63 }
 0x916   : > { %2830 = vadd.xlane.f32.xlu1 %v2829_v37 }
 0x9a3   : > { %v2831_v47 = vpop.xlane.xlu1 %2830 }
 0x9a4   : > { %v2832_v52 = vrot.slane %v2831_v47, 4 }
 0x9a6   : > { %v2833_v62 = vadd.f32 %v2832_v52, %v2831_v47 }
 0x9a8   : > { %v2834_v43 = vrot.slane %v2833_v62, 2 }
 0x9aa   : > { %v2835_v54 = vadd.f32 %v2834_v43, %v2833_v62 }
 0x9ac   : > { %v2836_v20 = vrot.slane %v2835_v54, 1 }
 0x9ae   : > { %v2837_v26 = vadd.f32 %v2836_v20, %v2835_v54 }
 0x9b0   : > { %10034 = vpush %v2837_v26 }
 0x9b3   : > { %v3334_v49 = vpop.f32.mrb[80].mxu0 }
 0x9b4   : > { %3338 = vadd.xlane.f32.xlu0 %v3334_v49  ;;  %v9066_v30 = vpop.f32.mrb[81].mxu0 }
 0x9ca   : > { %1807 = vperm.xlu0 %10084, %v1804_v31  }
 0x9e1   : > { %s11381_s30 = spop %10034 }
 0x9e2   : > { %v2839_v52 = vstv %s11381_s30 }
 0x9e3   : > { %v2840_v63 = vmul.f32 0.0009765625, %v2839_v52 }
 0x9e5   : > { %v2841_v62 = vadd.f32 1e-05, %v2840_v63 }
 0x9e7   : > { %10226 = vrsqrt.f32 %v2841_v62 }
 0xa41   : > { %v3339_v39 = vpop.xlane.xlu0 %3338 }
 0xa42   : > { %v3340_v38 = vrot.slane %v3339_v39, 4 }
 0xa44   : > { %v3341_v50 = vadd.f32 %v3340_v38, %v3339_v39 }
 0xa46   : > { %v3342_v51 = vrot.slane %v3341_v50, 2 }
 0xa48   : > { %v3343_v16 = vadd.f32 %v3342_v51, %v3341_v50 }
 0xa49   : > { %v1808_v61 = vpop.permute.xlu0 %1807 }
 0xa4a   : > { %v3344_v56 = vrot.slane %v3343_v16, 1  ;;  %v1810_v27 = vmul.f32 %v1808_v61, %v1803_v33 }
 0xa4c   : > { %v3345_v40 = vadd.f32 %v3344_v56, %v3343_v16 }
 0xa4e   : > { %10036 = vpush %v3345_v40 }
 0xa7f   : > { %s10037_s7 = spop %10036 }
 0xa80   : > { %v3347_v34 = vstv %s10037_s7 }
 0xa81   : > { %v3348_v60 = vmul.f32 0.0009765625, %v3347_v34 }
 0xa83   : > { %v11383_v18 = vsub.f32 %v3334_v49, %v3348_v60  ;;  %v10227_v49 = vpop.eup %10226 }
 0xa85   : > { %v3350_v6 = vmul.f32 %v11383_v18, %v11383_v18 }
 0xa87   : > { %3351 = vadd.xlane.f32.xlu1 %v3350_v6  ;;  %v8091_v6 = vld [vmem:[%s12448_s2 + $0x88] sm:$0xff] }
 0xa98   : > { %2327 = vperm.xlu1 %10085, %v8044_v2   ;;  %v8092_v2 = vld [vmem:[%s12448_s2 + $0x90] sm:$0xff] }
 0xa9c   : > { %1814 = vperm.xlu1 %10085, %v1811_v55   ;;  %v8093_v55 = vld [vmem:[%s12448_s2 + $0x98] sm:$0xff] }
 0xaa0   : > { %2335 = vperm.xlu1 %10085, %v8045_v28   ;;  %v8094_v28 = vld [vmem:[%s12448_s2 + $0xa0] sm:$0xff] }
 0xaa4   : > { %2848 = vperm.xlu1 %10085, %v8064_v32   ;;  %v8095_v32 = vld [vmem:[%s12448_s2 + $0xa8] sm:$0xff] }
 0xaa8   : > { %3369 = vperm.xlu1 %10085, %v8084_v9  }
 0xaac   : > { %2856 = vperm.xlu1 %10085, %v8065_v44  }
 0xab0   : > { %3377 = vperm.xlu1 %10085, %v8085_v53  }
 0xb14   : > { %v3352_v10 = vpop.xlane.xlu1 %3351 }
 0xb15   : > { %v3353_v1 = vrot.slane %v3352_v10, 4 }
 0xb17   : > { %v3354_v13 = vadd.f32 %v3353_v1, %v3352_v10 }
 0xb18   : > { %v2328_v8 = vpop.permute.xlu1 %2327 }
 0xb19   : > { %v3355_v11 = vrot.slane %v3354_v13, 2  ;;  %v2330_v21 = vmul.f32 %v2328_v8, %v2322_v24 }
 0xb1b   : > { %v3356_v5 = vadd.f32 %v3355_v11, %v3354_v13 }
 0xb1c   : > { %v1815_v12 = vpop.permute.xlu1 %1814 }
 0xb1d   : > { %v3357_v7 = vrot.slane %v3356_v5, 1  ;;  %v1817_v41 = vadd.f32 %v1815_v12, %v1810_v27 }
 0xb1f   : > { %v3358_v22 = vadd.f32 %v3357_v7, %v3356_v5  ;;  %v11417_v42 = vadd.f32 %v1817_v41, %v10781_v45 }
 0xb20   : > { %v2336_v25 = vpop.permute.xlu1 %2335 }
 0xb21   : > { %v2338_v37 = vadd.f32 %v2336_v25, %v2330_v21  ;;  %10038 = vpush %v3358_v22 }
 0xb23   : > { %v11420_v47 = vadd.f32 %v2338_v37, %v10783_v46  ;;  %v2843_v46 = vmul.f32 %v10227_v49, %v11374_v29  ;;  %v8087_v29 = vld [vmem:[%s12448_s2 + $0x68] sm:$0xff] }
 0xb24   : > { %v2849_v20 = vpop.permute.xlu1 %2848 }
 0xb25   : > { %v9815_v36 = vpack.c.bf16 %v11420_v47, %v11417_v42  ;;  %v2851_v39 = vmul.f32 %v2849_v20, %v2843_v46 }
 0xb27   : > { %9816 = vmatprep.subr.bf16.mxu1 %v9815_v36 }
 0xb28   : > { %9818 = vmatpush3.bf16.msra.mxu1 %v9815_v36  ;;  %v3370_v45 = vpop.permute.xlu1 %3369 }
 0xb2c   : > { %v2857_v31 = vpop.permute.xlu1 %2856 }
 0xb2d   : > { %v2859_v50 = vadd.f32 %v2857_v31, %v2851_v39 }
 0xb2f   : > { %v11428_v40 = vadd.f32 %v2859_v50, %v10787_v57  ;;  %v8089_v57 = vld [vmem:[%s12448_s2 + $0x78] sm:$0xff] }
 0xb30   : > { %v3378_v16 = vpop.permute.xlu1 %3377 }
 0xb52   : > { %s10039_s20 = spop %10038 }
 0xb53   : > { %v3360_v43 = vstv %s10039_s20 }
 0xb54   : > { %v3361_v54 = vmul.f32 0.0009765625, %v3360_v43 }
 0xb56   : > { %v3362_v26 = vadd.f32 1e-05, %v3361_v54 }
 0xb58   : > { %10228 = vrsqrt.f32 %v3362_v26 }
 0xb62   : > { %v10229_v30 = vpop.eup %10228 }
 0xb63   : > { %v3364_v38 = vmul.f32 %v10229_v30, %v11383_v18  ;;  %v8088_v18 = vld [vmem:[%s12448_s2 + $0x70] sm:$0xff] }
 0xb65   : > { %v3372_v51 = vmul.f32 %v3370_v45, %v3364_v38 }
 0xb67   : > { %v3380_v56 = vadd.f32 %v3378_v16, %v3372_v51 }
 0xb69   : > { %v11431_v34 = vadd.f32 %v3380_v56, %v10789_v58  ;;  %v8090_v58 = vld [vmem:[%s12448_s2 + $0x80] sm:$0xff] }
 0xb6b   : > { %v9819_v60 = vpack.c.bf16 %v11431_v34, %v11428_v40 }
 0xb6d   : > { %9820 = vmatprep.subr.bf16.mxu1 %v9819_v60 }
 0xb6e   : > { %9822 = vmatpush3.bf16.msra.mxu1 %v9819_v60 }
 0xb6f   : > { %9154 = vmatprep.subr.mxu1 %v12453_v0 }
 0xb71   : > { %9076 = vmatmul.mubr.msk.f32.vlgmr.msra.gmra.mrb[74].mxu1 %vm1137_vm1, %v8087_v29 }
 0xb72   : > { %9078 = vmatprep.mubr.msk.f32.mxu1 %vm1137_vm1, %v8088_v18 }
 0xb75   : > { %9079 = vmatmul.mubr.msk.f32.gmra.mrb[76].mxu1 %vm1137_vm1, %v8089_v57  ;;  %v8096_v57 = vld [vmem:[%s12448_s2 + $0xb0] sm:$0xff] }
 0xb76   : > { %9081 = vmatprep.mubr.msk.f32.mxu1 %vm1137_vm1, %v8090_v58  ;;  %v8097_v58 = vld [vmem:[%s12448_s2 + $0xb8] sm:$0xff] }
 0xb79   : > { %9082 = vmatmul.mubr.msk.f32.gmra.mrb[78].mxu1 %vm1137_vm1, %v8091_v6 }
 0xb7a   : > { %9084 = vmatprep.mubr.msk.f32.mxu1 %vm1137_vm1, %v8092_v2 }
 0xb7d   : > { %9085 = vmatmul.mubr.msk.f32.gmra.mrb[80].mxu1 %vm1137_vm1, %v8093_v55 }
 0xb7e   : > { %9087 = vmatprep.mubr.msk.f32.mxu1 %vm1137_vm1, %v8094_v28 }
 0xb81   : > { %9088 = vmatmul.mubr.msk.f32.gmra.mrb[82].mxu1 %vm1137_vm1, %v8095_v32 }
 0xb82   : > { %9090 = vmatprep.mubr.msk.f32.mxu1 %vm1137_vm1, %v8096_v57 }
 0xb85   : > { %9091 = vmatmul.mubr.msk.f32.gmra.mrb[84].mxu1 %vm1137_vm1, %v8097_v58 }
 0xb86   : > { %9156 = vmatprep.mubr.msk.f32.mxu1 %vm10528_vm3, %v12453_v0 }
 0xc44   : > { %v11472_v9 = vpop.f32.mrb[74].mxu1 }
 0xc45   : > { %v11474_v44 = vpop.f32.mrb[75].mxu1 }
 0xc48   : > { %v11476_v53 = vpop.f32.mrb[76].mxu1 }
 0xc49   : > { %v11478_v3 = vpop.f32.mrb[77].mxu1 }
 0xc4c   : > { %v11480_v19 = vpop.f32.mrb[78].mxu1 }
 0xc4d   : > { %v3517_v4 = vpop.f32.mrb[79].mxu1 }
 0xc4e   : > { %9093 = vmatprep.subr.mxu0 %v3517_v4 }
 0xc4f   : > { %9094 = vmatpush3.msra.mxu0 %v3517_v4 }
 0xc50   : > { %v11482_v14 = vpop.f32.mrb[80].mxu1  ;;  %9823 = vmatprep.subr.bf16.mxu0 %v12455_v48 }
 0xc51   : > { %v11485_v35 = vpop.f32.mrb[81].mxu1 }
 0xc54   : > { %v9089_v17 = vpop.f32.mrb[82].mxu1 }
 0xc55   : > { %v3537_v59 = vpop.f32.mrb[83].mxu1  ;;  %4077 = vxpose.xlu0.b32.start.end [1/1] (short) %v9089_v17, 128 }
 0xc56   : > { %3556 = vxpose.xlu1.b32.start.end [1/1] (short) %v3537_v59, 128 }
 0xcd6   : > { %v3572_v10 = vpop.trf.xlu1 }
 0xcd7   : > { %9095 = vmatprep.mubr.msk.f32.mxu0 %vm1331_vm2, %v3572_v10 }
 0xcda   : > { %v3573_v1 = vpop.trf.xlu1 }
 0xcdb   : > { %9096 = vmatmul.mubr.msk.f32.vlgmr.msra.gmra.mrb[82].mxu0 %vm1331_vm2, %v3573_v1 }
 0xcde   : > { %v3574_v13 = vpop.trf.xlu1 }
 0xcdf   : > { %9098 = vmatprep.mubr.msk.f32.mxu0 %vm1331_vm2, %v3574_v13 }
 0xce2   : > { %v3575_v23 = vpop.trf.xlu1 }
 0xce3   : > { %9099 = vmatmul.mubr.msk.f32.gmra.mrb[84].mxu0 %vm1331_vm2, %v3575_v23 }
 0xce6   : > { %v3576_v8 = vpop.trf.xlu1 }
 0xce7   : > { %9101 = vmatprep.mubr.msk.f32.mxu0 %vm1331_vm2, %v3576_v8 }
 0xcea   : > { %v3577_v11 = vpop.trf.xlu1 }
 0xceb   : > { %9102 = vmatmul.mubr.msk.f32.gmra.mrb[86].mxu0 %vm1331_vm2, %v3577_v11 }
 0xcee   : > { %v3578_v15 = vpop.trf.xlu1 }
 0xcef   : > { %9104 = vmatprep.mubr.msk.f32.mxu0 %vm1331_vm2, %v3578_v15 }
 0xcf2   : > { %v3579_v61 = vpop.trf.xlu1 }
 0xcf3   : > { %9105 = vmatmul.mubr.msk.f32.gmra.mrb[88].mxu0 %vm1331_vm2, %v3579_v61 }
 0xcf6   : > { %v3580_v33 = vpop.trf.xlu1 }
 0xcf7   : > { %9107 = vmatprep.mubr.msk.f32.mxu0 %vm1331_vm2, %v3580_v33 }
 0xcfa   : > { %v3581_v5 = vpop.trf.xlu1 }
 0xcfb   : > { %9108 = vmatmul.mubr.msk.f32.gmra.mrb[90].mxu0 %vm1331_vm2, %v3581_v5 }
 0xcfe   : > { %v3582_v12 = vpop.trf.xlu1 }
 0xcff   : > { %9110 = vmatprep.mubr.msk.f32.mxu0 %vm1331_vm2, %v3582_v12 }
 0xd02   : > { %v3583_v27 = vpop.trf.xlu1 }
 0xd03   : > { %9111 = vmatmul.mubr.msk.f32.gmra.mrb[92].mxu0 %vm1331_vm2, %v3583_v27 }
 0xd06   : > { %v3584_v24 = vpop.trf.xlu1 }
 0xd07   : > { %9113 = vmatprep.mubr.msk.f32.mxu0 %vm1331_vm2, %v3584_v24 }
 0xd0a   : > { %v3585_v7 = vpop.trf.xlu1 }
 0xd0b   : > { %9114 = vmatmul.mubr.msk.f32.gmra.mrb[94].mxu0 %vm1331_vm2, %v3585_v7 }
 0xd0e   : > { %v3586_v21 = vpop.trf.xlu1 }
 0xd0f   : > { %9116 = vmatprep.mubr.msk.f32.mxu0 %vm1331_vm2, %v3586_v21 }
 0xd12   : > { %v3587_v41 = vpop.trf.xlu1 }
 0xd13   : > { %9117 = vmatmul.mubr.msk.f32.gmra.mrb[96].mxu0 %vm1331_vm2, %v3587_v41 }
 0xd14   : > { %9151 = vmatprep.mubr.msk.f32.mxu0 %vm10528_vm3, %v12453_v0 }
 0xdae   : > { %v9097_v22 = vpop.f32.mrb[82].mxu0 }
 0xdaf   : > { %v3702_v25 = vpop.f32.mrb[83].mxu0 }
 0xdb6   : > { %v9100_v37 = vpop.f32.mrb[84].mxu0 }
 0xdb7   : > { %v3712_v36 = vpop.f32.mrb[85].mxu0 }
 0xdbe   : > { %v11505_v52 = vpop.f32.mrb[86].mxu0 }
 0xdbf   : > { %v3782_v63 = vmax.f32 %v9097_v22, %v11505_v52  ;;  %v3722_v62 = vpop.f32.mrb[87].mxu0 }
 0xdc0   : > { %v3781_v43 = vmax.f32 %v3702_v25, %v3722_v62 }
 0xdc6   : > { %v11508_v54 = vpop.f32.mrb[88].mxu0 }
 0xdc7   : > { %v3784_v20 = vmax.f32 %v9100_v37, %v11508_v54  ;;  %v3732_v26 = vpop.f32.mrb[89].mxu0 }
 0xdc8   : > { %v3783_v45 = vmax.f32 %v3712_v36, %v3732_v26 }
 0xdce   : > { %v11511_v49 = vpop.f32.mrb[90].mxu0 }
 0xdcf   : > { %v3786_v46 = vmax.f32 %v3782_v63, %v11511_v49  ;;  %v3742_v30 = vpop.f32.mrb[91].mxu0 }
 0xdd0   : > { %v3785_v31 = vmax.f32 %v3781_v43, %v3742_v30 }
 0xdd6   : > { %v11514_v39 = vpop.f32.mrb[92].mxu0 }
 0xdd7   : > { %v3788_v38 = vmax.f32 %v3784_v20, %v11514_v39  ;;  %v11517_v50 = vpop.f32.mrb[93].mxu0 }
 0xdd8   : > { %v3787_v51 = vmax.f32 %v3783_v45, %v11517_v50 }
 0xdde   : > { %v11520_v16 = vpop.f32.mrb[94].mxu0 }
 0xddf   : > { %v3790_v56 = vmax.f32 %v3786_v46, %v11520_v16  ;;  %v11523_v60 = vpop.f32.mrb[95].mxu0 }
 0xde0   : > { %v3789_v29 = vmax.f32 %v3785_v31, %v11523_v60 }
 0xde2   : > { %v3793_v18 = vmax.f32 %v3789_v29, %v3790_v56 }
 0xde6   : > { %v11533_v6 = vpop.f32.mrb[96].mxu0 }
 0xde7   : > { %v3792_v2 = vmax.f32 %v3788_v38, %v11533_v6  ;;  %v11537_v55 = vpop.f32.mrb[97].mxu0 }
 0xde8   : > { %v3791_v28 = vmax.f32 %v3787_v51, %v11537_v55 }
 0xdea   : > { %v3794_v32 = vmax.f32 %v3791_v28, %v3792_v2 }
 0xdec   : > { %v3795_v4 = vmax.f32 %v3793_v18, %v3794_v32 }
 0xdee   : > { %v3796_v17 = vrot.slane %v3795_v4, 4 }
 0xdf0   : > { %v3797_v59 = vmax.f32 %v3795_v4, %v3796_v17 }
 0xdf2   : > { %v3798_v10 = vrot.slane %v3797_v59, 2 }
 0xdf4   : > { %v3799_v1 = vmax.f32 %v3797_v59, %v3798_v10 }
 0xdf6   : > { %v3800_v13 = vrot.slane %v3799_v1, 1 }
 0xdf8   : > { %v3801_v23 = vmax.f32 %v3799_v1, %v3800_v13 }
 0xdfa   : > { %v3802_v8 = vsub.f32 %v3702_v25, %v3801_v23  ;;  %v3803_v11 = vsub.f32 %v9097_v22, %v3801_v23  ;;  %v3804_v15 = vsub.f32 %v3712_v36, %v3801_v23  ;;  %v3805_v61 = vsub.f32 %v9100_v37, %v3801_v23 }
 0xdfb   : > { %v3806_v33 = vsub.f32 %v3722_v62, %v3801_v23  ;;  %v3807_v5 = vsub.f32 %v11505_v52, %v3801_v23  ;;  %v3808_v12 = vsub.f32 %v3732_v26, %v3801_v23  ;;  %v3809_v27 = vsub.f32 %v11508_v54, %v3801_v23 }
 0xdfc   : > { %v3810_v24 = vsub.f32 %v3742_v30, %v3801_v23  ;;  %v3811_v7 = vsub.f32 %v11511_v49, %v3801_v23  ;;  %v3812_v21 = vsub.f32 %v11517_v50, %v3801_v23  ;;  %v3813_v41 = vsub.f32 %v11514_v39, %v3801_v23 }
 0xdfd   : > { %v3814_v63 = vsub.f32 %v11523_v60, %v3801_v23  ;;  %v3815_v25 = vsub.f32 %v11520_v16, %v3801_v23  ;;  %v3816_v22 = vsub.f32 %v11537_v55, %v3801_v23  ;;  %v3817_v37 = vsub.f32 %v11533_v6, %v3801_v23 }
 0xdfe   : > { %v3818_v36 = vmul.f32 1.442695, %v3802_v8  ;;  %v3820_v52 = vmul.f32 1.442695, %v3803_v11  ;;  %v3822_v62 = vmul.f32 1.442695, %v3804_v15 }
 0xdff   : > { %v3824_v43 = vmul.f32 1.442695, %v3805_v61  ;;  %v3826_v54 = vmul.f32 1.442695, %v3806_v33  ;;  %v3828_v20 = vmul.f32 1.442695, %v3807_v5 }
 0xe00   : > { %10230 = vpow2.f32 %v3818_v36  ;;  %v3830_v26 = vmul.f32 1.442695, %v3808_v12  ;;  %v3832_v45 = vmul.f32 1.442695, %v3809_v27  ;;  %v3834_v30 = vmul.f32 1.442695, %v3810_v24 }
 0xe01   : > { %10232 = vpow2.f32 %v3820_v52  ;;  %v3836_v38 = vmul.f32 1.442695, %v3811_v7  ;;  %v3838_v16 = vmul.f32 1.442695, %v3812_v21  ;;  %v3840_v29 = vmul.f32 1.442695, %v3813_v41 }
 0xe02   : > { %10234 = vpow2.f32 %v3822_v62  ;;  %v3842_v58 = vmul.f32 1.442695, %v3814_v63  ;;  %v3844_v55 = vmul.f32 1.442695, %v3815_v25  ;;  %v3846_v4 = vmul.f32 1.442695, %v3816_v22 }
 0xe03   : > { %10236 = vpow2.f32 %v3824_v43  ;;  %v3848_v10 = vmul.f32 1.442695, %v3817_v37 }
 0xe04   : > { %10238 = vpow2.f32 %v3826_v54 }
 0xe05   : > { %10240 = vpow2.f32 %v3828_v20 }
 0xe06   : > { %10242 = vpow2.f32 %v3830_v26 }
 0xe07   : > { %10244 = vpow2.f32 %v3832_v45 }
 0xe08   : > { %10246 = vpow2.f32 %v3834_v30 }
 0xe09   : > { %10248 = vpow2.f32 %v3836_v38 }
 0xe0a   : > { %v10231_v49 = vpop.eup %10230  ;;  %10250 = vpow2.f32 %v3838_v16 }
 0xe0b   : > { %v10233_v46 = vpop.eup %10232  ;;  %10252 = vpow2.f32 %v3840_v29 }
 0xe0c   : > { %v3850_v31 = vadd.f32 %v10233_v46, %v10231_v49  ;;  %v10235_v39 = vpop.eup %10234  ;;  %10254 = vpow2.f32 %v3842_v58 }
 0xe0d   : > { %v10237_v51 = vpop.eup %10236  ;;  %10256 = vpow2.f32 %v3844_v55 }
 0xe0e   : > { %v3851_v50 = vadd.f32 %v10235_v39, %v3850_v31  ;;  %v10239_v60 = vpop.eup %10238  ;;  %10258 = vpow2.f32 %v3846_v4 }
 0xe0f   : > { %v10241_v57 = vpop.eup %10240  ;;  %10260 = vpow2.f32 %v3848_v10 }
 0xe10   : > { %v3852_v56 = vadd.f32 %v10237_v51, %v3851_v50  ;;  %v10243_v2 = vpop.eup %10242 }
 0xe11   : > { %v10245_v32 = vpop.eup %10244 }
 0xe12   : > { %v3853_v18 = vadd.f32 %v10239_v60, %v3852_v56  ;;  %v10247_v59 = vpop.eup %10246 }
 0xe13   : > { %v10249_v13 = vpop.eup %10248 }
 0xe14   : > { %v3854_v6 = vadd.f32 %v10241_v57, %v3853_v18  ;;  %v10251_v8 = vpop.eup %10250 }
 0xe15   : > { %v10253_v15 = vpop.eup %10252 }
 0xe16   : > { %v3855_v28 = vadd.f32 %v10243_v2, %v3854_v6  ;;  %v10255_v33 = vpop.eup %10254 }
 0xe17   : > { %v10257_v12 = vpop.eup %10256 }
 0xe18   : > { %v3856_v17 = vadd.f32 %v10245_v32, %v3855_v28  ;;  %v10259_v24 = vpop.eup %10258 }
 0xe19   : > { %v10261_v21 = vpop.eup %10260 }
 0xe1a   : > { %v3857_v1 = vadd.f32 %v10247_v59, %v3856_v17 }
 0xe1c   : > { %v3858_v23 = vadd.f32 %v10249_v13, %v3857_v1 }
 0xe1e   : > { %v3859_v11 = vadd.f32 %v10251_v8, %v3858_v23 }
 0xe20   : > { %v3860_v61 = vadd.f32 %v10253_v15, %v3859_v11 }
 0xe22   : > { %v3861_v5 = vadd.f32 %v10255_v33, %v3860_v61 }
 0xe24   : > { %v3862_v27 = vadd.f32 %v10257_v12, %v3861_v5 }
 0xe26   : > { %v3863_v7 = vadd.f32 %v10259_v24, %v3862_v27 }
 0xe28   : > { %v3864_v41 = vadd.f32 %v10261_v21, %v3863_v7 }
 0xe2a   : > { %v3865_v63 = vrot.slane %v3864_v41, 4 }
 0xe2c   : > { %v3866_v25 = vadd.f32 %v3865_v63, %v3864_v41 }
 0xe2e   : > { %v3867_v22 = vrot.slane %v3866_v25, 2 }
 0xe30   : > { %v3868_v37 = vadd.f32 %v3867_v22, %v3866_v25 }
 0xe32   : > { %v3869_v36 = vrot.slane %v3868_v37, 1 }
 0xe34   : > { %v3870_v52 = vadd.f32 %v3869_v36, %v3868_v37 }
 0xe36   : > { %10262 = vrcp.f32 %v3870_v52 }
 0xe40   : > { %v10263_v62 = vpop.eup %10262 }
 0xe41   : > { %v3872_v43 = vmul.f32 %v10263_v62, %v10231_v49  ;;  %v3873_v54 = vmul.f32 %v10263_v62, %v10233_v46  ;;  %v3874_v20 = vmul.f32 %v10263_v62, %v10235_v39  ;;  %v3875_v26 = vmul.f32 %v10263_v62, %v10237_v51 }
 0xe42   : > { %v3876_v45 = vmul.f32 %v10263_v62, %v10239_v60  ;;  %v3877_v30 = vmul.f32 %v10263_v62, %v10241_v57  ;;  %v3878_v31 = vmul.f32 %v10263_v62, %v10243_v2  ;;  %v3879_v38 = vmul.f32 %v10263_v62, %v10245_v32  ;;  %v9092_v57 = vpop.f32.mrb[84].mxu1  ;;  %v4093_v32 = vpop.trf.xlu0 }
 0xe43   : > { %v9824_v50 = vpack.c.bf16 %v3873_v54, %v3872_v43  ;;  %v9827_v16 = vpack.c.bf16 %v3875_v26, %v3874_v20  ;;  %v3880_v56 = vmul.f32 %v10263_v62, %v10247_v59  ;;  %v3881_v29 = vmul.f32 %v10263_v62, %v10249_v13  ;;  %v3547_v2 = vpop.f32.mrb[85].mxu1  ;;  %5119 = vxpose.xlu1.b32.start.end [1/1] (short) %v9092_v57, 128 }
 0xe44   : > { %v9830_v18 = vpack.c.bf16 %v3877_v30, %v3876_v45  ;;  %v9833_v58 = vpack.c.bf16 %v3879_v38, %v3878_v31  ;;  %v3882_v6 = vmul.f32 %v10263_v62, %v10251_v8  ;;  %v3883_v55 = vmul.f32 %v10263_v62, %v10253_v15  ;;  %4598 = vxpose.xlu0.b32.start.end [1/1] (short) %v3547_v2, 128 }
 0xe45   : > { %9825 = vmatpush3.bf16.msra.mxu0 %v9824_v50  ;;  %v9836_v28 = vpack.c.bf16 %v3881_v29, %v3880_v56  ;;  %v3884_v4 = vmul.f32 %v10263_v62, %v10255_v33  ;;  %v3885_v17 = vmul.f32 %v10263_v62, %v10257_v12  ;;  %v3886_v49 = vmul.f32 %v10263_v62, %v10259_v24 }
 0xe46   : > { %9826 = vmatprep.subr.bf16.mxu0 %v12455_v48  ;;  %v9839_v46 = vpack.c.bf16 %v3883_v55, %v3882_v6  ;;  %v3887_v39 = vmul.f32 %v10263_v62, %v10261_v21  ;;  %v4094_v59 = vpop.trf.xlu0 }
 0xe47   : > { %v9842_v51 = vpack.c.bf16 %v3885_v17, %v3884_v4 }
 0xe48   : > { %v9845_v60 = vpack.c.bf16 %v3887_v39, %v3886_v49 }
 0xe49   : > { %9828 = vmatpush3.bf16.msra.mxu0 %v9827_v16 }
 0xe4a   : > { %9829 = vmatprep.subr.bf16.mxu0 %v12455_v48  ;;  %v4095_v10 = vpop.trf.xlu0 }
 0xe4d   : > { %9831 = vmatpush3.bf16.msra.mxu0 %v9830_v18 }
 0xe4e   : > { %9832 = vmatprep.subr.bf16.mxu0 %v12455_v48  ;;  %v4096_v1 = vpop.trf.xlu0 }
 0xe51   : > { %9834 = vmatpush3.bf16.msra.mxu0 %v9833_v58 }
 0xe52   : > { %9835 = vmatprep.subr.bf16.mxu0 %v12455_v48  ;;  %v4097_v13 = vpop.trf.xlu0 }
 0xe55   : > { %9837 = vmatpush3.bf16.msra.mxu0 %v9836_v28 }
 0xe56   : > { %9838 = vmatprep.subr.bf16.mxu0 %v12455_v48  ;;  %v4098_v23 = vpop.trf.xlu0 }
 0xe59   : > { %9840 = vmatpush3.bf16.msra.mxu0 %v9839_v46 }
 0xe5a   : > { %9841 = vmatprep.subr.bf16.mxu0 %v12455_v48  ;;  %v4099_v8 = vpop.trf.xlu0 }
 0xe5d   : > { %9843 = vmatpush3.bf16.msra.mxu0 %v9842_v51 }
 0xe5e   : > { %9844 = vmatprep.subr.bf16.mxu0 %v12455_v48  ;;  %v4100_v11 = vpop.trf.xlu0 }
 0xe61   : > { %9846 = vmatpush3.bf16.msra.mxu0 %v9845_v60 }
 0xe62   : > { %9220 = vmatprep.subr.mxu0 %v12453_v0  ;;  %v4101_v15 = vpop.trf.xlu0 }
 0xe64   : > { %9152 = vmatmul.mubr.f32.vlgmr.msra.gmra.mrb[98].mxu0 %v11474_v44  ;;  %v8126_v44 = vld [vmem:[%s12449_s3 + $0x20] sm:$0xff] }
 0xe65   : > { %9222 = vmatprep.mubr.msk.f32.mxu0 %vm10528_vm3, %v12453_v0 }
 0xe66   : > { %v4102_v61 = vpop.trf.xlu0 }
 0xe6a   : > { %v4103_v12 = vpop.trf.xlu0 }
 0xe6e   : > { %v4104_v27 = vpop.trf.xlu0 }
 0xe72   : > { %v4105_v24 = vpop.trf.xlu0 }
 0xf37   : > { %v3954_v33 = vpop.f32.mrb[98].mxu0 }
 0xf38   : > { %v9153_v5 = vpop.f32.mrb[99].mxu0  ;;  %9155 = vmatpush3.msra.mxu1 %v3954_v33 }
 0xf39   : > { %9157 = vmatmul.mubr.msk.f32.vlgmr.msra.gmra.mrb[86].mxu1 %vm1331_vm2, %v8126_v44  ;;  %9159 = vmatprep.subr.mxu1 %v11480_v19 }
 0xf3a   : > { %9160 = vmatpush3.msra.mxu1 %v11480_v19  ;;  %9161 = vmatprep.mubr.msk.f32.mxu1 %vm1331_vm2, %v4093_v32  ;;  %v4106_v19 = vpop.trf.xlu0 }
 0xf3b   : > { %9847 = vmatprep.subr.bf16.mxu1 %v12455_v48 }
 0xf3d   : > { %9162 = vmatmul.mubr.msk.f32.vlgmr.msra.gmra.mrb[88].mxu1 %vm1331_vm2, %v4094_v59 }
 0xf3e   : > { %9164 = vmatprep.mubr.msk.f32.mxu1 %vm1331_vm2, %v4095_v10  ;;  %v4107_v7 = vpop.trf.xlu0 }
 0xf41   : > { %9165 = vmatmul.mubr.msk.f32.gmra.mrb[90].mxu1 %vm1331_vm2, %v4096_v1 }
 0xf42   : > { %9167 = vmatprep.mubr.msk.f32.mxu1 %vm1331_vm2, %v4097_v13  ;;  %v4108_v21 = vpop.trf.xlu0 }
 0xf45   : > { %9168 = vmatmul.mubr.msk.f32.gmra.mrb[92].mxu1 %vm1331_vm2, %v4098_v23 }
 0xf46   : > { %9170 = vmatprep.mubr.msk.f32.mxu1 %vm1331_vm2, %v4099_v8  ;;  %v11611_v1 = vpop.trf.xlu0 }
 0xf49   : > { %9171 = vmatmul.mubr.msk.f32.gmra.mrb[94].mxu1 %vm1331_vm2, %v4100_v11 }
 0xf4a   : > { %9173 = vmatprep.mubr.msk.f32.mxu1 %vm1331_vm2, %v4101_v15  ;;  %v11619_v44 = vpop.trf.xlu0 }
 0xf4d   : > { %9174 = vmatmul.mubr.msk.f32.gmra.mrb[96].mxu1 %vm1331_vm2, %v4102_v61 }
 0xf4e   : > { %9176 = vmatprep.mubr.msk.f32.mxu1 %vm1331_vm2, %v4103_v12 }
 0xf51   : > { %9177 = vmatmul.mubr.msk.f32.gmra.mrb[98].mxu1 %vm1331_vm2, %v4104_v27 }
 0xf52   : > { %9179 = vmatprep.mubr.msk.f32.mxu1 %vm1331_vm2, %v4105_v24 }
 0xf55   : > { %9180 = vmatmul.mubr.msk.f32.gmra.mrb[100].mxu1 %vm1331_vm2, %v4106_v19 }
 0xf56   : > { %9182 = vmatprep.mubr.msk.f32.mxu1 %vm1331_vm2, %v4107_v7 }
 0xf59   : > { %9183 = vmatmul.mubr.msk.f32.gmra.mrb[102].mxu1 %vm1331_vm2, %v4108_v21 }
 0xf5a   : > { %9217 = vmatprep.mubr.msk.f32.mxu1 %vm10528_vm3, %v12453_v0 }
0x100c   : > { %v11587_v41 = vpop.f32.mrb[86].mxu1 }
0x100d   : > { %4033 = vadd.xlane.f32.xlu0 %v11587_v41  ;;  %v9158_v63 = vpop.f32.mrb[87].mxu1 }
0x1010   : > { %v9163_v25 = vpop.f32.mrb[88].mxu1 }
0x1011   : > { %v4223_v22 = vpop.f32.mrb[89].mxu1 }
0x1014   : > { %v9166_v37 = vpop.f32.mrb[90].mxu1 }
0x1015   : > { %v4233_v36 = vpop.f32.mrb[91].mxu1 }
0x1018   : > { %v9169_v52 = vpop.f32.mrb[92].mxu1 }
0x1019   : > { %v4303_v62 = vmax.f32 %v9163_v25, %v9169_v52  ;;  %v4243_v43 = vpop.f32.mrb[93].mxu1 }
0x101a   : > { %v4302_v54 = vmax.f32 %v4223_v22, %v4243_v43 }
0x101c   : > { %v9172_v20 = vpop.f32.mrb[94].mxu1 }
0x101d   : > { %v4305_v26 = vmax.f32 %v9166_v37, %v9172_v20  ;;  %v4253_v45 = vpop.f32.mrb[95].mxu1 }
0x101e   : > { %v4304_v30 = vmax.f32 %v4233_v36, %v4253_v45 }
0x1020   : > { %v11590_v31 = vpop.f32.mrb[96].mxu1 }
0x1021   : > { %v4307_v38 = vmax.f32 %v4303_v62, %v11590_v31  ;;  %v4263_v50 = vpop.f32.mrb[97].mxu1 }
0x1022   : > { %v4306_v16 = vmax.f32 %v4302_v54, %v4263_v50 }
0x1024   : > { %v11593_v56 = vpop.f32.mrb[98].mxu1 }
0x1025   : > { %v4309_v29 = vmax.f32 %v4305_v26, %v11593_v56  ;;  %v11596_v18 = vpop.f32.mrb[99].mxu1 }
0x1026   : > { %v4308_v58 = vmax.f32 %v4304_v30, %v11596_v18 }
0x1028   : > { %v11599_v6 = vpop.f32.mrb[100].mxu1 }
0x1029   : > { %v4311_v55 = vmax.f32 %v4307_v38, %v11599_v6  ;;  %v11602_v28 = vpop.f32.mrb[101].mxu1 }
0x102a   : > { %v4310_v4 = vmax.f32 %v4306_v16, %v11602_v28 }
0x102c   : > { %v4314_v17 = vmax.f32 %v4310_v4, %v4311_v55  ;;  %v11605_v49 = vpop.f32.mrb[102].mxu1 }
0x102d   : > { %v4313_v46 = vmax.f32 %v4309_v29, %v11605_v49  ;;  %v11608_v39 = vpop.f32.mrb[103].mxu1 }
0x102e   : > { %v4312_v51 = vmax.f32 %v4308_v58, %v11608_v39 }
0x1030   : > { %v4315_v60 = vmax.f32 %v4312_v51, %v4313_v46 }
0x1032   : > { %v4316_v57 = vmax.f32 %v4314_v17, %v4315_v60 }
0x1034   : > { %v4317_v2 = vrot.slane %v4316_v57, 4 }
0x1036   : > { %v4318_v32 = vmax.f32 %v4316_v57, %v4317_v2 }
0x1038   : > { %v4319_v59 = vrot.slane %v4318_v32, 2 }
0x103a   : > { %v4320_v10 = vmax.f32 %v4318_v32, %v4319_v59 }
0x103c   : > { %v4321_v13 = vrot.slane %v4320_v10, 1 }
0x103e   : > { %v11613_v23 = vmax.f32 %v4320_v10, %v4321_v13 }
0x1040   : > { %v4323_v8 = vsub.f32 %v4223_v22, %v11613_v23  ;;  %v4324_v11 = vsub.f32 %v9163_v25, %v11613_v23  ;;  %v4325_v15 = vsub.f32 %v4233_v36, %v11613_v23  ;;  %v4326_v61 = vsub.f32 %v9166_v37, %v11613_v23 }
0x1041   : > { %v4327_v33 = vsub.f32 %v4243_v43, %v11613_v23  ;;  %v4328_v5 = vsub.f32 %v9169_v52, %v11613_v23  ;;  %v4329_v12 = vsub.f32 %v4253_v45, %v11613_v23  ;;  %v4330_v27 = vsub.f32 %v9172_v20, %v11613_v23  ;;  %v11640_v43 = vpop.trf.xlu0 }
0x1042   : > { %v4331_v24 = vsub.f32 %v4263_v50, %v11613_v23  ;;  %v4332_v19 = vsub.f32 %v11590_v31, %v11613_v23  ;;  %v4333_v7 = vsub.f32 %v11596_v18, %v11613_v23  ;;  %v4334_v21 = vsub.f32 %v11593_v56, %v11613_v23 }
0x1043   : > { %v4335_v63 = vsub.f32 %v11602_v28, %v11613_v23  ;;  %v4336_v25 = vsub.f32 %v11599_v6, %v11613_v23  ;;  %v4337_v22 = vsub.f32 %v11608_v39, %v11613_v23  ;;  %v4338_v37 = vsub.f32 %v11605_v49, %v11613_v23 }
0x1044   : > { %v4339_v36 = vmul.f32 1.442695, %v4323_v8  ;;  %v4341_v52 = vmul.f32 1.442695, %v4324_v11  ;;  %v4343_v62 = vmul.f32 1.442695, %v4325_v15 }
0x1045   : > { %v4345_v54 = vmul.f32 1.442695, %v4326_v61  ;;  %v4347_v20 = vmul.f32 1.442695, %v4327_v33  ;;  %v4349_v26 = vmul.f32 1.442695, %v4328_v5  ;;  %v11642_v45 = vpop.trf.xlu0 }
0x1046   : > { %10264 = vpow2.f32 %v4339_v36  ;;  %v4351_v30 = vmul.f32 1.442695, %v4329_v12  ;;  %v4353_v31 = vmul.f32 1.442695, %v4330_v27  ;;  %v4355_v16 = vmul.f32 1.442695, %v4331_v24 }
0x1047   : > { %10266 = vpow2.f32 %v4341_v52  ;;  %v4357_v58 = vmul.f32 1.442695, %v4332_v19  ;;  %v4359_v28 = vmul.f32 1.442695, %v4333_v7  ;;  %v4361_v49 = vmul.f32 1.442695, %v4334_v21 }
0x1048   : > { %10268 = vpow2.f32 %v4343_v62  ;;  %v4363_v60 = vmul.f32 1.442695, %v4335_v63  ;;  %v4365_v32 = vmul.f32 1.442695, %v4336_v25  ;;  %v4367_v13 = vmul.f32 1.442695, %v4337_v22 }
0x1049   : > { %10270 = vpow2.f32 %v4345_v54  ;;  %v11650_v29 = vpop.trf.xlu0  ;;  %v4369_v15 = vmul.f32 1.442695, %v4338_v37 }
0x104a   : > { %10272 = vpow2.f32 %v4347_v20 }
0x104b   : > { %10274 = vpow2.f32 %v4349_v26 }
0x104c   : > { %10276 = vpow2.f32 %v4351_v30 }
0x104d   : > { %10278 = vpow2.f32 %v4353_v31  ;;  %v11652_v39 = vpop.trf.xlu0 }
0x104e   : > { %10280 = vpow2.f32 %v4355_v16 }
0x104f   : > { %10282 = vpow2.f32 %v4357_v58 }
0x1050   : > { %v11644_v38 = vpop.eup %10264  ;;  %10284 = vpow2.f32 %v4359_v28 }
0x1051   : > { %v11646_v50 = vpop.eup %10266  ;;  %10286 = vpow2.f32 %v4361_v49  ;;  %v11654_v8 = vpop.trf.xlu0 }
0x1052   : > { %v4371_v56 = vadd.f32 %v11646_v50, %v11644_v38  ;;  %v10269_v18 = vpop.eup %10268  ;;  %10288 = vpow2.f32 %v4363_v60 }
0x1053   : > { %v10271_v55 = vpop.eup %10270  ;;  %10290 = vpow2.f32 %v4365_v32 }
0x1054   : > { %v4372_v6 = vadd.f32 %v10269_v18, %v4371_v56  ;;  %v10273_v17 = vpop.eup %10272  ;;  %10292 = vpow2.f32 %v4367_v13 }
0x1055   : > { %v10275_v51 = vpop.eup %10274  ;;  %10294 = vpow2.f32 %v4369_v15  ;;  %v11656_v24 = vpop.trf.xlu0 }
0x1056   : > { %v4373_v4 = vadd.f32 %v10271_v55, %v4372_v6  ;;  %v10277_v2 = vpop.eup %10276 }
0x1057   : > { %v10279_v10 = vpop.eup %10278 }
0x1058   : > { %v4374_v46 = vadd.f32 %v10273_v17, %v4373_v4  ;;  %v10281_v11 = vpop.eup %10280 }
0x1059   : > { %v10283_v33 = vpop.eup %10282  ;;  %v11658_v36 = vpop.trf.xlu0 }
0x105a   : > { %v4375_v57 = vadd.f32 %v10275_v51, %v4374_v46  ;;  %v10285_v12 = vpop.eup %10284 }
0x105b   : > { %v10287_v19 = vpop.eup %10286 }
0x105c   : > { %v4376_v59 = vadd.f32 %v10277_v2, %v4375_v57  ;;  %v10289_v21 = vpop.eup %10288 }
0x105d   : > { %v10291_v25 = vpop.eup %10290  ;;  %v11660_v26 = vpop.trf.xlu0 }
0x105e   : > { %v4377_v23 = vadd.f32 %v10279_v10, %v4376_v59  ;;  %v10293_v52 = vpop.eup %10292 }
0x105f   : > { %v10295_v37 = vpop.eup %10294 }
0x1060   : > { %v4378_v61 = vadd.f32 %v10281_v11, %v4377_v23 }
0x1061   : > { %v11662_v56 = vpop.trf.xlu0 }
0x1062   : > { %v4379_v5 = vadd.f32 %v10283_v33, %v4378_v61 }
0x1064   : > { %v4380_v27 = vadd.f32 %v10285_v12, %v4379_v5 }
0x1065   : > { %v11664_v28 = vpop.trf.xlu0 }
0x1066   : > { %v4381_v7 = vadd.f32 %v10287_v19, %v4380_v27 }
0x1068   : > { %v4382_v63 = vadd.f32 %v10289_v21, %v4381_v7 }
0x1069   : > { %v11666_v4 = vpop.trf.xlu0 }
0x106a   : > { %v4383_v22 = vadd.f32 %v10291_v25, %v4382_v63 }
0x106c   : > { %v4384_v62 = vadd.f32 %v10293_v52, %v4383_v22 }
0x106d   : > { %v11670_v59 = vpop.trf.xlu0 }
0x106e   : > { %v4385_v54 = vadd.f32 %v10295_v37, %v4384_v62 }
0x1070   : > { %v4386_v20 = vrot.slane %v4385_v54, 4 }
0x1072   : > { %v4387_v30 = vadd.f32 %v4386_v20, %v4385_v54 }
0x1074   : > { %v4388_v31 = vrot.slane %v4387_v30, 2 }
0x1076   : > { %v4389_v16 = vadd.f32 %v4388_v31, %v4387_v30 }
0x1078   : > { %v4390_v58 = vrot.slane %v4389_v16, 1 }
0x107a   : > { %v4391_v6 = vadd.f32 %v4390_v58, %v4389_v16 }
0x107c   : > { %10296 = vrcp.f32 %v4391_v6 }
0x1086   : > { %v10297_v49 = vpop.eup %10296 }
0x1087   : > { %v4393_v46 = vmul.f32 %v10297_v49, %v11644_v38  ;;  %v4394_v60 = vmul.f32 %v10297_v49, %v11646_v50  ;;  %v4395_v57 = vmul.f32 %v10297_v49, %v10269_v18  ;;  %v4396_v32 = vmul.f32 %v10297_v49, %v10271_v55 }
0x1088   : > { %v4397_v13 = vmul.f32 %v10297_v49, %v10273_v17  ;;  %v4398_v23 = vmul.f32 %v10297_v49, %v10275_v51  ;;  %v4399_v15 = vmul.f32 %v10297_v49, %v10277_v2  ;;  %v4400_v61 = vmul.f32 %v10297_v49, %v10279_v10  ;;  %v11673_v2 = vpop.trf.xlu0 }
0x1089   : > { %v9848_v5 = vpack.c.bf16 %v4394_v60, %v4393_v46  ;;  %v9851_v27 = vpack.c.bf16 %v4396_v32, %v4395_v57  ;;  %v4401_v7 = vmul.f32 %v10297_v49, %v10281_v11  ;;  %v4402_v63 = vmul.f32 %v10297_v49, %v10283_v33 }
0x108a   : > { %v9854_v22 = vpack.c.bf16 %v4398_v23, %v4397_v13  ;;  %v9857_v62 = vpack.c.bf16 %v4400_v61, %v4399_v15  ;;  %v4403_v54 = vmul.f32 %v10297_v49, %v10285_v12  ;;  %v4404_v20 = vmul.f32 %v10297_v49, %v10287_v19 }
0x108b   : > { %9849 = vmatpush3.bf16.msra.mxu1 %v9848_v5  ;;  %v9860_v38 = vpack.c.bf16 %v4402_v63, %v4401_v7  ;;  %v4405_v30 = vmul.f32 %v10297_v49, %v10289_v21  ;;  %v4406_v50 = vmul.f32 %v10297_v49, %v10291_v25  ;;  %v4407_v18 = vmul.f32 %v10297_v49, %v10293_v52 }
0x108c   : > { %9850 = vmatprep.subr.bf16.mxu1 %v12455_v48  ;;  %v9863_v55 = vpack.c.bf16 %v4404_v20, %v4403_v54  ;;  %v4408_v17 = vmul.f32 %v10297_v49, %v10295_v37  ;;  %v11677_v11 = vpop.trf.xlu0  ;;  %v11692_v49 = vpop.trf.xlu1 }
0x108d   : > { %v9866_v51 = vpack.c.bf16 %v4406_v50, %v4405_v30 }
0x108e   : > { %v9869_v10 = vpack.c.bf16 %v4408_v17, %v4407_v18 }
0x108f   : > { %9852 = vmatpush3.bf16.msra.mxu1 %v9851_v27 }
0x1090   : > { %9853 = vmatprep.subr.bf16.mxu1 %v12455_v48  ;;  %v11694_v46 = vpop.trf.xlu1 }
0x1093   : > { %9855 = vmatpush3.bf16.msra.mxu1 %v9854_v22 }
0x1094   : > { %9856 = vmatprep.subr.bf16.mxu1 %v12455_v48  ;;  %v11696_v60 = vpop.trf.xlu1 }
0x1097   : > { %9858 = vmatpush3.bf16.msra.mxu1 %v9857_v62 }
0x1098   : > { %9859 = vmatprep.subr.bf16.mxu1 %v12455_v48 }
0x109a   : > { %v4034_v33 = vpop.xlane.xlu0 %4033 }
0x109b   : > { %9861 = vmatpush3.bf16.msra.mxu1 %v9860_v38  ;;  %v4035_v12 = vrot.slane %v4034_v33, 4 }
0x109c   : > { %9862 = vmatprep.subr.bf16.mxu1 %v12455_v48 }
0x109d   : > { %v4036_v19 = vadd.f32 %v4035_v12, %v4034_v33 }
0x109f   : > { %v4037_v21 = vrot.slane %v4036_v19, 2  ;;  %9864 = vmatpush3.bf16.msra.mxu1 %v9863_v55  ;;  %v8146_v55 = vld [vmem:[%s12449_s3 + $0x28] sm:$0xff] }
0x10a0   : > { %9865 = vmatprep.subr.bf16.mxu1 %v12455_v48 }
0x10a1   : > { %v4038_v25 = vadd.f32 %v4037_v21, %v4036_v19 }
0x10a3   : > { %9867 = vmatpush3.bf16.msra.mxu1 %v9866_v51  ;;  %v4039_v52 = vrot.slane %v4038_v25, 1 }
0x10a4   : > { %9868 = vmatprep.subr.bf16.mxu1 %v12455_v48 }
0x10a5   : > { %v4040_v37 = vadd.f32 %v4039_v52, %v4038_v25 }
0x10a7   : > { %9870 = vmatpush3.bf16.msra.mxu1 %v9869_v10  ;;  %10040 = vpush %v4040_v37 }
0x10a8   : > { %9286 = vmatprep.subr.mxu1 %v12453_v0 }
0x10aa   : > { %9218 = vmatmul.mubr.f32.vlgmr.msra.gmra.mrb[104].mxu1 %v11472_v9  ;;  %v11698_v9 = vpop.trf.xlu1 }
0x10ab   : > { %9288 = vmatprep.mubr.msk.f32.mxu1 %vm10528_vm3, %v12453_v0 }
0x10ae   : > { %v11700_v57 = vpop.trf.xlu1 }
0x10b2   : > { %v11702_v32 = vpop.trf.xlu1 }
0x10b6   : > { %v11704_v13 = vpop.trf.xlu1 }
0x10d8   : > { %s10041_s29 = spop %10040 }
0x10d9   : > { %v4042_v31 = vstv %s10041_s29 }
0x10da   : > { %v4043_v16 = vmul.f32 0.0009765625, %v4042_v31 }
0x10dc   : > { %v11688_v58 = vsub.f32 %v11587_v41, %v4043_v16  ;;  %v11706_v41 = vpop.trf.xlu1 }
0x10de   : > { %v4045_v6 = vmul.f32 %v11688_v58, %v11688_v58 }
0x10e0   : > { %4046 = vadd.xlane.f32.xlu1 %v4045_v6  ;;  %v11708_v23 = vpop.trf.xlu1 }
0x10e4   : > { %v11710_v15 = vpop.trf.xlu1 }
0x10e8   : > { %v11712_v61 = vpop.trf.xlu1 }
0x10ec   : > { %v11714_v5 = vpop.trf.xlu1 }
0x10f0   : > { %v11716_v27 = vpop.trf.xlu1 }
0x10f4   : > { %v11718_v7 = vpop.trf.xlu1 }
0x10f8   : > { %v11720_v63 = vpop.trf.xlu1 }
0x10fc   : > { %v11722_v22 = vpop.trf.xlu1 }
0x116d   : > { %v4047_v62 = vpop.xlane.xlu1 %4046 }
0x116e   : > { %v4048_v54 = vrot.slane %v4047_v62, 4 }
0x1170   : > { %v4049_v20 = vadd.f32 %v4048_v54, %v4047_v62 }
0x1172   : > { %v4050_v38 = vrot.slane %v4049_v20, 2 }
0x1174   : > { %v4051_v30 = vadd.f32 %v4050_v38, %v4049_v20 }
0x1176   : > { %v4052_v50 = vrot.slane %v4051_v30, 1 }
0x1178   : > { %v4053_v18 = vadd.f32 %v4052_v50, %v4051_v30 }
0x117a   : > { %10042 = vpush %v4053_v18 }
0x117d   : > { %v4475_v17 = vpop.f32.mrb[104].mxu1 }
0x117e   : > { %v9219_v51 = vpop.f32.mrb[105].mxu1  ;;  %9221 = vmatpush3.msra.mxu0 %v4475_v17 }
0x117f   : > { %9223 = vmatmul.mubr.msk.f32.vlgmr.msra.gmra.mrb[100].mxu0 %vm1331_vm2, %v8146_v55  ;;  %9225 = vmatprep.subr.mxu0 %v11485_v35 }
0x1180   : > { %9226 = vmatpush3.msra.mxu0 %v11485_v35  ;;  %9227 = vmatprep.mubr.msk.f32.mxu0 %vm1331_vm2, %v11611_v1 }
0x1181   : > { %9871 = vmatprep.subr.bf16.mxu0 %v12455_v48 }
0x1183   : > { %9228 = vmatmul.mubr.msk.f32.vlgmr.msra.gmra.mrb[102].mxu0 %vm1331_vm2, %v11619_v44 }
0x1184   : > { %9230 = vmatprep.mubr.msk.f32.mxu0 %vm1331_vm2, %v11640_v43 }
0x1187   : > { %9231 = vmatmul.mubr.msk.f32.gmra.mrb[104].mxu0 %vm1331_vm2, %v11642_v45 }
0x1188   : > { %9233 = vmatprep.mubr.msk.f32.mxu0 %vm1331_vm2, %v11650_v29 }
0x118b   : > { %9234 = vmatmul.mubr.msk.f32.gmra.mrb[106].mxu0 %vm1331_vm2, %v11652_v39 }
0x118c   : > { %9236 = vmatprep.mubr.msk.f32.mxu0 %vm1331_vm2, %v11654_v8 }
0x118f   : > { %9237 = vmatmul.mubr.msk.f32.gmra.mrb[108].mxu0 %vm1331_vm2, %v11656_v24 }
0x1190   : > { %9239 = vmatprep.mubr.msk.f32.mxu0 %vm1331_vm2, %v11658_v36 }
0x1193   : > { %9240 = vmatmul.mubr.msk.f32.gmra.mrb[110].mxu0 %vm1331_vm2, %v11660_v26 }
0x1194   : > { %9242 = vmatprep.mubr.msk.f32.mxu0 %vm1331_vm2, %v11662_v56 }
0x1197   : > { %9243 = vmatmul.mubr.msk.f32.gmra.mrb[112].mxu0 %vm1331_vm2, %v11664_v28 }
0x1198   : > { %9245 = vmatprep.mubr.msk.f32.mxu0 %vm1331_vm2, %v11666_v4 }
0x119b   : > { %9246 = vmatmul.mubr.msk.f32.gmra.mrb[114].mxu0 %vm1331_vm2, %v11670_v59 }
0x119c   : > { %9248 = vmatprep.mubr.msk.f32.mxu0 %vm1331_vm2, %v11673_v2 }
0x119f   : > { %9249 = vmatmul.mubr.msk.f32.gmra.mrb[116].mxu0 %vm1331_vm2, %v11677_v11 }
0x11a0   : > { %9283 = vmatprep.mubr.msk.f32.mxu0 %vm10528_vm3, %v12453_v0 }
0x11ab   : > { %s11799_s8 = spop %10042 }
0x1252   : > { %v11765_v35 = vpop.f32.mrb[100].mxu0 }
0x1253   : > { %4554 = vadd.xlane.f32.xlu0 %v11765_v35  ;;  %v9224_v1 = vpop.f32.mrb[101].mxu0 }
0x1256   : > { %v9229_v44 = vpop.f32.mrb[102].mxu0 }
0x1257   : > { %v4744_v43 = vpop.f32.mrb[103].mxu0 }
0x125a   : > { %v9232_v45 = vpop.f32.mrb[104].mxu0 }
0x125b   : > { %v4754_v29 = vpop.f32.mrb[105].mxu0 }
0x125e   : > { %v9235_v39 = vpop.f32.mrb[106].mxu0 }
0x125f   : > { %v4824_v8 = vmax.f32 %v9229_v44, %v9235_v39  ;;  %v4764_v24 = vpop.f32.mrb[107].mxu0 }
0x1260   : > { %v4823_v36 = vmax.f32 %v4744_v43, %v4764_v24 }
0x1262   : > { %v9238_v26 = vpop.f32.mrb[108].mxu0 }
0x1263   : > { %v4826_v56 = vmax.f32 %v9232_v45, %v9238_v26  ;;  %v4774_v28 = vpop.f32.mrb[109].mxu0 }
0x1264   : > { %v4825_v4 = vmax.f32 %v4754_v29, %v4774_v28 }
0x1266   : > { %v9241_v59 = vpop.f32.mrb[110].mxu0 }
0x1267   : > { %v4828_v2 = vmax.f32 %v4824_v8, %v9241_v59  ;;  %v4784_v10 = vpop.f32.mrb[111].mxu0 }
0x1268   : > { %v4827_v11 = vmax.f32 %v4823_v36, %v4784_v10 }
0x126a   : > { %v11768_v33 = vpop.f32.mrb[112].mxu0 }
0x126b   : > { %v4830_v12 = vmax.f32 %v4826_v56, %v11768_v33  ;;  %v4794_v19 = vpop.f32.mrb[113].mxu0 }
0x126c   : > { %v4829_v21 = vmax.f32 %v4825_v4, %v4794_v19 }
0x126e   : > { %v11771_v25 = vpop.f32.mrb[114].mxu0 }
0x126f   : > { %v4832_v52 = vmax.f32 %v4828_v2, %v11771_v25  ;;  %v11774_v37 = vpop.f32.mrb[115].mxu0 }
0x1270   : > { %v4831_v31 = vmax.f32 %v4827_v11, %v11774_v37 }
0x1272   : > { %v4835_v16 = vmax.f32 %v4831_v31, %v4832_v52  ;;  %v11777_v6 = vpop.f32.mrb[116].mxu0 }
0x1273   : > { %v4834_v62 = vmax.f32 %v4830_v12, %v11777_v6  ;;  %v11780_v54 = vpop.f32.mrb[117].mxu0 }
0x1274   : > { %v4833_v20 = vmax.f32 %v4829_v21, %v11780_v54 }
0x1276   : > { %v4836_v38 = vmax.f32 %v4833_v20, %v4834_v62 }
0x1278   : > { %v4837_v30 = vmax.f32 %v4835_v16, %v4836_v38 }
0x127a   : > { %v4838_v50 = vrot.slane %v4837_v30, 4 }
0x127c   : > { %v4839_v18 = vmax.f32 %v4837_v30, %v4838_v50 }
0x127e   : > { %v4840_v55 = vrot.slane %v4839_v18, 2 }
0x1280   : > { %v4841_v17 = vmax.f32 %v4839_v18, %v4840_v55 }
0x1282   : > { %v4842_v51 = vrot.slane %v4841_v17, 1 }
0x1284   : > { %v4843_v1 = vmax.f32 %v4841_v17, %v4842_v51 }
0x1286   : > { %v4844_v8 = vsub.f32 %v4744_v43, %v4843_v1  ;;  %v4845_v36 = vsub.f32 %v9229_v44, %v4843_v1  ;;  %v4846_v56 = vsub.f32 %v4754_v29, %v4843_v1  ;;  %v4847_v4 = vsub.f32 %v9232_v45, %v4843_v1 }
0x1287   : > { %v4848_v2 = vsub.f32 %v4764_v24, %v4843_v1  ;;  %v4849_v11 = vsub.f32 %v9235_v39, %v4843_v1  ;;  %v4850_v52 = vsub.f32 %v4774_v28, %v4843_v1  ;;  %v4851_v12 = vsub.f32 %v9238_v26, %v4843_v1 }
0x1288   : > { %v4852_v31 = vsub.f32 %v4784_v10, %v4843_v1  ;;  %v4853_v0 = vsub.f32 %v9241_v59, %v4843_v1  ;;  %v4854_v48 = vsub.f32 %v4794_v19, %v4843_v1  ;;  %v4855_v21 = vsub.f32 %v11768_v33, %v4843_v1 }
0x1289   : > { %v4856_v16 = vsub.f32 %v11774_v37, %v4843_v1  ;;  %v4857_v62 = vsub.f32 %v11771_v25, %v4843_v1  ;;  %v4858_v20 = vsub.f32 %v11780_v54, %v4843_v1  ;;  %v4859_v43 = vsub.f32 %v11777_v6, %v4843_v1 }
0x128a   : > { %v4860_v44 = vmul.f32 1.442695, %v4844_v8  ;;  %v4862_v29 = vmul.f32 1.442695, %v4845_v36  ;;  %v4864_v45 = vmul.f32 1.442695, %v4846_v56 }
0x128b   : > { %v4866_v39 = vmul.f32 1.442695, %v4847_v4  ;;  %v4868_v24 = vmul.f32 1.442695, %v4848_v2  ;;  %v4870_v26 = vmul.f32 1.442695, %v4849_v11 }
0x128c   : > { %10298 = vpow2.f32 %v4860_v44  ;;  %v4872_v28 = vmul.f32 1.442695, %v4850_v52  ;;  %v4874_v59 = vmul.f32 1.442695, %v4851_v12  ;;  %v4876_v19 = vmul.f32 1.442695, %v4852_v31 }
0x128d   : > { %10300 = vpow2.f32 %v4862_v29  ;;  %v4878_v6 = vmul.f32 1.442695, %v4853_v0  ;;  %v4880_v30 = vmul.f32 1.442695, %v4854_v48  ;;  %v4882_v55 = vmul.f32 1.442695, %v4855_v21 }
0x128e   : > { %10302 = vpow2.f32 %v4864_v45  ;;  %v4884_v1 = vmul.f32 1.442695, %v4856_v16  ;;  %v4886_v56 = vmul.f32 1.442695, %v4857_v62  ;;  %v4888_v0 = vmul.f32 1.442695, %v4858_v20 }
0x128f   : > { %10304 = vpow2.f32 %v4866_v39  ;;  %v4890_v48 = vmul.f32 1.442695, %v4859_v43 }
0x1290   : > { %10306 = vpow2.f32 %v4868_v24 }
0x1291   : > { %10308 = vpow2.f32 %v4870_v26 }
0x1292   : > { %10310 = vpow2.f32 %v4872_v28 }
0x1293   : > { %10312 = vpow2.f32 %v4874_v59 }
0x1294   : > { %10314 = vpow2.f32 %v4876_v19 }
0x1295   : > { %10316 = vpow2.f32 %v4878_v6 }
0x1296   : > { %v10299_v10 = vpop.eup %10298  ;;  %10318 = vpow2.f32 %v4880_v30 }
0x1297   : > { %v10301_v33 = vpop.eup %10300  ;;  %10320 = vpow2.f32 %v4882_v55 }
0x1298   : > { %v4892_v25 = vadd.f32 %v10301_v33, %v10299_v10  ;;  %v10303_v37 = vpop.eup %10302  ;;  %10322 = vpow2.f32 %v4884_v1 }
0x1299   : > { %v10305_v38 = vpop.eup %10304  ;;  %10324 = vpow2.f32 %v4886_v56 }
0x129a   : > { %v4893_v54 = vadd.f32 %v10303_v37, %v4892_v25  ;;  %v10307_v18 = vpop.eup %10306  ;;  %10326 = vpow2.f32 %v4888_v0 }
0x129b   : > { %v10309_v51 = vpop.eup %10308  ;;  %10328 = vpow2.f32 %v4890_v48 }
0x129c   : > { %v4894_v50 = vadd.f32 %v10305_v38, %v4893_v54  ;;  %v10311_v36 = vpop.eup %10310 }
0x129d   : > { %v10313_v2 = vpop.eup %10312 }
0x129e   : > { %v4895_v17 = vadd.f32 %v10307_v18, %v4894_v50  ;;  %v10315_v52 = vpop.eup %10314 }
0x129f   : > { %v10317_v31 = vpop.eup %10316 }
0x12a0   : > { %v4896_v8 = vadd.f32 %v10309_v51, %v4895_v17  ;;  %v10319_v44 = vpop.eup %10318 }
0x12a1   : > { %v10321_v16 = vpop.eup %10320 }
0x12a2   : > { %v4897_v4 = vadd.f32 %v10311_v36, %v4896_v8  ;;  %v10323_v39 = vpop.eup %10322 }
0x12a3   : > { %v10325_v62 = vpop.eup %10324 }
0x12a4   : > { %v4898_v11 = vadd.f32 %v10313_v2, %v4897_v4  ;;  %v10327_v28 = vpop.eup %10326 }
0x12a5   : > { %v10329_v20 = vpop.eup %10328 }
0x12a6   : > { %v4899_v12 = vadd.f32 %v10315_v52, %v4898_v11 }
0x12a8   : > { %v4900_v21 = vadd.f32 %v10317_v31, %v4899_v12 }
0x12aa   : > { %v4901_v29 = vadd.f32 %v10319_v44, %v4900_v21 }
0x12ac   : > { %v4902_v45 = vadd.f32 %v10321_v16, %v4901_v29 }
0x12ae   : > { %v4903_v24 = vadd.f32 %v10323_v39, %v4902_v45 }
0x12b0   : > { %v4904_v26 = vadd.f32 %v10325_v62, %v4903_v24 }
0x12b2   : > { %v4905_v59 = vadd.f32 %v10327_v28, %v4904_v26 }
0x12b4   : > { %v4906_v19 = vadd.f32 %v10329_v20, %v4905_v59 }
0x12b6   : > { %v4907_v25 = vrot.slane %v4906_v19, 4 }
0x12b8   : > { %v4908_v6 = vadd.f32 %v4907_v25, %v4906_v19 }
0x12ba   : > { %v4909_v43 = vrot.slane %v4908_v6, 2 }
0x12bc   : > { %v4910_v54 = vadd.f32 %v4909_v43, %v4908_v6 }
0x12be   : > { %v4911_v30 = vrot.slane %v4910_v54, 1 }
0x12c0   : > { %v4912_v50 = vadd.f32 %v4911_v30, %v4910_v54 }
0x12c2   : > { %10330 = vrcp.f32 %v4912_v50 }
0x12cc   : > { %v10331_v55 = vpop.eup %10330 }
0x12cd   : > { %v4914_v17 = vmul.f32 %v10331_v55, %v10299_v10  ;;  %v4915_v1 = vmul.f32 %v10331_v55, %v10301_v33  ;;  %v4916_v8 = vmul.f32 %v10331_v55, %v10303_v37  ;;  %v4917_v56 = vmul.f32 %v10331_v55, %v10305_v38 }
0x12ce   : > { %v4918_v4 = vmul.f32 %v10331_v55, %v10307_v18  ;;  %v4919_v0 = vmul.f32 %v10331_v55, %v10309_v51  ;;  %v4920_v11 = vmul.f32 %v10331_v55, %v10311_v36  ;;  %v4921_v48 = vmul.f32 %v10331_v55, %v10313_v2 }
0x12cf   : > { %v9872_v12 = vpack.c.bf16 %v4915_v1, %v4914_v17  ;;  %v9875_v21 = vpack.c.bf16 %v4917_v56, %v4916_v8  ;;  %v4922_v29 = vmul.f32 %v10331_v55, %v10315_v52  ;;  %v4923_v45 = vmul.f32 %v10331_v55, %v10317_v31 }
0x12d0   : > { %v9878_v24 = vpack.c.bf16 %v4919_v0, %v4918_v4  ;;  %v9881_v26 = vpack.c.bf16 %v4921_v48, %v4920_v11  ;;  %v4924_v59 = vmul.f32 %v10331_v55, %v10319_v44  ;;  %v4925_v19 = vmul.f32 %v10331_v55, %v10321_v16  ;;  %v8166_v4 = vld [vmem:[%s12449_s3 + $0x30] sm:$0xff] }
0x12d1   : > { %9873 = vmatpush3.bf16.msra.mxu0 %v9872_v12  ;;  %v9884_v25 = vpack.c.bf16 %v4923_v45, %v4922_v29  ;;  %v4926_v6 = vmul.f32 %v10331_v55, %v10323_v39  ;;  %v4927_v43 = vmul.f32 %v10331_v55, %v10325_v62  ;;  %v4928_v10 = vmul.f32 %v10331_v55, %v10327_v28 }
0x12d2   : > { %v12459_v33 = vmov 0.0|0.0   ;;  %v9887_v37 = vpack.c.bf16 %v4925_v19, %v4924_v59  ;;  %v4929_v38 = vmul.f32 %v10331_v55, %v10329_v20  ;;  %v12460_v62 = vmov 0.0  }
0x12d3   : > { %9874 = vmatprep.subr.bf16.mxu0 %v12459_v33  ;;  %v9890_v18 = vpack.c.bf16 %v4927_v43, %v4926_v6 }
0x12d4   : > { %v9893_v51 = vpack.c.bf16 %v4929_v38, %v4928_v10 }
0x12d5   : > { %9876 = vmatpush3.bf16.msra.mxu0 %v9875_v21 }
0x12d6   : > { %9877 = vmatprep.subr.bf16.mxu0 %v12459_v33 }
0x12d9   : > { %9879 = vmatpush3.bf16.msra.mxu0 %v9878_v24 }
0x12da   : > { %9880 = vmatprep.subr.bf16.mxu0 %v12459_v33 }
0x12dd   : > { %9882 = vmatpush3.bf16.msra.mxu0 %v9881_v26 }
0x12de   : > { %9883 = vmatprep.subr.bf16.mxu0 %v12459_v33 }
0x12e0   : > { %v4555_v36 = vpop.xlane.xlu0 %4554 }
0x12e1   : > { %9885 = vmatpush3.bf16.msra.mxu0 %v9884_v25  ;;  %v4556_v2 = vrot.slane %v4555_v36, 4 }
0x12e2   : > { %9886 = vmatprep.subr.bf16.mxu0 %v12459_v33 }
0x12e3   : > { %v4557_v52 = vadd.f32 %v4556_v2, %v4555_v36 }
0x12e5   : > { %v4558_v31 = vrot.slane %v4557_v52, 2  ;;  %9888 = vmatpush3.bf16.msra.mxu0 %v9887_v37 }
0x12e6   : > { %9889 = vmatprep.subr.bf16.mxu0 %v12459_v33 }
0x12e7   : > { %v4559_v44 = vadd.f32 %v4558_v31, %v4557_v52 }
0x12e9   : > { %9891 = vmatpush3.bf16.msra.mxu0 %v9890_v18  ;;  %v4560_v16 = vrot.slane %v4559_v44, 1 }
0x12ea   : > { %9892 = vmatprep.subr.bf16.mxu0 %v12459_v33 }
0x12eb   : > { %v4561_v39 = vadd.f32 %v4560_v16, %v4559_v44 }
0x12ed   : > { %9894 = vmatpush3.bf16.msra.mxu0 %v9893_v51  ;;  %10044 = vpush %v4561_v39 }
0x12ee   : > { %9352 = vmatprep.subr.mxu0 %v12460_v62 }
0x12f0   : > { %9284 = vmatmul.mubr.f32.vlgmr.msra.gmra.mrb[118].mxu0 %v11478_v3 }
0x12f1   : > { %9354 = vmatprep.mubr.msk.f32.mxu0 %vm10528_vm3, %v12460_v62 }
0x131e   : > { %s10045_s9 = spop %10044 }
0x131f   : > { %v4563_v28 = vstv %s10045_s9 }
0x1320   : > { %v4564_v20 = vmul.f32 0.0009765625, %v4563_v28 }
0x1322   : > { %v11802_v54 = vsub.f32 %v11765_v35, %v4564_v20 }
0x1324   : > { %v4566_v30 = vmul.f32 %v11802_v54, %v11802_v54 }
0x1326   : > { %4567 = vadd.xlane.f32.xlu0 %v4566_v30 }
0x13b3   : > { %v4568_v50 = vpop.xlane.xlu0 %4567 }
0x13b4   : > { %v4569_v55 = vrot.slane %v4568_v50, 4 }
0x13b6   : > { %v4570_v17 = vadd.f32 %v4569_v55, %v4568_v50 }
0x13b8   : > { %v4571_v1 = vrot.slane %v4570_v17, 2 }
0x13ba   : > { %v4572_v3 = vadd.f32 %v4571_v1, %v4570_v17 }
0x13bc   : > { %v4573_v8 = vrot.slane %v4572_v3, 1 }
0x13be   : > { %v4574_v56 = vadd.f32 %v4573_v8, %v4572_v3 }
0x13c0   : > { %10046 = vpush %v4574_v56 }
0x13c3   : > { %v4996_v0 = vpop.f32.mrb[118].mxu0 }
0x13c4   : > { %v9285_v11 = vpop.f32.mrb[119].mxu0  ;;  %9287 = vmatpush3.msra.mxu1 %v4996_v0 }
0x13c5   : > { %9289 = vmatmul.mubr.msk.f32.vlgmr.msra.gmra.mrb[106].mxu1 %vm1331_vm2, %v8166_v4  ;;  %9291 = vmatprep.subr.mxu1 %v11482_v14 }
0x13c6   : > { %9292 = vmatpush3.msra.mxu1 %v11482_v14  ;;  %9293 = vmatprep.mubr.msk.f32.mxu1 %vm1331_vm2, %v11692_v49 }
0x13c7   : > { %9895 = vmatprep.subr.bf16.mxu1 %v12459_v33 }
0x13c9   : > { %9294 = vmatmul.mubr.msk.f32.vlgmr.msra.gmra.mrb[108].mxu1 %vm1331_vm2, %v11694_v46 }
0x13ca   : > { %9296 = vmatprep.mubr.msk.f32.mxu1 %vm1331_vm2, %v11696_v60 }
0x13cd   : > { %9297 = vmatmul.mubr.msk.f32.gmra.mrb[110].mxu1 %vm1331_vm2, %v11698_v9 }
0x13ce   : > { %9299 = vmatprep.mubr.msk.f32.mxu1 %vm1331_vm2, %v11700_v57 }
0x13d1   : > { %9300 = vmatmul.mubr.msk.f32.gmra.mrb[112].mxu1 %vm1331_vm2, %v11702_v32 }
0x13d2   : > { %9302 = vmatprep.mubr.msk.f32.mxu1 %vm1331_vm2, %v11704_v13 }
0x13d5   : > { %9303 = vmatmul.mubr.msk.f32.gmra.mrb[114].mxu1 %vm1331_vm2, %v11706_v41 }
0x13d6   : > { %9305 = vmatprep.mubr.msk.f32.mxu1 %vm1331_vm2, %v11708_v23 }
0x13d9   : > { %9306 = vmatmul.mubr.msk.f32.gmra.mrb[116].mxu1 %vm1331_vm2, %v11710_v15 }
0x13da   : > { %9308 = vmatprep.mubr.msk.f32.mxu1 %vm1331_vm2, %v11712_v61 }
0x13dd   : > { %9309 = vmatmul.mubr.msk.f32.gmra.mrb[118].mxu1 %vm1331_vm2, %v11714_v5 }
0x13de   : > { %9311 = vmatprep.mubr.msk.f32.mxu1 %vm1331_vm2, %v11716_v27 }
0x13e1   : > { %9312 = vmatmul.mubr.msk.f32.gmra.mrb[120].mxu1 %vm1331_vm2, %v11718_v7 }
0x13e2   : > { %9314 = vmatprep.mubr.msk.f32.mxu1 %vm1331_vm2, %v11720_v63 }
0x13e5   : > { %9315 = vmatmul.mubr.msk.f32.gmra.mrb[122].mxu1 %vm1331_vm2, %v11722_v22 }
0x13e6   : > { %9349 = vmatprep.mubr.msk.f32.mxu1 %vm10528_vm3, %v12460_v62 }
0x13f1   : > { %s11878_s12 = spop %10046 }
0x1498   : > { %v11847_v14 = vpop.f32.mrb[106].mxu1 }
0x1499   : > { %5075 = vadd.xlane.f32.xlu1 %v11847_v14  ;;  %v9290_v49 = vpop.f32.mrb[107].mxu1 }
0x149c   : > { %v9295_v46 = vpop.f32.mrb[108].mxu1 }
0x149d   : > { %v5265_v60 = vpop.f32.mrb[109].mxu1 }
0x14a0   : > { %v9298_v9 = vpop.f32.mrb[110].mxu1 }
0x14a1   : > { %v5275_v57 = vpop.f32.mrb[111].mxu1 }
0x14a4   : > { %v9301_v32 = vpop.f32.mrb[112].mxu1 }
0x14a5   : > { %v5345_v13 = vmax.f32 %v9295_v46, %v9301_v32  ;;  %v5285_v41 = vpop.f32.mrb[113].mxu1 }
0x14a6   : > { %v5344_v23 = vmax.f32 %v5265_v60, %v5285_v41 }
0x14a8   : > { %v9304_v15 = vpop.f32.mrb[114].mxu1 }
0x14a9   : > { %v5347_v61 = vmax.f32 %v9298_v9, %v9304_v15  ;;  %v5295_v5 = vpop.f32.mrb[115].mxu1 }
0x14aa   : > { %v5346_v27 = vmax.f32 %v5275_v57, %v5295_v5 }
0x14ac   : > { %v9307_v7 = vpop.f32.mrb[116].mxu1 }
0x14ad   : > { %v5349_v63 = vmax.f32 %v5345_v13, %v9307_v7  ;;  %v5305_v22 = vpop.f32.mrb[117].mxu1 }
0x14ae   : > { %v5348_v35 = vmax.f32 %v5344_v23, %v5305_v22 }
0x14b0   : > { %v11850_v48 = vpop.f32.mrb[118].mxu1 }
0x14b1   : > { %v5351_v12 = vmax.f32 %v5347_v61, %v11850_v48  ;;  %v5315_v21 = vpop.f32.mrb[119].mxu1 }
0x14b2   : > { %v5350_v29 = vmax.f32 %v5346_v27, %v5315_v21 }
0x14b4   : > { %v11853_v45 = vpop.f32.mrb[120].mxu1 }
0x14b5   : > { %v5353_v24 = vmax.f32 %v5349_v63, %v11853_v45  ;;  %v11856_v26 = vpop.f32.mrb[121].mxu1 }
0x14b6   : > { %v5352_v59 = vmax.f32 %v5348_v35, %v11856_v26 }
0x14b8   : > { %v5356_v19 = vmax.f32 %v5352_v59, %v5353_v24  ;;  %v11859_v25 = vpop.f32.mrb[122].mxu1 }
0x14b9   : > { %v5355_v6 = vmax.f32 %v5351_v12, %v11859_v25  ;;  %v11862_v43 = vpop.f32.mrb[123].mxu1 }
0x14ba   : > { %v5354_v10 = vmax.f32 %v5350_v29, %v11862_v43 }
0x14bc   : > { %v5357_v37 = vmax.f32 %v5354_v10, %v5355_v6 }
0x14be   : > { %v5358_v38 = vmax.f32 %v5356_v19, %v5357_v37 }
0x14c0   : > { %v5359_v18 = vrot.slane %v5358_v38, 4 }
0x14c2   : > { %v5360_v51 = vmax.f32 %v5358_v38, %v5359_v18 }
0x14c4   : > { %v5361_v36 = vrot.slane %v5360_v51, 2 }
0x14c6   : > { %v5362_v2 = vmax.f32 %v5360_v51, %v5361_v36 }
0x14c8   : > { %v5363_v52 = vrot.slane %v5362_v2, 1 }
0x14ca   : > { %v5364_v31 = vmax.f32 %v5362_v2, %v5363_v52 }
0x14cc   : > { %v5365_v44 = vsub.f32 %v5265_v60, %v5364_v31  ;;  %v5366_v16 = vsub.f32 %v9295_v46, %v5364_v31  ;;  %v5367_v39 = vsub.f32 %v5275_v57, %v5364_v31  ;;  %v5368_v28 = vsub.f32 %v9298_v9, %v5364_v31 }
0x14cd   : > { %v5369_v20 = vsub.f32 %v5285_v41, %v5364_v31  ;;  %v5370_v30 = vsub.f32 %v9301_v32, %v5364_v31  ;;  %v5371_v50 = vsub.f32 %v5295_v5, %v5364_v31  ;;  %v5372_v55 = vsub.f32 %v9304_v15, %v5364_v31 }
0x14ce   : > { %v5373_v17 = vsub.f32 %v5305_v22, %v5364_v31  ;;  %v5374_v1 = vsub.f32 %v9307_v7, %v5364_v31  ;;  %v5375_v3 = vsub.f32 %v5315_v21, %v5364_v31  ;;  %v5376_v8 = vsub.f32 %v11850_v48, %v5364_v31 }
0x14cf   : > { %v5377_v56 = vsub.f32 %v11856_v26, %v5364_v31  ;;  %v5378_v4 = vsub.f32 %v11853_v45, %v5364_v31  ;;  %v5379_v0 = vsub.f32 %v11862_v43, %v5364_v31  ;;  %v5380_v11 = vsub.f32 %v11859_v25, %v5364_v31 }
0x14d0   : > { %v5381_v49 = vmul.f32 1.442695, %v5365_v44  ;;  %v5383_v46 = vmul.f32 1.442695, %v5366_v16  ;;  %v5385_v60 = vmul.f32 1.442695, %v5367_v39 }
0x14d1   : > { %v5387_v9 = vmul.f32 1.442695, %v5368_v28  ;;  %v5389_v57 = vmul.f32 1.442695, %v5369_v20  ;;  %v5391_v32 = vmul.f32 1.442695, %v5370_v30 }
0x14d2   : > { %10332 = vpow2.f32 %v5381_v49  ;;  %v5393_v13 = vmul.f32 1.442695, %v5371_v50  ;;  %v5395_v41 = vmul.f32 1.442695, %v5372_v55  ;;  %v5397_v61 = vmul.f32 1.442695, %v5373_v17 }
0x14d3   : > { %10334 = vpow2.f32 %v5383_v46  ;;  %v5399_v7 = vmul.f32 1.442695, %v5374_v1  ;;  %v5401_v35 = vmul.f32 1.442695, %v5375_v3  ;;  %v5403_v21 = vmul.f32 1.442695, %v5376_v8 }
0x14d4   : > { %10336 = vpow2.f32 %v5385_v60  ;;  %v5405_v24 = vmul.f32 1.442695, %v5377_v56  ;;  %v5407_v19 = vmul.f32 1.442695, %v5378_v4  ;;  %v5409_v43 = vmul.f32 1.442695, %v5379_v0 }
0x14d5   : > { %10338 = vpow2.f32 %v5387_v9  ;;  %v5411_v38 = vmul.f32 1.442695, %v5380_v11 }
0x14d6   : > { %10340 = vpow2.f32 %v5389_v57 }
0x14d7   : > { %10342 = vpow2.f32 %v5391_v32 }
0x14d8   : > { %10344 = vpow2.f32 %v5393_v13 }
0x14d9   : > { %10346 = vpow2.f32 %v5395_v41 }
0x14da   : > { %10348 = vpow2.f32 %v5397_v61 }
0x14db   : > { %10350 = vpow2.f32 %v5399_v7 }
0x14dc   : > { %v10333_v23 = vpop.eup %10332  ;;  %10352 = vpow2.f32 %v5401_v35 }
0x14dd   : > { %v10335_v15 = vpop.eup %10334  ;;  %10354 = vpow2.f32 %v5403_v21 }
0x14de   : > { %v5413_v5 = vadd.f32 %v10335_v15, %v10333_v23  ;;  %v10337_v27 = vpop.eup %10336  ;;  %10356 = vpow2.f32 %v5405_v24 }
0x14df   : > { %v10339_v22 = vpop.eup %10338  ;;  %10358 = vpow2.f32 %v5407_v19 }
0x14e0   : > { %v5414_v63 = vadd.f32 %v10337_v27, %v5413_v5  ;;  %v10341_v12 = vpop.eup %10340  ;;  %10360 = vpow2.f32 %v5409_v43 }
0x14e1   : > { %v10343_v45 = vpop.eup %10342  ;;  %10362 = vpow2.f32 %v5411_v38 }
0x14e2   : > { %v5415_v48 = vadd.f32 %v10339_v22, %v5414_v63  ;;  %v10345_v59 = vpop.eup %10344 }
0x14e3   : > { %v10347_v6 = vpop.eup %10346 }
0x14e4   : > { %v5416_v29 = vadd.f32 %v10341_v12, %v5415_v48  ;;  %v10349_v37 = vpop.eup %10348 }
0x14e5   : > { %v10351_v51 = vpop.eup %10350 }
0x14e6   : > { %v5417_v26 = vadd.f32 %v10343_v45, %v5416_v29  ;;  %v10353_v2 = vpop.eup %10352 }
0x14e7   : > { %v10355_v31 = vpop.eup %10354 }
0x14e8   : > { %v5418_v25 = vadd.f32 %v10345_v59, %v5417_v26  ;;  %v10357_v16 = vpop.eup %10356 }
0x14e9   : > { %v10359_v28 = vpop.eup %10358 }
0x14ea   : > { %v5419_v10 = vadd.f32 %v10347_v6, %v5418_v25  ;;  %v10361_v30 = vpop.eup %10360 }
0x14eb   : > { %v10363_v55 = vpop.eup %10362 }
0x14ec   : > { %v5420_v18 = vadd.f32 %v10349_v37, %v5419_v10 }
0x14ee   : > { %v5421_v36 = vadd.f32 %v10351_v51, %v5420_v18 }
0x14f0   : > { %v5422_v52 = vadd.f32 %v10353_v2, %v5421_v36 }
0x14f2   : > { %v5423_v44 = vadd.f32 %v10355_v31, %v5422_v52 }
0x14f4   : > { %v5424_v39 = vadd.f32 %v10357_v16, %v5423_v44 }
0x14f6   : > { %v5425_v20 = vadd.f32 %v10359_v28, %v5424_v39 }
0x14f8   : > { %v5426_v50 = vadd.f32 %v10361_v30, %v5425_v20 }
0x14fa   : > { %v5427_v17 = vadd.f32 %v10363_v55, %v5426_v50 }
0x14fc   : > { %v5428_v1 = vrot.slane %v5427_v17, 4 }
0x14fe   : > { %v5429_v3 = vadd.f32 %v5428_v1, %v5427_v17  ;;  %v8129_v17 = vld [vmem:[%s12451_s5 + $0x20] sm:$0xff]  ;;  %v8149_v1 = vld [vmem:[%s12451_s5 + $0x28] sm:$0xff] }
0x1500   : > { %v5430_v8 = vrot.slane %v5429_v3, 2 }
0x1502   : > { %v5431_v56 = vadd.f32 %v5430_v8, %v5429_v3  ;;  %v8168_v3 = vld [vmem:[%s12450_s4 + $0x30] sm:$0xff] }
0x1503   : > { %v8169_v8 = vld [vmem:[%s12451_s5 + $0x30] sm:$0xff] }
0x1504   : > { %v5432_v4 = vrot.slane %v5431_v56, 1 }
0x1506   : > { %v5433_v0 = vadd.f32 %v5432_v4, %v5431_v56 }
0x1508   : > { %10364 = vrcp.f32 %v5433_v0 }
0x1512   : > { %v10365_v11 = vpop.eup %10364 }
0x1513   : > { %v5435_v49 = vmul.f32 %v10365_v11, %v10333_v23  ;;  %v5436_v46 = vmul.f32 %v10365_v11, %v10335_v15  ;;  %v5437_v60 = vmul.f32 %v10365_v11, %v10337_v27  ;;  %v5438_v9 = vmul.f32 %v10365_v11, %v10339_v22 }
0x1514   : > { %v5439_v57 = vmul.f32 %v10365_v11, %v10341_v12  ;;  %v5440_v32 = vmul.f32 %v10365_v11, %v10343_v45  ;;  %v5441_v13 = vmul.f32 %v10365_v11, %v10345_v59  ;;  %v5442_v41 = vmul.f32 %v10365_v11, %v10347_v6 }
0x1515   : > { %v9896_v61 = vpack.c.bf16 %v5436_v46, %v5435_v49  ;;  %v9899_v5 = vpack.c.bf16 %v5438_v9, %v5437_v60  ;;  %v5443_v7 = vmul.f32 %v10365_v11, %v10349_v37  ;;  %v5444_v63 = vmul.f32 %v10365_v11, %v10351_v51 }
0x1516   : > { %v9902_v35 = vpack.c.bf16 %v5440_v32, %v5439_v57  ;;  %v9905_v48 = vpack.c.bf16 %v5442_v41, %v5441_v13  ;;  %v5445_v21 = vmul.f32 %v10365_v11, %v10353_v2  ;;  %v5446_v29 = vmul.f32 %v10365_v11, %v10355_v31  ;;  %v8148_v41 = vld [vmem:[%s12450_s4 + $0x28] sm:$0xff] }
0x1517   : > { %9897 = vmatpush3.bf16.msra.mxu1 %v9896_v61  ;;  %v9908_v24 = vpack.c.bf16 %v5444_v63, %v5443_v7  ;;  %v5447_v26 = vmul.f32 %v10365_v11, %v10357_v16  ;;  %v5448_v19 = vmul.f32 %v10365_v11, %v10359_v28  ;;  %v5449_v23 = vmul.f32 %v10365_v11, %v10361_v30  ;;  %v8188_v61 = vld [vmem:[%s12450_s4 + $0x38] sm:$0xff]  ;;  %v8190_v7 = vld [vmem:[%s12448_s2 + $0xc0] sm:$0xff] }
0x1518   : > { %9898 = vmatprep.subr.bf16.mxu1 %v12459_v33  ;;  %v9911_v15 = vpack.c.bf16 %v5446_v29, %v5445_v21  ;;  %v5450_v27 = vmul.f32 %v10365_v11, %v10363_v55  ;;  %v8128_v55 = vld [vmem:[%s12450_s4 + $0x20] sm:$0xff]  ;;  %v4055_v63 = vstv %s11799_s8 }
0x1519   : > { %v9914_v22 = vpack.c.bf16 %v5448_v19, %v5447_v26 }
0x151a   : > { %v9917_v12 = vpack.c.bf16 %v5450_v27, %v5449_v23 }
0x151b   : > { %9900 = vmatpush3.bf16.msra.mxu1 %v9899_v5  ;;  %v8189_v5 = vld [vmem:[%s12451_s5 + $0x38] sm:$0xff] }
0x151c   : > { %9901 = vmatprep.subr.bf16.mxu1 %v12459_v33 }
0x151f   : > { %9903 = vmatpush3.bf16.msra.mxu1 %v9902_v35  ;;  %v4576_v35 = vstv %s11878_s12 }
0x1520   : > { %9904 = vmatprep.subr.bf16.mxu1 %v12459_v33  ;;  %v4577_v21 = vmul.f32 0.0009765625, %v4576_v35 }
0x1523   : > { %9906 = vmatpush3.bf16.msra.mxu1 %v9905_v48  ;;  %v4056_v48 = vmul.f32 0.0009765625, %v4055_v63 }
0x1524   : > { %9907 = vmatprep.subr.bf16.mxu1 %v12459_v33 }
0x1525   : > { %v4057_v29 = vadd.f32 1e-05, %v4056_v48 }
0x1526   : > { %v5076_v45 = vpop.xlane.xlu1 %5075 }
0x1527   : > { %9909 = vmatpush3.bf16.msra.mxu1 %v9908_v24  ;;  %v5077_v59 = vrot.slane %v5076_v45, 4  ;;  %v4578_v24 = vadd.f32 1e-05, %v4577_v21  ;;  %10366 = vrsqrt.f32 %v4057_v29 }
0x1528   : > { %9910 = vmatprep.subr.bf16.mxu1 %v12459_v33 }
0x1529   : > { %v5078_v25 = vadd.f32 %v5077_v59, %v5076_v45  ;;  %10368 = vrsqrt.f32 %v4578_v24 }
0x152b   : > { %v5079_v6 = vrot.slane %v5078_v25, 2  ;;  %9912 = vmatpush3.bf16.msra.mxu1 %v9911_v15 }
0x152c   : > { %9913 = vmatprep.subr.bf16.mxu1 %v12459_v33 }
0x152d   : > { %v5080_v43 = vadd.f32 %v5079_v6, %v5078_v25 }
0x152f   : > { %9915 = vmatpush3.bf16.msra.mxu1 %v9914_v22  ;;  %v5081_v10 = vrot.slane %v5080_v43, 1 }
0x1530   : > { %9916 = vmatprep.subr.bf16.mxu1 %v12459_v33 }
0x1531   : > { %v5082_v37 = vadd.f32 %v5081_v10, %v5080_v43  ;;  %v10367_v15 = vpop.eup %10366 }
0x1532   : > { %v4059_v45 = vmul.f32 %v10367_v15, %v11688_v58 }
0x1533   : > { %9918 = vmatpush3.bf16.msra.mxu1 %v9917_v12  ;;  %10048 = vpush %v5082_v37  ;;  %v10369_v22 = vpop.eup %10368 }
0x1534   : > { %v4580_v6 = vmul.f32 %v10369_v22, %v11802_v54 }
0x1536   : > { %9350 = vmatmul.mubr.f32.vlgmr.msra.gmra.mrb[124].mxu1 %v11476_v53  ;;  %v8186_v53 = vld [vmem:[%s12449_s3 + $0x38] sm:$0xff] }
0x1564   : > { %s10049_s13 = spop %10048 }
0x1565   : > { %v5084_v38 = vstv %s10049_s13 }
0x1566   : > { %v5085_v18 = vmul.f32 0.0009765625, %v5084_v38 }
0x1568   : > { %v11881_v51 = vsub.f32 %v11847_v14, %v5085_v18 }
0x156a   : > { %v5087_v36 = vmul.f32 %v11881_v51, %v11881_v51 }
0x156c   : > { %5088 = vadd.xlane.f32.xlu0 %v5087_v36 }
0x15f9   : > { %v5089_v2 = vpop.xlane.xlu0 %5088 }
0x15fa   : > { %v5090_v52 = vrot.slane %v5089_v2, 4 }
0x15fc   : > { %v5091_v31 = vadd.f32 %v5090_v52, %v5089_v2 }
0x15fe   : > { %v5092_v44 = vrot.slane %v5091_v31, 2 }
0x1600   : > { %v5093_v16 = vadd.f32 %v5092_v44, %v5091_v31 }
0x1602   : > { %v5094_v39 = vrot.slane %v5093_v16, 1 }
0x1604   : > { %v5095_v28 = vadd.f32 %v5094_v39, %v5093_v16 }
0x1606   : > { %10050 = vpush %v5095_v28 }
0x1609   : > { %v5517_v20 = vpop.f32.mrb[124].mxu1 }
0x160a   : > { %v9351_v30 = vpop.f32.mrb[125].mxu1  ;;  %9353 = vmatpush3.msra.mxu0 %v5517_v20 }
0x160b   : > { %9355 = vmatmul.mubr.msk.f32.vlgmr.msra.gmra.mrb[120].mxu0 %vm1331_vm2, %v8186_v53 }
0x160c   : > { %9365 = vmatprep.mubr.msk.f32.mxu0 %vm1137_vm1, %v8190_v7 }
0x1637   : > { %s11904_s28 = spop %10050 }
0x1638   : > { %v5097_v54 = vstv %s11904_s28 }
0x1639   : > { %v5098_v16 = vmul.f32 0.0009765625, %v5097_v54 }
0x163b   : > { %v5099_v39 = vadd.f32 1e-05, %v5098_v16 }
0x163d   : > { %10370 = vrsqrt.f32 %v5099_v39 }
0x1647   : > { %v10371_v30 = vpop.eup %10370 }
0x16de   : > { %v5592_v14 = vpop.f32.mrb[120].mxu0 }
0x16df   : > { %5596 = vadd.xlane.f32.xlu1 %v5592_v14  ;;  %v9356_v50 = vpop.f32.mrb[121].mxu0 }
0x16f0   : > { %4064 = vperm.xlu1 %10085, %v8128_v55  }
0x16f4   : > { %4072 = vperm.xlu1 %10085, %v8129_v17  }
0x16f8   : > { %4593 = vperm.xlu1 %10085, %v8149_v1  }
0x16fc   : > { %5106 = vperm.xlu1 %10085, %v8168_v3  }
0x1700   : > { %5114 = vperm.xlu1 %10085, %v8169_v8  }
0x176c   : > { %v5597_v56 = vpop.xlane.xlu1 %5596 }
0x176d   : > { %v5598_v4 = vrot.slane %v5597_v56, 4 }
0x176f   : > { %v5599_v0 = vadd.f32 %v5598_v4, %v5597_v56 }
0x1770   : > { %v4065_v26 = vpop.permute.xlu1 %4064 }
0x1771   : > { %v5600_v11 = vrot.slane %v5599_v0, 2  ;;  %v4067_v25 = vmul.f32 %v4065_v26, %v4059_v45 }
0x1773   : > { %v5601_v49 = vadd.f32 %v5600_v11, %v5599_v0 }
0x1774   : > { %v4073_v12 = vpop.permute.xlu1 %4072 }
0x1775   : > { %v5602_v46 = vrot.slane %v5601_v49, 1  ;;  %v4075_v37 = vadd.f32 %v4073_v12, %v4067_v25 }
0x1777   : > { %v5603_v60 = vadd.f32 %v5602_v46, %v5601_v49  ;;  %v11924_v31 = vadd.f32 %v4075_v37, %v11417_v42  ;;  %v8192_v46 = vld [vmem:[%s12448_s2 + $0xd0] sm:$0xff] }
0x1778   : > { %v4594_v36 = vpop.permute.xlu1 %4593 }
0x1779   : > { %10052 = vpush %v5603_v60  ;;  %v8195_v60 = vld [vmem:[%s12448_s2 + $0xe8] sm:$0xff] }
0x177c   : > { %v5107_v42 = vpop.permute.xlu1 %5106 }
0x1780   : > { %v5115_v55 = vpop.permute.xlu1 %5114 }
0x17aa   : > { %s10053_s29 = spop %10052 }
0x17ab   : > { %v5605_v9 = vstv %s10053_s29 }
0x17ac   : > { %v5606_v57 = vmul.f32 0.0009765625, %v5605_v9  ;;  %v8196_v9 = vld [vmem:[%s12448_s2 + $0xf0] sm:$0xff] }
0x17ae   : > { %v5607_v32 = vsub.f32 %v5592_v14, %v5606_v57  ;;  %v8197_v57 = vld [vmem:[%s12448_s2 + $0xf8] sm:$0xff] }
0x17b0   : > { %v5608_v13 = vmul.f32 %v5607_v32, %v5607_v32 }
0x17b2   : > { %5609 = vadd.xlane.f32.xlu0 %v5608_v13  ;;  %v8199_v13 = vld [vmem:[%s12448_s2 + $0x108] sm:$0xff] }
0x17c8   : > { %4585 = vperm.xlu0 %10084, %v8148_v41  }
0x17cc   : > { %5627 = vperm.xlu0 %10084, %v8188_v61  }
0x17d0   : > { %5635 = vperm.xlu0 %10084, %v8189_v5  }
0x183f   : > { %v5610_v19 = vpop.xlane.xlu0 %5609 }
0x1840   : > { %v5611_v23 = vrot.slane %v5610_v19, 4 }
0x1842   : > { %v5612_v27 = vadd.f32 %v5611_v23, %v5610_v19 }
0x1844   : > { %v5613_v59 = vrot.slane %v5612_v27, 2 }
0x1846   : > { %v5614_v43 = vadd.f32 %v5613_v59, %v5612_v27 }
0x1847   : > { %v4586_v10 = vpop.permute.xlu0 %4585 }
0x1848   : > { %v4588_v38 = vmul.f32 %v4586_v10, %v4580_v6  ;;  %v5615_v18 = vrot.slane %v5614_v43, 1 }
0x184a   : > { %v4596_v2 = vadd.f32 %v4594_v36, %v4588_v38  ;;  %v5616_v52 = vadd.f32 %v5615_v18, %v5614_v43 }
0x184b   : > { %v5628_v14 = vpop.permute.xlu0 %5627 }
0x184c   : > { %v11927_v44 = vadd.f32 %v4596_v2, %v11420_v47  ;;  %10054 = vpush %v5616_v52  ;;  %v5101_v47 = vmul.f32 %v10371_v30, %v11881_v51  ;;  %v8191_v51 = vld [vmem:[%s12448_s2 + $0xc8] sm:$0xff] }
0x184e   : > { %v9919_v58 = vpack.c.bf16 %v11927_v44, %v11924_v31  ;;  %v5109_v17 = vmul.f32 %v5107_v42, %v5101_v47 }
0x184f   : > { %v5636_v56 = vpop.permute.xlu0 %5635 }
0x1850   : > { %9920 = vmatprep.subr.bf16.mxu0 %v9919_v58  ;;  %v5117_v3 = vadd.f32 %v5115_v55, %v5109_v17 }
0x1851   : > { %9922 = vmatpush3.bf16.msra.mxu0 %v9919_v58 }
0x1852   : > { %v11934_v0 = vadd.f32 %v5117_v3, %v11428_v40  ;;  %v8193_v40 = vld [vmem:[%s12448_s2 + $0xd8] sm:$0xff] }
0x1854   : > { %12461 = vst [vmem:[#allocation2_spill] sm:$0xff] %v11934_v0 }
0x187d   : > { %s10055_s8 = spop %10054 }
0x187e   : > { %v5618_v28 = vstv %s10055_s8 }
0x187f   : > { %v5619_v53 = vmul.f32 0.0009765625, %v5618_v28 }
0x1881   : > { %v5620_v20 = vadd.f32 1e-05, %v5619_v53 }
0x1883   : > { %10372 = vrsqrt.f32 %v5620_v20 }
0x188d   : > { %v10373_v50 = vpop.eup %10372 }
0x188e   : > { %v5622_v1 = vmul.f32 %v10373_v50, %v5607_v32  ;;  %v8198_v32 = vld [vmem:[%s12448_s2 + $0x100] sm:$0xff] }
0x1890   : > { %v5630_v8 = vmul.f32 %v5628_v14, %v5622_v1 }
0x1892   : > { %v5638_v4 = vadd.f32 %v5636_v56, %v5630_v8  ;;  %v8200_v56 = vld [vmem:[%s12448_s2 + $0x110] sm:$0xff] }
0x1894   : > { %v11937_v11 = vadd.f32 %v5638_v4, %v11431_v34  ;;  %v8194_v34 = vld [vmem:[%s12448_s2 + $0xe0] sm:$0xff]  ;;  %v8201_v4 = vld [vmem:[%s12448_s2 + $0x118] sm:$0xff] }
0x1896   : > { %12462 = vst [vmem:[#allocation3_spill] sm:$0xff] %v11937_v11  ;;  %v9923_v49 = vpack.c.bf16 %v11937_v11, %v11934_v0 }
0x1898   : > { %9924 = vmatprep.subr.bf16.mxu0 %v9923_v49 }
0x1899   : > { %9926 = vmatpush3.bf16.msra.mxu0 %v9923_v49 }
0x189a   : > { %9927 = vmatprep.subr.bf16.mxu0 %v12459_v33 }
0x189c   : > { %9366 = vmatmul.mubr.msk.f32.vlgmr.msra.gmra.mrb[122].mxu0 %vm1137_vm1, %v8191_v51 }
0x189d   : > { %9368 = vmatprep.mubr.msk.f32.mxu0 %vm1137_vm1, %v8192_v46 }
0x18a0   : > { %9369 = vmatmul.mubr.msk.f32.gmra.mrb[124].mxu0 %vm1137_vm1, %v8193_v40 }
0x18a1   : > { %9371 = vmatprep.mubr.msk.f32.mxu0 %vm1137_vm1, %v8194_v34 }
0x18a4   : > { %9372 = vmatmul.mubr.msk.f32.gmra.mrb[126].mxu0 %vm1137_vm1, %v8195_v60 }
0x18a5   : > { %9374 = vmatprep.mubr.msk.f32.mxu0 %vm1137_vm1, %v8196_v9 }
0x18a8   : > { %9375 = vmatmul.mubr.msk.f32.gmra.mrb[128].mxu0 %vm1137_vm1, %v8197_v57 }
0x18a9   : > { %9377 = vmatprep.mubr.msk.f32.mxu0 %vm1137_vm1, %v8198_v32 }
0x18ac   : > { %9378 = vmatmul.mubr.msk.f32.gmra.mrb[130].mxu0 %vm1137_vm1, %v8199_v13 }
0x18ad   : > { %9380 = vmatprep.mubr.msk.f32.mxu0 %vm1137_vm1, %v8200_v56 }
0x18b0   : > { %9381 = vmatmul.mubr.msk.f32.gmra.mrb[132].mxu0 %vm1137_vm1, %v8201_v4 }
0x18b1   : > { %9441 = vmatprep.mubr.msk.f32.mxu0 %vm10528_vm3, %v12460_v62 }
0x196f   : > { %v11978_v41 = vpop.f32.mrb[122].mxu0 }
0x1970   : > { %v11980_v61 = vpop.f32.mrb[123].mxu0 }
0x1973   : > { %v11982_v5 = vpop.f32.mrb[124].mxu0 }
0x1974   : > { %v11984_v7 = vpop.f32.mrb[125].mxu0 }
0x1977   : > { %v11986_v63 = vpop.f32.mrb[126].mxu0 }
0x1978   : > { %v5775_v35 = vpop.f32.mrb[127].mxu0 }
0x1979   : > { %9383 = vmatprep.subr.mxu1 %v5775_v35 }
0x197a   : > { %9384 = vmatpush3.msra.mxu1 %v5775_v35 }
0x197b   : > { %v11988_v48 = vpop.f32.mrb[128].mxu0  ;;  %9951 = vmatprep.subr.bf16.mxu1 %v12459_v33 }
0x197c   : > { %v11991_v21 = vpop.f32.mrb[129].mxu0 }
0x197f   : > { %v9379_v29 = vpop.f32.mrb[130].mxu0 }
0x1980   : > { %v5795_v24 = vpop.f32.mrb[131].mxu0  ;;  %6335 = vxpose.xlu0.b32.start.end [1/1] (short) %v9379_v29, 128 }
0x1981   : > { %5814 = vxpose.xlu1.b32.start.end [1/1] (short) %v5795_v24, 128 }
0x1a01   : > { %v5830_v26 = vpop.trf.xlu1 }
0x1a02   : > { %9385 = vmatprep.mubr.msk.f32.mxu1 %vm1331_vm2, %v5830_v26 }
0x1a05   : > { %v5831_v19 = vpop.trf.xlu1 }
0x1a06   : > { %9386 = vmatmul.mubr.msk.f32.vlgmr.msra.gmra.mrb[126].mxu1 %vm1331_vm2, %v5831_v19 }
0x1a09   : > { %v5832_v23 = vpop.trf.xlu1 }
0x1a0a   : > { %9388 = vmatprep.mubr.msk.f32.mxu1 %vm1331_vm2, %v5832_v23 }
0x1a0d   : > { %v5833_v15 = vpop.trf.xlu1 }
0x1a0e   : > { %9389 = vmatmul.mubr.msk.f32.gmra.mrb[128].mxu1 %vm1331_vm2, %v5833_v15 }
0x1a11   : > { %v5834_v27 = vpop.trf.xlu1 }
0x1a12   : > { %9391 = vmatprep.mubr.msk.f32.mxu1 %vm1331_vm2, %v5834_v27 }
0x1a15   : > { %v5835_v22 = vpop.trf.xlu1 }
0x1a16   : > { %9392 = vmatmul.mubr.msk.f32.gmra.mrb[130].mxu1 %vm1331_vm2, %v5835_v22 }
0x1a19   : > { %v5836_v12 = vpop.trf.xlu1 }
0x1a1a   : > { %9394 = vmatprep.mubr.msk.f32.mxu1 %vm1331_vm2, %v5836_v12 }
0x1a1d   : > { %v5837_v45 = vpop.trf.xlu1 }
0x1a1e   : > { %9395 = vmatmul.mubr.msk.f32.gmra.mrb[132].mxu1 %vm1331_vm2, %v5837_v45 }
0x1a21   : > { %v5838_v59 = vpop.trf.xlu1 }
0x1a22   : > { %9397 = vmatprep.mubr.msk.f32.mxu1 %vm1331_vm2, %v5838_v59 }
0x1a25   : > { %v5839_v25 = vpop.trf.xlu1 }
0x1a26   : > { %9398 = vmatmul.mubr.msk.f32.gmra.mrb[134].mxu1 %vm1331_vm2, %v5839_v25 }
0x1a29   : > { %v5840_v6 = vpop.trf.xlu1 }
0x1a2a   : > { %9400 = vmatprep.mubr.msk.f32.mxu1 %vm1331_vm2, %v5840_v6 }
0x1a2d   : > { %v5841_v43 = vpop.trf.xlu1 }
0x1a2e   : > { %9401 = vmatmul.mubr.msk.f32.gmra.mrb[136].mxu1 %vm1331_vm2, %v5841_v43 }
0x1a31   : > { %v5842_v10 = vpop.trf.xlu1 }
0x1a32   : > { %9403 = vmatprep.mubr.msk.f32.mxu1 %vm1331_vm2, %v5842_v10 }
0x1a35   : > { %v5843_v37 = vpop.trf.xlu1 }
0x1a36   : > { %9404 = vmatmul.mubr.msk.f32.gmra.mrb[138].mxu1 %vm1331_vm2, %v5843_v37 }
0x1a39   : > { %v5844_v38 = vpop.trf.xlu1 }
0x1a3a   : > { %9406 = vmatprep.mubr.msk.f32.mxu1 %vm1331_vm2, %v5844_v38 }
0x1a3d   : > { %v5845_v18 = vpop.trf.xlu1 }
0x1a3e   : > { %9407 = vmatmul.mubr.msk.f32.gmra.mrb[140].mxu1 %vm1331_vm2, %v5845_v18 }
0x1a3f   : > { %9507 = vmatprep.mubr.msk.f32.mxu1 %vm10528_vm3, %v12460_v62 }
0x1ad9   : > { %v9387_v36 = vpop.f32.mrb[126].mxu1 }
0x1ada   : > { %v5960_v2 = vpop.f32.mrb[127].mxu1 }
0x1ae1   : > { %v9390_v52 = vpop.f32.mrb[128].mxu1 }
0x1ae2   : > { %v5970_v58 = vpop.f32.mrb[129].mxu1 }
0x1ae9   : > { %v12011_v54 = vpop.f32.mrb[130].mxu1 }
0x1aea   : > { %v6040_v16 = vmax.f32 %v9387_v36, %v12011_v54  ;;  %v5980_v39 = vpop.f32.mrb[131].mxu1 }
0x1aeb   : > { %v6039_v28 = vmax.f32 %v5960_v2, %v5980_v39 }
0x1af1   : > { %v12014_v53 = vpop.f32.mrb[132].mxu1 }
0x1af2   : > { %v6042_v20 = vmax.f32 %v9390_v52, %v12014_v53  ;;  %v5990_v42 = vpop.f32.mrb[133].mxu1 }
0x1af3   : > { %v6041_v30 = vmax.f32 %v5970_v58, %v5990_v42 }
0x1af9   : > { %v12017_v14 = vpop.f32.mrb[134].mxu1 }
0x1afa   : > { %v6044_v47 = vmax.f32 %v6040_v16, %v12017_v14  ;;  %v6000_v50 = vpop.f32.mrb[135].mxu1 }
0x1afb   : > { %v6043_v55 = vmax.f32 %v6039_v28, %v6000_v50 }
0x1b01   : > { %v12020_v17 = vpop.f32.mrb[136].mxu1 }
0x1b02   : > { %v6046_v1 = vmax.f32 %v6042_v20, %v12020_v17  ;;  %v12023_v3 = vpop.f32.mrb[137].mxu1 }
0x1b03   : > { %v6045_v8 = vmax.f32 %v6041_v30, %v12023_v3 }
0x1b09   : > { %v12032_v49 = vpop.f32.mrb[138].mxu1 }
0x1b0a   : > { %v6048_v51 = vmax.f32 %v6044_v47, %v12032_v49  ;;  %v12036_v46 = vpop.f32.mrb[139].mxu1 }
0x1b0b   : > { %v6047_v40 = vmax.f32 %v6043_v55, %v12036_v46 }
0x1b0d   : > { %v6051_v34 = vmax.f32 %v6047_v40, %v6048_v51 }
0x1b11   : > { %v12042_v60 = vpop.f32.mrb[140].mxu1 }
0x1b12   : > { %v6050_v9 = vmax.f32 %v6046_v1, %v12042_v60  ;;  %v12045_v57 = vpop.f32.mrb[141].mxu1 }
0x1b13   : > { %v6049_v32 = vmax.f32 %v6045_v8, %v12045_v57 }
0x1b15   : > { %v6052_v13 = vmax.f32 %v6049_v32, %v6050_v9 }
0x1b17   : > { %v6053_v35 = vmax.f32 %v6051_v34, %v6052_v13 }
0x1b19   : > { %v6054_v29 = vrot.slane %v6053_v35, 4 }
0x1b1b   : > { %v6055_v24 = vmax.f32 %v6053_v35, %v6054_v29 }
0x1b1d   : > { %v6056_v26 = vrot.slane %v6055_v24, 2 }
0x1b1f   : > { %v6057_v19 = vmax.f32 %v6055_v24, %v6056_v26 }
0x1b21   : > { %v6058_v23 = vrot.slane %v6057_v19, 1 }
0x1b23   : > { %v6059_v15 = vmax.f32 %v6057_v19, %v6058_v23 }
0x1b25   : > { %v6060_v27 = vsub.f32 %v5960_v2, %v6059_v15  ;;  %v6061_v22 = vsub.f32 %v9387_v36, %v6059_v15  ;;  %v6062_v12 = vsub.f32 %v5970_v58, %v6059_v15  ;;  %v6063_v45 = vsub.f32 %v9390_v52, %v6059_v15 }
0x1b26   : > { %v6064_v59 = vsub.f32 %v5980_v39, %v6059_v15  ;;  %v6065_v25 = vsub.f32 %v12011_v54, %v6059_v15  ;;  %v6066_v6 = vsub.f32 %v5990_v42, %v6059_v15  ;;  %v6067_v43 = vsub.f32 %v12014_v53, %v6059_v15 }
0x1b27   : > { %v6068_v10 = vsub.f32 %v6000_v50, %v6059_v15  ;;  %v6069_v37 = vsub.f32 %v12017_v14, %v6059_v15  ;;  %v6070_v38 = vsub.f32 %v12023_v3, %v6059_v15  ;;  %v6071_v18 = vsub.f32 %v12020_v17, %v6059_v15 }
0x1b28   : > { %v6072_v16 = vsub.f32 %v12036_v46, %v6059_v15  ;;  %v6073_v2 = vsub.f32 %v12032_v49, %v6059_v15  ;;  %v6074_v36 = vsub.f32 %v12045_v57, %v6059_v15  ;;  %v6075_v52 = vsub.f32 %v12042_v60, %v6059_v15 }
0x1b29   : > { %v6076_v58 = vmul.f32 1.442695, %v6060_v27  ;;  %v6078_v54 = vmul.f32 1.442695, %v6061_v22  ;;  %v6080_v39 = vmul.f32 1.442695, %v6062_v12 }
0x1b2a   : > { %v6082_v28 = vmul.f32 1.442695, %v6063_v45  ;;  %v6084_v53 = vmul.f32 1.442695, %v6064_v59  ;;  %v6086_v20 = vmul.f32 1.442695, %v6065_v25 }
0x1b2b   : > { %10374 = vpow2.f32 %v6076_v58  ;;  %v6088_v42 = vmul.f32 1.442695, %v6066_v6  ;;  %v6090_v30 = vmul.f32 1.442695, %v6067_v43  ;;  %v6092_v50 = vmul.f32 1.442695, %v6068_v10 }
0x1b2c   : > { %10376 = vpow2.f32 %v6078_v54  ;;  %v6094_v1 = vmul.f32 1.442695, %v6069_v37  ;;  %v6096_v56 = vmul.f32 1.442695, %v6070_v38  ;;  %v6098_v51 = vmul.f32 1.442695, %v6071_v18 }
0x1b2d   : > { %10378 = vpow2.f32 %v6080_v39  ;;  %v6100_v34 = vmul.f32 1.442695, %v6072_v16  ;;  %v6102_v57 = vmul.f32 1.442695, %v6073_v2  ;;  %v6104_v35 = vmul.f32 1.442695, %v6074_v36 }
0x1b2e   : > { %10380 = vpow2.f32 %v6082_v28  ;;  %v6106_v26 = vmul.f32 1.442695, %v6075_v52 }
0x1b2f   : > { %10382 = vpow2.f32 %v6084_v53 }
0x1b30   : > { %10384 = vpow2.f32 %v6086_v20 }
0x1b31   : > { %10386 = vpow2.f32 %v6088_v42 }
0x1b32   : > { %10388 = vpow2.f32 %v6090_v30 }
0x1b33   : > { %10390 = vpow2.f32 %v6092_v50 }
0x1b34   : > { %10392 = vpow2.f32 %v6094_v1 }
0x1b35   : > { %v10375_v14 = vpop.eup %10374  ;;  %10394 = vpow2.f32 %v6096_v56 }
0x1b36   : > { %v10377_v47 = vpop.eup %10376  ;;  %10396 = vpow2.f32 %v6098_v51 }
0x1b37   : > { %v6108_v55 = vadd.f32 %v10377_v47, %v10375_v14  ;;  %v10379_v17 = vpop.eup %10378  ;;  %10398 = vpow2.f32 %v6100_v34 }
0x1b38   : > { %v10381_v8 = vpop.eup %10380  ;;  %10400 = vpow2.f32 %v6102_v57 }
0x1b39   : > { %v6109_v3 = vadd.f32 %v10379_v17, %v6108_v55  ;;  %v10383_v49 = vpop.eup %10382  ;;  %10402 = vpow2.f32 %v6104_v35 }
0x1b3a   : > { %v10385_v40 = vpop.eup %10384  ;;  %10404 = vpow2.f32 %v6106_v26 }
0x1b3b   : > { %v6110_v4 = vadd.f32 %v10381_v8, %v6109_v3  ;;  %v10387_v9 = vpop.eup %10386 }
0x1b3c   : > { %v10389_v13 = vpop.eup %10388 }
0x1b3d   : > { %v6111_v46 = vadd.f32 %v10383_v49, %v6110_v4  ;;  %v10391_v24 = vpop.eup %10390 }
0x1b3e   : > { %v10393_v23 = vpop.eup %10392 }
0x1b3f   : > { %v6112_v60 = vadd.f32 %v10385_v40, %v6111_v46  ;;  %v10395_v27 = vpop.eup %10394 }
0x1b40   : > { %v10397_v12 = vpop.eup %10396 }
0x1b41   : > { %v6113_v32 = vadd.f32 %v10387_v9, %v6112_v60  ;;  %v10399_v59 = vpop.eup %10398 }
0x1b42   : > { %v10401_v6 = vpop.eup %10400 }
0x1b43   : > { %v6114_v29 = vadd.f32 %v10389_v13, %v6113_v32  ;;  %v10403_v10 = vpop.eup %10402 }
0x1b44   : > { %v10405_v38 = vpop.eup %10404 }
0x1b45   : > { %v6115_v19 = vadd.f32 %v10391_v24, %v6114_v29 }
0x1b47   : > { %v6116_v15 = vadd.f32 %v10393_v23, %v6115_v19 }
0x1b49   : > { %v6117_v22 = vadd.f32 %v10395_v27, %v6116_v15 }
0x1b4b   : > { %v6118_v45 = vadd.f32 %v10397_v12, %v6117_v22 }
0x1b4d   : > { %v6119_v25 = vadd.f32 %v10399_v59, %v6118_v45 }
0x1b4f   : > { %v6120_v43 = vadd.f32 %v10401_v6, %v6119_v25 }
0x1b51   : > { %v6121_v37 = vadd.f32 %v10403_v10, %v6120_v43 }
0x1b53   : > { %v6122_v18 = vadd.f32 %v10405_v38, %v6121_v37 }
0x1b55   : > { %v6123_v16 = vrot.slane %v6122_v18, 4 }
0x1b57   : > { %v6124_v2 = vadd.f32 %v6123_v16, %v6122_v18 }
0x1b59   : > { %v6125_v36 = vrot.slane %v6124_v2, 2 }
0x1b5b   : > { %v6126_v52 = vadd.f32 %v6125_v36, %v6124_v2 }
0x1b5d   : > { %v6127_v58 = vrot.slane %v6126_v52, 1 }
0x1b5f   : > { %v6128_v54 = vadd.f32 %v6127_v58, %v6126_v52 }
0x1b61   : > { %10406 = vrcp.f32 %v6128_v54 }
0x1b6b   : > { %v10407_v39 = vpop.eup %10406 }
0x1b6c   : > { %v6130_v28 = vmul.f32 %v10407_v39, %v10375_v14  ;;  %v6131_v53 = vmul.f32 %v10407_v39, %v10377_v47  ;;  %v6132_v20 = vmul.f32 %v10407_v39, %v10379_v17  ;;  %v6133_v42 = vmul.f32 %v10407_v39, %v10381_v8 }
0x1b6d   : > { %v6134_v30 = vmul.f32 %v10407_v39, %v10383_v49  ;;  %v6135_v50 = vmul.f32 %v10407_v39, %v10385_v40  ;;  %v6136_v55 = vmul.f32 %v10407_v39, %v10387_v9  ;;  %v6137_v1 = vmul.f32 %v10407_v39, %v10389_v13  ;;  %v9382_v40 = vpop.f32.mrb[132].mxu0  ;;  %v6351_v13 = vpop.trf.xlu0 }
0x1b6e   : > { %v9928_v3 = vpack.c.bf16 %v6131_v53, %v6130_v28  ;;  %v9931_v56 = vpack.c.bf16 %v6133_v42, %v6132_v20  ;;  %v6138_v4 = vmul.f32 %v10407_v39, %v10391_v24  ;;  %v6139_v51 = vmul.f32 %v10407_v39, %v10393_v23  ;;  %v5805_v9 = vpop.f32.mrb[133].mxu0  ;;  %7377 = vxpose.xlu1.b32.start.end [1/1] (short) %v9382_v40, 128 }
0x1b6f   : > { %v9934_v46 = vpack.c.bf16 %v6135_v50, %v6134_v30  ;;  %v9937_v34 = vpack.c.bf16 %v6137_v1, %v6136_v55  ;;  %v6140_v60 = vmul.f32 %v10407_v39, %v10395_v27  ;;  %v6141_v57 = vmul.f32 %v10407_v39, %v10397_v12  ;;  %6856 = vxpose.xlu0.b32.start.end [1/1] (short) %v5805_v9, 128 }
0x1b70   : > { %9929 = vmatpush3.bf16.msra.mxu0 %v9928_v3  ;;  %v9940_v32 = vpack.c.bf16 %v6139_v51, %v6138_v4  ;;  %v6142_v35 = vmul.f32 %v10407_v39, %v10399_v59  ;;  %v6143_v29 = vmul.f32 %v10407_v39, %v10401_v6  ;;  %v6144_v14 = vmul.f32 %v10407_v39, %v10403_v10 }
0x1b71   : > { %9930 = vmatprep.subr.bf16.mxu0 %v12459_v33  ;;  %v9943_v47 = vpack.c.bf16 %v6141_v57, %v6140_v60  ;;  %v6145_v17 = vmul.f32 %v10407_v39, %v10405_v38  ;;  %v6352_v24 = vpop.trf.xlu0 }
0x1b72   : > { %v9946_v8 = vpack.c.bf16 %v6143_v29, %v6142_v35 }
0x1b73   : > { %v9949_v49 = vpack.c.bf16 %v6145_v17, %v6144_v14 }
0x1b74   : > { %9932 = vmatpush3.bf16.msra.mxu0 %v9931_v56 }
0x1b75   : > { %9933 = vmatprep.subr.bf16.mxu0 %v12459_v33  ;;  %v6353_v26 = vpop.trf.xlu0 }
0x1b78   : > { %9935 = vmatpush3.bf16.msra.mxu0 %v9934_v46 }
0x1b79   : > { %9936 = vmatprep.subr.bf16.mxu0 %v12459_v33  ;;  %v6354_v19 = vpop.trf.xlu0 }
0x1b7c   : > { %9938 = vmatpush3.bf16.msra.mxu0 %v9937_v34 }
0x1b7d   : > { %9939 = vmatprep.subr.bf16.mxu0 %v12459_v33  ;;  %v6355_v23 = vpop.trf.xlu0 }
0x1b80   : > { %9941 = vmatpush3.bf16.msra.mxu0 %v9940_v32 }
0x1b81   : > { %9942 = vmatprep.subr.bf16.mxu0 %v12459_v33  ;;  %v6356_v15 = vpop.trf.xlu0 }
0x1b84   : > { %9944 = vmatpush3.bf16.msra.mxu0 %v9943_v47 }
0x1b85   : > { %9945 = vmatprep.subr.bf16.mxu0 %v12459_v33  ;;  %v6357_v27 = vpop.trf.xlu0 }
0x1b88   : > { %9947 = vmatpush3.bf16.msra.mxu0 %v9946_v8 }
0x1b89   : > { %9948 = vmatprep.subr.bf16.mxu0 %v12459_v33  ;;  %v6358_v22 = vpop.trf.xlu0 }
0x1b8c   : > { %9950 = vmatpush3.bf16.msra.mxu0 %v9949_v49 }
0x1b8d   : > { %9444 = vmatprep.subr.mxu0 %v12460_v62  ;;  %v6359_v12 = vpop.trf.xlu0 }
0x1b8f   : > { %9442 = vmatmul.mubr.f32.vlgmr.msra.gmra.mrb[134].mxu0 %v11980_v61  ;;  %v8230_v61 = vld [vmem:[%s12449_s3 + $0x40] sm:$0xff] }
0x1b90   : > { %9446 = vmatprep.mubr.msk.f32.mxu0 %vm10528_vm3, %v12460_v62 }
0x1b91   : > { %v6360_v45 = vpop.trf.xlu0 }
0x1b95   : > { %v6361_v6 = vpop.trf.xlu0 }
0x1b99   : > { %v6362_v43 = vpop.trf.xlu0 }
0x1b9d   : > { %v6363_v10 = vpop.trf.xlu0 }
0x1c62   : > { %v6212_v59 = vpop.f32.mrb[134].mxu0 }
0x1c63   : > { %v9443_v25 = vpop.f32.mrb[135].mxu0  ;;  %9445 = vmatpush3.msra.mxu0 %v6212_v59 }
0x1c64   : > { %9447 = vmatmul.mubr.msk.f32.vlgmr.msra.gmra.mrb[136].mxu0 %vm1331_vm2, %v8230_v61  ;;  %9449 = vmatprep.subr.mxu0 %v11986_v63 }
0x1c65   : > { %9450 = vmatpush3.msra.mxu0 %v11986_v63  ;;  %9451 = vmatprep.mubr.msk.f32.mxu0 %vm1331_vm2, %v6351_v13  ;;  %v6364_v63 = vpop.trf.xlu0 }
0x1c66   : > { %9975 = vmatprep.subr.bf16.mxu0 %v12459_v33 }
0x1c68   : > { %9452 = vmatmul.mubr.msk.f32.vlgmr.msra.gmra.mrb[138].mxu0 %vm1331_vm2, %v6352_v24 }
0x1c69   : > { %9454 = vmatprep.mubr.msk.f32.mxu0 %vm1331_vm2, %v6353_v26  ;;  %v6365_v37 = vpop.trf.xlu0 }
0x1c6c   : > { %9455 = vmatmul.mubr.msk.f32.gmra.mrb[140].mxu0 %vm1331_vm2, %v6354_v19 }
0x1c6d   : > { %9457 = vmatprep.mubr.msk.f32.mxu0 %vm1331_vm2, %v6355_v23  ;;  %v6366_v38 = vpop.trf.xlu0 }
0x1c70   : > { %9458 = vmatmul.mubr.msk.f32.gmra.mrb[142].mxu0 %vm1331_vm2, %v6356_v15 }
0x1c71   : > { %9460 = vmatprep.mubr.msk.f32.mxu0 %vm1331_vm2, %v6357_v27  ;;  %v12117_v19 = vpop.trf.xlu0 }
0x1c74   : > { %9461 = vmatmul.mubr.msk.f32.gmra.mrb[144].mxu0 %vm1331_vm2, %v6358_v22 }
0x1c75   : > { %9463 = vmatprep.mubr.msk.f32.mxu0 %vm1331_vm2, %v6359_v12  ;;  %v12125_v61 = vpop.trf.xlu0 }
0x1c78   : > { %9464 = vmatmul.mubr.msk.f32.gmra.mrb[146].mxu0 %vm1331_vm2, %v6360_v45 }
0x1c79   : > { %9466 = vmatprep.mubr.msk.f32.mxu0 %vm1331_vm2, %v6361_v6 }
0x1c7c   : > { %9467 = vmatmul.mubr.msk.f32.gmra.mrb[148].mxu0 %vm1331_vm2, %v6362_v43 }
0x1c7d   : > { %9469 = vmatprep.mubr.msk.f32.mxu0 %vm1331_vm2, %v6363_v10 }
0x1c80   : > { %9470 = vmatmul.mubr.msk.f32.gmra.mrb[150].mxu0 %vm1331_vm2, %v6364_v63 }
0x1c81   : > { %9472 = vmatprep.mubr.msk.f32.mxu0 %vm1331_vm2, %v6365_v37 }
0x1c84   : > { %9473 = vmatmul.mubr.msk.f32.gmra.mrb[152].mxu0 %vm1331_vm2, %v6366_v38 }
0x1c85   : > { %9573 = vmatprep.mubr.msk.f32.mxu0 %vm10528_vm3, %v12460_v62 }
0x1d37   : > { %v12093_v18 = vpop.f32.mrb[136].mxu0 }
0x1d38   : > { %6291 = vadd.xlane.f32.xlu0 %v12093_v18  ;;  %v9448_v16 = vpop.f32.mrb[137].mxu0 }
0x1d3b   : > { %v9453_v2 = vpop.f32.mrb[138].mxu0 }
0x1d3c   : > { %v6481_v36 = vpop.f32.mrb[139].mxu0 }
0x1d3f   : > { %v9456_v52 = vpop.f32.mrb[140].mxu0 }
0x1d40   : > { %v6491_v58 = vpop.f32.mrb[141].mxu0 }
0x1d43   : > { %v9459_v54 = vpop.f32.mrb[142].mxu0 }
0x1d44   : > { %v6561_v39 = vmax.f32 %v9453_v2, %v9459_v54  ;;  %v6501_v28 = vpop.f32.mrb[143].mxu0 }
0x1d45   : > { %v6560_v53 = vmax.f32 %v6481_v36, %v6501_v28 }
0x1d47   : > { %v9462_v20 = vpop.f32.mrb[144].mxu0 }
0x1d48   : > { %v6563_v42 = vmax.f32 %v9456_v52, %v9462_v20  ;;  %v6511_v30 = vpop.f32.mrb[145].mxu0 }
0x1d49   : > { %v6562_v50 = vmax.f32 %v6491_v58, %v6511_v30 }
0x1d4b   : > { %v12096_v55 = vpop.f32.mrb[146].mxu0 }
0x1d4c   : > { %v6565_v1 = vmax.f32 %v6561_v39, %v12096_v55  ;;  %v6521_v3 = vpop.f32.mrb[147].mxu0 }
0x1d4d   : > { %v6564_v56 = vmax.f32 %v6560_v53, %v6521_v3 }
0x1d4f   : > { %v12099_v4 = vpop.f32.mrb[148].mxu0 }
0x1d50   : > { %v6567_v51 = vmax.f32 %v6563_v42, %v12099_v4  ;;  %v12102_v46 = vpop.f32.mrb[149].mxu0 }
0x1d51   : > { %v6566_v34 = vmax.f32 %v6562_v50, %v12102_v46 }
0x1d53   : > { %v12105_v60 = vpop.f32.mrb[150].mxu0 }
0x1d54   : > { %v6569_v57 = vmax.f32 %v6565_v1, %v12105_v60  ;;  %v12108_v32 = vpop.f32.mrb[151].mxu0 }
0x1d55   : > { %v6568_v35 = vmax.f32 %v6564_v56, %v12108_v32 }
0x1d57   : > { %v6572_v29 = vmax.f32 %v6568_v35, %v6569_v57  ;;  %v12111_v14 = vpop.f32.mrb[152].mxu0 }
0x1d58   : > { %v6571_v47 = vmax.f32 %v6567_v51, %v12111_v14  ;;  %v12114_v17 = vpop.f32.mrb[153].mxu0 }
0x1d59   : > { %v6570_v8 = vmax.f32 %v6566_v34, %v12114_v17 }
0x1d5b   : > { %v6573_v49 = vmax.f32 %v6570_v8, %v6571_v47 }
0x1d5d   : > { %v6574_v40 = vmax.f32 %v6572_v29, %v6573_v49 }
0x1d5f   : > { %v6575_v9 = vrot.slane %v6574_v40, 4 }
0x1d61   : > { %v6576_v13 = vmax.f32 %v6574_v40, %v6575_v9 }
0x1d63   : > { %v6577_v24 = vrot.slane %v6576_v13, 2 }
0x1d65   : > { %v6578_v26 = vmax.f32 %v6576_v13, %v6577_v24 }
0x1d67   : > { %v6579_v23 = vrot.slane %v6578_v26, 1 }
0x1d69   : > { %v12119_v15 = vmax.f32 %v6578_v26, %v6579_v23 }
0x1d6b   : > { %v6581_v27 = vsub.f32 %v6481_v36, %v12119_v15  ;;  %v6582_v22 = vsub.f32 %v9453_v2, %v12119_v15  ;;  %v6583_v12 = vsub.f32 %v6491_v58, %v12119_v15  ;;  %v6584_v45 = vsub.f32 %v9456_v52, %v12119_v15 }
0x1d6c   : > { %v6585_v59 = vsub.f32 %v6501_v28, %v12119_v15  ;;  %v6586_v25 = vsub.f32 %v9459_v54, %v12119_v15  ;;  %v6587_v6 = vsub.f32 %v6511_v30, %v12119_v15  ;;  %v6588_v43 = vsub.f32 %v9462_v20, %v12119_v15  ;;  %v12146_v28 = vpop.trf.xlu0 }
0x1d6d   : > { %v6589_v10 = vsub.f32 %v6521_v3, %v12119_v15  ;;  %v6590_v63 = vsub.f32 %v12096_v55, %v12119_v15  ;;  %v6591_v37 = vsub.f32 %v12102_v46, %v12119_v15  ;;  %v6592_v38 = vsub.f32 %v12099_v4, %v12119_v15 }
0x1d6e   : > { %v6593_v16 = vsub.f32 %v12108_v32, %v12119_v15  ;;  %v6594_v2 = vsub.f32 %v12105_v60, %v12119_v15  ;;  %v6595_v36 = vsub.f32 %v12114_v17, %v12119_v15  ;;  %v6596_v52 = vsub.f32 %v12111_v14, %v12119_v15 }
0x1d6f   : > { %v6597_v58 = vmul.f32 1.442695, %v6581_v27  ;;  %v6599_v54 = vmul.f32 1.442695, %v6582_v22  ;;  %v6601_v39 = vmul.f32 1.442695, %v6583_v12 }
0x1d70   : > { %v6603_v53 = vmul.f32 1.442695, %v6584_v45  ;;  %v6605_v20 = vmul.f32 1.442695, %v6585_v59  ;;  %v6607_v42 = vmul.f32 1.442695, %v6586_v25  ;;  %v12148_v30 = vpop.trf.xlu0 }
0x1d71   : > { %10408 = vpow2.f32 %v6597_v58  ;;  %v6609_v50 = vmul.f32 1.442695, %v6587_v6  ;;  %v6611_v55 = vmul.f32 1.442695, %v6588_v43  ;;  %v6613_v56 = vmul.f32 1.442695, %v6589_v10 }
0x1d72   : > { %10410 = vpow2.f32 %v6599_v54  ;;  %v6615_v34 = vmul.f32 1.442695, %v6590_v63  ;;  %v6617_v32 = vmul.f32 1.442695, %v6591_v37  ;;  %v6619_v14 = vmul.f32 1.442695, %v6592_v38 }
0x1d73   : > { %10412 = vpow2.f32 %v6601_v39  ;;  %v6621_v49 = vmul.f32 1.442695, %v6593_v16  ;;  %v6623_v13 = vmul.f32 1.442695, %v6594_v2  ;;  %v6625_v23 = vmul.f32 1.442695, %v6595_v36 }
0x1d74   : > { %10414 = vpow2.f32 %v6603_v53  ;;  %v12156_v51 = vpop.trf.xlu0  ;;  %v6627_v12 = vmul.f32 1.442695, %v6596_v52 }
0x1d75   : > { %10416 = vpow2.f32 %v6605_v20 }
0x1d76   : > { %10418 = vpow2.f32 %v6607_v42 }
0x1d77   : > { %10420 = vpow2.f32 %v6609_v50 }
0x1d78   : > { %10422 = vpow2.f32 %v6611_v55  ;;  %v12158_v17 = vpop.trf.xlu0 }
0x1d79   : > { %10424 = vpow2.f32 %v6613_v56 }
0x1d7a   : > { %10426 = vpow2.f32 %v6615_v34 }
0x1d7b   : > { %v12150_v1 = vpop.eup %10408  ;;  %10428 = vpow2.f32 %v6617_v32 }
0x1d7c   : > { %v12152_v3 = vpop.eup %10410  ;;  %10430 = vpow2.f32 %v6619_v14  ;;  %v12160_v27 = vpop.trf.xlu0 }
0x1d7d   : > { %v6629_v4 = vadd.f32 %v12152_v3, %v12150_v1  ;;  %v10413_v46 = vpop.eup %10412  ;;  %10432 = vpow2.f32 %v6621_v49 }
0x1d7e   : > { %v10415_v57 = vpop.eup %10414  ;;  %10434 = vpow2.f32 %v6623_v13 }
0x1d7f   : > { %v6630_v60 = vadd.f32 %v10413_v46, %v6629_v4  ;;  %v10417_v29 = vpop.eup %10416  ;;  %10436 = vpow2.f32 %v6625_v23 }
0x1d80   : > { %v10419_v8 = vpop.eup %10418  ;;  %10438 = vpow2.f32 %v6627_v12  ;;  %v12162_v10 = vpop.trf.xlu0 }
0x1d81   : > { %v6631_v35 = vadd.f32 %v10415_v57, %v6630_v60  ;;  %v10421_v9 = vpop.eup %10420 }
0x1d82   : > { %v10423_v26 = vpop.eup %10422 }
0x1d83   : > { %v6632_v47 = vadd.f32 %v10417_v29, %v6631_v35  ;;  %v10425_v22 = vpop.eup %10424 }
0x1d84   : > { %v10427_v59 = vpop.eup %10426  ;;  %v12164_v58 = vpop.trf.xlu0 }
0x1d85   : > { %v6633_v40 = vadd.f32 %v10419_v8, %v6632_v47  ;;  %v10429_v6 = vpop.eup %10428 }
0x1d86   : > { %v10431_v63 = vpop.eup %10430 }
0x1d87   : > { %v6634_v24 = vadd.f32 %v10421_v9, %v6633_v40  ;;  %v10433_v38 = vpop.eup %10432 }
0x1d88   : > { %v10435_v2 = vpop.eup %10434  ;;  %v12166_v42 = vpop.trf.xlu0 }
0x1d89   : > { %v6635_v15 = vadd.f32 %v10423_v26, %v6634_v24  ;;  %v10437_v54 = vpop.eup %10436 }
0x1d8a   : > { %v10439_v52 = vpop.eup %10438 }
0x1d8b   : > { %v6636_v45 = vadd.f32 %v10425_v22, %v6635_v15 }
0x1d8c   : > { %v12168_v4 = vpop.trf.xlu0 }
0x1d8d   : > { %v6637_v25 = vadd.f32 %v10427_v59, %v6636_v45 }
0x1d8f   : > { %v6638_v43 = vadd.f32 %v10429_v6, %v6637_v25 }
0x1d90   : > { %v12170_v32 = vpop.trf.xlu0 }
0x1d91   : > { %v6639_v37 = vadd.f32 %v10431_v63, %v6638_v43 }
0x1d93   : > { %v6640_v16 = vadd.f32 %v10433_v38, %v6639_v37 }
0x1d94   : > { %v12172_v35 = vpop.trf.xlu0 }
0x1d95   : > { %v6641_v36 = vadd.f32 %v10435_v2, %v6640_v16 }
0x1d97   : > { %v6642_v39 = vadd.f32 %v10437_v54, %v6641_v36 }
0x1d98   : > { %v12176_v24 = vpop.trf.xlu0 }
0x1d99   : > { %v6643_v53 = vadd.f32 %v10439_v52, %v6642_v39 }
0x1d9b   : > { %v6644_v20 = vrot.slane %v6643_v53, 4 }
0x1d9d   : > { %v6645_v50 = vadd.f32 %v6644_v20, %v6643_v53 }
0x1d9f   : > { %v6646_v55 = vrot.slane %v6645_v50, 2 }
0x1da1   : > { %v6647_v56 = vadd.f32 %v6646_v55, %v6645_v50 }
0x1da3   : > { %v6648_v34 = vrot.slane %v6647_v56, 1 }
0x1da5   : > { %v6649_v60 = vadd.f32 %v6648_v34, %v6647_v56 }
0x1da7   : > { %10440 = vrcp.f32 %v6649_v60 }
0x1db1   : > { %v10441_v14 = vpop.eup %10440 }
0x1db2   : > { %v6651_v47 = vmul.f32 %v10441_v14, %v12150_v1  ;;  %v6652_v49 = vmul.f32 %v10441_v14, %v12152_v3  ;;  %v6653_v40 = vmul.f32 %v10441_v14, %v10413_v46  ;;  %v6654_v13 = vmul.f32 %v10441_v14, %v10415_v57 }
0x1db3   : > { %v6655_v23 = vmul.f32 %v10441_v14, %v10417_v29  ;;  %v6656_v15 = vmul.f32 %v10441_v14, %v10419_v8  ;;  %v6657_v12 = vmul.f32 %v10441_v14, %v10421_v9  ;;  %v6658_v45 = vmul.f32 %v10441_v14, %v10423_v26  ;;  %v12179_v9 = vpop.trf.xlu0 }
0x1db4   : > { %v9952_v25 = vpack.c.bf16 %v6652_v49, %v6651_v47  ;;  %v9955_v43 = vpack.c.bf16 %v6654_v13, %v6653_v40  ;;  %v6659_v37 = vmul.f32 %v10441_v14, %v10425_v22  ;;  %v6660_v16 = vmul.f32 %v10441_v14, %v10427_v59 }
0x1db5   : > { %v9958_v36 = vpack.c.bf16 %v6656_v15, %v6655_v23  ;;  %v9961_v39 = vpack.c.bf16 %v6658_v45, %v6657_v12  ;;  %v6661_v53 = vmul.f32 %v10441_v14, %v10429_v6  ;;  %v6662_v20 = vmul.f32 %v10441_v14, %v10431_v63 }
0x1db6   : > { %9953 = vmatpush3.bf16.msra.mxu1 %v9952_v25  ;;  %v9964_v1 = vpack.c.bf16 %v6660_v16, %v6659_v37  ;;  %v6663_v50 = vmul.f32 %v10441_v14, %v10433_v38  ;;  %v6664_v3 = vmul.f32 %v10441_v14, %v10435_v2  ;;  %v6665_v46 = vmul.f32 %v10441_v14, %v10437_v54 }
0x1db7   : > { %9954 = vmatprep.subr.bf16.mxu1 %v12459_v33  ;;  %v9967_v57 = vpack.c.bf16 %v6662_v20, %v6661_v53  ;;  %v6666_v29 = vmul.f32 %v10441_v14, %v10439_v52  ;;  %v12183_v22 = vpop.trf.xlu0  ;;  %v12198_v14 = vpop.trf.xlu1 }
0x1db8   : > { %v9970_v8 = vpack.c.bf16 %v6664_v3, %v6663_v50 }
0x1db9   : > { %v9973_v26 = vpack.c.bf16 %v6666_v29, %v6665_v46 }
0x1dba   : > { %9956 = vmatpush3.bf16.msra.mxu1 %v9955_v43 }
0x1dbb   : > { %9957 = vmatprep.subr.bf16.mxu1 %v12459_v33  ;;  %v12200_v47 = vpop.trf.xlu1 }
0x1dbe   : > { %9959 = vmatpush3.bf16.msra.mxu1 %v9958_v36 }
0x1dbf   : > { %9960 = vmatprep.subr.bf16.mxu1 %v12459_v33  ;;  %v12202_v49 = vpop.trf.xlu1 }
0x1dc2   : > { %9962 = vmatpush3.bf16.msra.mxu1 %v9961_v39 }
0x1dc3   : > { %9963 = vmatprep.subr.bf16.mxu1 %v12459_v33 }
0x1dc5   : > { %v6292_v59 = vpop.xlane.xlu0 %6291 }
0x1dc6   : > { %9965 = vmatpush3.bf16.msra.mxu1 %v9964_v1  ;;  %v6293_v6 = vrot.slane %v6292_v59, 4 }
0x1dc7   : > { %9966 = vmatprep.subr.bf16.mxu1 %v12459_v33 }
0x1dc8   : > { %v6294_v63 = vadd.f32 %v6293_v6, %v6292_v59 }
0x1dca   : > { %v6295_v38 = vrot.slane %v6294_v63, 2  ;;  %9968 = vmatpush3.bf16.msra.mxu1 %v9967_v57  ;;  %v8250_v57 = vld [vmem:[%s12449_s3 + $0x48] sm:$0xff] }
0x1dcb   : > { %9969 = vmatprep.subr.bf16.mxu1 %v12459_v33 }
0x1dcc   : > { %v6296_v2 = vadd.f32 %v6295_v38, %v6294_v63 }
0x1dce   : > { %9971 = vmatpush3.bf16.msra.mxu1 %v9970_v8  ;;  %v6297_v54 = vrot.slane %v6296_v2, 1 }
0x1dcf   : > { %9972 = vmatprep.subr.bf16.mxu1 %v12459_v33 }
0x1dd0   : > { %v6298_v52 = vadd.f32 %v6297_v54, %v6296_v2 }
0x1dd2   : > { %9974 = vmatpush3.bf16.msra.mxu1 %v9973_v26  ;;  %10056 = vpush %v6298_v52 }
0x1dd3   : > { %9510 = vmatprep.subr.mxu1 %v12460_v62 }
0x1dd5   : > { %9508 = vmatmul.mubr.f32.vlgmr.msra.gmra.mrb[142].mxu1 %v11978_v41  ;;  %v12204_v41 = vpop.trf.xlu1 }
0x1dd6   : > { %9512 = vmatprep.mubr.msk.f32.mxu1 %vm10528_vm3, %v12460_v62 }
0x1dd9   : > { %v12206_v40 = vpop.trf.xlu1 }
0x1ddd   : > { %v12208_v13 = vpop.trf.xlu1 }
0x1de1   : > { %v12210_v23 = vpop.trf.xlu1 }
0x1e03   : > { %s10057_s17 = spop %10056 }
0x1e04   : > { %v6300_v55 = vstv %s10057_s17 }
0x1e05   : > { %v6301_v56 = vmul.f32 0.0009765625, %v6300_v55 }
0x1e07   : > { %v12194_v34 = vsub.f32 %v12093_v18, %v6301_v56  ;;  %v12212_v18 = vpop.trf.xlu1 }
0x1e09   : > { %v6303_v60 = vmul.f32 %v12194_v34, %v12194_v34 }
0x1e0b   : > { %6304 = vadd.xlane.f32.xlu1 %v6303_v60  ;;  %v12214_v15 = vpop.trf.xlu1 }
0x1e0f   : > { %v12216_v12 = vpop.trf.xlu1 }
0x1e13   : > { %v12218_v45 = vpop.trf.xlu1 }
0x1e17   : > { %v12220_v25 = vpop.trf.xlu1 }
0x1e1b   : > { %v12222_v43 = vpop.trf.xlu1 }
0x1e1f   : > { %v12224_v37 = vpop.trf.xlu1 }
0x1e23   : > { %v12226_v16 = vpop.trf.xlu1 }
0x1e27   : > { %v12228_v36 = vpop.trf.xlu1 }
0x1e98   : > { %v6305_v39 = vpop.xlane.xlu1 %6304 }
0x1e99   : > { %v6306_v53 = vrot.slane %v6305_v39, 4 }
0x1e9b   : > { %v6307_v20 = vadd.f32 %v6306_v53, %v6305_v39 }
0x1e9d   : > { %v6308_v1 = vrot.slane %v6307_v20, 2 }
0x1e9f   : > { %v6309_v50 = vadd.f32 %v6308_v1, %v6307_v20 }
0x1ea1   : > { %v6310_v3 = vrot.slane %v6309_v50, 1 }
0x1ea3   : > { %v6311_v46 = vadd.f32 %v6310_v3, %v6309_v50 }
0x1ea5   : > { %10058 = vpush %v6311_v46 }
0x1ea8   : > { %v6733_v29 = vpop.f32.mrb[142].mxu1 }
0x1ea9   : > { %v9509_v8 = vpop.f32.mrb[143].mxu1  ;;  %9511 = vmatpush3.msra.mxu1 %v6733_v29 }
0x1eaa   : > { %9513 = vmatmul.mubr.msk.f32.vlgmr.msra.gmra.mrb[144].mxu1 %vm1331_vm2, %v8250_v57  ;;  %9515 = vmatprep.subr.mxu1 %v11991_v21 }
0x1eab   : > { %9516 = vmatpush3.msra.mxu1 %v11991_v21  ;;  %9517 = vmatprep.mubr.msk.f32.mxu1 %vm1331_vm2, %v12117_v19 }
0x1eac   : > { %9999 = vmatprep.subr.bf16.mxu1 %v12459_v33 }
0x1eae   : > { %9518 = vmatmul.mubr.msk.f32.vlgmr.msra.gmra.mrb[146].mxu1 %vm1331_vm2, %v12125_v61 }
0x1eaf   : > { %9520 = vmatprep.mubr.msk.f32.mxu1 %vm1331_vm2, %v12146_v28 }
0x1eb2   : > { %9521 = vmatmul.mubr.msk.f32.gmra.mrb[148].mxu1 %vm1331_vm2, %v12148_v30 }
0x1eb3   : > { %9523 = vmatprep.mubr.msk.f32.mxu1 %vm1331_vm2, %v12156_v51 }
0x1eb6   : > { %9524 = vmatmul.mubr.msk.f32.gmra.mrb[150].mxu1 %vm1331_vm2, %v12158_v17 }
0x1eb7   : > { %9526 = vmatprep.mubr.msk.f32.mxu1 %vm1331_vm2, %v12160_v27 }
0x1eba   : > { %9527 = vmatmul.mubr.msk.f32.gmra.mrb[152].mxu1 %vm1331_vm2, %v12162_v10 }
0x1ebb   : > { %9529 = vmatprep.mubr.msk.f32.mxu1 %vm1331_vm2, %v12164_v58 }
0x1ebe   : > { %9530 = vmatmul.mubr.msk.f32.gmra.mrb[154].mxu1 %vm1331_vm2, %v12166_v42 }
0x1ebf   : > { %9532 = vmatprep.mubr.msk.f32.mxu1 %vm1331_vm2, %v12168_v4 }
0x1ec2   : > { %9533 = vmatmul.mubr.msk.f32.gmra.mrb[156].mxu1 %vm1331_vm2, %v12170_v32 }
0x1ec3   : > { %9535 = vmatprep.mubr.msk.f32.mxu1 %vm1331_vm2, %v12172_v35 }
0x1ec6   : > { %9536 = vmatmul.mubr.msk.f32.gmra.mrb[158].mxu1 %vm1331_vm2, %v12176_v24 }
0x1ec7   : > { %9538 = vmatprep.mubr.msk.f32.mxu1 %vm1331_vm2, %v12179_v9 }
0x1eca   : > { %9539 = vmatmul.mubr.msk.f32.gmra.mrb[160].mxu1 %vm1331_vm2, %v12183_v22 }
0x1ecb   : > { %9639 = vmatprep.mubr.msk.f32.mxu1 %vm10528_vm3, %v12460_v62 }
0x1ed6   : > { %s12305_s23 = spop %10058 }
0x1f7d   : > { %v12271_v21 = vpop.f32.mrb[144].mxu1 }
0x1f7e   : > { %6812 = vadd.xlane.f32.xlu0 %v12271_v21  ;;  %v9514_v19 = vpop.f32.mrb[145].mxu1 }
0x1f81   : > { %v9519_v61 = vpop.f32.mrb[146].mxu1 }
0x1f82   : > { %v7002_v28 = vpop.f32.mrb[147].mxu1 }
0x1f85   : > { %v9522_v30 = vpop.f32.mrb[148].mxu1 }
0x1f86   : > { %v7012_v51 = vpop.f32.mrb[149].mxu1 }
0x1f89   : > { %v9525_v17 = vpop.f32.mrb[150].mxu1 }
0x1f8a   : > { %v7082_v27 = vmax.f32 %v9519_v61, %v9525_v17  ;;  %v7022_v10 = vpop.f32.mrb[151].mxu1 }
0x1f8b   : > { %v7081_v58 = vmax.f32 %v7002_v28, %v7022_v10 }
0x1f8d   : > { %v9528_v42 = vpop.f32.mrb[152].mxu1 }
0x1f8e   : > { %v7084_v4 = vmax.f32 %v9522_v30, %v9528_v42  ;;  %v7032_v32 = vpop.f32.mrb[153].mxu1 }
0x1f8f   : > { %v7083_v35 = vmax.f32 %v7012_v51, %v7032_v32 }
0x1f91   : > { %v9531_v24 = vpop.f32.mrb[154].mxu1 }
0x1f92   : > { %v7086_v9 = vmax.f32 %v7082_v27, %v9531_v24  ;;  %v7042_v26 = vpop.f32.mrb[155].mxu1 }
0x1f93   : > { %v7085_v22 = vmax.f32 %v7081_v58, %v7042_v26 }
0x1f95   : > { %v12274_v59 = vpop.f32.mrb[156].mxu1 }
0x1f96   : > { %v7088_v6 = vmax.f32 %v7084_v4, %v12274_v59  ;;  %v7052_v63 = vpop.f32.mrb[157].mxu1 }
0x1f97   : > { %v7087_v38 = vmax.f32 %v7083_v35, %v7052_v63 }
0x1f99   : > { %v12277_v2 = vpop.f32.mrb[158].mxu1 }
0x1f9a   : > { %v7090_v54 = vmax.f32 %v7086_v9, %v12277_v2  ;;  %v12280_v52 = vpop.f32.mrb[159].mxu1 }
0x1f9b   : > { %v7089_v55 = vmax.f32 %v7085_v22, %v12280_v52 }
0x1f9d   : > { %v7093_v56 = vmax.f32 %v7089_v55, %v7090_v54  ;;  %v12283_v60 = vpop.f32.mrb[160].mxu1 }
0x1f9e   : > { %v7092_v39 = vmax.f32 %v7088_v6, %v12283_v60  ;;  %v12286_v53 = vpop.f32.mrb[161].mxu1 }
0x1f9f   : > { %v7091_v20 = vmax.f32 %v7087_v38, %v12286_v53 }
0x1fa1   : > { %v7094_v1 = vmax.f32 %v7091_v20, %v7092_v39 }
0x1fa3   : > { %v7095_v50 = vmax.f32 %v7093_v56, %v7094_v1 }
0x1fa5   : > { %v7096_v3 = vrot.slane %v7095_v50, 4 }
0x1fa7   : > { %v7097_v46 = vmax.f32 %v7095_v50, %v7096_v3 }
0x1fa9   : > { %v7098_v57 = vrot.slane %v7097_v46, 2 }
0x1fab   : > { %v7099_v29 = vmax.f32 %v7097_v46, %v7098_v57 }
0x1fad   : > { %v7100_v8 = vrot.slane %v7099_v29, 1 }
0x1faf   : > { %v7101_v19 = vmax.f32 %v7099_v29, %v7100_v8 }
0x1fb1   : > { %v7102_v27 = vsub.f32 %v7002_v28, %v7101_v19  ;;  %v7103_v58 = vsub.f32 %v9519_v61, %v7101_v19  ;;  %v7104_v4 = vsub.f32 %v7012_v51, %v7101_v19  ;;  %v7105_v35 = vsub.f32 %v9522_v30, %v7101_v19 }
0x1fb2   : > { %v7106_v9 = vsub.f32 %v7022_v10, %v7101_v19  ;;  %v7107_v22 = vsub.f32 %v9525_v17, %v7101_v19  ;;  %v7108_v54 = vsub.f32 %v7032_v32, %v7101_v19  ;;  %v7109_v6 = vsub.f32 %v9528_v42, %v7101_v19 }
0x1fb3   : > { %v7110_v55 = vsub.f32 %v7042_v26, %v7101_v19  ;;  %v7111_v11 = vsub.f32 %v9531_v24, %v7101_v19  ;;  %v7112_v0 = vsub.f32 %v7052_v63, %v7101_v19  ;;  %v7113_v38 = vsub.f32 %v12274_v59, %v7101_v19 }
0x1fb4   : > { %v7114_v56 = vsub.f32 %v12280_v52, %v7101_v19  ;;  %v7115_v39 = vsub.f32 %v12277_v2, %v7101_v19  ;;  %v7116_v20 = vsub.f32 %v12286_v53, %v7101_v19  ;;  %v7117_v28 = vsub.f32 %v12283_v60, %v7101_v19 }
0x1fb5   : > { %v7118_v61 = vmul.f32 1.442695, %v7102_v27  ;;  %v7120_v51 = vmul.f32 1.442695, %v7103_v58  ;;  %v7122_v30 = vmul.f32 1.442695, %v7104_v4 }
0x1fb6   : > { %v7124_v17 = vmul.f32 1.442695, %v7105_v35  ;;  %v7126_v10 = vmul.f32 1.442695, %v7106_v9  ;;  %v7128_v42 = vmul.f32 1.442695, %v7107_v22 }
0x1fb7   : > { %10442 = vpow2.f32 %v7118_v61  ;;  %v7130_v32 = vmul.f32 1.442695, %v7108_v54  ;;  %v7132_v24 = vmul.f32 1.442695, %v7109_v6  ;;  %v7134_v63 = vmul.f32 1.442695, %v7110_v55 }
0x1fb8   : > { %10444 = vpow2.f32 %v7120_v51  ;;  %v7136_v60 = vmul.f32 1.442695, %v7111_v11  ;;  %v7138_v50 = vmul.f32 1.442695, %v7112_v0  ;;  %v7140_v57 = vmul.f32 1.442695, %v7113_v38 }
0x1fb9   : > { %10446 = vpow2.f32 %v7122_v30  ;;  %v7142_v19 = vmul.f32 1.442695, %v7114_v56  ;;  %v7144_v4 = vmul.f32 1.442695, %v7115_v39  ;;  %v7146_v11 = vmul.f32 1.442695, %v7116_v20 }
0x1fba   : > { %10448 = vpow2.f32 %v7124_v17  ;;  %v7148_v0 = vmul.f32 1.442695, %v7117_v28 }
0x1fbb   : > { %10450 = vpow2.f32 %v7126_v10 }
0x1fbc   : > { %10452 = vpow2.f32 %v7128_v42 }
0x1fbd   : > { %10454 = vpow2.f32 %v7130_v32 }
0x1fbe   : > { %10456 = vpow2.f32 %v7132_v24 }
0x1fbf   : > { %10458 = vpow2.f32 %v7134_v63 }
0x1fc0   : > { %10460 = vpow2.f32 %v7136_v60 }
0x1fc1   : > { %v10443_v26 = vpop.eup %10442  ;;  %10462 = vpow2.f32 %v7138_v50 }
0x1fc2   : > { %v10445_v59 = vpop.eup %10444  ;;  %10464 = vpow2.f32 %v7140_v57 }
0x1fc3   : > { %v7150_v2 = vadd.f32 %v10445_v59, %v10443_v26  ;;  %v10447_v52 = vpop.eup %10446  ;;  %10466 = vpow2.f32 %v7142_v19 }
0x1fc4   : > { %v10449_v1 = vpop.eup %10448  ;;  %10468 = vpow2.f32 %v7144_v4 }
0x1fc5   : > { %v7151_v53 = vadd.f32 %v10447_v52, %v7150_v2  ;;  %v10451_v46 = vpop.eup %10450  ;;  %10470 = vpow2.f32 %v7146_v11 }
0x1fc6   : > { %v10453_v8 = vpop.eup %10452  ;;  %10472 = vpow2.f32 %v7148_v0 }
0x1fc7   : > { %v7152_v3 = vadd.f32 %v10449_v1, %v7151_v53  ;;  %v10455_v58 = vpop.eup %10454 }
0x1fc8   : > { %v10457_v9 = vpop.eup %10456 }
0x1fc9   : > { %v7153_v29 = vadd.f32 %v10451_v46, %v7152_v3  ;;  %v10459_v54 = vpop.eup %10458 }
0x1fca   : > { %v10461_v55 = vpop.eup %10460 }
0x1fcb   : > { %v7154_v27 = vadd.f32 %v10453_v8, %v7153_v29  ;;  %v10463_v61 = vpop.eup %10462 }
0x1fcc   : > { %v10465_v56 = vpop.eup %10464 }
0x1fcd   : > { %v7155_v35 = vadd.f32 %v10455_v58, %v7154_v27  ;;  %v10467_v17 = vpop.eup %10466 }
0x1fce   : > { %v10469_v39 = vpop.eup %10468 }
0x1fcf   : > { %v7156_v22 = vadd.f32 %v10457_v9, %v7155_v35  ;;  %v10471_v32 = vpop.eup %10470 }
0x1fd0   : > { %v10473_v20 = vpop.eup %10472 }
0x1fd1   : > { %v7157_v6 = vadd.f32 %v10459_v54, %v7156_v22 }
0x1fd3   : > { %v7158_v38 = vadd.f32 %v10461_v55, %v7157_v6 }
0x1fd5   : > { %v7159_v51 = vadd.f32 %v10463_v61, %v7158_v38 }
0x1fd7   : > { %v7160_v30 = vadd.f32 %v10465_v56, %v7159_v51 }
0x1fd9   : > { %v7161_v10 = vadd.f32 %v10467_v17, %v7160_v30 }
0x1fdb   : > { %v7162_v42 = vadd.f32 %v10469_v39, %v7161_v10 }
0x1fdd   : > { %v7163_v24 = vadd.f32 %v10471_v32, %v7162_v42 }
0x1fdf   : > { %v7164_v63 = vadd.f32 %v10473_v20, %v7163_v24 }
0x1fe1   : > { %v7165_v2 = vrot.slane %v7164_v63, 4 }
0x1fe3   : > { %v7166_v60 = vadd.f32 %v7165_v2, %v7164_v63 }
0x1fe5   : > { %v7167_v28 = vrot.slane %v7166_v60, 2 }
0x1fe7   : > { %v7168_v53 = vadd.f32 %v7167_v28, %v7166_v60 }
0x1fe9   : > { %v7169_v50 = vrot.slane %v7168_v53, 1 }
0x1feb   : > { %v7170_v3 = vadd.f32 %v7169_v50, %v7168_v53 }
0x1fed   : > { %10474 = vrcp.f32 %v7170_v3 }
0x1ff7   : > { %v10475_v57 = vpop.eup %10474 }
0x1ff8   : > { %v7172_v29 = vmul.f32 %v10475_v57, %v10443_v26  ;;  %v7173_v19 = vmul.f32 %v10475_v57, %v10445_v59  ;;  %v7174_v27 = vmul.f32 %v10475_v57, %v10447_v52  ;;  %v7175_v4 = vmul.f32 %v10475_v57, %v10449_v1 }
0x1ff9   : > { %v7176_v35 = vmul.f32 %v10475_v57, %v10451_v46  ;;  %v7177_v11 = vmul.f32 %v10475_v57, %v10453_v8  ;;  %v7178_v22 = vmul.f32 %v10475_v57, %v10455_v58  ;;  %v7179_v0 = vmul.f32 %v10475_v57, %v10457_v9 }
0x1ffa   : > { %v9976_v6 = vpack.c.bf16 %v7173_v19, %v7172_v29  ;;  %v9979_v38 = vpack.c.bf16 %v7175_v4, %v7174_v27  ;;  %v7180_v51 = vmul.f32 %v10475_v57, %v10459_v54  ;;  %v7181_v30 = vmul.f32 %v10475_v57, %v10461_v55  ;;  %v8270_v27 = vld [vmem:[%s12449_s3 + $0x50] sm:$0xff] }
0x1ffb   : > { %v9982_v10 = vpack.c.bf16 %v7177_v11, %v7176_v35  ;;  %v9985_v42 = vpack.c.bf16 %v7179_v0, %v7178_v22  ;;  %v7182_v24 = vmul.f32 %v10475_v57, %v10463_v61  ;;  %v7183_v63 = vmul.f32 %v10475_v57, %v10465_v56 }
0x1ffc   : > { %9977 = vmatpush3.bf16.msra.mxu0 %v9976_v6  ;;  %v9988_v2 = vpack.c.bf16 %v7181_v30, %v7180_v51  ;;  %v7184_v60 = vmul.f32 %v10475_v57, %v10467_v17  ;;  %v7185_v28 = vmul.f32 %v10475_v57, %v10469_v39  ;;  %v7186_v26 = vmul.f32 %v10475_v57, %v10471_v32 }
0x1ffd   : > { %9978 = vmatprep.subr.bf16.mxu0 %v12459_v33  ;;  %v9991_v59 = vpack.c.bf16 %v7183_v63, %v7182_v24  ;;  %v7187_v52 = vmul.f32 %v10475_v57, %v10473_v20 }
0x1ffe   : > { %v9994_v1 = vpack.c.bf16 %v7185_v28, %v7184_v60 }
0x1fff   : > { %v9997_v46 = vpack.c.bf16 %v7187_v52, %v7186_v26 }
0x2000   : > { %9980 = vmatpush3.bf16.msra.mxu0 %v9979_v38 }
0x2001   : > { %9981 = vmatprep.subr.bf16.mxu0 %v12459_v33 }
0x2004   : > { %9983 = vmatpush3.bf16.msra.mxu0 %v9982_v10 }
0x2005   : > { %9984 = vmatprep.subr.bf16.mxu0 %v12459_v33 }
0x2008   : > { %9986 = vmatpush3.bf16.msra.mxu0 %v9985_v42 }
0x2009   : > { %9987 = vmatprep.subr.bf16.mxu0 %v12459_v33 }
0x200b   : > { %v6813_v8 = vpop.xlane.xlu0 %6812 }
0x200c   : > { %9989 = vmatpush3.bf16.msra.mxu0 %v9988_v2  ;;  %v6814_v58 = vrot.slane %v6813_v8, 4 }
0x200d   : > { %9990 = vmatprep.subr.bf16.mxu0 %v12459_v33 }
0x200e   : > { %v6815_v9 = vadd.f32 %v6814_v58, %v6813_v8 }
0x2010   : > { %v6816_v54 = vrot.slane %v6815_v9, 2  ;;  %9992 = vmatpush3.bf16.msra.mxu0 %v9991_v59 }
0x2011   : > { %9993 = vmatprep.subr.bf16.mxu0 %v12459_v33 }
0x2012   : > { %v6817_v55 = vadd.f32 %v6816_v54, %v6815_v9 }
0x2014   : > { %9995 = vmatpush3.bf16.msra.mxu0 %v9994_v1  ;;  %v6818_v61 = vrot.slane %v6817_v55, 1 }
0x2015   : > { %9996 = vmatprep.subr.bf16.mxu0 %v12459_v33 }
0x2016   : > { %v6819_v56 = vadd.f32 %v6818_v61, %v6817_v55 }
0x2018   : > { %9998 = vmatpush3.bf16.msra.mxu0 %v9997_v46  ;;  %10060 = vpush %v6819_v56 }
0x2019   : > { %9576 = vmatprep.subr.mxu0 %v12460_v62 }
0x201b   : > { %9574 = vmatmul.mubr.f32.vlgmr.msra.gmra.mrb[154].mxu0 %v11984_v7 }
0x201c   : > { %9578 = vmatprep.mubr.msk.f32.mxu0 %vm10528_vm3, %v12460_v62 }
0x2049   : > { %s10061_s24 = spop %10060 }
0x204a   : > { %v6821_v17 = vstv %s10061_s24 }
0x204b   : > { %v6822_v39 = vmul.f32 0.0009765625, %v6821_v17 }
0x204d   : > { %v12308_v32 = vsub.f32 %v12271_v21, %v6822_v39 }
0x204f   : > { %v6824_v20 = vmul.f32 %v12308_v32, %v12308_v32 }
0x2051   : > { %6825 = vadd.xlane.f32.xlu1 %v6824_v20 }
0x20de   : > { %v6826_v53 = vpop.xlane.xlu1 %6825 }
0x20df   : > { %v6827_v50 = vrot.slane %v6826_v53, 4 }
0x20e1   : > { %v6828_v3 = vadd.f32 %v6827_v50, %v6826_v53 }
0x20e3   : > { %v6829_v57 = vrot.slane %v6828_v3, 2 }
0x20e5   : > { %v6830_v7 = vadd.f32 %v6829_v57, %v6828_v3 }
0x20e7   : > { %v6831_v29 = vrot.slane %v6830_v7, 1 }
0x20e9   : > { %v6832_v19 = vadd.f32 %v6831_v29, %v6830_v7 }
0x20eb   : > { %10062 = vpush %v6832_v19 }
0x20ee   : > { %v7254_v4 = vpop.f32.mrb[154].mxu0 }
0x20ef   : > { %v9575_v35 = vpop.f32.mrb[155].mxu0  ;;  %9577 = vmatpush3.msra.mxu0 %v7254_v4 }
0x20f0   : > { %9579 = vmatmul.mubr.msk.f32.vlgmr.msra.gmra.mrb[156].mxu0 %vm1331_vm2, %v8270_v27  ;;  %9581 = vmatprep.subr.mxu0 %v11988_v48 }
0x20f1   : > { %9582 = vmatpush3.msra.mxu0 %v11988_v48  ;;  %9583 = vmatprep.mubr.msk.f32.mxu0 %vm1331_vm2, %v12198_v14 }
0x20f4   : > { %9584 = vmatmul.mubr.msk.f32.vlgmr.msra.gmra.mrb[158].mxu0 %vm1331_vm2, %v12200_v47 }
0x20f5   : > { %9586 = vmatprep.mubr.msk.f32.mxu0 %vm1331_vm2, %v12202_v49 }
0x20f8   : > { %9587 = vmatmul.mubr.msk.f32.gmra.mrb[160].mxu0 %vm1331_vm2, %v12204_v41 }
0x20f9   : > { %9589 = vmatprep.mubr.msk.f32.mxu0 %vm1331_vm2, %v12206_v40 }
0x20fc   : > { %9590 = vmatmul.mubr.msk.f32.gmra.mrb[162].mxu0 %vm1331_vm2, %v12208_v13 }
0x20fd   : > { %9592 = vmatprep.mubr.msk.f32.mxu0 %vm1331_vm2, %v12210_v23 }
0x2100   : > { %9593 = vmatmul.mubr.msk.f32.gmra.mrb[164].mxu0 %vm1331_vm2, %v12212_v18 }
0x2101   : > { %9595 = vmatprep.mubr.msk.f32.mxu0 %vm1331_vm2, %v12214_v15 }
0x2104   : > { %9596 = vmatmul.mubr.msk.f32.gmra.mrb[166].mxu0 %vm1331_vm2, %v12216_v12 }
0x2105   : > { %9598 = vmatprep.mubr.msk.f32.mxu0 %vm1331_vm2, %v12218_v45 }
0x2108   : > { %9599 = vmatmul.mubr.msk.f32.gmra.mrb[168].mxu0 %vm1331_vm2, %v12220_v25 }
0x2109   : > { %9601 = vmatprep.mubr.msk.f32.mxu0 %vm1331_vm2, %v12222_v43 }
0x210c   : > { %9602 = vmatmul.mubr.msk.f32.gmra.mrb[170].mxu0 %vm1331_vm2, %v12224_v37 }
0x210d   : > { %9604 = vmatprep.mubr.msk.f32.mxu0 %vm1331_vm2, %v12226_v16 }
0x2110   : > { %9605 = vmatmul.mubr.msk.f32.gmra.mrb[172].mxu0 %vm1331_vm2, %v12228_v36 }
0x211c   : > { %s12384_s20 = spop %10062 }
0x21c3   : > { %v12350_v48 = vpop.f32.mrb[156].mxu0 }
0x21c4   : > { %7333 = vadd.xlane.f32.xlu0 %v12350_v48  ;;  %v9580_v14 = vpop.f32.mrb[157].mxu0 }
0x21c7   : > { %v9585_v47 = vpop.f32.mrb[158].mxu0 }
0x21c8   : > { %v7523_v49 = vpop.f32.mrb[159].mxu0 }
0x21cb   : > { %v9588_v41 = vpop.f32.mrb[160].mxu0 }
0x21cc   : > { %v7533_v40 = vpop.f32.mrb[161].mxu0 }
0x21cf   : > { %v9591_v13 = vpop.f32.mrb[162].mxu0 }
0x21d0   : > { %v7603_v23 = vmax.f32 %v9585_v47, %v9591_v13  ;;  %v7543_v18 = vpop.f32.mrb[163].mxu0 }
0x21d1   : > { %v7602_v15 = vmax.f32 %v7523_v49, %v7543_v18 }
0x21d3   : > { %v9594_v12 = vpop.f32.mrb[164].mxu0 }
0x21d4   : > { %v7605_v45 = vmax.f32 %v9588_v41, %v9594_v12  ;;  %v7553_v25 = vpop.f32.mrb[165].mxu0 }
0x21d5   : > { %v7604_v43 = vmax.f32 %v7533_v40, %v7553_v25 }
0x21d7   : > { %v9597_v37 = vpop.f32.mrb[166].mxu0 }
0x21d8   : > { %v7607_v16 = vmax.f32 %v7603_v23, %v9597_v37  ;;  %v7563_v36 = vpop.f32.mrb[167].mxu0 }
0x21d9   : > { %v7606_v21 = vmax.f32 %v7602_v15, %v7563_v36 }
0x21db   : > { %v12353_v11 = vpop.f32.mrb[168].mxu0 }
0x21dc   : > { %v7609_v22 = vmax.f32 %v7605_v45, %v12353_v11  ;;  %v7573_v0 = vpop.f32.mrb[169].mxu0 }
0x21dd   : > { %v7608_v6 = vmax.f32 %v7604_v43, %v7573_v0 }
0x21df   : > { %v12356_v38 = vpop.f32.mrb[170].mxu0 }
0x21e0   : > { %v7611_v51 = vmax.f32 %v7607_v16, %v12356_v38  ;;  %v12359_v30 = vpop.f32.mrb[171].mxu0 }
0x21e1   : > { %v7610_v10 = vmax.f32 %v7606_v21, %v12359_v30 }
0x21e3   : > { %v7614_v42 = vmax.f32 %v7610_v10, %v7611_v51  ;;  %v12362_v24 = vpop.f32.mrb[172].mxu0 }
0x21e4   : > { %v7613_v63 = vmax.f32 %v7609_v22, %v12362_v24  ;;  %v12365_v2 = vpop.f32.mrb[173].mxu0 }
0x21e5   : > { %v7612_v60 = vmax.f32 %v7608_v6, %v12365_v2 }
0x21e7   : > { %v7615_v28 = vmax.f32 %v7612_v60, %v7613_v63 }
0x21e9   : > { %v7616_v26 = vmax.f32 %v7614_v42, %v7615_v28 }
0x21eb   : > { %v7617_v59 = vrot.slane %v7616_v26, 4 }
0x21ed   : > { %v7618_v52 = vmax.f32 %v7616_v26, %v7617_v59 }
0x21ef   : > { %v7619_v1 = vrot.slane %v7618_v52, 2 }
0x21f1   : > { %v7620_v46 = vmax.f32 %v7618_v52, %v7619_v1 }
0x21f3   : > { %v7621_v8 = vrot.slane %v7620_v46, 1 }
0x21f5   : > { %v7622_v58 = vmax.f32 %v7620_v46, %v7621_v8 }
0x21f7   : > { %v7623_v9 = vsub.f32 %v7523_v49, %v7622_v58  ;;  %v7624_v54 = vsub.f32 %v9585_v47, %v7622_v58  ;;  %v7625_v55 = vsub.f32 %v7533_v40, %v7622_v58  ;;  %v7626_v61 = vsub.f32 %v9588_v41, %v7622_v58 }
0x21f8   : > { %v7627_v56 = vsub.f32 %v7543_v18, %v7622_v58  ;;  %v7628_v17 = vsub.f32 %v9591_v13, %v7622_v58  ;;  %v7629_v39 = vsub.f32 %v7553_v25, %v7622_v58  ;;  %v7630_v20 = vsub.f32 %v9594_v12, %v7622_v58 }
0x21f9   : > { %v7631_v53 = vsub.f32 %v7563_v36, %v7622_v58  ;;  %v7632_v50 = vsub.f32 %v9597_v37, %v7622_v58  ;;  %v7633_v3 = vsub.f32 %v7573_v0, %v7622_v58  ;;  %v7634_v57 = vsub.f32 %v12353_v11, %v7622_v58 }
0x21fa   : > { %v7635_v7 = vsub.f32 %v12359_v30, %v7622_v58  ;;  %v7636_v29 = vsub.f32 %v12356_v38, %v7622_v58  ;;  %v7637_v19 = vsub.f32 %v12365_v2, %v7622_v58  ;;  %v7638_v27 = vsub.f32 %v12362_v24, %v7622_v58 }
0x21fb   : > { %v7639_v4 = vmul.f32 1.442695, %v7623_v9  ;;  %v7641_v35 = vmul.f32 1.442695, %v7624_v54  ;;  %v7643_v14 = vmul.f32 1.442695, %v7625_v55 }
0x21fc   : > { %v7645_v47 = vmul.f32 1.442695, %v7626_v61  ;;  %v7647_v49 = vmul.f32 1.442695, %v7627_v56  ;;  %v7649_v41 = vmul.f32 1.442695, %v7628_v17 }
0x21fd   : > { %10476 = vpow2.f32 %v7639_v4  ;;  %v7651_v40 = vmul.f32 1.442695, %v7629_v39  ;;  %v7653_v13 = vmul.f32 1.442695, %v7630_v20  ;;  %v7655_v15 = vmul.f32 1.442695, %v7631_v53 }
0x21fe   : > { %10478 = vpow2.f32 %v7641_v35  ;;  %v7657_v25 = vmul.f32 1.442695, %v7632_v50  ;;  %v7659_v16 = vmul.f32 1.442695, %v7633_v3  ;;  %v7661_v11 = vmul.f32 1.442695, %v7634_v57 }
0x21ff   : > { %10480 = vpow2.f32 %v7643_v14  ;;  %v7663_v6 = vmul.f32 1.442695, %v7635_v7  ;;  %v7665_v30 = vmul.f32 1.442695, %v7636_v29  ;;  %v7667_v24 = vmul.f32 1.442695, %v7637_v19 }
0x2200   : > { %10482 = vpow2.f32 %v7645_v47  ;;  %v7669_v60 = vmul.f32 1.442695, %v7638_v27 }
0x2201   : > { %10484 = vpow2.f32 %v7647_v49 }
0x2202   : > { %10486 = vpow2.f32 %v7649_v41 }
0x2203   : > { %10488 = vpow2.f32 %v7651_v40 }
0x2204   : > { %10490 = vpow2.f32 %v7653_v13 }
0x2205   : > { %10492 = vpow2.f32 %v7655_v15 }
0x2206   : > { %10494 = vpow2.f32 %v7657_v25 }
0x2207   : > { %v10477_v23 = vpop.eup %10476  ;;  %10496 = vpow2.f32 %v7659_v16 }
0x2208   : > { %v10479_v18 = vpop.eup %10478  ;;  %10498 = vpow2.f32 %v7661_v11 }
0x2209   : > { %v7671_v12 = vadd.f32 %v10479_v18, %v10477_v23  ;;  %v10481_v45 = vpop.eup %10480  ;;  %10500 = vpow2.f32 %v7663_v6 }
0x220a   : > { %v10483_v37 = vpop.eup %10482  ;;  %10502 = vpow2.f32 %v7665_v30 }
0x220b   : > { %v7672_v43 = vadd.f32 %v10481_v45, %v7671_v12  ;;  %v10485_v21 = vpop.eup %10484  ;;  %10504 = vpow2.f32 %v7667_v24 }
0x220c   : > { %v10487_v0 = vpop.eup %10486  ;;  %10506 = vpow2.f32 %v7669_v60 }
0x220d   : > { %v7673_v36 = vadd.f32 %v10483_v37, %v7672_v43  ;;  %v10489_v51 = vpop.eup %10488 }
0x220e   : > { %v10491_v42 = vpop.eup %10490 }
0x220f   : > { %v7674_v22 = vadd.f32 %v10485_v21, %v7673_v36  ;;  %v10493_v2 = vpop.eup %10492 }
0x2210   : > { %v10495_v26 = vpop.eup %10494 }
0x2211   : > { %v7675_v38 = vadd.f32 %v10487_v0, %v7674_v22  ;;  %v10497_v52 = vpop.eup %10496 }
0x2212   : > { %v10499_v46 = vpop.eup %10498 }
0x2213   : > { %v7676_v10 = vadd.f32 %v10489_v51, %v7675_v38  ;;  %v10501_v58 = vpop.eup %10500 }
0x2214   : > { %v10503_v54 = vpop.eup %10502 }
0x2215   : > { %v7677_v63 = vadd.f32 %v10491_v42, %v7676_v10  ;;  %v10505_v61 = vpop.eup %10504 }
0x2216   : > { %v10507_v17 = vpop.eup %10506 }
0x2217   : > { %v7678_v28 = vadd.f32 %v10493_v2, %v7677_v63 }
0x2219   : > { %v7679_v59 = vadd.f32 %v10495_v26, %v7678_v28 }
0x221b   : > { %v7680_v1 = vadd.f32 %v10497_v52, %v7679_v59 }
0x221d   : > { %v7681_v8 = vadd.f32 %v10499_v46, %v7680_v1 }
0x221f   : > { %v7682_v9 = vadd.f32 %v10501_v58, %v7681_v8 }
0x2221   : > { %v7683_v55 = vadd.f32 %v10503_v54, %v7682_v9 }
0x2223   : > { %v7684_v56 = vadd.f32 %v10505_v61, %v7683_v55  ;;  %v8272_v55 = vld [vmem:[%s12450_s4 + $0x50] sm:$0xff] }
0x2225   : > { %v7685_v39 = vadd.f32 %v10507_v17, %v7684_v56 }
0x2227   : > { %v7686_v20 = vrot.slane %v7685_v39, 4 }
0x2229   : > { %v7687_v53 = vadd.f32 %v7686_v20, %v7685_v39 }
0x222b   : > { %v7688_v50 = vrot.slane %v7687_v53, 2 }
0x222d   : > { %v7689_v3 = vadd.f32 %v7688_v50, %v7687_v53 }
0x222f   : > { %v7690_v57 = vrot.slane %v7689_v3, 1 }
0x2231   : > { %v7691_v7 = vadd.f32 %v7690_v57, %v7689_v3 }
0x2233   : > { %10508 = vrcp.f32 %v7691_v7 }
0x223d   : > { %v10509_v29 = vpop.eup %10508 }
0x223e   : > { %v7693_v19 = vmul.f32 %v10509_v29, %v10477_v23  ;;  %v7694_v27 = vmul.f32 %v10509_v29, %v10479_v18  ;;  %v7695_v4 = vmul.f32 %v10509_v29, %v10481_v45  ;;  %v7696_v35 = vmul.f32 %v10509_v29, %v10483_v37 }
0x223f   : > { %v7697_v14 = vmul.f32 %v10509_v29, %v10485_v21  ;;  %v7698_v47 = vmul.f32 %v10509_v29, %v10487_v0  ;;  %v7699_v49 = vmul.f32 %v10509_v29, %v10489_v51  ;;  %v7700_v41 = vmul.f32 %v10509_v29, %v10491_v42 }
0x2240   : > { %v10000_v40 = vpack.c.bf16 %v7694_v27, %v7693_v19  ;;  %v10003_v13 = vpack.c.bf16 %v7696_v35, %v7695_v4  ;;  %v7701_v15 = vmul.f32 %v10509_v29, %v10493_v2  ;;  %v7702_v12 = vmul.f32 %v10509_v29, %v10495_v26  ;;  %v8232_v27 = vld [vmem:[%s12450_s4 + $0x40] sm:$0xff]  ;;  %v8252_v4 = vld [vmem:[%s12450_s4 + $0x48] sm:$0xff] }
0x2241   : > { %v10006_v25 = vpack.c.bf16 %v7698_v47, %v7697_v14  ;;  %v10009_v43 = vpack.c.bf16 %v7700_v41, %v7699_v49  ;;  %v7703_v16 = vmul.f32 %v10509_v29, %v10497_v52  ;;  %v7704_v36 = vmul.f32 %v10509_v29, %v10499_v46  ;;  %v8253_v35 = vld [vmem:[%s12451_s5 + $0x48] sm:$0xff]  ;;  %v8273_v14 = vld [vmem:[%s12451_s5 + $0x50] sm:$0xff]  ;;  %v8293_v47 = vld [vmem:[%s12451_s5 + $0x58] sm:$0xff] }
0x2242   : > { %10001 = vmatpush3.bf16.msra.mxu1 %v10000_v40  ;;  %v10012_v11 = vpack.c.bf16 %v7702_v12, %v7701_v15  ;;  %v7705_v22 = vmul.f32 %v10509_v29, %v10501_v58  ;;  %v7706_v6 = vmul.f32 %v10509_v29, %v10503_v54  ;;  %v7707_v23 = vmul.f32 %v10509_v29, %v10505_v61  ;;  %v8233_v54 = vld [vmem:[%s12451_s5 + $0x40] sm:$0xff]  ;;  %v8292_v61 = vld [vmem:[%s12450_s4 + $0x58] sm:$0xff] }
0x2243   : > { %10002 = vmatprep.subr.bf16.mxu1 %v12459_v33  ;;  %v10015_v18 = vpack.c.bf16 %v7704_v36, %v7703_v16  ;;  %v7708_v45 = vmul.f32 %v10509_v29, %v10507_v17  ;;  %v6313_v49 = vstv %s12305_s23  ;;  %v6834_v40 = vstv %s12384_s20  ;;  %s8296_s23 = sshll.u32 %s12466_s22, 5 }
0x2244   : > { %v10018_v37 = vpack.c.bf16 %v7706_v6, %v7705_v22  ;;  %v6314_v41 = vmul.f32 0.0009765625, %v6313_v49  ;;  %v6835_v15 = vmul.f32 0.0009765625, %v6834_v40  ;;  %s12430_s29 = scalar_lea.vmem %s12452_s6, %s8296_s23 }
0x2245   : > { %v10021_v21 = vpack.c.bf16 %v7708_v45, %v7707_v23 }
0x2246   : > { %10004 = vmatpush3.bf16.msra.mxu1 %v10003_v13  ;;  %v6315_v13 = vadd.f32 1e-05, %v6314_v41 }
0x2247   : > { %10005 = vmatprep.subr.bf16.mxu1 %v12459_v33 }
0x2248   : > { %10510 = vrsqrt.f32 %v6315_v13 }
0x224a   : > { %10007 = vmatpush3.bf16.msra.mxu1 %v10006_v25  ;;  %v6836_v25 = vadd.f32 1e-05, %v6835_v15 }
0x224b   : > { %10008 = vmatprep.subr.bf16.mxu1 %v12459_v33 }
0x224c   : > { %10512 = vrsqrt.f32 %v6836_v25 }
0x224e   : > { %10010 = vmatpush3.bf16.msra.mxu1 %v10009_v43 }
0x224f   : > { %10011 = vmatprep.subr.bf16.mxu1 %v12459_v33 }
0x2251   : > { %v7334_v0 = vpop.xlane.xlu0 %7333 }
0x2252   : > { %10013 = vmatpush3.bf16.msra.mxu1 %v10012_v11  ;;  %v7335_v38 = vrot.slane %v7334_v0, 4  ;;  %v10511_v6 = vpop.eup %10510 }
0x2253   : > { %10014 = vmatprep.subr.bf16.mxu1 %v12459_v33 }
0x2254   : > { %v7336_v51 = vadd.f32 %v7335_v38, %v7334_v0 }
0x2256   : > { %v7337_v30 = vrot.slane %v7336_v51, 2  ;;  %10016 = vmatpush3.bf16.msra.mxu1 %v10015_v18  ;;  %v6317_v18 = vmul.f32 %v10511_v6, %v12194_v34  ;;  %v10513_v38 = vpop.eup %10512 }
0x2257   : > { %10017 = vmatprep.subr.bf16.mxu1 %v12459_v33  ;;  %v6838_v34 = vmul.f32 %v10513_v38, %v12308_v32 }
0x2258   : > { %v7338_v10 = vadd.f32 %v7337_v30, %v7336_v51 }
0x225a   : > { %10019 = vmatpush3.bf16.msra.mxu1 %v10018_v37  ;;  %v7339_v42 = vrot.slane %v7338_v10, 1 }
0x225b   : > { %10020 = vmatprep.subr.bf16.mxu1 %v12459_v33 }
0x225c   : > { %v7340_v24 = vadd.f32 %v7339_v42, %v7338_v10 }
0x225e   : > { %10022 = vmatpush3.bf16.msra.mxu1 %v10021_v21  ;;  %10064 = vpush %v7340_v24 }
0x225f   : > { %9642 = vmatprep.subr.mxu1 %v12460_v62 }
0x2261   : > { %9640 = vmatmul.mubr.f32.vlgmr.msra.gmra.mrb[162].mxu1 %v11982_v5 }
0x2262   : > { %9644 = vmatprep.mubr.msk.f32.mxu1 %vm10528_vm3, %v12460_v62  ;;  %v8290_v62 = vld [vmem:[%s12449_s3 + $0x58] sm:$0xff] }
0x228f   : > { %s10065_s26 = spop %10064 }
0x2290   : > { %v7342_v63 = vstv %s10065_s26 }
0x2291   : > { %v7343_v2 = vmul.f32 0.0009765625, %v7342_v63 }
0x2293   : > { %v12387_v60 = vsub.f32 %v12350_v48, %v7343_v2 }
0x2295   : > { %v7345_v33 = vmul.f32 %v12387_v60, %v12387_v60 }
0x2297   : > { %7346 = vadd.xlane.f32.xlu1 %v7345_v33 }
0x2324   : > { %v7347_v28 = vpop.xlane.xlu1 %7346 }
0x2325   : > { %v7348_v26 = vrot.slane %v7347_v28, 4 }
0x2327   : > { %v7349_v59 = vadd.f32 %v7348_v26, %v7347_v28 }
0x2329   : > { %v7350_v52 = vrot.slane %v7349_v59, 2 }
0x232b   : > { %v7351_v5 = vadd.f32 %v7350_v52, %v7349_v59 }
0x232d   : > { %v7352_v1 = vrot.slane %v7351_v5, 1 }
0x232f   : > { %v7353_v46 = vadd.f32 %v7352_v1, %v7351_v5 }
0x2331   : > { %10066 = vpush %v7353_v46 }
0x2334   : > { %v7775_v8 = vpop.f32.mrb[162].mxu1 }
0x2335   : > { %v9641_v58 = vpop.f32.mrb[163].mxu1  ;;  %9643 = vmatpush3.msra.mxu1 %v7775_v8 }
0x2336   : > { %9645 = vmatmul.mubr.msk.f32.vlgmr.msra.gmra.mrb[164].mxu1 %vm1331_vm2, %v8290_v62 }
0x2362   : > { %s10067_s14 = spop %10066 }
0x2363   : > { %v7355_v12 = vstv %s10067_s14 }
0x2364   : > { %v7356_v43 = vmul.f32 0.0009765625, %v7355_v12 }
0x2366   : > { %v7357_v16 = vadd.f32 1e-05, %v7356_v43 }
0x2368   : > { %10514 = vrsqrt.f32 %v7357_v16 }
0x2372   : > { %v10515_v63 = vpop.eup %10514 }
0x2373   : > { %v7359_v26 = vmul.f32 %v10515_v63, %v12387_v60 }
0x2409   : > { %v7850_v48 = vpop.f32.mrb[164].mxu1 }
0x240a   : > { %7854 = vadd.xlane.f32.xlu1 %v7850_v48  ;;  %v9646_v9 = vpop.f32.mrb[165].mxu1 }
0x241b   : > { %6330 = vperm.xlu1 %10085, %v8233_v54  }
0x241f   : > { %7364 = vperm.xlu1 %10085, %v8272_v55  }
0x2423   : > { %7885 = vperm.xlu1 %10085, %v8292_v61  }
0x2497   : > { %v7855_v56 = vpop.xlane.xlu1 %7854 }
0x2498   : > { %v7856_v17 = vrot.slane %v7855_v56, 4 }
0x249a   : > { %v7857_v39 = vadd.f32 %v7856_v17, %v7855_v56 }
0x249b   : > { %v6331_v51 = vpop.permute.xlu1 %6330 }
0x249c   : > { %v7858_v20 = vrot.slane %v7857_v39, 2 }
0x249e   : > { %v7859_v53 = vadd.f32 %v7858_v20, %v7857_v39 }
0x249f   : > { %v7365_v33 = vpop.permute.xlu1 %7364 }
0x24a0   : > { %v7860_v50 = vrot.slane %v7859_v53, 1  ;;  %v7367_v52 = vmul.f32 %v7365_v33, %v7359_v26 }
0x24a2   : > { %v7861_v3 = vadd.f32 %v7860_v50, %v7859_v53 }
0x24a3   : > { %v7886_v60 = vpop.permute.xlu1 %7885 }
0x24a4   : > { %10068 = vpush %v7861_v3 }
0x24d5   : > { %s10069_s15 = spop %10068 }
0x24d6   : > { %v7863_v57 = vstv %s10069_s15 }
0x24d7   : > { %v7864_v7 = vmul.f32 0.0009765625, %v7863_v57 }
0x24d9   : > { %v12404_v29 = vsub.f32 %v7850_v48, %v7864_v7 }
0x24db   : > { %v7866_v19 = vmul.f32 %v12404_v29, %v12404_v29 }
0x24dd   : > { %7867 = vadd.xlane.f32.xlu0 %v7866_v19 }
0x24f3   : > { %6322 = vperm.xlu0 %10084, %v8232_v27  }
0x24f7   : > { %6843 = vperm.xlu0 %10084, %v8252_v4  }
0x24fb   : > { %6851 = vperm.xlu0 %10084, %v8253_v35  }
0x24ff   : > { %7372 = vperm.xlu0 %10084, %v8273_v14  }
0x2503   : > { %7893 = vperm.xlu0 %10084, %v8293_v47  }
0x256a   : > { %v7868_v36 = vpop.xlane.xlu0 %7867 }
0x256b   : > { %v7869_v11 = vrot.slane %v7868_v36, 4 }
0x256d   : > { %v7870_v22 = vadd.f32 %v7869_v11, %v7868_v36 }
0x256f   : > { %v7871_v23 = vrot.slane %v7870_v22, 2 }
0x2571   : > { %v7872_v45 = vadd.f32 %v7871_v23, %v7870_v22 }
0x2572   : > { %v6323_v37 = vpop.permute.xlu0 %6322 }
0x2573   : > { %v6325_v21 = vmul.f32 %v6323_v37, %v6317_v18  ;;  %v7873_v0 = vrot.slane %v7872_v45, 1 }
0x2575   : > { %v6333_v30 = vadd.f32 %v6331_v51, %v6325_v21  ;;  %v7874_v10 = vadd.f32 %v7873_v0, %v7872_v45 }
0x2576   : > { %v6844_v42 = vpop.permute.xlu0 %6843 }
0x2577   : > { %v6334_v24 = vadd.f32 %v6333_v30, %v11924_v31  ;;  %10070 = vpush %v7874_v10  ;;  %v6846_v2 = vmul.f32 %v6844_v42, %v6838_v34  ;;  %v12463_v31 = vld [vmem:[#allocation2_spill] sm:$0xff] }
0x2579   : > { %7898 = vst [vmem:[%s12430_s29] sm:$0xff] %v6334_v24 }
0x257a   : > { %v6852_v28 = vpop.permute.xlu0 %6851 }
0x257b   : > { %v6854_v59 = vadd.f32 %v6852_v28, %v6846_v2 }
0x257d   : > { %v6855_v5 = vadd.f32 %v6854_v59, %v11927_v44  ;;  %v12464_v44 = vld [vmem:[#allocation3_spill] sm:$0xff] }
0x257e   : > { %v7373_v1 = vpop.permute.xlu0 %7372 }
0x257f   : > { %7899 = vst [vmem:[%s12430_s29 + $0x8] sm:$0xff] %v6855_v5  ;;  %v7375_v46 = vadd.f32 %v7373_v1, %v7367_v52 }
0x2581   : > { %v7376_v62 = vadd.f32 %v7375_v46, %v12463_v31 }
0x2582   : > { %v7894_v55 = vpop.permute.xlu0 %7893 }
0x2583   : > { %7900 = vst [vmem:[%s12430_s29 + $0x10] sm:$0xff] %v7376_v62 }
0x25a8   : > { %s10071_s22 = spop %10070 }
0x25a9   : > { %v7876_v32 = vstv %s10071_s22 }
0x25aa   : > { %v7877_v8 = vmul.f32 0.0009765625, %v7876_v32 }
0x25ac   : > { %v7878_v58 = vadd.f32 1e-05, %v7877_v8 }
0x25ae   : > { %10516 = vrsqrt.f32 %v7878_v58 }
0x25b8   : > { %v10517_v48 = vpop.eup %10516 }
0x25b9   : > { %v7880_v9 = vmul.f32 %v10517_v48, %v12404_v29 }
0x25bb   : > { %v7888_v54 = vmul.f32 %v7886_v60, %v7880_v9 }
0x25bd   : > { %v7896_v61 = vadd.f32 %v7894_v55, %v7888_v54 }
0x25bf   : > { %v7897_v56 = vadd.f32 %v7896_v61, %v12464_v44 }
0x25c1   : > { %7901 = vst [vmem:[%s12430_s29 + $0x18] sm:$0xff] %v7897_v56 }
0x25c2 PF: > { %s16_s21 = sadd.s32 1, %s10524_s21  }
0x25c3   : > { %p13_p4 = scmp.ge.s32.totalorder %s16_s21, 4  }
0x25c5   :  { %15 = sbr.rel (!%p13_p4) target bundleno = 1 (0x1), region = 109 }

// kernel: voxel_context_3d_dsa_forward.4
= control target key start
LH: loop header
LB: loop body
LE: loop exit
PB: predicated region body
PF: predicated region fallthrough
CT: control target
= control target key end

     0   :  { %v2905_v3 = vmov 0.0   ;;  %vm255_vm0 = vcmask 326656   ;;  %s4050_s0 = inlined_call_operand.vmem [shape: f32[1,40,6144], index: 0, kind: input, shape index: {}]   ;;  %s4051_s1 = inlined_call_operand.vmem [shape: f32[32,40], index: 1, kind: input, shape index: {}]   ;;  %s4052_s2 = inlined_call_operand.vmem [shape: f32[1,32,384], index: 2, kind: output, shape index: {}]  }
   0x1   :  { %v16_v0 = vld [vmem:[%s4050_s0 + $0x8] sm:$0xff]  ;;  %v18_v2 = vld [vmem:[%s4050_s0 + $0x18] sm:$0xff]  ;;  %332 = vmatprep.mubr.f32.mxu0 %v2905_v3  ;;  %421 = vmatprep.mubr.f32.mxu1 %v2905_v3  ;;  %v15_v6 = vld [vmem:[%s4050_s0] sm:$0xff] }
   0x2   :  { %v64_v1 = vld [vmem:[%s4050_s0 + $0x188] sm:$0xff]  ;;  %v66_v5 = vld [vmem:[%s4050_s0 + $0x198] sm:$0xff]  ;;  %v63_v7 = vld [vmem:[%s4050_s0 + $0x180] sm:$0xff] }
   0x3   :  { %v2708_v4 = vpack.c.bf16 %v64_v1, %v16_v0  ;;  %v2716_v8 = vpack.c.bf16 %v66_v5, %v18_v2  ;;  %v2710_v9 = vpack.c.bf16 %v63_v7, %v15_v6  ;;  %v17_v10 = vld [vmem:[%s4050_s0 + $0x10] sm:$0xff]  ;;  %v112_v12 = vld [vmem:[%s4050_s0 + $0x308] sm:$0xff]  ;;  %v114_v15 = vld [vmem:[%s4050_s0 + $0x318] sm:$0xff] }
   0x4   :  { %v65_v11 = vld [vmem:[%s4050_s0 + $0x190] sm:$0xff]  ;;  %v160_v14 = vld [vmem:[%s4050_s0 + $0x488] sm:$0xff]  ;;  %v162_v16 = vld [vmem:[%s4050_s0 + $0x498] sm:$0xff] }
   0x5   :  { %2709 = vmatprep.subr.bf16.mxu0 %v2708_v4  ;;  %v2718_v13 = vpack.c.bf16 %v65_v11, %v17_v10  ;;  %2717 = vmatprep.subr.bf16.mxu1 %v2716_v8  ;;  %v2712_v17 = vpack.c.bf16 %v160_v14, %v112_v12  ;;  %v2720_v18 = vpack.c.bf16 %v162_v16, %v114_v15  ;;  %v111_v19 = vld [vmem:[%s4050_s0 + $0x300] sm:$0xff]  ;;  %v113_v21 = vld [vmem:[%s4050_s0 + $0x310] sm:$0xff]  ;;  %v208_v25 = vld [vmem:[%s4050_s0 + $0x608] sm:$0xff] }
   0x6   :  { %2711 = vmatpush1.bf16.msra.mxu0 %v2710_v9  ;;  %v159_v20 = vld [vmem:[%s4050_s0 + $0x480] sm:$0xff]  ;;  %v161_v23 = vld [vmem:[%s4050_s0 + $0x490] sm:$0xff]  ;;  %v210_v26 = vld [vmem:[%s4050_s0 + $0x618] sm:$0xff] }
   0x7   :  { %2719 = vmatpush1.bf16.msra.mxu1 %v2718_v13  ;;  %v2714_v22 = vpack.c.bf16 %v159_v20, %v111_v19  ;;  %2713 = vmatprep.subr.bf16.mxu0 %v2712_v17  ;;  %v2722_v24 = vpack.c.bf16 %v161_v23, %v113_v21  ;;  %v20_v27 = vld [vmem:[%s4050_s0 + $0x28] sm:$0xff]  ;;  %v19_v29 = vld [vmem:[%s4050_s0 + $0x20] sm:$0xff]  ;;  %v22_v31 = vld [vmem:[%s4050_s0 + $0x38] sm:$0xff] }
   0x8   :  { %2721 = vmatprep.subr.bf16.mxu1 %v2720_v18  ;;  %v68_v28 = vld [vmem:[%s4050_s0 + $0x1a8] sm:$0xff]  ;;  %v67_v30 = vld [vmem:[%s4050_s0 + $0x1a0] sm:$0xff]  ;;  %v70_v32 = vld [vmem:[%s4050_s0 + $0x1b8] sm:$0xff] }
   0x9   :  { %v207_v33 = vld [vmem:[%s4050_s0 + $0x600] sm:$0xff]  ;;  %v21_v34 = vld [vmem:[%s4050_s0 + $0x30] sm:$0xff]  ;;  %v2724_v38 = vpack.c.bf16 %v68_v28, %v20_v27  ;;  %v2726_v39 = vpack.c.bf16 %v67_v30, %v19_v29  ;;  %v2732_v40 = vpack.c.bf16 %v70_v32, %v22_v31  ;;  %v116_v41 = vld [vmem:[%s4050_s0 + $0x328] sm:$0xff] }
   0xa   :  { %2715 = vmatpush1.bf16.msra.mxu0 %v2714_v22  ;;  %v69_v35 = vld [vmem:[%s4050_s0 + $0x1b0] sm:$0xff]  ;;  %v3010_v37 = vld [vmem:[%s4051_s1] sm:$0xff]  ;;  %v164_v42 = vld [vmem:[%s4050_s0 + $0x4a8] sm:$0xff] }
   0xb   :  { %2723 = vmatpush1.bf16.msra.mxu1 %v2722_v24  ;;  %276 = vmatprep.subr.mxu0 %v208_v25  ;;  %v209_v36 = vld [vmem:[%s4050_s0 + $0x610] sm:$0xff]  ;;  %v2734_v43 = vpack.c.bf16 %v69_v35, %v21_v34  ;;  %v115_v44 = vld [vmem:[%s4050_s0 + $0x320] sm:$0xff]  ;;  %v118_v46 = vld [vmem:[%s4050_s0 + $0x338] sm:$0xff]  ;;  %v2728_v49 = vpack.c.bf16 %v164_v42, %v116_v41 }
   0xc   :  { %365 = vmatprep.subr.mxu1 %v210_v26  ;;  %v163_v45 = vld [vmem:[%s4050_s0 + $0x4a0] sm:$0xff]  ;;  %v166_v47 = vld [vmem:[%s4050_s0 + $0x4b8] sm:$0xff]  ;;  %v3037_v48 = vld [vmem:[%s4051_s1 + $0x8] sm:$0xff] }
   0xd   :  { %v117_v50 = vld [vmem:[%s4050_s0 + $0x330] sm:$0xff]  ;;  %v2730_v52 = vpack.c.bf16 %v163_v45, %v115_v44  ;;  %v2736_v53 = vpack.c.bf16 %v166_v47, %v118_v46  ;;  %v212_v56 = vld [vmem:[%s4050_s0 + $0x628] sm:$0xff]  ;;  %v211_v57 = vld [vmem:[%s4050_s0 + $0x620] sm:$0xff] }
   0xe   :  { %277 = vmatpush1.msra.mxu0 %v207_v33  ;;  %v165_v51 = vld [vmem:[%s4050_s0 + $0x4b0] sm:$0xff]  ;;  %v24_v58 = vld [vmem:[%s4050_s0 + $0x48] sm:$0xff]  ;;  %v214_v60 = vld [vmem:[%s4050_s0 + $0x638] sm:$0xff] }
   0xf   :  { %366 = vmatpush1.msra.mxu1 %v209_v36  ;;  %2612 = vmatmul.mubr.msk.f32.vlgmr.msra.gmra.mrb[0].mxu0 %vm255_vm0, %v3010_v37  ;;  %v2738_v54 = vpack.c.bf16 %v165_v51, %v117_v50  ;;  %v3054_v55 = vld [vmem:[%s4051_s1 + $0x10] sm:$0xff]  ;;  %v72_v59 = vld [vmem:[%s4050_s0 + $0x1c8] sm:$0xff]  ;;  %v26_v61 = vld [vmem:[%s4050_s0 + $0x58] sm:$0xff] }
  0x10   :  { %2616 = vmatmul.mubr.msk.f32.vlgmr.msra.gmra.mrb[0].mxu1 %vm255_vm0, %v3010_v37  ;;  %2725 = vmatprep.subr.bf16.mxu0 %v2724_v38  ;;  %v74_v62 = vld [vmem:[%s4050_s0 + $0x1d8] sm:$0xff]  ;;  %v213_v0 = vld [vmem:[%s4050_s0 + $0x630] sm:$0xff]  ;;  %v2740_v1 = vpack.c.bf16 %v72_v59, %v24_v58  ;;  %v23_v2 = vld [vmem:[%s4050_s0 + $0x40] sm:$0xff] }
  0x11   :  { %2727 = vmatpush1.bf16.msra.mxu0 %v2726_v39  ;;  %2733 = vmatprep.subr.bf16.mxu1 %v2732_v40  ;;  %v3087_v63 = vld [vmem:[%s4051_s1 + $0x18] sm:$0xff]  ;;  %v71_v4 = vld [vmem:[%s4050_s0 + $0x1c0] sm:$0xff]  ;;  %v2748_v5 = vpack.c.bf16 %v74_v62, %v26_v61  ;;  %v25_v6 = vld [vmem:[%s4050_s0 + $0x50] sm:$0xff] }
  0x12   :  { %2735 = vmatpush1.bf16.msra.mxu1 %v2734_v43  ;;  %338 = vmatprep.mubr.f32.mxu0 %v2905_v3  ;;  %v73_v7 = vld [vmem:[%s4050_s0 + $0x1d0] sm:$0xff]  ;;  %v120_v8 = vld [vmem:[%s4050_s0 + $0x348] sm:$0xff]  ;;  %v2742_v10 = vpack.c.bf16 %v71_v4, %v23_v2  ;;  %v122_v11 = vld [vmem:[%s4050_s0 + $0x358] sm:$0xff] }
  0x13   :  { %427 = vmatprep.mubr.f32.mxu1 %v2905_v3  ;;  %2613 = vmatmul.mubr.msk.f32.gmra.mrb[2].mxu0 %vm255_vm0, %v3037_v48  ;;  %v168_v9 = vld [vmem:[%s4050_s0 + $0x4c8] sm:$0xff]  ;;  %v170_v12 = vld [vmem:[%s4050_s0 + $0x4d8] sm:$0xff]  ;;  %v2750_v13 = vpack.c.bf16 %v73_v7, %v25_v6  ;;  %v119_v15 = vld [vmem:[%s4050_s0 + $0x340] sm:$0xff] }
  0x14   :  { %2617 = vmatmul.mubr.msk.f32.gmra.mrb[2].mxu1 %vm255_vm0, %v3037_v48  ;;  %2729 = vmatprep.subr.bf16.mxu0 %v2728_v49  ;;  %v2744_v14 = vpack.c.bf16 %v168_v9, %v120_v8  ;;  %v167_v16 = vld [vmem:[%s4050_s0 + $0x4c0] sm:$0xff]  ;;  %v2752_v17 = vpack.c.bf16 %v170_v12, %v122_v11  ;;  %v121_v18 = vld [vmem:[%s4050_s0 + $0x350] sm:$0xff]  ;;  %v216_v22 = vld [vmem:[%s4050_s0 + $0x648] sm:$0xff] }
  0x15   :  { %344 = vmatprep.mubr.f32.mxu0 %v2905_v3  ;;  %433 = vmatprep.mubr.f32.mxu1 %v2905_v3  ;;  %v169_v19 = vld [vmem:[%s4050_s0 + $0x4d0] sm:$0xff]  ;;  %v2746_v20 = vpack.c.bf16 %v167_v16, %v119_v15  ;;  %v28_v23 = vld [vmem:[%s4050_s0 + $0x68] sm:$0xff]  ;;  %v218_v25 = vld [vmem:[%s4050_s0 + $0x658] sm:$0xff] }
  0x16   :  { %2731 = vmatpush1.bf16.msra.mxu0 %v2730_v52  ;;  %2737 = vmatprep.subr.bf16.mxu1 %v2736_v53  ;;  %v2754_v21 = vpack.c.bf16 %v169_v19, %v121_v18  ;;  %v76_v24 = vld [vmem:[%s4050_s0 + $0x1e8] sm:$0xff]  ;;  %v30_v26 = vld [vmem:[%s4050_s0 + $0x78] sm:$0xff]  ;;  %v215_v28 = vld [vmem:[%s4050_s0 + $0x640] sm:$0xff] }
  0x17   :  { %2614 = vmatmul.mubr.msk.f32.gmra.mrb[4].mxu0 %vm255_vm0, %v3054_v55  ;;  %2739 = vmatpush1.bf16.msra.mxu1 %v2738_v54  ;;  %v78_v27 = vld [vmem:[%s4050_s0 + $0x1f8] sm:$0xff]  ;;  %v2756_v29 = vpack.c.bf16 %v76_v24, %v28_v23  ;;  %v217_v30 = vld [vmem:[%s4050_s0 + $0x650] sm:$0xff]  ;;  %v27_v32 = vld [vmem:[%s4050_s0 + $0x60] sm:$0xff] }
  0x18   :  { %2618 = vmatmul.mubr.msk.f32.gmra.mrb[4].mxu1 %vm255_vm0, %v3054_v55  ;;  %350 = vmatprep.mubr.f32.mxu0 %v2905_v3  ;;  %v2764_v31 = vpack.c.bf16 %v78_v27, %v30_v26  ;;  %v75_v33 = vld [vmem:[%s4050_s0 + $0x1e0] sm:$0xff]  ;;  %v29_v34 = vld [vmem:[%s4050_s0 + $0x70] sm:$0xff]  ;;  %v124_v36 = vld [vmem:[%s4050_s0 + $0x368] sm:$0xff] }
  0x19   :  { %439 = vmatprep.mubr.f32.mxu1 %v2905_v3  ;;  %454 = vmatprep.subr.mxu0 %v212_v56  ;;  %v77_v35 = vld [vmem:[%s4050_s0 + $0x1f0] sm:$0xff]  ;;  %v172_v38 = vld [vmem:[%s4050_s0 + $0x4e8] sm:$0xff]  ;;  %v2758_v39 = vpack.c.bf16 %v75_v33, %v27_v32  ;;  %v126_v40 = vld [vmem:[%s4050_s0 + $0x378] sm:$0xff] }
  0x1a   :  { %455 = vmatpush1.msra.mxu0 %v211_v57  ;;  %543 = vmatprep.subr.mxu1 %v214_v60  ;;  %v174_v41 = vld [vmem:[%s4050_s0 + $0x4f8] sm:$0xff]  ;;  %v2766_v42 = vpack.c.bf16 %v77_v35, %v29_v34  ;;  %v2760_v43 = vpack.c.bf16 %v172_v38, %v124_v36  ;;  %v123_v44 = vld [vmem:[%s4050_s0 + $0x360] sm:$0xff]  ;;  %v125_v47 = vld [vmem:[%s4050_s0 + $0x370] sm:$0xff] }
  0x1b   :  { %2615 = vmatmul.mubr.msk.f32.gmra.mrb[6].mxu0 %vm255_vm0, %v3087_v63  ;;  %544 = vmatpush1.msra.mxu1 %v213_v0  ;;  %v171_v45 = vld [vmem:[%s4050_s0 + $0x4e0] sm:$0xff]  ;;  %v2768_v46 = vpack.c.bf16 %v174_v41, %v126_v40  ;;  %v173_v49 = vld [vmem:[%s4050_s0 + $0x4f0] sm:$0xff]  ;;  %v220_v52 = vld [vmem:[%s4050_s0 + $0x668] sm:$0xff] }
  0x1c   :  { %2619 = vmatmul.mubr.msk.f32.gmra.mrb[6].mxu1 %vm255_vm0, %v3087_v63  ;;  %510 = vmatprep.mubr.f32.mxu0 %v2905_v3  ;;  %v2762_v50 = vpack.c.bf16 %v171_v45, %v123_v44  ;;  %v2770_v51 = vpack.c.bf16 %v173_v49, %v125_v47  ;;  %v32_v53 = vld [vmem:[%s4050_s0 + $0x88] sm:$0xff]  ;;  %v222_v56 = vld [vmem:[%s4050_s0 + $0x678] sm:$0xff]  ;;  %v219_v59 = vld [vmem:[%s4050_s0 + $0x660] sm:$0xff] }
  0x1d   :  { %599 = vmatprep.mubr.f32.mxu1 %v2905_v3  ;;  %2741 = vmatprep.subr.bf16.mxu0 %v2740_v1  ;;  %v80_v54 = vld [vmem:[%s4050_s0 + $0x208] sm:$0xff]  ;;  %v34_v57 = vld [vmem:[%s4050_s0 + $0x98] sm:$0xff]  ;;  %v221_v61 = vld [vmem:[%s4050_s0 + $0x670] sm:$0xff] }
  0x1e   :  { %2749 = vmatprep.subr.bf16.mxu1 %v2748_v5  ;;  %v82_v58 = vld [vmem:[%s4050_s0 + $0x218] sm:$0xff]  ;;  %v2772_v60 = vpack.c.bf16 %v80_v54, %v32_v53  ;;  %v31_v0 = vld [vmem:[%s4050_s0 + $0x80] sm:$0xff]  ;;  %v33_v2 = vld [vmem:[%s4050_s0 + $0x90] sm:$0xff] }
  0x1f   :  { %2620 = vmatmul.mubr.msk.f32.vlgmr.msra.gmra.mrb[8].mxu0 %vm255_vm0, %v3010_v37  ;;  %v2780_v62 = vpack.c.bf16 %v82_v58, %v34_v57  ;;  %v79_v1 = vld [vmem:[%s4050_s0 + $0x200] sm:$0xff]  ;;  %v81_v4 = vld [vmem:[%s4050_s0 + $0x210] sm:$0xff]  ;;  %v128_v5 = vld [vmem:[%s4050_s0 + $0x388] sm:$0xff] }
  0x20   :  { %2624 = vmatmul.mubr.msk.f32.vlgmr.msra.gmra.mrb[8].mxu1 %vm255_vm0, %v3010_v37  ;;  %2743 = vmatpush1.bf16.msra.mxu0 %v2742_v10  ;;  %v176_v6 = vld [vmem:[%s4050_s0 + $0x508] sm:$0xff]  ;;  %v2774_v7 = vpack.c.bf16 %v79_v1, %v31_v0  ;;  %v130_v8 = vld [vmem:[%s4050_s0 + $0x398] sm:$0xff]  ;;  %v2782_v10 = vpack.c.bf16 %v81_v4, %v33_v2  ;;  %v127_v12 = vld [vmem:[%s4050_s0 + $0x380] sm:$0xff] }
  0x21   :  { %2751 = vmatpush1.bf16.msra.mxu1 %v2750_v13  ;;  %516 = vmatprep.mubr.f32.mxu0 %v2905_v3  ;;  %v178_v9 = vld [vmem:[%s4050_s0 + $0x518] sm:$0xff]  ;;  %v2776_v11 = vpack.c.bf16 %v176_v6, %v128_v5  ;;  %v175_v13 = vld [vmem:[%s4050_s0 + $0x500] sm:$0xff]  ;;  %v129_v15 = vld [vmem:[%s4050_s0 + $0x390] sm:$0xff] }
  0x22   :  { %605 = vmatprep.mubr.f32.mxu1 %v2905_v3  ;;  %2745 = vmatprep.subr.bf16.mxu0 %v2744_v14  ;;  %v2784_v14 = vpack.c.bf16 %v178_v9, %v130_v8  ;;  %v177_v16 = vld [vmem:[%s4050_s0 + $0x510] sm:$0xff]  ;;  %v224_v19 = vld [vmem:[%s4050_s0 + $0x688] sm:$0xff]  ;;  %v38_v23 = vld [vmem:[%s4050_s0 + $0xb8] sm:$0xff] }
  0x23   :  { %2621 = vmatmul.mubr.msk.f32.gmra.mrb[10].mxu0 %vm255_vm0, %v3037_v48  ;;  %2753 = vmatprep.subr.bf16.mxu1 %v2752_v17  ;;  %v2778_v17 = vpack.c.bf16 %v175_v13, %v127_v12  ;;  %v2786_v18 = vpack.c.bf16 %v177_v16, %v129_v15  ;;  %v86_v24 = vld [vmem:[%s4050_s0 + $0x238] sm:$0xff]  ;;  %v225_v27 = vld [vmem:[%s4050_s0 + $0x690] sm:$0xff]  ;;  %v132_v33 = vld [vmem:[%s4050_s0 + $0x3a8] sm:$0xff] }
  0x24   :  { %2625 = vmatmul.mubr.msk.f32.gmra.mrb[10].mxu1 %vm255_vm0, %v3037_v48  ;;  %522 = vmatprep.mubr.f32.mxu0 %v2905_v3  ;;  %v85_v32 = vld [vmem:[%s4050_s0 + $0x230] sm:$0xff]  ;;  %v180_v34 = vld [vmem:[%s4050_s0 + $0x528] sm:$0xff]  ;;  %v134_v36 = vld [vmem:[%s4050_s0 + $0x3b8] sm:$0xff] }
  0x25   :  { %611 = vmatprep.mubr.f32.mxu1 %v2905_v3  ;;  %2747 = vmatpush1.bf16.msra.mxu0 %v2746_v20  ;;  %v36_v20 = vld [vmem:[%s4050_s0 + $0xa8] sm:$0xff]  ;;  %v182_v38 = vld [vmem:[%s4050_s0 + $0x538] sm:$0xff]  ;;  %v2792_v40 = vpack.c.bf16 %v180_v34, %v132_v33  ;;  %v131_v41 = vld [vmem:[%s4050_s0 + $0x3a0] sm:$0xff] }
  0x26   :  { %2755 = vmatpush1.bf16.msra.mxu1 %v2754_v21  ;;  %632 = vmatprep.subr.mxu0 %v216_v22  ;;  %v84_v21 = vld [vmem:[%s4050_s0 + $0x228] sm:$0xff]  ;;  %v226_v22 = vld [vmem:[%s4050_s0 + $0x698] sm:$0xff]  ;;  %v133_v44 = vld [vmem:[%s4050_s0 + $0x3b0] sm:$0xff] }
  0x27   :  { %2622 = vmatmul.mubr.msk.f32.gmra.mrb[12].mxu0 %vm255_vm0, %v3054_v55  ;;  %721 = vmatprep.subr.mxu1 %v218_v25  ;;  %v223_v25 = vld [vmem:[%s4050_s0 + $0x680] sm:$0xff]  ;;  %v2788_v26 = vpack.c.bf16 %v84_v21, %v36_v20  ;;  %v181_v45 = vld [vmem:[%s4050_s0 + $0x530] sm:$0xff]  ;;  %v228_v49 = vld [vmem:[%s4050_s0 + $0x6a8] sm:$0xff] }
  0x28   :  { %2626 = vmatmul.mubr.msk.f32.gmra.mrb[12].mxu1 %vm255_vm0, %v3054_v55  ;;  %528 = vmatprep.mubr.f32.mxu0 %v2905_v3  ;;  %v2802_v47 = vpack.c.bf16 %v181_v45, %v133_v44  ;;  %v42_v53 = vld [vmem:[%s4050_s0 + $0xd8] sm:$0xff]  ;;  %v229_v58 = vld [vmem:[%s4050_s0 + $0x6b0] sm:$0xff]  ;;  %v136_v1 = vld [vmem:[%s4050_s0 + $0x3c8] sm:$0xff] }
  0x29   :  { %617 = vmatprep.mubr.f32.mxu1 %v2905_v3  ;;  %633 = vmatpush1.msra.mxu0 %v215_v28  ;;  %v2796_v28 = vpack.c.bf16 %v86_v24, %v38_v23  ;;  %v90_v54 = vld [vmem:[%s4050_s0 + $0x258] sm:$0xff]  ;;  %v89_v0 = vld [vmem:[%s4050_s0 + $0x250] sm:$0xff]  ;;  %v184_v2 = vld [vmem:[%s4050_s0 + $0x548] sm:$0xff] }
  0x2a   :  { %722 = vmatpush1.msra.mxu1 %v217_v30  ;;  %2757 = vmatprep.subr.bf16.mxu0 %v2756_v29  ;;  %v35_v29 = vld [vmem:[%s4050_s0 + $0xa0] sm:$0xff]  ;;  %v138_v5 = vld [vmem:[%s4050_s0 + $0x3d8] sm:$0xff]  ;;  %v2808_v8 = vpack.c.bf16 %v184_v2, %v136_v1  ;;  %v137_v12 = vld [vmem:[%s4050_s0 + $0x3d0] sm:$0xff] }
  0x2b   :  { %2623 = vmatmul.mubr.msk.f32.gmra.mrb[14].mxu0 %vm255_vm0, %v3087_v63  ;;  %2765 = vmatprep.subr.bf16.mxu1 %v2764_v31  ;;  %v83_v30 = vld [vmem:[%s4050_s0 + $0x220] sm:$0xff]  ;;  %v37_v31 = vld [vmem:[%s4050_s0 + $0xb0] sm:$0xff]  ;;  %v186_v6 = vld [vmem:[%s4050_s0 + $0x558] sm:$0xff] }
  0x2c   :  { %2627 = vmatmul.mubr.msk.f32.gmra.mrb[14].mxu1 %vm255_vm0, %v3087_v63  ;;  %688 = vmatprep.mubr.f32.mxu0 %v2905_v3  ;;  %v2790_v35 = vpack.c.bf16 %v83_v30, %v35_v29  ;;  %v135_v9 = vld [vmem:[%s4050_s0 + $0x3c0] sm:$0xff]  ;;  %v185_v13 = vld [vmem:[%s4050_s0 + $0x550] sm:$0xff]  ;;  %v232_v16 = vld [vmem:[%s4050_s0 + $0x6c8] sm:$0xff] }
  0x2d   :  { %777 = vmatprep.mubr.f32.mxu1 %v2905_v3  ;;  %v2818_v15 = vpack.c.bf16 %v185_v13, %v137_v12  ;;  %v46_v20 = vld [vmem:[%s4050_s0 + $0xf8] sm:$0xff]  ;;  %v233_v24 = vld [vmem:[%s4050_s0 + $0x6d0] sm:$0xff]  ;;  %v140_v30 = vld [vmem:[%s4050_s0 + $0x3e8] sm:$0xff] }
  0x2e   :  { %v94_v21 = vld [vmem:[%s4050_s0 + $0x278] sm:$0xff]  ;;  %v93_v29 = vld [vmem:[%s4050_s0 + $0x270] sm:$0xff]  ;;  %v236_v45 = vld [vmem:[%s4050_s0 + $0x6e8] sm:$0xff] }
  0x2f   :  { %2628 = vmatmul.mubr.msk.f32.vlgmr.msra.gmra.mrb[16].mxu0 %vm255_vm0, %v3010_v37  ;;  %v142_v33 = vld [vmem:[%s4050_s0 + $0x3f8] sm:$0xff]  ;;  %v240_v13 = vld [vmem:[%s4050_s0 + $0x708] sm:$0xff] }
  0x30   :  { %2632 = vmatmul.mubr.msk.f32.vlgmr.msra.gmra.mrb[16].mxu1 %vm255_vm0, %v3010_v37  ;;  %2759 = vmatpush1.bf16.msra.mxu0 %v2758_v39  ;;  %v2798_v39 = vpack.c.bf16 %v85_v32, %v37_v31  ;;  %v188_v31 = vld [vmem:[%s4050_s0 + $0x568] sm:$0xff]  ;;  %v190_v34 = vld [vmem:[%s4050_s0 + $0x578] sm:$0xff] }
  0x31   :  { %2767 = vmatpush1.bf16.msra.mxu1 %v2766_v42  ;;  %694 = vmatprep.mubr.f32.mxu0 %v2905_v3  ;;  %v179_v42 = vld [vmem:[%s4050_s0 + $0x520] sm:$0xff]  ;;  %v146_v1 = vld [vmem:[%s4050_s0 + $0x418] sm:$0xff] }
  0x32   :  { %783 = vmatprep.mubr.f32.mxu1 %v2905_v3  ;;  %2761 = vmatprep.subr.bf16.mxu0 %v2760_v43  ;;  %v2800_v43 = vpack.c.bf16 %v182_v38, %v134_v36  ;;  %v2824_v36 = vpack.c.bf16 %v188_v31, %v140_v30  ;;  %v139_v38 = vld [vmem:[%s4050_s0 + $0x3e0] sm:$0xff]  ;;  %v194_v2 = vld [vmem:[%s4050_s0 + $0x598] sm:$0xff] }
  0x33   :  { %2629 = vmatmul.mubr.msk.f32.gmra.mrb[18].mxu0 %vm255_vm0, %v3037_v48  ;;  %2769 = vmatprep.subr.bf16.mxu1 %v2768_v46  ;;  %v2794_v46 = vpack.c.bf16 %v179_v42, %v131_v41  ;;  %v141_v41 = vld [vmem:[%s4050_s0 + $0x3f0] sm:$0xff]  ;;  %v150_v30 = vld [vmem:[%s4050_s0 + $0x438] sm:$0xff] }
  0x34   :  { %2633 = vmatmul.mubr.msk.f32.gmra.mrb[18].mxu1 %vm255_vm0, %v3037_v48  ;;  %700 = vmatprep.mubr.f32.mxu0 %v2905_v3  ;;  %v189_v42 = vld [vmem:[%s4050_s0 + $0x570] sm:$0xff]  ;;  %v198_v31 = vld [vmem:[%s4050_s0 + $0x5b8] sm:$0xff] }
  0x35   :  { %789 = vmatprep.mubr.f32.mxu1 %v2905_v3  ;;  %2763 = vmatpush1.bf16.msra.mxu0 %v2762_v50  ;;  %v40_v50 = vld [vmem:[%s4050_s0 + $0xc8] sm:$0xff]  ;;  %v2834_v44 = vpack.c.bf16 %v189_v42, %v141_v41 }
  0x36   :  { %2771 = vmatpush1.bf16.msra.mxu1 %v2770_v51  ;;  %810 = vmatprep.subr.mxu0 %v220_v52  ;;  %v88_v51 = vld [vmem:[%s4050_s0 + $0x248] sm:$0xff]  ;;  %v230_v52 = vld [vmem:[%s4050_s0 + $0x6b8] sm:$0xff] }
  0x37   :  { %2630 = vmatmul.mubr.msk.f32.gmra.mrb[20].mxu0 %vm255_vm0, %v3054_v55  ;;  %899 = vmatprep.subr.mxu1 %v222_v56  ;;  %v227_v56 = vld [vmem:[%s4050_s0 + $0x6a0] sm:$0xff]  ;;  %v2804_v57 = vpack.c.bf16 %v88_v51, %v40_v50  ;;  %v50_v50 = vld [vmem:[%s4050_s0 + $0x118] sm:$0xff]  ;;  %v244_v42 = vld [vmem:[%s4050_s0 + $0x728] sm:$0xff] }
  0x38   :  { %2634 = vmatmul.mubr.msk.f32.gmra.mrb[20].mxu1 %vm255_vm0, %v3054_v55  ;;  %706 = vmatprep.mubr.f32.mxu0 %v2905_v3  ;;  %v98_v51 = vld [vmem:[%s4050_s0 + $0x298] sm:$0xff] }
  0x39   :  { %795 = vmatprep.mubr.f32.mxu1 %v2905_v3  ;;  %811 = vmatpush1.msra.mxu0 %v219_v59  ;;  %v2812_v59 = vpack.c.bf16 %v90_v54, %v42_v53  ;;  %v237_v54 = vld [vmem:[%s4050_s0 + $0x6f0] sm:$0xff] }
  0x3a   :  { %900 = vmatpush1.msra.mxu1 %v221_v61  ;;  %2773 = vmatprep.subr.bf16.mxu0 %v2772_v60  ;;  %v39_v60 = vld [vmem:[%s4050_s0 + $0xc0] sm:$0xff] }
  0x3b   :  { %2631 = vmatmul.mubr.msk.f32.gmra.mrb[22].mxu0 %vm255_vm0, %v3087_v63  ;;  %2781 = vmatprep.subr.bf16.mxu1 %v2780_v62  ;;  %v87_v61 = vld [vmem:[%s4050_s0 + $0x240] sm:$0xff]  ;;  %v41_v62 = vld [vmem:[%s4050_s0 + $0xd0] sm:$0xff] }
  0x3c   :  { %2635 = vmatmul.mubr.msk.f32.gmra.mrb[22].mxu1 %vm255_vm0, %v3087_v63  ;;  %866 = vmatprep.mubr.f32.mxu0 %v2905_v3  ;;  %v2806_v4 = vpack.c.bf16 %v87_v61, %v39_v60  ;;  %v97_v60 = vld [vmem:[%s4050_s0 + $0x290] sm:$0xff]  ;;  %v144_v61 = vld [vmem:[%s4050_s0 + $0x408] sm:$0xff] }
  0x3d   :  { %955 = vmatprep.mubr.f32.mxu1 %v2905_v3 }
  0x3f   :  { %2636 = vmatmul.mubr.msk.f32.vlgmr.msra.gmra.mrb[24].mxu0 %vm255_vm0, %v3010_v37 }
  0x40   :  { %2640 = vmatmul.mubr.msk.f32.vlgmr.msra.gmra.mrb[24].mxu1 %vm255_vm0, %v3010_v37  ;;  %2775 = vmatpush1.bf16.msra.mxu0 %v2774_v7  ;;  %v2814_v7 = vpack.c.bf16 %v89_v0, %v41_v62  ;;  %v192_v62 = vld [vmem:[%s4050_s0 + $0x588] sm:$0xff] }
  0x41   :  { %2783 = vmatpush1.bf16.msra.mxu1 %v2782_v10  ;;  %872 = vmatprep.mubr.f32.mxu0 %v2905_v3  ;;  %v183_v10 = vld [vmem:[%s4050_s0 + $0x540] sm:$0xff] }
  0x42   :  { %961 = vmatprep.mubr.f32.mxu1 %v2905_v3  ;;  %2777 = vmatprep.subr.bf16.mxu0 %v2776_v11  ;;  %v2816_v11 = vpack.c.bf16 %v186_v6, %v138_v5  ;;  %v2840_v5 = vpack.c.bf16 %v192_v62, %v144_v61  ;;  %v143_v6 = vld [vmem:[%s4050_s0 + $0x400] sm:$0xff] }
  0x43   :  { %2637 = vmatmul.mubr.msk.f32.gmra.mrb[26].mxu0 %vm255_vm0, %v3037_v48  ;;  %2785 = vmatprep.subr.bf16.mxu1 %v2784_v14  ;;  %v2810_v14 = vpack.c.bf16 %v183_v10, %v135_v9  ;;  %v145_v9 = vld [vmem:[%s4050_s0 + $0x410] sm:$0xff]  ;;  %v151_v62 = vld [vmem:[%s4050_s0 + $0x440] sm:$0xff] }
  0x44   :  { %2641 = vmatmul.mubr.msk.f32.gmra.mrb[26].mxu1 %vm255_vm0, %v3037_v48  ;;  %878 = vmatprep.mubr.f32.mxu0 %v2905_v3  ;;  %v193_v10 = vld [vmem:[%s4050_s0 + $0x590] sm:$0xff] }
  0x45   :  { %967 = vmatprep.mubr.f32.mxu1 %v2905_v3  ;;  %2779 = vmatpush1.bf16.msra.mxu0 %v2778_v17  ;;  %v44_v17 = vld [vmem:[%s4050_s0 + $0xe8] sm:$0xff]  ;;  %v2850_v12 = vpack.c.bf16 %v193_v10, %v145_v9 }
  0x46   :  { %2787 = vmatpush1.bf16.msra.mxu1 %v2786_v18  ;;  %988 = vmatprep.subr.mxu0 %v224_v19  ;;  %v92_v18 = vld [vmem:[%s4050_s0 + $0x268] sm:$0xff]  ;;  %v234_v19 = vld [vmem:[%s4050_s0 + $0x6d8] sm:$0xff] }
  0x47   :  { %2638 = vmatmul.mubr.msk.f32.gmra.mrb[28].mxu0 %vm255_vm0, %v3054_v55  ;;  %1077 = vmatprep.subr.mxu1 %v226_v22  ;;  %v231_v22 = vld [vmem:[%s4050_s0 + $0x6c0] sm:$0xff]  ;;  %v2820_v23 = vpack.c.bf16 %v92_v18, %v44_v17  ;;  %v54_v17 = vld [vmem:[%s4050_s0 + $0x138] sm:$0xff]  ;;  %v60_v9 = vld [vmem:[%s4050_s0 + $0x168] sm:$0xff] }
  0x48   :  { %2642 = vmatmul.mubr.msk.f32.gmra.mrb[28].mxu1 %vm255_vm0, %v3054_v55  ;;  %884 = vmatprep.mubr.f32.mxu0 %v2905_v3  ;;  %v102_v18 = vld [vmem:[%s4050_s0 + $0x2b8] sm:$0xff]  ;;  %v108_v10 = vld [vmem:[%s4050_s0 + $0x2e8] sm:$0xff] }
  0x49   :  { %973 = vmatprep.mubr.f32.mxu1 %v2905_v3  ;;  %989 = vmatpush1.msra.mxu0 %v223_v25  ;;  %v2828_v25 = vpack.c.bf16 %v94_v21, %v46_v20  ;;  %v241_v21 = vld [vmem:[%s4050_s0 + $0x710] sm:$0xff] }
  0x4a   :  { %1078 = vmatpush1.msra.mxu1 %v225_v27  ;;  %2789 = vmatprep.subr.bf16.mxu0 %v2788_v26  ;;  %v43_v26 = vld [vmem:[%s4050_s0 + $0xe0] sm:$0xff] }
  0x4b   :  { %2639 = vmatmul.mubr.msk.f32.gmra.mrb[30].mxu0 %vm255_vm0, %v3087_v63  ;;  %2797 = vmatprep.subr.bf16.mxu1 %v2796_v28  ;;  %v91_v27 = vld [vmem:[%s4050_s0 + $0x260] sm:$0xff]  ;;  %v45_v28 = vld [vmem:[%s4050_s0 + $0xf0] sm:$0xff] }
  0x4c   :  { %2643 = vmatmul.mubr.msk.f32.gmra.mrb[30].mxu1 %vm255_vm0, %v3087_v63  ;;  %1044 = vmatprep.mubr.f32.mxu0 %v2905_v3  ;;  %v2822_v32 = vpack.c.bf16 %v91_v27, %v43_v26  ;;  %v101_v26 = vld [vmem:[%s4050_s0 + $0x2b0] sm:$0xff]  ;;  %v148_v27 = vld [vmem:[%s4050_s0 + $0x428] sm:$0xff] }
  0x4d   :  { %1133 = vmatprep.mubr.f32.mxu1 %v2905_v3 }
  0x4f   :  { %2644 = vmatmul.mubr.msk.f32.vlgmr.msra.gmra.mrb[32].mxu0 %vm255_vm0, %v3010_v37 }
  0x50   :  { %2648 = vmatmul.mubr.msk.f32.vlgmr.msra.gmra.mrb[32].mxu1 %vm255_vm0, %v3010_v37  ;;  %2791 = vmatpush1.bf16.msra.mxu0 %v2790_v35  ;;  %v2830_v35 = vpack.c.bf16 %v93_v29, %v45_v28  ;;  %v196_v28 = vld [vmem:[%s4050_s0 + $0x5a8] sm:$0xff] }
  0x51   :  { %2799 = vmatpush1.bf16.msra.mxu1 %v2798_v39  ;;  %1050 = vmatprep.mubr.f32.mxu0 %v2905_v3  ;;  %v187_v39 = vld [vmem:[%s4050_s0 + $0x560] sm:$0xff] }
  0x52   :  { %1139 = vmatprep.mubr.f32.mxu1 %v2905_v3  ;;  %2793 = vmatprep.subr.bf16.mxu0 %v2792_v40  ;;  %v2832_v40 = vpack.c.bf16 %v190_v34, %v142_v33  ;;  %v2856_v33 = vpack.c.bf16 %v196_v28, %v148_v27  ;;  %v147_v34 = vld [vmem:[%s4050_s0 + $0x420] sm:$0xff]  ;;  %v158_v27 = vld [vmem:[%s4050_s0 + $0x478] sm:$0xff] }
  0x53   :  { %2645 = vmatmul.mubr.msk.f32.gmra.mrb[34].mxu0 %vm255_vm0, %v3037_v48  ;;  %2801 = vmatprep.subr.bf16.mxu1 %v2800_v43  ;;  %v2826_v43 = vpack.c.bf16 %v187_v39, %v139_v38  ;;  %v149_v38 = vld [vmem:[%s4050_s0 + $0x430] sm:$0xff]  ;;  %v206_v28 = vld [vmem:[%s4050_s0 + $0x5f8] sm:$0xff] }
  0x54   :  { %2649 = vmatmul.mubr.msk.f32.gmra.mrb[34].mxu1 %vm255_vm0, %v3037_v48  ;;  %1056 = vmatprep.mubr.f32.mxu0 %v2905_v3  ;;  %v197_v39 = vld [vmem:[%s4050_s0 + $0x5b0] sm:$0xff] }
  0x55   :  { %1145 = vmatprep.mubr.f32.mxu1 %v2905_v3  ;;  %2795 = vmatpush1.bf16.msra.mxu0 %v2794_v46  ;;  %v48_v46 = vld [vmem:[%s4050_s0 + $0x108] sm:$0xff]  ;;  %v2866_v41 = vpack.c.bf16 %v197_v39, %v149_v38 }
  0x56   :  { %2803 = vmatpush1.bf16.msra.mxu1 %v2802_v47  ;;  %1166 = vmatprep.subr.mxu0 %v228_v49  ;;  %v96_v47 = vld [vmem:[%s4050_s0 + $0x288] sm:$0xff]  ;;  %v238_v49 = vld [vmem:[%s4050_s0 + $0x6f8] sm:$0xff] }
  0x57   :  { %2646 = vmatmul.mubr.msk.f32.gmra.mrb[36].mxu0 %vm255_vm0, %v3054_v55  ;;  %1255 = vmatprep.subr.mxu1 %v230_v52  ;;  %v235_v52 = vld [vmem:[%s4050_s0 + $0x6e0] sm:$0xff]  ;;  %v2836_v53 = vpack.c.bf16 %v96_v47, %v48_v46  ;;  %v106_v46 = vld [vmem:[%s4050_s0 + $0x2d8] sm:$0xff]  ;;  %v252_v39 = vld [vmem:[%s4050_s0 + $0x768] sm:$0xff] }
  0x58   :  { %2650 = vmatmul.mubr.msk.f32.gmra.mrb[36].mxu1 %vm255_vm0, %v3054_v55  ;;  %1062 = vmatprep.mubr.f32.mxu0 %v2905_v3 }
  0x59   :  { %1151 = vmatprep.mubr.f32.mxu1 %v2905_v3  ;;  %1167 = vmatpush1.msra.mxu0 %v227_v56  ;;  %v2844_v56 = vpack.c.bf16 %v98_v51, %v50_v50  ;;  %v55_v51 = vld [vmem:[%s4050_s0 + $0x140] sm:$0xff] }
  0x5a   :  { %1256 = vmatpush1.msra.mxu1 %v229_v58  ;;  %2805 = vmatprep.subr.bf16.mxu0 %v2804_v57  ;;  %v47_v57 = vld [vmem:[%s4050_s0 + $0x100] sm:$0xff] }
  0x5b   :  { %2647 = vmatmul.mubr.msk.f32.gmra.mrb[38].mxu0 %vm255_vm0, %v3087_v63  ;;  %2813 = vmatprep.subr.bf16.mxu1 %v2812_v59  ;;  %v95_v58 = vld [vmem:[%s4050_s0 + $0x280] sm:$0xff]  ;;  %v49_v59 = vld [vmem:[%s4050_s0 + $0x110] sm:$0xff] }
  0x5c   :  { %2651 = vmatmul.mubr.msk.f32.gmra.mrb[38].mxu1 %vm255_vm0, %v3087_v63  ;;  %1222 = vmatprep.mubr.f32.mxu0 %v2905_v3  ;;  %v2838_v0 = vpack.c.bf16 %v95_v58, %v47_v57  ;;  %v154_v58 = vld [vmem:[%s4050_s0 + $0x458] sm:$0xff] }
  0x5d   :  { %1311 = vmatprep.mubr.f32.mxu1 %v2905_v3 }
  0x5f   :  { %2652 = vmatmul.mubr.msk.f32.vlgmr.msra.gmra.mrb[40].mxu0 %vm255_vm0, %v3010_v37 }
  0x60   :  { %2656 = vmatmul.mubr.msk.f32.vlgmr.msra.gmra.mrb[40].mxu1 %vm255_vm0, %v3010_v37  ;;  %2807 = vmatpush1.bf16.msra.mxu0 %v2806_v4  ;;  %v2846_v4 = vpack.c.bf16 %v97_v60, %v49_v59  ;;  %v202_v59 = vld [vmem:[%s4050_s0 + $0x5d8] sm:$0xff] }
  0x61   :  { %2815 = vmatpush1.bf16.msra.mxu1 %v2814_v7  ;;  %1228 = vmatprep.mubr.f32.mxu0 %v2905_v3  ;;  %v191_v7 = vld [vmem:[%s4050_s0 + $0x580] sm:$0xff] }
  0x62   :  { %1317 = vmatprep.mubr.f32.mxu1 %v2905_v3  ;;  %2809 = vmatprep.subr.bf16.mxu0 %v2808_v8  ;;  %v2848_v8 = vpack.c.bf16 %v194_v2, %v146_v1  ;;  %v2880_v1 = vpack.c.bf16 %v202_v59, %v154_v58  ;;  %v153_v2 = vld [vmem:[%s4050_s0 + $0x450] sm:$0xff] }
  0x63   :  { %2653 = vmatmul.mubr.msk.f32.gmra.mrb[42].mxu0 %vm255_vm0, %v3037_v48  ;;  %2817 = vmatprep.subr.bf16.mxu1 %v2816_v11  ;;  %v2842_v11 = vpack.c.bf16 %v191_v7, %v143_v6  ;;  %v3821_v7 = vld [vmem:[%s4051_s1 + $0x8] sm:$0xff] }
  0x64   :  { %2657 = vmatmul.mubr.msk.f32.gmra.mrb[42].mxu1 %vm255_vm0, %v3037_v48  ;;  %1234 = vmatprep.mubr.f32.mxu0 %v2905_v3 }
  0x65   :  { %1323 = vmatprep.mubr.f32.mxu1 %v2905_v3  ;;  %2811 = vmatpush1.bf16.msra.mxu0 %v2810_v14  ;;  %v52_v14 = vld [vmem:[%s4050_s0 + $0x128] sm:$0xff] }
  0x66   :  { %2819 = vmatpush1.bf16.msra.mxu1 %v2818_v15  ;;  %1344 = vmatprep.subr.mxu0 %v232_v16  ;;  %v100_v15 = vld [vmem:[%s4050_s0 + $0x2a8] sm:$0xff]  ;;  %v242_v16 = vld [vmem:[%s4050_s0 + $0x718] sm:$0xff] }
  0x67   :  { %2654 = vmatmul.mubr.msk.f32.gmra.mrb[44].mxu0 %vm255_vm0, %v3054_v55  ;;  %1433 = vmatprep.subr.mxu1 %v234_v19  ;;  %v239_v19 = vld [vmem:[%s4050_s0 + $0x700] sm:$0xff]  ;;  %v2852_v20 = vpack.c.bf16 %v100_v15, %v52_v14  ;;  %v2884_v15 = vpack.c.bf16 %v108_v10, %v60_v9 }
  0x68   :  { %2658 = vmatmul.mubr.msk.f32.gmra.mrb[44].mxu1 %vm255_vm0, %v3054_v55  ;;  %1240 = vmatprep.mubr.f32.mxu0 %v2905_v3  ;;  %v247_v14 = vld [vmem:[%s4050_s0 + $0x740] sm:$0xff] }
  0x69   :  { %1329 = vmatprep.mubr.f32.mxu1 %v2905_v3  ;;  %1345 = vmatpush1.msra.mxu0 %v231_v22  ;;  %v2860_v22 = vpack.c.bf16 %v102_v18, %v54_v17  ;;  %v249_v17 = vld [vmem:[%s4050_s0 + $0x750] sm:$0xff] }
  0x6a   :  { %1434 = vmatpush1.msra.mxu1 %v233_v24  ;;  %2821 = vmatprep.subr.bf16.mxu0 %v2820_v23  ;;  %v51_v23 = vld [vmem:[%s4050_s0 + $0x120] sm:$0xff] }
  0x6b   :  { %2655 = vmatmul.mubr.msk.f32.gmra.mrb[46].mxu0 %vm255_vm0, %v3087_v63  ;;  %2829 = vmatprep.subr.bf16.mxu1 %v2828_v25  ;;  %v99_v24 = vld [vmem:[%s4050_s0 + $0x2a0] sm:$0xff]  ;;  %v53_v25 = vld [vmem:[%s4050_s0 + $0x130] sm:$0xff] }
  0x6c   :  { %2659 = vmatmul.mubr.msk.f32.gmra.mrb[46].mxu1 %vm255_vm0, %v3087_v63  ;;  %1400 = vmatprep.mubr.f32.mxu0 %v2905_v3  ;;  %v2854_v29 = vpack.c.bf16 %v99_v24, %v51_v23  ;;  %v3879_v23 = vld [vmem:[%s4051_s1 + $0x18] sm:$0xff]  ;;  %v156_v24 = vld [vmem:[%s4050_s0 + $0x468] sm:$0xff] }
  0x6d   :  { %1489 = vmatprep.mubr.f32.mxu1 %v2905_v3 }
  0x6f   :  { %2660 = vmatmul.mubr.msk.f32.vlgmr.msra.gmra.mrb[48].mxu0 %vm255_vm0, %v3010_v37 }
  0x70   :  { %2664 = vmatmul.mubr.msk.f32.vlgmr.msra.gmra.mrb[48].mxu1 %vm255_vm0, %v3010_v37  ;;  %2823 = vmatpush1.bf16.msra.mxu0 %v2822_v32  ;;  %v2862_v32 = vpack.c.bf16 %v101_v26, %v53_v25  ;;  %v204_v25 = vld [vmem:[%s4050_s0 + $0x5e8] sm:$0xff] }
  0x71   :  { %2831 = vmatpush1.bf16.msra.mxu1 %v2830_v35  ;;  %1406 = vmatprep.mubr.f32.mxu0 %v2905_v3  ;;  %v195_v35 = vld [vmem:[%s4050_s0 + $0x5a0] sm:$0xff] }
  0x72   :  { %1495 = vmatprep.mubr.f32.mxu1 %v2905_v3  ;;  %2825 = vmatprep.subr.bf16.mxu0 %v2824_v36  ;;  %v2864_v36 = vpack.c.bf16 %v198_v31, %v150_v30  ;;  %v2888_v30 = vpack.c.bf16 %v204_v25, %v156_v24  ;;  %v155_v31 = vld [vmem:[%s4050_s0 + $0x460] sm:$0xff] }
  0x73   :  { %2661 = vmatmul.mubr.msk.f32.gmra.mrb[50].mxu0 %vm255_vm0, %v3037_v48  ;;  %2833 = vmatprep.subr.bf16.mxu1 %v2832_v40  ;;  %v2858_v40 = vpack.c.bf16 %v195_v35, %v147_v34  ;;  %v157_v34 = vld [vmem:[%s4050_s0 + $0x470] sm:$0xff] }
  0x74   :  { %2665 = vmatmul.mubr.msk.f32.gmra.mrb[50].mxu1 %vm255_vm0, %v3037_v48  ;;  %1412 = vmatprep.mubr.f32.mxu0 %v2905_v3  ;;  %v205_v35 = vld [vmem:[%s4050_s0 + $0x5f0] sm:$0xff] }
  0x75   :  { %1501 = vmatprep.mubr.f32.mxu1 %v2905_v3  ;;  %2827 = vmatpush1.bf16.msra.mxu0 %v2826_v43  ;;  %v104_v43 = vld [vmem:[%s4050_s0 + $0x2c8] sm:$0xff]  ;;  %v2898_v38 = vpack.c.bf16 %v205_v35, %v157_v34 }
  0x76   :  { %2835 = vmatpush1.bf16.msra.mxu1 %v2834_v44  ;;  %1522 = vmatprep.subr.mxu0 %v236_v45  ;;  %v246_v44 = vld [vmem:[%s4050_s0 + $0x738] sm:$0xff] }
  0x77   :  { %2662 = vmatmul.mubr.msk.f32.gmra.mrb[52].mxu0 %vm255_vm0, %v3054_v55  ;;  %1611 = vmatprep.subr.mxu1 %v238_v49  ;;  %v58_v45 = vld [vmem:[%s4050_s0 + $0x158] sm:$0xff]  ;;  %v245_v49 = vld [vmem:[%s4050_s0 + $0x730] sm:$0xff] }
  0x78   :  { %2666 = vmatmul.mubr.msk.f32.gmra.mrb[52].mxu1 %vm255_vm0, %v3054_v55  ;;  %1418 = vmatprep.mubr.f32.mxu0 %v2905_v3  ;;  %v2876_v50 = vpack.c.bf16 %v106_v46, %v58_v45 }
  0x79   :  { %1507 = vmatprep.mubr.f32.mxu1 %v2905_v3  ;;  %1523 = vmatpush1.msra.mxu0 %v235_v52  ;;  %v103_v52 = vld [vmem:[%s4050_s0 + $0x2c0] sm:$0xff] }
  0x7a   :  { %1612 = vmatpush1.msra.mxu1 %v237_v54  ;;  %2837 = vmatprep.subr.bf16.mxu0 %v2836_v53  ;;  %v57_v53 = vld [vmem:[%s4050_s0 + $0x150] sm:$0xff]  ;;  %v152_v54 = vld [vmem:[%s4050_s0 + $0x448] sm:$0xff]  ;;  %v2870_v57 = vpack.c.bf16 %v103_v52, %v55_v51 }
  0x7b   :  { %2663 = vmatmul.mubr.msk.f32.gmra.mrb[54].mxu0 %vm255_vm0, %v3087_v63  ;;  %2845 = vmatprep.subr.bf16.mxu1 %v2844_v56  ;;  %v200_v56 = vld [vmem:[%s4050_s0 + $0x5c8] sm:$0xff] }
  0x7c   :  { %2667 = vmatmul.mubr.msk.f32.gmra.mrb[54].mxu1 %vm255_vm0, %v3087_v63  ;;  %1578 = vmatprep.mubr.f32.mxu0 %v2905_v3  ;;  %v2872_v61 = vpack.c.bf16 %v200_v56, %v152_v54 }
  0x7d   :  { %1667 = vmatprep.mubr.f32.mxu1 %v2905_v3 }
  0x7f   :  { %2668 = vmatmul.mubr.msk.f32.vlgmr.msra.gmra.mrb[56].mxu0 %vm255_vm0, %v3010_v37 }
  0x80   :  { %2672 = vmatmul.mubr.msk.f32.vlgmr.msra.gmra.mrb[56].mxu1 %vm255_vm0, %v3010_v37  ;;  %2839 = vmatpush1.bf16.msra.mxu0 %v2838_v0  ;;  %v3804_v0 = vld [vmem:[%s4051_s1] sm:$0xff] }
  0x81   :  { %2847 = vmatpush1.bf16.msra.mxu1 %v2846_v4  ;;  %1584 = vmatprep.mubr.f32.mxu0 %v2905_v3  ;;  %v201_v4 = vld [vmem:[%s4050_s0 + $0x5d0] sm:$0xff] }
  0x82   :  { %1673 = vmatprep.mubr.f32.mxu1 %v2905_v3  ;;  %2841 = vmatprep.subr.bf16.mxu0 %v2840_v5  ;;  %v2882_v6 = vpack.c.bf16 %v201_v4, %v153_v2 }
  0x83   :  { %2669 = vmatmul.mubr.msk.f32.gmra.mrb[58].mxu0 %vm255_vm0, %v3037_v48  ;;  %2849 = vmatprep.subr.bf16.mxu1 %v2848_v8  ;;  %v248_v8 = vld [vmem:[%s4050_s0 + $0x748] sm:$0xff] }
  0x84   :  { %2673 = vmatmul.mubr.msk.f32.gmra.mrb[58].mxu1 %vm255_vm0, %v3037_v48  ;;  %1590 = vmatprep.mubr.f32.mxu0 %v2905_v3 }
  0x85   :  { %1679 = vmatprep.mubr.f32.mxu1 %v2905_v3  ;;  %2843 = vmatpush1.bf16.msra.mxu0 %v2842_v11  ;;  %v250_v11 = vld [vmem:[%s4050_s0 + $0x758] sm:$0xff] }
  0x86   :  { %2851 = vmatpush1.bf16.msra.mxu1 %v2850_v12  ;;  %1700 = vmatprep.subr.mxu0 %v240_v13  ;;  %v62_v12 = vld [vmem:[%s4050_s0 + $0x178] sm:$0xff] }
  0x87   :  { %2670 = vmatmul.mubr.msk.f32.gmra.mrb[60].mxu0 %vm255_vm0, %v3054_v55  ;;  %1789 = vmatprep.subr.mxu1 %v242_v16  ;;  %v110_v13 = vld [vmem:[%s4050_s0 + $0x2f8] sm:$0xff]  ;;  %v3853_v16 = vld [vmem:[%s4051_s1 + $0x10] sm:$0xff] }
  0x88   :  { %2674 = vmatmul.mubr.msk.f32.gmra.mrb[60].mxu1 %vm255_vm0, %v3054_v55  ;;  %1596 = vmatprep.mubr.f32.mxu0 %v2905_v3  ;;  %v2892_v18 = vpack.c.bf16 %v110_v13, %v62_v12 }
  0x89   :  { %1685 = vmatprep.mubr.f32.mxu1 %v2905_v3  ;;  %1701 = vmatpush1.msra.mxu0 %v239_v19  ;;  %v59_v19 = vld [vmem:[%s4050_s0 + $0x160] sm:$0xff] }
  0x8a   :  { %1790 = vmatpush1.msra.mxu1 %v241_v21  ;;  %2853 = vmatprep.subr.bf16.mxu0 %v2852_v20  ;;  %v107_v20 = vld [vmem:[%s4050_s0 + $0x2e0] sm:$0xff]  ;;  %v61_v21 = vld [vmem:[%s4050_s0 + $0x170] sm:$0xff] }
  0x8b   :  { %2671 = vmatmul.mubr.msk.f32.gmra.mrb[62].mxu0 %vm255_vm0, %v3087_v63  ;;  %2861 = vmatprep.subr.bf16.mxu1 %v2860_v22  ;;  %v109_v22 = vld [vmem:[%s4050_s0 + $0x2f0] sm:$0xff]  ;;  %v2886_v26 = vpack.c.bf16 %v107_v20, %v59_v19 }
  0x8c   :  { %2675 = vmatmul.mubr.msk.f32.gmra.mrb[62].mxu1 %vm255_vm0, %v3087_v63  ;;  %1756 = vmatprep.mubr.f32.mxu0 %v2905_v3 }
  0x8d   :  { %1845 = vmatprep.mubr.f32.mxu1 %v2905_v3 }
  0x8f   :  { %2676 = vmatmul.mubr.msk.f32.vlgmr.msra.gmra.mrb[64].mxu0 %vm255_vm0, %v3010_v37 }
  0x90   :  { %2680 = vmatmul.mubr.msk.f32.vlgmr.msra.gmra.mrb[64].mxu1 %vm255_vm0, %v3010_v37  ;;  %2855 = vmatpush1.bf16.msra.mxu0 %v2854_v29  ;;  %v56_v37 = vld [vmem:[%s4050_s0 + $0x148] sm:$0xff]  ;;  %v2894_v29 = vpack.c.bf16 %v109_v22, %v61_v21 }
  0x91   :  { %2863 = vmatpush1.bf16.msra.mxu1 %v2862_v32  ;;  %1762 = vmatprep.mubr.f32.mxu0 %v2905_v3  ;;  %v2868_v47 = vpack.c.bf16 %v104_v43, %v56_v37  ;;  %v203_v32 = vld [vmem:[%s4050_s0 + $0x5e0] sm:$0xff] }
  0x92   :  { %1851 = vmatprep.mubr.f32.mxu1 %v2905_v3  ;;  %2857 = vmatprep.subr.bf16.mxu0 %v2856_v33  ;;  %v2896_v33 = vpack.c.bf16 %v206_v28, %v158_v27 }
  0x93   :  { %2677 = vmatmul.mubr.msk.f32.gmra.mrb[66].mxu0 %vm255_vm0, %v3037_v48  ;;  %2865 = vmatprep.subr.bf16.mxu1 %v2864_v36  ;;  %v2890_v36 = vpack.c.bf16 %v203_v32, %v155_v31 }
  0x94   :  { %2681 = vmatmul.mubr.msk.f32.gmra.mrb[66].mxu1 %vm255_vm0, %v3037_v48  ;;  %1768 = vmatprep.mubr.f32.mxu0 %v2905_v3  ;;  %v243_v48 = vld [vmem:[%s4050_s0 + $0x720] sm:$0xff] }
  0x95   :  { %1857 = vmatprep.mubr.f32.mxu1 %v2905_v3  ;;  %2859 = vmatpush1.bf16.msra.mxu0 %v2858_v40  ;;  %v254_v40 = vld [vmem:[%s4050_s0 + $0x778] sm:$0xff] }
  0x96   :  { %2867 = vmatpush1.bf16.msra.mxu1 %v2866_v41  ;;  %1878 = vmatprep.subr.mxu0 %v244_v42  ;;  %v251_v41 = vld [vmem:[%s4050_s0 + $0x760] sm:$0xff]  ;;  %v253_v42 = vld [vmem:[%s4050_s0 + $0x770] sm:$0xff] }
  0x97   :  { %2678 = vmatmul.mubr.msk.f32.gmra.mrb[68].mxu0 %vm255_vm0, %v3054_v55  ;;  %1967 = vmatprep.subr.mxu1 %v246_v44 }
  0x98   :  { %2682 = vmatmul.mubr.msk.f32.gmra.mrb[68].mxu1 %vm255_vm0, %v3054_v55  ;;  %1774 = vmatprep.mubr.f32.mxu0 %v2905_v3  ;;  %v105_v55 = vld [vmem:[%s4050_s0 + $0x2d0] sm:$0xff] }
  0x99   :  { %1863 = vmatprep.mubr.f32.mxu1 %v2905_v3  ;;  %1879 = vmatpush1.msra.mxu0 %v243_v48  ;;  %v2878_v60 = vpack.c.bf16 %v105_v55, %v57_v53 }
  0x9a   :  { %1968 = vmatpush1.msra.mxu1 %v245_v49  ;;  %2869 = vmatprep.subr.bf16.mxu0 %v2868_v47 }
  0x9b   :  { %2679 = vmatmul.mubr.msk.f32.gmra.mrb[70].mxu0 %vm255_vm0, %v3087_v63  ;;  %2877 = vmatprep.subr.bf16.mxu1 %v2876_v50 }
  0x9c   :  { %2683 = vmatmul.mubr.msk.f32.gmra.mrb[70].mxu1 %vm255_vm0, %v3087_v63  ;;  %1934 = vmatprep.mubr.f32.mxu0 %v2905_v3  ;;  %v199_v63 = vld [vmem:[%s4050_s0 + $0x5c0] sm:$0xff] }
  0x9d   :  { %2023 = vmatprep.mubr.f32.mxu1 %v2905_v3  ;;  %v2874_v5 = vpack.c.bf16 %v199_v63, %v151_v62 }
  0x9f   :  { %2684 = vmatmul.mubr.msk.f32.vlgmr.msra.gmra.mrb[72].mxu0 %vm255_vm0, %v3804_v0 }
  0xa0   :  { %2688 = vmatmul.mubr.msk.f32.vlgmr.msra.gmra.mrb[72].mxu1 %vm255_vm0, %v3804_v0  ;;  %2871 = vmatpush1.bf16.msra.mxu0 %v2870_v57 }
  0xa1   :  { %2879 = vmatpush1.bf16.msra.mxu1 %v2878_v60  ;;  %1940 = vmatprep.mubr.f32.mxu0 %v2905_v3 }
  0xa2   :  { %2029 = vmatprep.mubr.f32.mxu1 %v2905_v3  ;;  %2873 = vmatprep.subr.bf16.mxu0 %v2872_v61 }
  0xa3   :  { %2685 = vmatmul.mubr.msk.f32.gmra.mrb[74].mxu0 %vm255_vm0, %v3821_v7  ;;  %2881 = vmatprep.subr.bf16.mxu1 %v2880_v1 }
  0xa4   :  { %2689 = vmatmul.mubr.msk.f32.gmra.mrb[74].mxu1 %vm255_vm0, %v3821_v7  ;;  %1946 = vmatprep.mubr.f32.mxu0 %v2905_v3 }
  0xa5   :  { %2035 = vmatprep.mubr.f32.mxu1 %v2905_v3  ;;  %2875 = vmatpush1.bf16.msra.mxu0 %v2874_v5 }
  0xa6   :  { %2883 = vmatpush1.bf16.msra.mxu1 %v2882_v6  ;;  %2056 = vmatprep.subr.mxu0 %v248_v8 }
  0xa7   :  { %2686 = vmatmul.mubr.msk.f32.gmra.mrb[76].mxu0 %vm255_vm0, %v3853_v16  ;;  %2145 = vmatprep.subr.mxu1 %v250_v11 }
  0xa8   :  { %2690 = vmatmul.mubr.msk.f32.gmra.mrb[76].mxu1 %vm255_vm0, %v3853_v16  ;;  %1952 = vmatprep.mubr.f32.mxu0 %v2905_v3 }
  0xa9   :  { %2041 = vmatprep.mubr.f32.mxu1 %v2905_v3  ;;  %2057 = vmatpush1.msra.mxu0 %v247_v14 }
  0xaa   :  { %2146 = vmatpush1.msra.mxu1 %v249_v17  ;;  %2885 = vmatprep.subr.bf16.mxu0 %v2884_v15 }
  0xab   :  { %2687 = vmatmul.mubr.msk.f32.gmra.mrb[78].mxu0 %vm255_vm0, %v3879_v23  ;;  %2893 = vmatprep.subr.bf16.mxu1 %v2892_v18 }
  0xac   :  { %2691 = vmatmul.mubr.msk.f32.gmra.mrb[78].mxu1 %vm255_vm0, %v3879_v23  ;;  %2112 = vmatprep.mubr.f32.mxu0 %v2905_v3 }
  0xad   :  { %2201 = vmatprep.mubr.f32.mxu1 %v2905_v3 }
  0xaf   :  { %2692 = vmatmul.mubr.msk.f32.vlgmr.msra.gmra.mrb[80].mxu0 %vm255_vm0, %v3804_v0 }
  0xb0   :  { %2696 = vmatmul.mubr.msk.f32.vlgmr.msra.gmra.mrb[80].mxu1 %vm255_vm0, %v3804_v0  ;;  %2887 = vmatpush1.bf16.msra.mxu0 %v2886_v26 }
  0xb1   :  { %2895 = vmatpush1.bf16.msra.mxu1 %v2894_v29  ;;  %2118 = vmatprep.mubr.f32.mxu0 %v2905_v3 }
  0xb2   :  { %2207 = vmatprep.mubr.f32.mxu1 %v2905_v3  ;;  %2889 = vmatprep.subr.bf16.mxu0 %v2888_v30 }
  0xb3   :  { %2693 = vmatmul.mubr.msk.f32.gmra.mrb[82].mxu0 %vm255_vm0, %v3821_v7  ;;  %2897 = vmatprep.subr.bf16.mxu1 %v2896_v33 }
  0xb4   :  { %2697 = vmatmul.mubr.msk.f32.gmra.mrb[82].mxu1 %vm255_vm0, %v3821_v7  ;;  %2124 = vmatprep.mubr.f32.mxu0 %v2905_v3 }
  0xb5   :  { %2213 = vmatprep.mubr.f32.mxu1 %v2905_v3  ;;  %2891 = vmatpush1.bf16.msra.mxu0 %v2890_v36 }
  0xb6   :  { %2899 = vmatpush1.bf16.msra.mxu1 %v2898_v38  ;;  %2234 = vmatprep.subr.mxu0 %v252_v39 }
  0xb7   :  { %2694 = vmatmul.mubr.msk.f32.gmra.mrb[84].mxu0 %vm255_vm0, %v3853_v16  ;;  %2323 = vmatprep.subr.mxu1 %v254_v40 }
  0xb8   :  { %2698 = vmatmul.mubr.msk.f32.gmra.mrb[84].mxu1 %vm255_vm0, %v3853_v16  ;;  %2130 = vmatprep.mubr.f32.mxu0 %v2905_v3 }
  0xb9   :  { %2219 = vmatprep.mubr.f32.mxu1 %v2905_v3  ;;  %2235 = vmatpush1.msra.mxu0 %v251_v41 }
  0xba   :  { %2324 = vmatpush1.msra.mxu1 %v253_v42 }
  0xbb   :  { %2695 = vmatmul.mubr.msk.f32.gmra.mrb[86].mxu0 %vm255_vm0, %v3879_v23 }
  0xbc   :  { %2699 = vmatmul.mubr.msk.f32.gmra.mrb[86].mxu1 %vm255_vm0, %v3879_v23  ;;  %2290 = vmatprep.mubr.f32.mxu0 %v2905_v3 }
  0xbd   :  { %2379 = vmatprep.mubr.f32.mxu1 %v2905_v3 }
  0xbf   :  { %2700 = vmatmul.mubr.msk.f32.vlgmr.msra.gmra.mrb[88].mxu0 %vm255_vm0, %v3804_v0 }
  0xc0   :  { %2704 = vmatmul.mubr.msk.f32.vlgmr.msra.gmra.mrb[88].mxu1 %vm255_vm0, %v3804_v0  ;;  %2296 = vmatprep.mubr.f32.mxu0 %v2905_v3 }
  0xc1   :  { %2385 = vmatprep.mubr.f32.mxu1 %v2905_v3 }
  0xc3   :  { %2701 = vmatmul.mubr.msk.f32.gmra.mrb[90].mxu0 %vm255_vm0, %v3821_v7 }
  0xc4   :  { %2705 = vmatmul.mubr.msk.f32.gmra.mrb[90].mxu1 %vm255_vm0, %v3821_v7  ;;  %2302 = vmatprep.mubr.f32.mxu0 %v2905_v3 }
  0xc5   :  { %2391 = vmatprep.mubr.f32.mxu1 %v2905_v3 }
  0xc7   :  { %2702 = vmatmul.mubr.msk.f32.gmra.mrb[92].mxu0 %vm255_vm0, %v3853_v16 }
  0xc8   :  { %2706 = vmatmul.mubr.msk.f32.gmra.mrb[92].mxu1 %vm255_vm0, %v3853_v16  ;;  %2308 = vmatprep.mubr.f32.mxu0 %v2905_v3 }
  0xc9   :  { %2397 = vmatprep.mubr.f32.mxu1 %v2905_v3 }
  0xcb   :  { %2703 = vmatmul.mubr.msk.f32.gmra.mrb[94].mxu0 %vm255_vm0, %v3879_v23 }
  0xcc   :  { %2707 = vmatmul.mubr.msk.f32.gmra.mrb[94].mxu1 %vm255_vm0, %v3879_v23 }
  0xe2   :  { %v334_v37 = vpop.f32.mrb[0].mxu0 }
  0xe3   :  { %v423_v43 = vpop.f32.mrb[0].mxu1  ;;  %v336_v44 = vpop.f32.mrb[1].mxu0 }
  0xe4   :  { %v425_v45 = vpop.f32.mrb[1].mxu1 }
  0xe5   :  { %v2404_v46 = vmax.f32 %v334_v37, %v425_v45 }
  0xe6   :  { %v340_v48 = vpop.f32.mrb[2].mxu0 }
  0xe7   :  { %v429_v47 = vpop.f32.mrb[2].mxu1  ;;  %v342_v49 = vpop.f32.mrb[3].mxu0 }
  0xe8   :  { %v431_v50 = vpop.f32.mrb[3].mxu1 }
  0xe9   :  { %v2407_v51 = vmax.f32 %v340_v48, %v431_v50 }
  0xea   :  { %v346_v52 = vpop.f32.mrb[4].mxu0 }
  0xeb   :  { %v435_v53 = vpop.f32.mrb[4].mxu1  ;;  %v348_v55 = vpop.f32.mrb[5].mxu0 }
  0xec   :  { %v437_v3 = vpop.f32.mrb[5].mxu1 }
  0xed   :  { %v2410_v54 = vmax.f32 %v346_v52, %v437_v3 }
  0xee   :  { %v352_v56 = vpop.f32.mrb[6].mxu0 }
  0xef   :  { %v441_v57 = vpop.f32.mrb[6].mxu1  ;;  %v354_v58 = vpop.f32.mrb[7].mxu0 }
  0xf0   :  { %v443_v59 = vpop.f32.mrb[7].mxu1 }
  0xf1   :  { %v2413_v60 = vmax.f32 %v352_v56, %v443_v59 }
  0xf2   :  { %v512_v61 = vpop.f32.mrb[8].mxu0 }
  0xf3   :  { %v2405_v62 = vmax.f32 %v336_v44, %v512_v61  ;;  %v601_v63 = vpop.f32.mrb[8].mxu1  ;;  %v514_v0 = vpop.f32.mrb[9].mxu0 }
  0xf4   :  { %v2416_v1 = vmax.f32 %v2404_v46, %v601_v63  ;;  %v2406_v2 = vmax.f32 %v423_v43, %v514_v0  ;;  %v603_v4 = vpop.f32.mrb[9].mxu1 }
  0xf5   :  { %v3969_v5 = vmax.f32 %v2405_v62, %v603_v4 }
  0xf6   :  { %v518_v6 = vpop.f32.mrb[10].mxu0 }
  0xf7   :  { %v2408_v7 = vmax.f32 %v342_v49, %v518_v6  ;;  %v607_v8 = vpop.f32.mrb[10].mxu1  ;;  %v520_v9 = vpop.f32.mrb[11].mxu0 }
  0xf8   :  { %v2419_v10 = vmax.f32 %v2407_v51, %v607_v8  ;;  %v2409_v11 = vmax.f32 %v429_v47, %v520_v9  ;;  %v609_v12 = vpop.f32.mrb[11].mxu1 }
  0xf9   :  { %v3971_v13 = vmax.f32 %v2408_v7, %v609_v12 }
  0xfa   :  { %v524_v14 = vpop.f32.mrb[12].mxu0 }
  0xfb   :  { %v2411_v15 = vmax.f32 %v348_v55, %v524_v14  ;;  %v613_v16 = vpop.f32.mrb[12].mxu1  ;;  %v526_v17 = vpop.f32.mrb[13].mxu0 }
  0xfc   :  { %v2422_v18 = vmax.f32 %v2410_v54, %v613_v16  ;;  %v2412_v19 = vmax.f32 %v435_v53, %v526_v17  ;;  %v615_v20 = vpop.f32.mrb[13].mxu1 }
  0xfd   :  { %v3973_v21 = vmax.f32 %v2411_v15, %v615_v20 }
  0xfe   :  { %v530_v22 = vpop.f32.mrb[14].mxu0 }
  0xff   :  { %v2414_v23 = vmax.f32 %v354_v58, %v530_v22  ;;  %v619_v24 = vpop.f32.mrb[14].mxu1  ;;  %v532_v25 = vpop.f32.mrb[15].mxu0 }
 0x100   :  { %v2425_v26 = vmax.f32 %v2413_v60, %v619_v24  ;;  %v2415_v27 = vmax.f32 %v441_v57, %v532_v25  ;;  %v621_v28 = vpop.f32.mrb[15].mxu1 }
 0x101   :  { %v3975_v29 = vmax.f32 %v2414_v23, %v621_v28 }
 0x102   :  { %v690_v30 = vpop.f32.mrb[16].mxu0 }
 0x103   :  { %v2418_v31 = vmax.f32 %v2406_v2, %v690_v30  ;;  %v779_v32 = vpop.f32.mrb[16].mxu1  ;;  %v692_v33 = vpop.f32.mrb[17].mxu0 }
 0x104   :  { %v2429_v34 = vmax.f32 %v3969_v5, %v779_v32  ;;  %v2428_v35 = vmax.f32 %v2416_v1, %v692_v33  ;;  %v781_v36 = vpop.f32.mrb[17].mxu1 }
 0x105   :  { %v2430_v38 = vmax.f32 %v2418_v31, %v781_v36 }
 0x106   :  { %v696_v39 = vpop.f32.mrb[18].mxu0 }
 0x107   :  { %v2421_v40 = vmax.f32 %v2409_v11, %v696_v39  ;;  %v785_v41 = vpop.f32.mrb[18].mxu1  ;;  %v698_v42 = vpop.f32.mrb[19].mxu0 }
 0x108   :  { %v2432_v37 = vmax.f32 %v3971_v13, %v785_v41  ;;  %v2431_v43 = vmax.f32 %v2419_v10, %v698_v42  ;;  %v787_v44 = vpop.f32.mrb[19].mxu1 }
 0x109   :  { %v2433_v45 = vmax.f32 %v2421_v40, %v787_v44 }
 0x10a   :  { %v702_v46 = vpop.f32.mrb[20].mxu0 }
 0x10b   :  { %v2424_v48 = vmax.f32 %v2412_v19, %v702_v46  ;;  %v791_v47 = vpop.f32.mrb[20].mxu1  ;;  %v704_v49 = vpop.f32.mrb[21].mxu0 }
 0x10c   :  { %v2435_v50 = vmax.f32 %v3973_v21, %v791_v47  ;;  %v2434_v51 = vmax.f32 %v2422_v18, %v704_v49  ;;  %v793_v52 = vpop.f32.mrb[21].mxu1 }
 0x10d   :  { %v2436_v53 = vmax.f32 %v2424_v48, %v793_v52 }
 0x10e   :  { %v708_v55 = vpop.f32.mrb[22].mxu0 }
 0x10f   :  { %v2427_v3 = vmax.f32 %v2415_v27, %v708_v55  ;;  %v797_v54 = vpop.f32.mrb[22].mxu1  ;;  %v710_v56 = vpop.f32.mrb[23].mxu0 }
 0x110   :  { %v2438_v57 = vmax.f32 %v3975_v29, %v797_v54  ;;  %v2437_v58 = vmax.f32 %v2425_v26, %v710_v56  ;;  %v799_v59 = vpop.f32.mrb[23].mxu1 }
 0x111   :  { %v2439_v60 = vmax.f32 %v2427_v3, %v799_v59 }
 0x112   :  { %v868_v61 = vpop.f32.mrb[24].mxu0 }
 0x113   :  { %v2440_v62 = vmax.f32 %v2428_v35, %v868_v61  ;;  %v957_v63 = vpop.f32.mrb[24].mxu1  ;;  %v870_v0 = vpop.f32.mrb[25].mxu0 }
 0x114   :  { %v2442_v1 = vmax.f32 %v2430_v38, %v957_v63  ;;  %v2441_v2 = vmax.f32 %v2429_v34, %v870_v0  ;;  %v959_v4 = vpop.f32.mrb[25].mxu1 }
 0x115   :  { %v2452_v5 = vmax.f32 %v2440_v62, %v959_v4 }
 0x116   :  { %v874_v6 = vpop.f32.mrb[26].mxu0 }
 0x117   :  { %v2443_v7 = vmax.f32 %v2431_v43, %v874_v6  ;;  %v963_v8 = vpop.f32.mrb[26].mxu1  ;;  %v876_v9 = vpop.f32.mrb[27].mxu0 }
 0x118   :  { %v2445_v10 = vmax.f32 %v2433_v45, %v963_v8  ;;  %v2444_v11 = vmax.f32 %v2432_v37, %v876_v9  ;;  %v965_v12 = vpop.f32.mrb[27].mxu1 }
 0x119   :  { %v2455_v13 = vmax.f32 %v2443_v7, %v965_v12 }
 0x11a   :  { %v880_v14 = vpop.f32.mrb[28].mxu0 }
 0x11b   :  { %v2446_v15 = vmax.f32 %v2434_v51, %v880_v14  ;;  %v969_v16 = vpop.f32.mrb[28].mxu1  ;;  %v882_v17 = vpop.f32.mrb[29].mxu0 }
 0x11c   :  { %v2448_v18 = vmax.f32 %v2436_v53, %v969_v16  ;;  %v2447_v19 = vmax.f32 %v2435_v50, %v882_v17  ;;  %v971_v20 = vpop.f32.mrb[29].mxu1 }
 0x11d   :  { %v2458_v21 = vmax.f32 %v2446_v15, %v971_v20 }
 0x11e   :  { %v886_v22 = vpop.f32.mrb[30].mxu0 }
 0x11f   :  { %v2449_v23 = vmax.f32 %v2437_v58, %v886_v22  ;;  %v975_v24 = vpop.f32.mrb[30].mxu1  ;;  %v888_v25 = vpop.f32.mrb[31].mxu0 }
 0x120   :  { %v2451_v26 = vmax.f32 %v2439_v60, %v975_v24  ;;  %v2450_v27 = vmax.f32 %v2438_v57, %v888_v25  ;;  %v977_v28 = vpop.f32.mrb[31].mxu1 }
 0x121   :  { %v2461_v29 = vmax.f32 %v2449_v23, %v977_v28 }
 0x122   :  { %v1046_v30 = vpop.f32.mrb[32].mxu0 }
 0x123   :  { %v2453_v31 = vmax.f32 %v2441_v2, %v1046_v30  ;;  %v1135_v32 = vpop.f32.mrb[32].mxu1  ;;  %v1048_v33 = vpop.f32.mrb[33].mxu0 }
 0x124   :  { %v2464_v34 = vmax.f32 %v2452_v5, %v1135_v32  ;;  %v2454_v35 = vmax.f32 %v2442_v1, %v1048_v33  ;;  %v1137_v36 = vpop.f32.mrb[33].mxu1 }
 0x125   :  { %v3981_v38 = vmax.f32 %v2453_v31, %v1137_v36 }
 0x126   :  { %v1052_v39 = vpop.f32.mrb[34].mxu0 }
 0x127   :  { %v2456_v40 = vmax.f32 %v2444_v11, %v1052_v39  ;;  %v1141_v41 = vpop.f32.mrb[34].mxu1  ;;  %v1054_v42 = vpop.f32.mrb[35].mxu0 }
 0x128   :  { %v2467_v37 = vmax.f32 %v2455_v13, %v1141_v41  ;;  %v2457_v43 = vmax.f32 %v2445_v10, %v1054_v42  ;;  %v1143_v44 = vpop.f32.mrb[35].mxu1 }
 0x129   :  { %v3983_v45 = vmax.f32 %v2456_v40, %v1143_v44 }
 0x12a   :  { %v1058_v46 = vpop.f32.mrb[36].mxu0 }
 0x12b   :  { %v2459_v48 = vmax.f32 %v2447_v19, %v1058_v46  ;;  %v1147_v47 = vpop.f32.mrb[36].mxu1  ;;  %v1060_v49 = vpop.f32.mrb[37].mxu0 }
 0x12c   :  { %v2470_v50 = vmax.f32 %v2458_v21, %v1147_v47  ;;  %v2460_v51 = vmax.f32 %v2448_v18, %v1060_v49  ;;  %v1149_v52 = vpop.f32.mrb[37].mxu1 }
 0x12d   :  { %v3985_v53 = vmax.f32 %v2459_v48, %v1149_v52 }
 0x12e   :  { %v1064_v55 = vpop.f32.mrb[38].mxu0 }
 0x12f   :  { %v2462_v3 = vmax.f32 %v2450_v27, %v1064_v55  ;;  %v1153_v54 = vpop.f32.mrb[38].mxu1  ;;  %v1066_v56 = vpop.f32.mrb[39].mxu0 }
 0x130   :  { %v2473_v57 = vmax.f32 %v2461_v29, %v1153_v54  ;;  %v2463_v58 = vmax.f32 %v2451_v26, %v1066_v56  ;;  %v1155_v59 = vpop.f32.mrb[39].mxu1 }
 0x131   :  { %v3987_v60 = vmax.f32 %v2462_v3, %v1155_v59 }
 0x132   :  { %v1224_v61 = vpop.f32.mrb[40].mxu0 }
 0x133   :  { %v2466_v62 = vmax.f32 %v2454_v35, %v1224_v61  ;;  %v1313_v63 = vpop.f32.mrb[40].mxu1  ;;  %v1226_v0 = vpop.f32.mrb[41].mxu0 }
 0x134   :  { %v2477_v1 = vmax.f32 %v3981_v38, %v1313_v63  ;;  %v2476_v2 = vmax.f32 %v2464_v34, %v1226_v0  ;;  %v1315_v4 = vpop.f32.mrb[41].mxu1 }
 0x135   :  { %v2478_v5 = vmax.f32 %v2466_v62, %v1315_v4 }
 0x136   :  { %v1230_v6 = vpop.f32.mrb[42].mxu0 }
 0x137   :  { %v2469_v7 = vmax.f32 %v2457_v43, %v1230_v6  ;;  %v1319_v8 = vpop.f32.mrb[42].mxu1  ;;  %v1232_v9 = vpop.f32.mrb[43].mxu0 }
 0x138   :  { %v2480_v10 = vmax.f32 %v3983_v45, %v1319_v8  ;;  %v2479_v11 = vmax.f32 %v2467_v37, %v1232_v9  ;;  %v1321_v12 = vpop.f32.mrb[43].mxu1 }
 0x139   :  { %v2481_v13 = vmax.f32 %v2469_v7, %v1321_v12 }
 0x13a   :  { %v1236_v14 = vpop.f32.mrb[44].mxu0 }
 0x13b   :  { %v2472_v15 = vmax.f32 %v2460_v51, %v1236_v14  ;;  %v1325_v16 = vpop.f32.mrb[44].mxu1  ;;  %v1238_v17 = vpop.f32.mrb[45].mxu0 }
 0x13c   :  { %v2483_v18 = vmax.f32 %v3985_v53, %v1325_v16  ;;  %v2482_v19 = vmax.f32 %v2470_v50, %v1238_v17  ;;  %v1327_v20 = vpop.f32.mrb[45].mxu1 }
 0x13d   :  { %v2484_v21 = vmax.f32 %v2472_v15, %v1327_v20 }
 0x13e   :  { %v1242_v22 = vpop.f32.mrb[46].mxu0 }
 0x13f   :  { %v2475_v23 = vmax.f32 %v2463_v58, %v1242_v22  ;;  %v1331_v24 = vpop.f32.mrb[46].mxu1  ;;  %v1244_v25 = vpop.f32.mrb[47].mxu0 }
 0x140   :  { %v2486_v26 = vmax.f32 %v3987_v60, %v1331_v24  ;;  %v2485_v27 = vmax.f32 %v2473_v57, %v1244_v25  ;;  %v1333_v28 = vpop.f32.mrb[47].mxu1 }
 0x141   :  { %v2487_v29 = vmax.f32 %v2475_v23, %v1333_v28 }
 0x142   :  { %v1402_v30 = vpop.f32.mrb[48].mxu0 }
 0x143   :  { %v2488_v31 = vmax.f32 %v2476_v2, %v1402_v30  ;;  %v1491_v32 = vpop.f32.mrb[48].mxu1  ;;  %v1404_v33 = vpop.f32.mrb[49].mxu0 }
 0x144   :  { %v2490_v34 = vmax.f32 %v2478_v5, %v1491_v32  ;;  %v2489_v35 = vmax.f32 %v2477_v1, %v1404_v33  ;;  %v1493_v36 = vpop.f32.mrb[49].mxu1 }
 0x145   :  { %v2500_v38 = vmax.f32 %v2488_v31, %v1493_v36 }
 0x146   :  { %v1408_v39 = vpop.f32.mrb[50].mxu0 }
 0x147   :  { %v2491_v40 = vmax.f32 %v2479_v11, %v1408_v39  ;;  %v1497_v41 = vpop.f32.mrb[50].mxu1  ;;  %v1410_v42 = vpop.f32.mrb[51].mxu0 }
 0x148   :  { %v2493_v37 = vmax.f32 %v2481_v13, %v1497_v41  ;;  %v2492_v43 = vmax.f32 %v2480_v10, %v1410_v42  ;;  %v1499_v44 = vpop.f32.mrb[51].mxu1 }
 0x149   :  { %v2503_v45 = vmax.f32 %v2491_v40, %v1499_v44 }
 0x14a   :  { %v1414_v46 = vpop.f32.mrb[52].mxu0 }
 0x14b   :  { %v2494_v48 = vmax.f32 %v2482_v19, %v1414_v46  ;;  %v1503_v47 = vpop.f32.mrb[52].mxu1  ;;  %v1416_v49 = vpop.f32.mrb[53].mxu0 }
 0x14c   :  { %v2496_v50 = vmax.f32 %v2484_v21, %v1503_v47  ;;  %v2495_v51 = vmax.f32 %v2483_v18, %v1416_v49  ;;  %v1505_v52 = vpop.f32.mrb[53].mxu1 }
 0x14d   :  { %v2506_v53 = vmax.f32 %v2494_v48, %v1505_v52 }
 0x14e   :  { %v1420_v55 = vpop.f32.mrb[54].mxu0 }
 0x14f   :  { %v2497_v3 = vmax.f32 %v2485_v27, %v1420_v55  ;;  %v1509_v54 = vpop.f32.mrb[54].mxu1  ;;  %v1422_v56 = vpop.f32.mrb[55].mxu0 }
 0x150   :  { %v2499_v57 = vmax.f32 %v2487_v29, %v1509_v54  ;;  %v2498_v58 = vmax.f32 %v2486_v26, %v1422_v56  ;;  %v1511_v59 = vpop.f32.mrb[55].mxu1 }
 0x151   :  { %v2509_v60 = vmax.f32 %v2497_v3, %v1511_v59 }
 0x152   :  { %v1580_v61 = vpop.f32.mrb[56].mxu0 }
 0x153   :  { %v2501_v62 = vmax.f32 %v2489_v35, %v1580_v61  ;;  %v1669_v63 = vpop.f32.mrb[56].mxu1  ;;  %v1582_v0 = vpop.f32.mrb[57].mxu0 }
 0x154   :  { %v2512_v1 = vmax.f32 %v2500_v38, %v1669_v63  ;;  %v2502_v2 = vmax.f32 %v2490_v34, %v1582_v0  ;;  %v1671_v4 = vpop.f32.mrb[57].mxu1 }
 0x155   :  { %v3993_v5 = vmax.f32 %v2501_v62, %v1671_v4 }
 0x156   :  { %v1586_v6 = vpop.f32.mrb[58].mxu0 }
 0x157   :  { %v2504_v7 = vmax.f32 %v2492_v43, %v1586_v6  ;;  %v1675_v8 = vpop.f32.mrb[58].mxu1  ;;  %v1588_v9 = vpop.f32.mrb[59].mxu0 }
 0x158   :  { %v2515_v10 = vmax.f32 %v2503_v45, %v1675_v8  ;;  %v2505_v11 = vmax.f32 %v2493_v37, %v1588_v9  ;;  %v1677_v12 = vpop.f32.mrb[59].mxu1 }
 0x159   :  { %v3995_v13 = vmax.f32 %v2504_v7, %v1677_v12 }
 0x15a   :  { %v1592_v14 = vpop.f32.mrb[60].mxu0 }
 0x15b   :  { %v2507_v15 = vmax.f32 %v2495_v51, %v1592_v14  ;;  %v1681_v16 = vpop.f32.mrb[60].mxu1  ;;  %v1594_v17 = vpop.f32.mrb[61].mxu0 }
 0x15c   :  { %v2518_v18 = vmax.f32 %v2506_v53, %v1681_v16  ;;  %v2508_v19 = vmax.f32 %v2496_v50, %v1594_v17  ;;  %v1683_v20 = vpop.f32.mrb[61].mxu1 }
 0x15d   :  { %v3997_v21 = vmax.f32 %v2507_v15, %v1683_v20 }
 0x15e   :  { %v1598_v22 = vpop.f32.mrb[62].mxu0 }
 0x15f   :  { %v2510_v23 = vmax.f32 %v2498_v58, %v1598_v22  ;;  %v1687_v24 = vpop.f32.mrb[62].mxu1  ;;  %v1600_v25 = vpop.f32.mrb[63].mxu0 }
 0x160   :  { %v2521_v26 = vmax.f32 %v2509_v60, %v1687_v24  ;;  %v2511_v27 = vmax.f32 %v2499_v57, %v1600_v25  ;;  %v1689_v28 = vpop.f32.mrb[63].mxu1 }
 0x161   :  { %v3999_v29 = vmax.f32 %v2510_v23, %v1689_v28 }
 0x162   :  { %v1758_v30 = vpop.f32.mrb[64].mxu0 }
 0x163   :  { %v2514_v31 = vmax.f32 %v2502_v2, %v1758_v30  ;;  %v1847_v32 = vpop.f32.mrb[64].mxu1  ;;  %v1760_v33 = vpop.f32.mrb[65].mxu0 }
 0x164   :  { %v2525_v34 = vmax.f32 %v3993_v5, %v1847_v32  ;;  %v2524_v35 = vmax.f32 %v2512_v1, %v1760_v33  ;;  %v1849_v36 = vpop.f32.mrb[65].mxu1 }
 0x165   :  { %v2526_v38 = vmax.f32 %v2514_v31, %v1849_v36 }
 0x166   :  { %v1764_v39 = vpop.f32.mrb[66].mxu0 }
 0x167   :  { %v2517_v40 = vmax.f32 %v2505_v11, %v1764_v39  ;;  %v1853_v41 = vpop.f32.mrb[66].mxu1  ;;  %v1766_v42 = vpop.f32.mrb[67].mxu0 }
 0x168   :  { %v2528_v37 = vmax.f32 %v3995_v13, %v1853_v41  ;;  %v2527_v43 = vmax.f32 %v2515_v10, %v1766_v42  ;;  %v1855_v44 = vpop.f32.mrb[67].mxu1 }
 0x169   :  { %v2529_v45 = vmax.f32 %v2517_v40, %v1855_v44 }
 0x16a   :  { %v1770_v46 = vpop.f32.mrb[68].mxu0 }
 0x16b   :  { %v2520_v48 = vmax.f32 %v2508_v19, %v1770_v46  ;;  %v1859_v47 = vpop.f32.mrb[68].mxu1  ;;  %v1772_v49 = vpop.f32.mrb[69].mxu0 }
 0x16c   :  { %v2531_v50 = vmax.f32 %v3997_v21, %v1859_v47  ;;  %v2530_v51 = vmax.f32 %v2518_v18, %v1772_v49  ;;  %v1861_v52 = vpop.f32.mrb[69].mxu1 }
 0x16d   :  { %v2532_v53 = vmax.f32 %v2520_v48, %v1861_v52 }
 0x16e   :  { %v1776_v55 = vpop.f32.mrb[70].mxu0 }
 0x16f   :  { %v2523_v3 = vmax.f32 %v2511_v27, %v1776_v55  ;;  %v1865_v54 = vpop.f32.mrb[70].mxu1  ;;  %v1778_v56 = vpop.f32.mrb[71].mxu0 }
 0x170   :  { %v2534_v57 = vmax.f32 %v3999_v29, %v1865_v54  ;;  %v2533_v58 = vmax.f32 %v2521_v26, %v1778_v56  ;;  %v1867_v59 = vpop.f32.mrb[71].mxu1 }
 0x171   :  { %v2535_v60 = vmax.f32 %v2523_v3, %v1867_v59 }
 0x172   :  { %v1936_v61 = vpop.f32.mrb[72].mxu0 }
 0x173   :  { %v2536_v62 = vmax.f32 %v2524_v35, %v1936_v61  ;;  %v2025_v63 = vpop.f32.mrb[72].mxu1  ;;  %v1938_v0 = vpop.f32.mrb[73].mxu0 }
 0x174   :  { %v2538_v1 = vmax.f32 %v2526_v38, %v2025_v63  ;;  %v2537_v2 = vmax.f32 %v2525_v34, %v1938_v0  ;;  %v2027_v4 = vpop.f32.mrb[73].mxu1 }
 0x175   :  { %v2548_v5 = vmax.f32 %v2536_v62, %v2027_v4 }
 0x176   :  { %v1942_v6 = vpop.f32.mrb[74].mxu0 }
 0x177   :  { %v2539_v7 = vmax.f32 %v2527_v43, %v1942_v6  ;;  %v2031_v8 = vpop.f32.mrb[74].mxu1  ;;  %v1944_v9 = vpop.f32.mrb[75].mxu0 }
 0x178   :  { %v4005_v10 = vmax.f32 %v2529_v45, %v2031_v8  ;;  %v2540_v11 = vmax.f32 %v2528_v37, %v1944_v9  ;;  %v2033_v12 = vpop.f32.mrb[75].mxu1 }
 0x179   :  { %v2551_v13 = vmax.f32 %v2539_v7, %v2033_v12 }
 0x17a   :  { %v1948_v14 = vpop.f32.mrb[76].mxu0 }
 0x17b   :  { %v2542_v15 = vmax.f32 %v2530_v51, %v1948_v14  ;;  %v2037_v16 = vpop.f32.mrb[76].mxu1  ;;  %v1950_v17 = vpop.f32.mrb[77].mxu0 }
 0x17c   :  { %v4007_v18 = vmax.f32 %v2532_v53, %v2037_v16  ;;  %v2543_v19 = vmax.f32 %v2531_v50, %v1950_v17  ;;  %v2039_v20 = vpop.f32.mrb[77].mxu1 }
 0x17d   :  { %v2554_v21 = vmax.f32 %v2542_v15, %v2039_v20 }
 0x17e   :  { %v1954_v22 = vpop.f32.mrb[78].mxu0 }
 0x17f   :  { %v2545_v23 = vmax.f32 %v2533_v58, %v1954_v22  ;;  %v2043_v24 = vpop.f32.mrb[78].mxu1  ;;  %v1956_v25 = vpop.f32.mrb[79].mxu0 }
 0x180   :  { %v4009_v26 = vmax.f32 %v2535_v60, %v2043_v24  ;;  %v2546_v27 = vmax.f32 %v2534_v57, %v1956_v25  ;;  %v2045_v28 = vpop.f32.mrb[79].mxu1 }
 0x181   :  { %v2557_v29 = vmax.f32 %v2545_v23, %v2045_v28 }
 0x182   :  { %v2114_v30 = vpop.f32.mrb[80].mxu0 }
 0x183   :  { %v2549_v31 = vmax.f32 %v2537_v2, %v2114_v30  ;;  %v2203_v32 = vpop.f32.mrb[80].mxu1  ;;  %v2116_v33 = vpop.f32.mrb[81].mxu0 }
 0x184   :  { %v2560_v34 = vmax.f32 %v2548_v5, %v2203_v32  ;;  %v2550_v35 = vmax.f32 %v2538_v1, %v2116_v33  ;;  %v2205_v36 = vpop.f32.mrb[81].mxu1 }
 0x185   :  { %v2561_v38 = vmax.f32 %v2549_v31, %v2205_v36 }
 0x186   :  { %v2120_v39 = vpop.f32.mrb[82].mxu0 }
 0x187   :  { %v2552_v40 = vmax.f32 %v2540_v11, %v2120_v39  ;;  %v2209_v41 = vpop.f32.mrb[82].mxu1  ;;  %v2122_v42 = vpop.f32.mrb[83].mxu0 }
 0x188   :  { %v2563_v37 = vmax.f32 %v2551_v13, %v2209_v41  ;;  %v2553_v43 = vmax.f32 %v4005_v10, %v2122_v42  ;;  %v2211_v44 = vpop.f32.mrb[83].mxu1 }
 0x189   :  { %v2564_v45 = vmax.f32 %v2552_v40, %v2211_v44 }
 0x18a   :  { %v2126_v46 = vpop.f32.mrb[84].mxu0 }
 0x18b   :  { %v2555_v48 = vmax.f32 %v2543_v19, %v2126_v46  ;;  %v2215_v47 = vpop.f32.mrb[84].mxu1  ;;  %v2128_v49 = vpop.f32.mrb[85].mxu0 }
 0x18c   :  { %v2566_v50 = vmax.f32 %v2554_v21, %v2215_v47  ;;  %v2556_v51 = vmax.f32 %v4007_v18, %v2128_v49  ;;  %v2217_v52 = vpop.f32.mrb[85].mxu1 }
 0x18d   :  { %v2567_v53 = vmax.f32 %v2555_v48, %v2217_v52 }
 0x18e   :  { %v2132_v55 = vpop.f32.mrb[86].mxu0 }
 0x18f   :  { %v2558_v3 = vmax.f32 %v2546_v27, %v2132_v55  ;;  %v2221_v54 = vpop.f32.mrb[86].mxu1  ;;  %v2134_v56 = vpop.f32.mrb[87].mxu0 }
 0x190   :  { %v2569_v57 = vmax.f32 %v2557_v29, %v2221_v54  ;;  %v2559_v58 = vmax.f32 %v4009_v26, %v2134_v56  ;;  %v2223_v59 = vpop.f32.mrb[87].mxu1 }
 0x191   :  { %v2570_v60 = vmax.f32 %v2558_v3, %v2223_v59 }
 0x192   :  { %v2292_v61 = vpop.f32.mrb[88].mxu0 }
 0x193   :  { %v2562_v62 = vmax.f32 %v2550_v35, %v2292_v61  ;;  %v2381_v63 = vpop.f32.mrb[88].mxu1  ;;  %v2294_v0 = vpop.f32.mrb[89].mxu0 }
 0x194   :  { %v2573_v1 = vmax.f32 %v2561_v38, %v2381_v63  ;;  %v2572_v2 = vmax.f32 %v2560_v34, %v2294_v0  ;;  %v2383_v4 = vpop.f32.mrb[89].mxu1 }
 0x195   :  { %v2574_v5 = vmax.f32 %v2562_v62, %v2383_v4 }
 0x196   :  { %v2585_v6 = vmax.f32 %v2573_v1, 0.0  ;;  %v2584_v7 = vmax.f32 %v2572_v2, 0.0  ;;  %v2298_v8 = vpop.f32.mrb[90].mxu0 }
 0x197   :  { %v2586_v9 = vmax.f32 %v2574_v5, 0.0  ;;  %v2565_v10 = vmax.f32 %v2553_v43, %v2298_v8  ;;  %v2387_v11 = vpop.f32.mrb[90].mxu1  ;;  %v2300_v12 = vpop.f32.mrb[91].mxu0 }
 0x198   :  { %2597 = vst [vmem:[%s4052_s2 + $0x8] sm:$0xff] %v2585_v6  ;;  %2596 = vst [vmem:[%s4052_s2] sm:$0xff] %v2584_v7  ;;  %v2576_v13 = vmax.f32 %v2564_v45, %v2387_v11  ;;  %v2575_v14 = vmax.f32 %v2563_v37, %v2300_v12  ;;  %v2389_v15 = vpop.f32.mrb[91].mxu1 }
 0x199   :  { %2598 = vst [vmem:[%s4052_s2 + $0x10] sm:$0xff] %v2586_v9  ;;  %v2577_v16 = vmax.f32 %v2565_v10, %v2389_v15 }
 0x19a   :  { %v2588_v17 = vmax.f32 %v2576_v13, 0.0  ;;  %v2587_v18 = vmax.f32 %v2575_v14, 0.0  ;;  %v2304_v19 = vpop.f32.mrb[92].mxu0 }
 0x19b   :  { %v2589_v20 = vmax.f32 %v2577_v16, 0.0  ;;  %v2568_v21 = vmax.f32 %v2556_v51, %v2304_v19  ;;  %v2393_v22 = vpop.f32.mrb[92].mxu1  ;;  %v2306_v23 = vpop.f32.mrb[93].mxu0 }
 0x19c   :  { %2600 = vst [vmem:[%s4052_s2 + $0x20] sm:$0xff] %v2588_v17  ;;  %2599 = vst [vmem:[%s4052_s2 + $0x18] sm:$0xff] %v2587_v18  ;;  %v2579_v24 = vmax.f32 %v2567_v53, %v2393_v22  ;;  %v2578_v25 = vmax.f32 %v2566_v50, %v2306_v23  ;;  %v2395_v26 = vpop.f32.mrb[93].mxu1 }
 0x19d   :  { %2601 = vst [vmem:[%s4052_s2 + $0x28] sm:$0xff] %v2589_v20  ;;  %v2580_v27 = vmax.f32 %v2568_v21, %v2395_v26 }
 0x19e   :  { %v2591_v28 = vmax.f32 %v2579_v24, 0.0  ;;  %v2590_v29 = vmax.f32 %v2578_v25, 0.0  ;;  %v2310_v30 = vpop.f32.mrb[94].mxu0 }
 0x19f   :  { %v2592_v31 = vmax.f32 %v2580_v27, 0.0  ;;  %v2571_v32 = vmax.f32 %v2559_v58, %v2310_v30  ;;  %v2399_v33 = vpop.f32.mrb[94].mxu1  ;;  %v2312_v34 = vpop.f32.mrb[95].mxu0 }
 0x1a0   :  { %2603 = vst [vmem:[%s4052_s2 + $0x38] sm:$0xff] %v2591_v28  ;;  %2602 = vst [vmem:[%s4052_s2 + $0x30] sm:$0xff] %v2590_v29  ;;  %v2582_v35 = vmax.f32 %v2570_v60, %v2399_v33  ;;  %v2581_v36 = vmax.f32 %v2569_v57, %v2312_v34  ;;  %v2401_v38 = vpop.f32.mrb[95].mxu1 }
 0x1a1   :  { %2604 = vst [vmem:[%s4052_s2 + $0x40] sm:$0xff] %v2592_v31  ;;  %v2583_v39 = vmax.f32 %v2571_v32, %v2401_v38 }
 0x1a2   :  { %v2594_v40 = vmax.f32 %v2582_v35, 0.0  ;;  %v2593_v41 = vmax.f32 %v2581_v36, 0.0 }
 0x1a3   :  { %v2595_v42 = vmax.f32 %v2583_v39, 0.0 }
 0x1a4   :  { %2606 = vst [vmem:[%s4052_s2 + $0x50] sm:$0xff] %v2594_v40  ;;  %2605 = vst [vmem:[%s4052_s2 + $0x48] sm:$0xff] %v2593_v41 }
 0x1a5   :  { %2607 = vst [vmem:[%s4052_s2 + $0x58] sm:$0xff] %v2595_v42 }

// kernel: voxel_context_3d_dsa_forward.5
= control target key start
LH: loop header
LB: loop body
LE: loop exit
PB: predicated region body
PF: predicated region fallthrough
CT: control target
= control target key end

     0   :  { %s494_s6 = smov 0   ;;  %s580_s0 = inlined_call_operand.vmem [shape: f32[2,4,2048], index: 0, kind: input, shape index: {}]   ;;  %s581_s1 = inlined_call_operand.vmem [shape: f32[2,1,2048], index: 1, kind: output, shape index: {}]  }
   0x1 LB: > { %s447_s7 = sadd.s32 4294967295, %s481_s6   ;;  %p451_p0 = scmp.ge.s32.totalorder %s481_s6, 1  ;;  %s481_s6 = sphi %s494_s6, %s11_s6  }
   0x2   : > { %p87_p1 = scmp.lt.s32.totalorder %s481_s6, 3 }
   0x4   : > { %p88_p2 = pnand %p451_p0, %p87_p1 }
   0x5   : > { %p106_p3 = scmp.lt.s32.totalorder (!%p88_p2), %s447_s7, 1  ;;  %v299_v0 = vlaneseq (!%p88_p2)  ;;  %v483_v1 = vmov (!%p88_p2), 1966171168   ;;  %vm147_vm0 = vcmask (!%p88_p2), 1043456  }
   0x6   : > { %91 = sbr.rel (%p88_p2) target bundleno = 65 (0x41), region = 24  ;;  %v297_v2 = vunpack.c.l.s4 (!%p88_p2), %v483_v1 }
   0x7   : > { %v300_v3 = vshrl.u32 (!%p88_p2), %v299_v0, 7 }
   0x8   : > { %v298_v4 = vunpack.c.0.s8 (!%p88_p2), %v297_v2 }
   0xa   : > { %v508_v8 = vsub.s32 (!%p88_p2), %v298_v4, %v300_v3 }
   0xd   : > { %s583_s7 = smov (!%p106_p3, %s447_s7), 1 }
   0xe   : > { %s457_s8 = sshll.u32 %s583_s7, 6  ;;  %s454_s12 = sshll.u32 %s583_s7, 4 }
   0xf   : > { %s110_s11 = scalar_lea.vmem %s580_s0, %s457_s8  ;;  %s114_s15 = scalar_lea.vmem %s581_s1, %s454_s12 }
  0x10   : > { %v115_v5 = vld [vmem:[%s110_s11] sm:$0xff]  ;;  %v116_v6 = vld [vmem:[%s110_s11 + $0x8] sm:$0xff]  ;;  %v117_v7 = vld [vmem:[%s110_s11 + $0x10] sm:$0xff] }
  0x11   : > { %v118_v9 = vld [vmem:[%s110_s11 + $0x18] sm:$0xff]  ;;  %v510_v10 = vld [vmem:[%s110_s11 + $0x20] sm:$0xff]  ;;  %v512_v11 = vld [vmem:[%s110_s11 + $0x28] sm:$0xff]  ;;  %v131_v12 = vcombine.high %v115_v5, %v115_v5  ;;  %v132_v13 = vcombine.high %v116_v6, %v116_v6  ;;  %v133_v14 = vcombine.high %v117_v7, %v117_v7  ;;  %v148_v15 = vsel %vm147_vm0, %v115_v5, 0.0 }
  0x12   : > { %v515_v16 = vld [vmem:[%s110_s11 + $0x30] sm:$0xff]  ;;  %v517_v17 = vld [vmem:[%s110_s11 + $0x38] sm:$0xff]  ;;  %v134_v18 = vcombine.high %v118_v9, %v118_v9  ;;  %v135_v19 = vcombine.high %v510_v10, %v510_v10  ;;  %v136_v20 = vcombine.high %v512_v11, %v512_v11  ;;  %v149_v21 = vrot.slane %v148_v15, 4 }
  0x13   : > { %v137_v22 = vcombine.high %v515_v16, %v515_v16  ;;  %v138_v23 = vcombine.high %v517_v17, %v517_v17  ;;  %v155_v24 = vsel %vm147_vm0, %v131_v12, 0.0  ;;  %v162_v25 = vsel %vm147_vm0, %v116_v6, 0.0 }
  0x14   : > { %v150_v26 = vadd.f32 %v149_v21, %v148_v15  ;;  %v156_v27 = vrot.slane %v155_v24, 4  ;;  %v163_v28 = vrot.slane %v162_v25, 4  ;;  %v169_v29 = vsel %vm147_vm0, %v132_v13, 0.0 }
  0x15   : > { %v170_v30 = vrot.slane %v169_v29, 4  ;;  %v176_v31 = vsel %vm147_vm0, %v117_v7, 0.0  ;;  %v183_v32 = vsel %vm147_vm0, %v133_v14, 0.0  ;;  %v190_v33 = vsel %vm147_vm0, %v118_v9, 0.0 }
  0x16   : > { %v151_v34 = vrot.slane %v150_v26, 2  ;;  %v157_v35 = vadd.f32 %v156_v27, %v155_v24  ;;  %v164_v36 = vadd.f32 %v163_v28, %v162_v25  ;;  %v177_v37 = vrot.slane %v176_v31, 4 }
  0x17   : > { %v171_v38 = vadd.f32 %v170_v30, %v169_v29  ;;  %v184_v39 = vrot.slane %v183_v32, 4  ;;  %v191_v40 = vrot.slane %v190_v33, 4  ;;  %v197_v41 = vsel %vm147_vm0, %v134_v18, 0.0 }
  0x18   : > { %v152_v42 = vadd.f32 %v151_v34, %v150_v26  ;;  %v158_v43 = vrot.slane %v157_v35, 2  ;;  %v165_v44 = vrot.slane %v164_v36, 2  ;;  %v178_v45 = vadd.f32 %v177_v37, %v176_v31 }
  0x19   : > { %v172_v46 = vrot.slane %v171_v38, 2  ;;  %v185_v47 = vadd.f32 %v184_v39, %v183_v32  ;;  %v192_v48 = vadd.f32 %v191_v40, %v190_v33  ;;  %v198_v49 = vrot.slane %v197_v41, 4 }
  0x1a   : > { %v153_v50 = vrot.slane %v152_v42, 1  ;;  %v159_v51 = vadd.f32 %v158_v43, %v157_v35  ;;  %v166_v52 = vadd.f32 %v165_v44, %v164_v36  ;;  %v179_v53 = vrot.slane %v178_v45, 2 }
  0x1b   : > { %v173_v54 = vadd.f32 %v172_v46, %v171_v38  ;;  %v186_v55 = vrot.slane %v185_v47, 2  ;;  %v193_v56 = vrot.slane %v192_v48, 2  ;;  %v199_v57 = vadd.f32 %v198_v49, %v197_v41 }
  0x1c   : > { %v534_v58 = vadd.f32 %v153_v50, %v152_v42  ;;  %v160_v59 = vrot.slane %v159_v51, 1  ;;  %v167_v60 = vrot.slane %v166_v52, 1  ;;  %v180_v61 = vadd.f32 %v179_v53, %v178_v45 }
  0x1d   : > { %v174_v62 = vrot.slane %v173_v54, 1  ;;  %v187_v63 = vadd.f32 %v186_v55, %v185_v47  ;;  %v194_v0 = vadd.f32 %v193_v56, %v192_v48  ;;  %v200_v1 = vrot.slane %v199_v57, 2 }
  0x1e   : > { %v161_v2 = vadd.f32 %v160_v59, %v159_v51  ;;  %v536_v3 = vadd.f32 %v167_v60, %v166_v52  ;;  %v181_v4 = vrot.slane %v180_v61, 1  ;;  %v204_v5 = vsel %vm147_vm0, %v510_v10, 0.0 }
  0x1f   : > { %v175_v6 = vadd.f32 %v174_v62, %v173_v54  ;;  %v188_v7 = vrot.slane %v187_v63, 1  ;;  %v195_v9 = vrot.slane %v194_v0, 1  ;;  %v201_v12 = vadd.f32 %v200_v1, %v199_v57 }
  0x20   : > { %v182_v13 = vadd.f32 %v181_v4, %v180_v61  ;;  %v205_v14 = vrot.slane %v204_v5, 4  ;;  %v211_v15 = vsel %vm147_vm0, %v135_v19, 0.0  ;;  %v218_v18 = vsel %vm147_vm0, %v512_v11, 0.0 }
  0x21   : > { %v189_v21 = vadd.f32 %v188_v7, %v187_v63  ;;  %v196_v24 = vadd.f32 %v195_v9, %v194_v0  ;;  %v202_v25 = vrot.slane %v201_v12, 1  ;;  %v212_v26 = vrot.slane %v211_v15, 4 }
  0x22   : > { %v206_v27 = vadd.f32 %v205_v14, %v204_v5  ;;  %v219_v28 = vrot.slane %v218_v18, 4  ;;  %v225_v10 = vsel %vm147_vm0, %v136_v20, 0.0  ;;  %v232_v29 = vsel %vm147_vm0, %v515_v16, 0.0 }
  0x23   : > { %v203_v30 = vadd.f32 %v202_v25, %v201_v12  ;;  %v213_v31 = vadd.f32 %v212_v26, %v211_v15  ;;  %v226_v19 = vrot.slane %v225_v10, 4  ;;  %v233_v32 = vrot.slane %v232_v29, 4 }
  0x24   : > { %v207_v33 = vrot.slane %v206_v27, 2  ;;  %v220_v34 = vadd.f32 %v219_v28, %v218_v18  ;;  %v239_v35 = vsel %vm147_vm0, %v137_v22, 0.0  ;;  %v246_v36 = vsel %vm147_vm0, %v517_v17, 0.0 }
  0x25   : > { %v214_v11 = vrot.slane %v213_v31, 2  ;;  %v227_v37 = vadd.f32 %v226_v19, %v225_v10  ;;  %v234_v20 = vadd.f32 %v233_v32, %v232_v29  ;;  %v240_v38 = vrot.slane %v239_v35, 4 }
  0x26   : > { %v208_v39 = vadd.f32 %v207_v33, %v206_v27  ;;  %v221_v40 = vrot.slane %v220_v34, 2  ;;  %v247_v41 = vrot.slane %v246_v36, 4  ;;  %v253_v42 = vsel %vm147_vm0, %v138_v23, 0.0 }
  0x27   : > { %v215_v43 = vadd.f32 %v214_v11, %v213_v31  ;;  %v228_v44 = vrot.slane %v227_v37, 2  ;;  %v235_v16 = vrot.slane %v234_v20, 2  ;;  %v241_v45 = vadd.f32 %v240_v38, %v239_v35 }
  0x28   : > { %v209_v22 = vrot.slane %v208_v39, 1  ;;  %v222_v46 = vadd.f32 %v221_v40, %v220_v34  ;;  %v248_v47 = vadd.f32 %v247_v41, %v246_v36  ;;  %v254_v48 = vrot.slane %v253_v42, 4 }
  0x29   : > { %v216_v49 = vrot.slane %v215_v43, 1  ;;  %v229_v50 = vadd.f32 %v228_v44, %v227_v37  ;;  %v236_v51 = vadd.f32 %v235_v16, %v234_v20  ;;  %v242_v52 = vrot.slane %v241_v45, 2 }
  0x2a   : > { %v210_v53 = vadd.f32 %v209_v22, %v208_v39  ;;  %v223_v54 = vrot.slane %v222_v46, 1  ;;  %v249_v55 = vrot.slane %v248_v47, 2  ;;  %v255_v56 = vadd.f32 %v254_v48, %v253_v42 }
  0x2b   : > { %v217_v57 = vadd.f32 %v216_v49, %v215_v43  ;;  %v230_v17 = vrot.slane %v229_v50, 1  ;;  %v237_v59 = vrot.slane %v236_v51, 1  ;;  %v243_v23 = vadd.f32 %v242_v52, %v241_v45 }
  0x2c   : > { %v224_v60 = vadd.f32 %v223_v54, %v222_v46  ;;  %v250_v61 = vadd.f32 %v249_v55, %v248_v47  ;;  %v256_v62 = vrot.slane %v255_v56, 2  ;;  %v260_v63 = vmul.f32 0.25, %v534_v58 }
  0x2d   : > { %v231_v0 = vadd.f32 %v230_v17, %v229_v50  ;;  %v238_v1 = vadd.f32 %v237_v59, %v236_v51  ;;  %v244_v4 = vrot.slane %v243_v23, 1  ;;  %v261_v5 = vmul.f32 0.25, %v161_v2 }
  0x2e   : > { %v251_v7 = vrot.slane %v250_v61, 1  ;;  %v257_v9 = vadd.f32 %v256_v62, %v255_v56  ;;  %v262_v12 = vmul.f32 0.25, %v536_v3  ;;  %v263_v14 = vmul.f32 0.25, %v175_v6 }
  0x2f   : > { %v245_v15 = vadd.f32 %v244_v4, %v243_v23  ;;  %v264_v18 = vmul.f32 0.25, %v182_v13  ;;  %v265_v25 = vmul.f32 0.25, %v189_v21  ;;  %v266_v26 = vmul.f32 0.25, %v196_v24 }
  0x30   : > { %v252_v27 = vadd.f32 %v251_v7, %v250_v61  ;;  %v258_v28 = vrot.slane %v257_v9, 1  ;;  %v267_v10 = vmul.f32 0.25, %v203_v30  ;;  %v268_v29 = vmul.f32 0.25, %v210_v53 }
  0x31   : > { %v269_v31 = vmul.f32 0.25, %v217_v57  ;;  %v270_v19 = vmul.f32 0.25, %v224_v60  ;;  %v271_v58 = vmul.f32 0.25, %v231_v0  ;;  %v272_v32 = vmul.f32 0.25, %v238_v1 }
  0x32   : > { %v259_v33 = vadd.f32 %v258_v28, %v257_v9  ;;  %v273_v34 = vmul.f32 0.25, %v245_v15  ;;  %v274_v2 = vmul.f32 0.25, %v252_v27  ;;  %v292_v35 = vcombine.low %v260_v63, %v261_v5 }
  0x33   : > { %v293_v36 = vcombine.low %v262_v12, %v263_v14  ;;  %v294_v3 = vcombine.low %v264_v18, %v265_v25  ;;  %v295_v6 = vcombine.low %v266_v26, %v267_v10  ;;  %v341_v11 = vcombine.low %v268_v29, %v269_v31 }
  0x34   : > { %v275_v13 = vmul.f32 0.25, %v259_v33  ;;  %v302_v21 = vrot.slane %v292_v35, %v508_v8  ;;  %v342_v24 = vcombine.low %v270_v19, %v271_v58  ;;  %v343_v37 = vcombine.low %v272_v32, %v273_v34 }
  0x35   : > { %v309_v30 = vrot.slane %v293_v36, %v508_v8  ;;  %v316_v20 = vrot.slane %v294_v3, %v508_v8  ;;  %v323_v38 = vrot.slane %v295_v6, %v508_v8  ;;  %v351_v39 = vrot.slane %v341_v11, %v508_v8 }
  0x36   : > { %v344_v40 = vcombine.low %v274_v2, %v275_v13  ;;  %v358_v41 = vrot.slane %v342_v24, %v508_v8  ;;  %v365_v42 = vrot.slane %v343_v37, %v508_v8 }
  0x37   : > { %v324_v43 = vcombine.low %v302_v21, %v309_v30  ;;  %v325_v44 = vcombine.low %v316_v20, %v323_v38 }
  0x38   : > { %v372_v16 = vrot.slane %v344_v40, %v508_v8  ;;  %v373_v45 = vcombine.low %v351_v39, %v358_v41 }
  0x39   : > { %v332_v22 = vrot.slane %v324_v43, %v508_v8  ;;  %v339_v46 = vrot.slane %v325_v44, %v508_v8 }
  0x3a   : > { %v374_v47 = vcombine.low %v365_v42, %v372_v16  ;;  %v381_v48 = vrot.slane %v373_v45, %v508_v8 }
  0x3b   : > { %v340_v49 = vcombine.low %v332_v22, %v339_v46 }
  0x3c   : > { %v388_v50 = vrot.slane %v374_v47, %v508_v8 }
  0x3d   : > { %392 = vst [vmem:[%s114_s15] sm:$0xff] %v340_v49 }
  0x3e   : > { %v389_v51 = vcombine.low %v381_v48, %v388_v50 }
  0x40   : > { %393 = vst [vmem:[%s114_s15 + $0x8] sm:$0xff] %v389_v51 }
  0x41 PF: > { %s11_s6 = sadd.s32 1, %s481_s6  }
  0x42   : > { %p8_p4 = scmp.ge.s32.totalorder %s11_s6, 4  }
  0x44   :  { %10 = sbr.rel (!%p8_p4) target bundleno = 1 (0x1), region = 54 }

</bundles_post_ra>
